<compile_context>
chip_gen: v7x
topology: tpu7x:2x2x1
jax: 0.10.0
libtpu: 0.0.40
codegen_flags: <defaults>
</compile_context>

<pallas_src>
import functools

import jax
import jax.numpy as jnp
from jax.experimental import pallas as pl
from jax.experimental.pallas import tpu as pltpu


def _round_up(v, m):
    return (v + m - 1) // m * m


def _densenet_stack_kernel(x_hbm, w_ref, b_ref, o_ref, xp_ref, dma_sem, *,
                           K, H, W, B_tile, w_off):
    """One (batch-tile, layer) grid step of the fused DenseNet stack.

    x_hbm:   (N, H, W, Cp)        bf16  HBM (pl.ANY), channel-padded input
    w_ref:   (L*K*K, Cp, Cp)      bf16  per-tap weights, BN scale folded in
    b_ref:   (L, 1, Cp)           f32   folded-BN bias (0 on pad channels)
    o_ref:   (B_tile, H, W, Cp)   f32   output block; doubles as the f32
                                        dense running sum across the layer axis
    xp_ref:  (B_tile, H+2p, w_off+W+p, Cp) bf16  padded current-layer input
    dma_sem: DMA semaphore
    """
    n = pl.program_id(0)
    l = pl.program_id(1)
    nl = pl.num_programs(1)
    p = K // 2
    Cp = o_ref.shape[-1]
    M = B_tile * H * W
    Wtot = w_off + W + p

    # ---- layer 0: zero the halo strips, DMA this batch tile HBM -> interior.
    @pl.when(l == 0)
    def _init():
        if p > 0:
            zrow = jnp.zeros((B_tile, p, Wtot, Cp), jnp.bfloat16)
            xp_ref[:, 0:p, :, :] = zrow
            xp_ref[:, p + H:p + H + p, :, :] = zrow
            xp_ref[:, p:p + H, w_off + W:w_off + W + p, :] = (
                jnp.zeros((B_tile, H, p, Cp), jnp.bfloat16))
        if w_off > 0:
            xp_ref[:, p:p + H, 0:w_off, :] = (
                jnp.zeros((B_tile, H, w_off, Cp), jnp.bfloat16))
        cp = pltpu.make_async_copy(
            x_hbm.at[pl.ds(n * B_tile, B_tile)],
            xp_ref.at[:, pl.ds(p, H), pl.ds(w_off, W), :],
            dma_sem)
        cp.start()
        cp.wait()

    # ---- conv: K*K accumulating MXU matmuls, sliced straight off the bf16 ref.
    acc = None
    for dy in range(K):
        for dx in range(K):
            c0 = w_off - p + dx
            patch = xp_ref[:, dy:dy + H, c0:c0 + W, :].reshape(M, Cp)
            part = jnp.dot(patch, w_ref[l * (K * K) + dy * K + dx],
                           preferred_element_type=jnp.float32)
            acc = part if acc is None else acc + part

    # ---- bias (BN scale already folded into the weights) + ReLU, f32 VPU. ---
    y = jnp.maximum(acc + b_ref[l], 0.0).reshape(B_tile, H, W, Cp)

    # ---- dense running-sum recurrence, entirely VMEM-resident ---------------
    # o_ref (f32) carries sum_{j<=l} out_j across the layer axis; the bf16
    # interior of xp_ref is its cast copy = the next layer's input.
    @pl.when(l < nl - 1)
    def _carry():
        # select: the o_ref read at l==0 is never used (no garbage propagation)
        s = jnp.where(l == 0, y, o_ref[...] + y)
        o_ref[...] = s
        xp_ref[:, p:p + H, w_off:w_off + W, :] = s.astype(jnp.bfloat16)

    @pl.when(l == nl - 1)
    def _finish():
        o_ref[...] = y


def _pack_params(params, Cp, K):
    """Fold BN scale into the conv weights (f32), pad channels to Cp, lay out
    weights per conv tap as (L*K*K, Cp, Cp) bf16, and pad the bias to Cp."""
    w_all, b_all = [], []
    for w, scale, bias in params:
        cin, cout = w.shape[2], w.shape[3]
        w_s = w * scale[None, None, None, :]          # fold BN scale in f32
        wp = jnp.zeros((K, K, Cp, Cp), jnp.float32).at[:, :, :cin, :cout].set(w_s)
        w_all.append(wp.reshape(K * K, Cp, Cp).astype(jnp.bfloat16))
        b_all.append(jnp.zeros((Cp,), jnp.float32).at[:cout].set(bias))
    w_all = jnp.stack(w_all).reshape(len(params) * K * K, Cp, Cp)   # bf16
    b_all = jnp.stack(b_all)[:, None, :]                            # (L,1,Cp) f32
    return w_all, b_all


def _pick_batch_tile(n_batch, per_image_bytes, budget_bytes=40 << 20):
    """Largest divisor of N that keeps >=2 parallel grid blocks (v7x megacore)
    and fits the per-step VMEM budget."""
    cap = budget_bytes // max(per_image_bytes, 1)
    cap = max(1, min(cap, n_batch // 2 if n_batch >= 2 else 1))
    for bt in range(min(n_batch, cap), 0, -1):
        if n_batch % bt == 0:
            return bt
    return 1


def densenet_forward(x_nchw, params):
    """Fused Pallas forward pass; matches DenseNet.forward. NCHW in/out."""
    N, Cin, H, W = x_nchw.shape
    K = params[0][0].shape[0]
    Cout = params[0][0].shape[-1]
    nlayers = len(params)
    p = K // 2
    w_off = _round_up(p, 16) if p > 0 else 0      # bf16 sublane-tile aligned
    Cp = _round_up(max(Cin, Cout), 128)           # lane-dense channel padding
    Hp, Wtot = H + 2 * p, w_off + W + p

    # Per-image resident bytes: bf16 padded scratch + double-buffered o block.
    per_image = Hp * Wtot * Cp * 2 + 2 * H * W * Cp * 4
    B_tile = _pick_batch_tile(N, per_image)

    w_all, b_all = _pack_params(params, Cp, K)

    # NCHW -> NHWC, zero-pad channels to Cp, cast to bf16 once (the matmul
    # consumes bf16 anyway); x stays in HBM (pl.ANY) and is DMA'd per tile.
    x = jnp.transpose(x_nchw, (0, 2, 3, 1))
    x = jnp.pad(x, ((0, 0), (0, 0), (0, 0), (0, Cp - Cin))).astype(jnp.bfloat16)

    kernel = functools.partial(_densenet_stack_kernel, K=K, H=H, W=W,
                               B_tile=B_tile, w_off=w_off)

    # VMEM budget from the actual resident buffers (no hardcoded 32 MiB).
    need = (B_tile * Hp * Wtot * Cp * 2
            + 2 * (nlayers * K * K * Cp * Cp * 2 + nlayers * Cp * 4)
            + 2 * B_tile * H * W * Cp * 4)
    vmem_limit = int(min(need * 5 // 4 + (8 << 20), 96 << 20))

    out = pl.pallas_call(
        kernel,
        out_shape=jax.ShapeDtypeStruct((N, H, W, Cp), jnp.float32),
        grid=(N // B_tile, nlayers),
        in_specs=[
            pl.BlockSpec(memory_space=pl.ANY),                      # x in HBM
            pl.BlockSpec((nlayers * K * K, Cp, Cp),                 # resident
                         lambda n, l: (0, 0, 0)),
            pl.BlockSpec((nlayers, 1, Cp), lambda n, l: (0, 0, 0)),  # resident
        ],
        out_specs=pl.BlockSpec((B_tile, H, W, Cp), lambda n, l: (n, 0, 0, 0)),
        scratch_shapes=[
            pltpu.VMEM((B_tile, Hp, Wtot, Cp), jnp.bfloat16),
            pltpu.SemaphoreType.DMA,
        ],
        compiler_params=pltpu.CompilerParams(
            dimension_semantics=("parallel", "arbitrary"),
            vmem_limit_bytes=vmem_limit),
    )(x, w_all, b_all)

    # Strip channel padding, return NCHW to match PyTorch.
    return jnp.transpose(out[..., :Cout], (0, 3, 1, 2))


def make_densenet_params(key, inchannels, outchannels, kernel_size, nlayers,
                         eps=1e-5):
    """Deterministic synthetic params; BN (inference) + conv bias pre-folded."""
    params = []
    cin = inchannels
    for _ in range(nlayers):
        key, k1, k2 = jax.random.split(key, 3)
        fan_in = cin * kernel_size * kernel_size
        w = jax.random.normal(
            k1, (kernel_size, kernel_size, cin, outchannels),
            jnp.float32) / jnp.sqrt(jnp.float32(fan_in))
        conv_b = jax.random.normal(k2, (outchannels,), jnp.float32) * 0.01
        gamma = 1.0 + 0.1 * jnp.arange(outchannels, dtype=jnp.float32)
        beta = 0.01 * jnp.arange(outchannels, dtype=jnp.float32)
        run_mean = 0.05 * jnp.arange(outchannels, dtype=jnp.float32)
        run_var = 1.0 + 0.02 * jnp.arange(outchannels, dtype=jnp.float32)
        scale = gamma / jnp.sqrt(run_var + eps)
        bias = (conv_b - run_mean) * scale + beta
        params.append((w, scale, bias))
        cin = outchannels
    return params


# ---- pure-JAX reference (bf16 conv inputs/weights, f32 accumulate/affine) ---
def densenet_ref(x_nchw, params):
    x = jnp.transpose(x_nchw, (0, 2, 3, 1))
    act_sum = 0.0
    prev_act = 0.0
    for i, (w, scale, bias) in enumerate(params):
        if i > 0:
            prev_act = x
        inp = (x + act_sum).astype(jnp.bfloat16)
        y = jax.lax.conv_general_dilated(
            inp, w.astype(jnp.bfloat16),
            window_strides=(1, 1), padding="SAME",
            dimension_numbers=("NHWC", "HWIO", "NHWC"),
            preferred_element_type=jnp.float32)
        x = jnp.maximum(y * scale.reshape(1, 1, 1, -1)
                        + bias.reshape(1, 1, 1, -1), 0.0)
        act_sum = act_sum + prev_act
    return jnp.transpose(x, (0, 3, 1, 2))


if __name__ == "__main__":
    key = jax.random.PRNGKey(0)
    kx, kp = jax.random.split(key)

    N, Cin, H, W = 4, 4, 16, 16
    Cout, K, nlayers = 8, 3, 3

    x = jax.random.normal(kx, (N, Cin, H, W), jnp.float32)
    params = make_densenet_params(kp, Cin, Cout, K, nlayers)

    fwd = jax.jit(densenet_forward)
    out = jax.block_until_ready(fwd(x, params))
    assert out.shape == (N, Cout, H, W), out.shape

    ref = densenet_ref(x, params)
    max_err = float(jnp.max(jnp.abs(out - ref)))
    # Kernel folds the BN scale into the bf16 weights (per perf review); the
    # reference applies scale post-matmul in f32 -> allow bf16-level slack.
    assert jnp.allclose(out, ref, atol=2e-2, rtol=2e-2), max_err

    print("KERNEL_OK")
</pallas_src>

<mosaic_0001>
module attributes {stable_mosaic.version = 11 : i64} {
  func.func @_densenet_stack_kernel(%arg0: i32, %arg1: i32, %arg2: memref<4x16x16x128xbf16, #tpu.memory_space<any>>, %arg3: memref<27x128x128xbf16, #tpu.memory_space<vmem>>, %arg4: memref<3x1x128xf32, #tpu.memory_space<vmem>>, %arg5: memref<2x16x16x128xf32, #tpu.memory_space<vmem>>, %arg6: memref<2x18x33x128xbf16, #tpu.memory_space<vmem>>, %arg7: memref<!tpu.dma_semaphore, #tpu.memory_space<semaphore_mem>>) attributes {dimension_semantics = [#tpu.dimension_semantics<parallel>, #tpu.dimension_semantics<arbitrary>], iteration_bounds = array<i64: 2, 3>, scalar_prefetch = 0 : i64, scratch_operands = 2 : i64, tpu.core_type = #tpu.core_type<tc>, window_params = [{}, {pipeline_mode = #tpu.pipeline_mode<synchronous>, transform_indices = @transform_1, window_bounds = array<i64: 27, 128, 128>}, {pipeline_mode = #tpu.pipeline_mode<synchronous>, transform_indices = @transform_2, window_bounds = array<i64: 3, 1, 128>}, {transform_indices = @transform_3, window_bounds = array<i64: 2, 16, 16, 128>}]} {
    %c0_i32 = arith.constant 0 : i32
    %0 = arith.cmpi eq, %arg1, %c0_i32 : i32
    %1 = arith.extui %0 : i1 to i32
    %c0_i32_0 = arith.constant 0 : i32
    %2 = arith.cmpi ne, %1, %c0_i32_0 : i32
    scf.if %2 {
      %cst_86 = arith.constant 0.000000e+00 : bf16
      %106 = vector.broadcast %cst_86 : bf16 to vector<2x1x33x128xbf16>
      %c0_87 = arith.constant 0 : index
      %c0_88 = arith.constant 0 : index
      %c0_89 = arith.constant 0 : index
      %c0_90 = arith.constant 0 : index
      %107 = vector.load %arg6[%c0_87, %c0_88, %c0_89, %c0_90] : memref<2x18x33x128xbf16, #tpu.memory_space<vmem>>, vector<2x1x33x128xbf16>
      tpu.vector_store %arg6[%c0_87, %c0_88, %c0_89, %c0_90], %106 {strides = array<i32>} : memref<2x18x33x128xbf16, #tpu.memory_space<vmem>>, vector<2x1x33x128xbf16>,
      %c0_91 = arith.constant 0 : index
      %c17_92 = arith.constant 17 : index
      %c0_93 = arith.constant 0 : index
      %c0_94 = arith.constant 0 : index
      %108 = vector.load %arg6[%c0_91, %c17_92, %c0_93, %c0_94] : memref<2x18x33x128xbf16, #tpu.memory_space<vmem>>, vector<2x1x33x128xbf16>
      tpu.vector_store %arg6[%c0_91, %c17_92, %c0_93, %c0_94], %106 {strides = array<i32>} : memref<2x18x33x128xbf16, #tpu.memory_space<vmem>>, vector<2x1x33x128xbf16>,
      %cst_95 = arith.constant 0.000000e+00 : bf16
      %109 = vector.broadcast %cst_95 : bf16 to vector<2x16x1x128xbf16>
      %c0_96 = arith.constant 0 : index
      %c1_97 = arith.constant 1 : index
      %c32 = arith.constant 32 : index
      %c0_98 = arith.constant 0 : index
      %110 = vector.load %arg6[%c0_96, %c1_97, %c32, %c0_98] : memref<2x18x33x128xbf16, #tpu.memory_space<vmem>>, vector<2x16x1x128xbf16>
      tpu.vector_store %arg6[%c0_96, %c1_97, %c32, %c0_98], %109 {strides = array<i32>} : memref<2x18x33x128xbf16, #tpu.memory_space<vmem>>, vector<2x16x1x128xbf16>,
      %cst_99 = arith.constant 0.000000e+00 : bf16
      %111 = vector.broadcast %cst_99 : bf16 to vector<2x16x16x128xbf16>
      %c0_100 = arith.constant 0 : index
      %c1_101 = arith.constant 1 : index
      %c0_102 = arith.constant 0 : index
      %c0_103 = arith.constant 0 : index
      %112 = vector.load %arg6[%c0_100, %c1_101, %c0_102, %c0_103] : memref<2x18x33x128xbf16, #tpu.memory_space<vmem>>, vector<2x16x16x128xbf16>
      tpu.vector_store %arg6[%c0_100, %c1_101, %c0_102, %c0_103], %111 {strides = array<i32>} : memref<2x18x33x128xbf16, #tpu.memory_space<vmem>>, vector<2x16x16x128xbf16>,
      %c2_i32_104 = arith.constant 2 : i32
      %113 = arith.muli %arg0, %c2_i32_104 : i32
      %c0_i32_105 = arith.constant 0 : i32
      %c0_i32_106 = arith.constant 0 : i32
      %c0_i32_107 = arith.constant 0 : i32
      %114 = tpu.memref_slice %arg2[%113, %c0_i32_105, %c0_i32_106, %c0_i32_107] : memref<4x16x16x128xbf16, #tpu.memory_space<any>> -> memref<2x16x16x128xbf16, #tpu.memory_space<any>>
      %c0_i32_108 = arith.constant 0 : i32
      %c1_i32_109 = arith.constant 1 : i32
      %c16_i32 = arith.constant 16 : i32
      %c0_i32_110 = arith.constant 0 : i32
      %115 = tpu.memref_slice %arg6[%c0_i32_108, %c1_i32_109, %c16_i32, %c0_i32_110] : memref<2x18x33x128xbf16, #tpu.memory_space<vmem>> -> memref<2x16x16x128xbf16, #tpu.memory_space<vmem>>
      tpu.enqueue_dma source(%114 : memref<2x16x16x128xbf16, #tpu.memory_space<any>>) target(%115 : memref<2x16x16x128xbf16, #tpu.memory_space<vmem>>) target_semaphore(%arg7 : memref<!tpu.dma_semaphore, #tpu.memory_space<semaphore_mem>>)
      %c0_i32_111 = arith.constant 0 : i32
      %c0_i32_112 = arith.constant 0 : i32
      %c0_i32_113 = arith.constant 0 : i32
      %116 = tpu.memref_slice %arg2[%113, %c0_i32_111, %c0_i32_112, %c0_i32_113] : memref<4x16x16x128xbf16, #tpu.memory_space<any>> -> memref<2x16x16x128xbf16, #tpu.memory_space<any>>
      %c0_i32_114 = arith.constant 0 : i32
      %c1_i32_115 = arith.constant 1 : i32
      %c16_i32_116 = arith.constant 16 : i32
      %c0_i32_117 = arith.constant 0 : i32
      %117 = tpu.memref_slice %arg6[%c0_i32_114, %c1_i32_115, %c16_i32_116, %c0_i32_117] : memref<2x18x33x128xbf16, #tpu.memory_space<vmem>> -> memref<2x16x16x128xbf16, #tpu.memory_space<vmem>>
      tpu.wait_dma2 semaphore(%arg7 : memref<!tpu.dma_semaphore, #tpu.memory_space<semaphore_mem>>) src(%116 : memref<2x16x16x128xbf16, #tpu.memory_space<any>>) dst(%117 : memref<2x16x16x128xbf16, #tpu.memory_space<vmem>>)
    } else {
    }
    %c0 = arith.constant 0 : index
    %c0_1 = arith.constant 0 : index
    %c15 = arith.constant 15 : index
    %c0_2 = arith.constant 0 : index
    %3 = vector.load %arg6[%c0, %c0_1, %c15, %c0_2] : memref<2x18x33x128xbf16, #tpu.memory_space<vmem>>, vector<2x16x16x128xbf16>
    %4 = vector.shape_cast %3 : vector<2x16x16x128xbf16> to vector<512x128xbf16>
    %c9_i32 = arith.constant 9 : i32
    %5 = arith.muli %arg1, %c9_i32 : i32
    %c0_i32_3 = arith.constant 0 : i32
    %6 = arith.addi %5, %c0_i32_3 : i32
    %c0_i32_4 = arith.constant 0 : i32
    %7 = arith.addi %6, %c0_i32_4 : i32
    %8 = arith.index_cast %7 : i32 to index
    %c0_5 = arith.constant 0 : index
    %c0_6 = arith.constant 0 : index
    %9 = vector.load %arg3[%8, %c0_5, %c0_6] : memref<27x128x128xbf16, #tpu.memory_space<vmem>>, vector<1x128x128xbf16>
    %10 = vector.shape_cast %9 : vector<1x128x128xbf16> to vector<128x128xbf16>
    %cst = arith.constant dense<0.000000e+00> : vector<512x128xf32>
    %11 = tpu.matmul %4, %10, %cst {dimension_numbers = #tpu.dot_dimension_numbers<[1], [0], [0], [1], [0, 0, 1, 1], [], []>} : vector<512x128xbf16>, vector<128x128xbf16>, vector<512x128xf32> -> vector<512x128xf32>
    %c0_7 = arith.constant 0 : index
    %c0_8 = arith.constant 0 : index
    %c16 = arith.constant 16 : index
    %c0_9 = arith.constant 0 : index
    %12 = vector.load %arg6[%c0_7, %c0_8, %c16, %c0_9] : memref<2x18x33x128xbf16, #tpu.memory_space<vmem>>, vector<2x16x16x128xbf16>
    %13 = vector.shape_cast %12 : vector<2x16x16x128xbf16> to vector<512x128xbf16>
    %c9_i32_10 = arith.constant 9 : i32
    %14 = arith.muli %arg1, %c9_i32_10 : i32
    %c0_i32_11 = arith.constant 0 : i32
    %15 = arith.addi %14, %c0_i32_11 : i32
    %c1_i32 = arith.constant 1 : i32
    %16 = arith.addi %15, %c1_i32 : i32
    %17 = arith.index_cast %16 : i32 to index
    %c0_12 = arith.constant 0 : index
    %c0_13 = arith.constant 0 : index
    %18 = vector.load %arg3[%17, %c0_12, %c0_13] : memref<27x128x128xbf16, #tpu.memory_space<vmem>>, vector<1x128x128xbf16>
    %19 = vector.shape_cast %18 : vector<1x128x128xbf16> to vector<128x128xbf16>
    %cst_14 = arith.constant dense<0.000000e+00> : vector<512x128xf32>
    %20 = tpu.matmul %13, %19, %cst_14 {dimension_numbers = #tpu.dot_dimension_numbers<[1], [0], [0], [1], [0, 0, 1, 1], [], []>} : vector<512x128xbf16>, vector<128x128xbf16>, vector<512x128xf32> -> vector<512x128xf32>
    %21 = arith.addf %11, %20 : vector<512x128xf32>
    %c0_15 = arith.constant 0 : index
    %c0_16 = arith.constant 0 : index
    %c17 = arith.constant 17 : index
    %c0_17 = arith.constant 0 : index
    %22 = vector.load %arg6[%c0_15, %c0_16, %c17, %c0_17] : memref<2x18x33x128xbf16, #tpu.memory_space<vmem>>, vector<2x16x16x128xbf16>
    %23 = vector.shape_cast %22 : vector<2x16x16x128xbf16> to vector<512x128xbf16>
    %c9_i32_18 = arith.constant 9 : i32
    %24 = arith.muli %arg1, %c9_i32_18 : i32
    %c0_i32_19 = arith.constant 0 : i32
    %25 = arith.addi %24, %c0_i32_19 : i32
    %c2_i32 = arith.constant 2 : i32
    %26 = arith.addi %25, %c2_i32 : i32
    %27 = arith.index_cast %26 : i32 to index
    %c0_20 = arith.constant 0 : index
    %c0_21 = arith.constant 0 : index
    %28 = vector.load %arg3[%27, %c0_20, %c0_21] : memref<27x128x128xbf16, #tpu.memory_space<vmem>>, vector<1x128x128xbf16>
    %29 = vector.shape_cast %28 : vector<1x128x128xbf16> to vector<128x128xbf16>
    %cst_22 = arith.constant dense<0.000000e+00> : vector<512x128xf32>
    %30 = tpu.matmul %23, %29, %cst_22 {dimension_numbers = #tpu.dot_dimension_numbers<[1], [0], [0], [1], [0, 0, 1, 1], [], []>} : vector<512x128xbf16>, vector<128x128xbf16>, vector<512x128xf32> -> vector<512x128xf32>
    %31 = arith.addf %21, %30 : vector<512x128xf32>
    %c0_23 = arith.constant 0 : index
    %c1 = arith.constant 1 : index
    %c15_24 = arith.constant 15 : index
    %c0_25 = arith.constant 0 : index
    %32 = vector.load %arg6[%c0_23, %c1, %c15_24, %c0_25] : memref<2x18x33x128xbf16, #tpu.memory_space<vmem>>, vector<2x16x16x128xbf16>
    %33 = vector.shape_cast %32 : vector<2x16x16x128xbf16> to vector<512x128xbf16>
    %c9_i32_26 = arith.constant 9 : i32
    %34 = arith.muli %arg1, %c9_i32_26 : i32
    %c3_i32 = arith.constant 3 : i32
    %35 = arith.addi %34, %c3_i32 : i32
    %c0_i32_27 = arith.constant 0 : i32
    %36 = arith.addi %35, %c0_i32_27 : i32
    %37 = arith.index_cast %36 : i32 to index
    %c0_28 = arith.constant 0 : index
    %c0_29 = arith.constant 0 : index
    %38 = vector.load %arg3[%37, %c0_28, %c0_29] : memref<27x128x128xbf16, #tpu.memory_space<vmem>>, vector<1x128x128xbf16>
    %39 = vector.shape_cast %38 : vector<1x128x128xbf16> to vector<128x128xbf16>
    %cst_30 = arith.constant dense<0.000000e+00> : vector<512x128xf32>
    %40 = tpu.matmul %33, %39, %cst_30 {dimension_numbers = #tpu.dot_dimension_numbers<[1], [0], [0], [1], [0, 0, 1, 1], [], []>} : vector<512x128xbf16>, vector<128x128xbf16>, vector<512x128xf32> -> vector<512x128xf32>
    %41 = arith.addf %31, %40 : vector<512x128xf32>
    %c0_31 = arith.constant 0 : index
    %c1_32 = arith.constant 1 : index
    %c16_33 = arith.constant 16 : index
    %c0_34 = arith.constant 0 : index
    %42 = vector.load %arg6[%c0_31, %c1_32, %c16_33, %c0_34] : memref<2x18x33x128xbf16, #tpu.memory_space<vmem>>, vector<2x16x16x128xbf16>
    %43 = vector.shape_cast %42 : vector<2x16x16x128xbf16> to vector<512x128xbf16>
    %c9_i32_35 = arith.constant 9 : i32
    %44 = arith.muli %arg1, %c9_i32_35 : i32
    %c3_i32_36 = arith.constant 3 : i32
    %45 = arith.addi %44, %c3_i32_36 : i32
    %c1_i32_37 = arith.constant 1 : i32
    %46 = arith.addi %45, %c1_i32_37 : i32
    %47 = arith.index_cast %46 : i32 to index
    %c0_38 = arith.constant 0 : index
    %c0_39 = arith.constant 0 : index
    %48 = vector.load %arg3[%47, %c0_38, %c0_39] : memref<27x128x128xbf16, #tpu.memory_space<vmem>>, vector<1x128x128xbf16>
    %49 = vector.shape_cast %48 : vector<1x128x128xbf16> to vector<128x128xbf16>
    %cst_40 = arith.constant dense<0.000000e+00> : vector<512x128xf32>
    %50 = tpu.matmul %43, %49, %cst_40 {dimension_numbers = #tpu.dot_dimension_numbers<[1], [0], [0], [1], [0, 0, 1, 1], [], []>} : vector<512x128xbf16>, vector<128x128xbf16>, vector<512x128xf32> -> vector<512x128xf32>
    %51 = arith.addf %41, %50 : vector<512x128xf32>
    %c0_41 = arith.constant 0 : index
    %c1_42 = arith.constant 1 : index
    %c17_43 = arith.constant 17 : index
    %c0_44 = arith.constant 0 : index
    %52 = vector.load %arg6[%c0_41, %c1_42, %c17_43, %c0_44] : memref<2x18x33x128xbf16, #tpu.memory_space<vmem>>, vector<2x16x16x128xbf16>
    %53 = vector.shape_cast %52 : vector<2x16x16x128xbf16> to vector<512x128xbf16>
    %c9_i32_45 = arith.constant 9 : i32
    %54 = arith.muli %arg1, %c9_i32_45 : i32
    %c3_i32_46 = arith.constant 3 : i32
    %55 = arith.addi %54, %c3_i32_46 : i32
    %c2_i32_47 = arith.constant 2 : i32
    %56 = arith.addi %55, %c2_i32_47 : i32
    %57 = arith.index_cast %56 : i32 to index
    %c0_48 = arith.constant 0 : index
    %c0_49 = arith.constant 0 : index
    %58 = vector.load %arg3[%57, %c0_48, %c0_49] : memref<27x128x128xbf16, #tpu.memory_space<vmem>>, vector<1x128x128xbf16>
    %59 = vector.shape_cast %58 : vector<1x128x128xbf16> to vector<128x128xbf16>
    %cst_50 = arith.constant dense<0.000000e+00> : vector<512x128xf32>
    %60 = tpu.matmul %53, %59, %cst_50 {dimension_numbers = #tpu.dot_dimension_numbers<[1], [0], [0], [1], [0, 0, 1, 1], [], []>} : vector<512x128xbf16>, vector<128x128xbf16>, vector<512x128xf32> -> vector<512x128xf32>
    %61 = arith.addf %51, %60 : vector<512x128xf32>
    %c0_51 = arith.constant 0 : index
    %c2 = arith.constant 2 : index
    %c15_52 = arith.constant 15 : index
    %c0_53 = arith.constant 0 : index
    %62 = vector.load %arg6[%c0_51, %c2, %c15_52, %c0_53] : memref<2x18x33x128xbf16, #tpu.memory_space<vmem>>, vector<2x16x16x128xbf16>
    %63 = vector.shape_cast %62 : vector<2x16x16x128xbf16> to vector<512x128xbf16>
    %c9_i32_54 = arith.constant 9 : i32
    %64 = arith.muli %arg1, %c9_i32_54 : i32
    %c6_i32 = arith.constant 6 : i32
    %65 = arith.addi %64, %c6_i32 : i32
    %c0_i32_55 = arith.constant 0 : i32
    %66 = arith.addi %65, %c0_i32_55 : i32
    %67 = arith.index_cast %66 : i32 to index
    %c0_56 = arith.constant 0 : index
    %c0_57 = arith.constant 0 : index
    %68 = vector.load %arg3[%67, %c0_56, %c0_57] : memref<27x128x128xbf16, #tpu.memory_space<vmem>>, vector<1x128x128xbf16>
    %69 = vector.shape_cast %68 : vector<1x128x128xbf16> to vector<128x128xbf16>
    %cst_58 = arith.constant dense<0.000000e+00> : vector<512x128xf32>
    %70 = tpu.matmul %63, %69, %cst_58 {dimension_numbers = #tpu.dot_dimension_numbers<[1], [0], [0], [1], [0, 0, 1, 1], [], []>} : vector<512x128xbf16>, vector<128x128xbf16>, vector<512x128xf32> -> vector<512x128xf32>
    %71 = arith.addf %61, %70 : vector<512x128xf32>
    %c0_59 = arith.constant 0 : index
    %c2_60 = arith.constant 2 : index
    %c16_61 = arith.constant 16 : index
    %c0_62 = arith.constant 0 : index
    %72 = vector.load %arg6[%c0_59, %c2_60, %c16_61, %c0_62] : memref<2x18x33x128xbf16, #tpu.memory_space<vmem>>, vector<2x16x16x128xbf16>
    %73 = vector.shape_cast %72 : vector<2x16x16x128xbf16> to vector<512x128xbf16>
    %c9_i32_63 = arith.constant 9 : i32
    %74 = arith.muli %arg1, %c9_i32_63 : i32
    %c6_i32_64 = arith.constant 6 : i32
    %75 = arith.addi %74, %c6_i32_64 : i32
    %c1_i32_65 = arith.constant 1 : i32
    %76 = arith.addi %75, %c1_i32_65 : i32
    %77 = arith.index_cast %76 : i32 to index
    %c0_66 = arith.constant 0 : index
    %c0_67 = arith.constant 0 : index
    %78 = vector.load %arg3[%77, %c0_66, %c0_67] : memref<27x128x128xbf16, #tpu.memory_space<vmem>>, vector<1x128x128xbf16>
    %79 = vector.shape_cast %78 : vector<1x128x128xbf16> to vector<128x128xbf16>
    %cst_68 = arith.constant dense<0.000000e+00> : vector<512x128xf32>
    %80 = tpu.matmul %73, %79, %cst_68 {dimension_numbers = #tpu.dot_dimension_numbers<[1], [0], [0], [1], [0, 0, 1, 1], [], []>} : vector<512x128xbf16>, vector<128x128xbf16>, vector<512x128xf32> -> vector<512x128xf32>
    %81 = arith.addf %71, %80 : vector<512x128xf32>
    %c0_69 = arith.constant 0 : index
    %c2_70 = arith.constant 2 : index
    %c17_71 = arith.constant 17 : index
    %c0_72 = arith.constant 0 : index
    %82 = vector.load %arg6[%c0_69, %c2_70, %c17_71, %c0_72] : memref<2x18x33x128xbf16, #tpu.memory_space<vmem>>, vector<2x16x16x128xbf16>
    %83 = vector.shape_cast %82 : vector<2x16x16x128xbf16> to vector<512x128xbf16>
    %c9_i32_73 = arith.constant 9 : i32
    %84 = arith.muli %arg1, %c9_i32_73 : i32
    %c6_i32_74 = arith.constant 6 : i32
    %85 = arith.addi %84, %c6_i32_74 : i32
    %c2_i32_75 = arith.constant 2 : i32
    %86 = arith.addi %85, %c2_i32_75 : i32
    %87 = arith.index_cast %86 : i32 to index
    %c0_76 = arith.constant 0 : index
    %c0_77 = arith.constant 0 : index
    %88 = vector.load %arg3[%87, %c0_76, %c0_77] : memref<27x128x128xbf16, #tpu.memory_space<vmem>>, vector<1x128x128xbf16>
    %89 = vector.shape_cast %88 : vector<1x128x128xbf16> to vector<128x128xbf16>
    %cst_78 = arith.constant dense<0.000000e+00> : vector<512x128xf32>
    %90 = tpu.matmul %83, %89, %cst_78 {dimension_numbers = #tpu.dot_dimension_numbers<[1], [0], [0], [1], [0, 0, 1, 1], [], []>} : vector<512x128xbf16>, vector<128x128xbf16>, vector<512x128xf32> -> vector<512x128xf32>
    %91 = arith.addf %81, %90 : vector<512x128xf32>
    %92 = arith.index_cast %arg1 : i32 to index
    %c0_79 = arith.constant 0 : index
    %c0_80 = arith.constant 0 : index
    %93 = vector.load %arg4[%92, %c0_79, %c0_80] : memref<3x1x128xf32, #tpu.memory_space<vmem>>, vector<1x1x128xf32>
    %94 = vector.shape_cast %93 : vector<1x1x128xf32> to vector<1x128xf32>
    %95 = vector.broadcast %94 : vector<1x128xf32> to vector<512x128xf32>
    %96 = arith.addf %91, %95 : vector<512x128xf32>
    %cst_81 = arith.constant 0.000000e+00 : f32
    %97 = vector.broadcast %cst_81 : f32 to vector<512x128xf32>
    %98 = arith.maximumf %96, %97 : vector<512x128xf32>
    %99 = vector.shape_cast %98 : vector<512x128xf32> to vector<2x16x16x128xf32>
    %c2_i32_82 = arith.constant 2 : i32
    %100 = arith.cmpi slt, %arg1, %c2_i32_82 : i32
    %101 = arith.extui %100 : i1 to i32
    %c0_i32_83 = arith.constant 0 : i32
    %102 = arith.cmpi ne, %101, %c0_i32_83 : i32
    scf.if %102 {
      %c0_i32_86 = arith.constant 0 : i32
      %106 = arith.cmpi eq, %arg1, %c0_i32_86 : i32
      %c0_87 = arith.constant 0 : index
      %c0_88 = arith.constant 0 : index
      %c0_89 = arith.constant 0 : index
      %c0_90 = arith.constant 0 : index
      %107 = vector.load %arg5[%c0_87, %c0_88, %c0_89, %c0_90] : memref<2x16x16x128xf32, #tpu.memory_space<vmem>>, vector<2x16x16x128xf32>
      %108 = arith.addf %107, %99 : vector<2x16x16x128xf32>
      %109 = arith.select %106, %99, %108 : vector<2x16x16x128xf32>
      %c0_91 = arith.constant 0 : index
      %c0_92 = arith.constant 0 : index
      %c0_93 = arith.constant 0 : index
      %c0_94 = arith.constant 0 : index
      %110 = vector.load %arg5[%c0_91, %c0_92, %c0_93, %c0_94] : memref<2x16x16x128xf32, #tpu.memory_space<vmem>>, vector<2x16x16x128xf32>
      tpu.vector_store %arg5[%c0_91, %c0_92, %c0_93, %c0_94], %109 {strides = array<i32>} : memref<2x16x16x128xf32, #tpu.memory_space<vmem>>, vector<2x16x16x128xf32>,
      %111 = arith.truncf %109 : vector<2x16x16x128xf32> to vector<2x16x16x128xbf16>
      %c0_95 = arith.constant 0 : index
      %c1_96 = arith.constant 1 : index
      %c16_97 = arith.constant 16 : index
      %c0_98 = arith.constant 0 : index
      %112 = vector.load %arg6[%c0_95, %c1_96, %c16_97, %c0_98] : memref<2x18x33x128xbf16, #tpu.memory_space<vmem>>, vector<2x16x16x128xbf16>
      tpu.vector_store %arg6[%c0_95, %c1_96, %c16_97, %c0_98], %111 {strides = array<i32>} : memref<2x18x33x128xbf16, #tpu.memory_space<vmem>>, vector<2x16x16x128xbf16>,
    } else {
    }
    %c2_i32_84 = arith.constant 2 : i32
    %103 = arith.cmpi eq, %arg1, %c2_i32_84 : i32
    %104 = arith.extui %103 : i1 to i32
    %c0_i32_85 = arith.constant 0 : i32
    %105 = arith.cmpi ne, %104, %c0_i32_85 : i32
    scf.if %105 {
      %c0_86 = arith.constant 0 : index
      %c0_87 = arith.constant 0 : index
      %c0_88 = arith.constant 0 : index
      %c0_89 = arith.constant 0 : index
      %106 = vector.load %arg5[%c0_86, %c0_87, %c0_88, %c0_89] : memref<2x16x16x128xf32, #tpu.memory_space<vmem>>, vector<2x16x16x128xf32>
      tpu.vector_store %arg5[%c0_86, %c0_87, %c0_88, %c0_89], %99 {strides = array<i32>} : memref<2x16x16x128xf32, #tpu.memory_space<vmem>>, vector<2x16x16x128xf32>,
    } else {
    }
    return
  }
  func.func @transform_1(%arg0: i32, %arg1: i32) -> (i32, i32, i32) {
    %c0_i32 = arith.constant 0 : i32
    %c0_i32_0 = arith.constant 0 : i32
    %c0_i32_1 = arith.constant 0 : i32
    %c0_i32_2 = arith.constant 0 : i32
    return %c0_i32, %c0_i32_0, %c0_i32_1 : i32, i32, i32
  }
  func.func @transform_2(%arg0: i32, %arg1: i32) -> (i32, i32, i32) {
    %c0_i32 = arith.constant 0 : i32
    %c0_i32_0 = arith.constant 0 : i32
    %c0_i32_1 = arith.constant 0 : i32
    %c0_i32_2 = arith.constant 0 : i32
    return %c0_i32, %c0_i32_0, %c0_i32_1 : i32, i32, i32
  }
  func.func @transform_3(%arg0: i32, %arg1: i32) -> (i32, i32, i32, i32) {
    %c0_i32 = arith.constant 0 : i32
    %c0_i32_0 = arith.constant 0 : i32
    %c0_i32_1 = arith.constant 0 : i32
    %c0_i32_2 = arith.constant 0 : i32
    return %arg0, %c0_i32, %c0_i32_0, %c0_i32_1 : i32, i32, i32, i32
  }
}

</mosaic_0001>

<bundles_post_ra>
// kernel: densenet_forward.1
= control target key start
LH: loop header
LB: loop body
LE: loop exit
PB: predicated region body
PF: predicated region fallthrough
CT: control target
= control target key end

     0   :  { %s14228_s12 = smov 0   ;;  %s14230_s13 = smov 0   ;;  %s17747_s0 = inlined_call_operand.vmem [shape: bf16[4,16,16,128], index: 0, kind: input, shape index: {}]   ;;  %s17748_s1 = inlined_call_operand.vmem [shape: bf16[27,128,128], index: 1, kind: input, shape index: {}]   ;;  %s17749_s2 = inlined_call_operand.vmem [shape: f32[3,1,128], index: 2, kind: input, shape index: {}]   ;;  %s17750_s3 = inlined_call_operand.vmem [shape: f32[4,16,16,128], index: 3, kind: output, shape index: {}]  }
   0x1   :  { %s14232_s14 = smov 0   ;;  %s14234_s15 = smov 0  }
   0x2   :  { %s14236_s16 = smov 0  }
   0x3 LB: > { %s22_s17 = sadd.s32 1, %s14197_s14  ;;  %s25_s18 = sadd.s32 1, %s14201_s15  ;;  %s14205_s16 = sphi %s14236_s16, %s13_s16   ;;  %s14201_s15 = sphi %s14234_s15, %s18516_s15   ;;  %s14197_s14 = sphi %s14232_s14, %s18515_s14   ;;  %s14193_s13 = sphi %s14230_s13, %s18514_s13   ;;  %s14189_s12 = sphi %s14228_s12, %s18513_s12  }
   0x4   : > { %p23_p0 = scmp.ge.s32.totalorder %s22_s17, 3  ;;  %p11419_p1 = scmp.ge.s32.totalorder %s14205_s16, 1 }
   0x5   : > { %p115_p2 = scmp.lt.s32.totalorder %s14205_s16, 7 }
   0x6   : > { %s18518_s17 = smov (%p23_p0, %s22_s17), 0  ;;  %s18520_s18 = smov (!%p23_p0, %s25_s18), %s14201_s15 }
   0x7   : > { %p116_p3 = pnand %p11419_p1, %p115_p2  ;;  %p27_p4 = scmp.ge.s32.totalorder %s18520_s18, 2 }
   0x9   : > { %s18522_s18 = smov (%p27_p4, %s18520_s18), 0  ;;  %119 = sbr.rel (%p116_p3) target bundleno = 1224 (0x4c8), region = 28 }
  0x10   : > { %s11420_s19 = sshll.u32 %s14193_s13, 1  ;;  %p141_p5 = scmp.eq.s32.totalorder %s14189_s12, 0 }
  0x11   : > { %p134_p6 = scmp.lt.s32.totalorder %s11420_s19, 3  ;;  %p11423_p7 = scmp.ne.s32.totalorder %s14189_s12, 0 }
  0x12   : > { %vm149_vm0 = vcmask (!%p11423_p7), 1040384   ;;  %vm150_vm1 = vsmask.f32 (!%p11423_p7), 256  ;;  %v152_v0 = vld [vmem:[#allocation2 + $0x10] sm:$0x1] (!%p11423_p7)  ;;  %v14207_v1 = vmov (!%p11423_p7), 0  }
  0x13   : > { %s18524_s19 = smov (!%p134_p6, %s11420_s19), 3  ;;  %144 = sbr.rel (%p11423_p7) target bundleno = 85 (0x55), region = 32 }
  0x14   : > { %s12091_s20 = sshll.u32 %s18524_s19, 8  ;;  %146 = vst [vmem:[#allocation2 + $0x4] sm:$0xf] (!%p11423_p7), %v14207_v1  ;;  %147 = vst [vmem:[#allocation2 + $0x8] sm:$0xf] (!%p11423_p7), %v14207_v1  ;;  %s12093_s24 = sshll.u32 (!%p11423_p7), %s14193_s13, 8 }
  0x15   : > { %s14267_s23 = scalar_lea.vmem %s17750_s3, %s12091_s20  ;;  %148 = vst [vmem:[#allocation2 + $0xc] sm:$0xf] (!%p11423_p7), %v14207_v1  ;;  %156 = vst [vmem:[#allocation2 + $0x16c] sm:$0xf] (!%p11423_p7), %v14207_v1  ;;  %v159_v3 = vld [vmem:[#allocation2 + $0x178] sm:$0x1] (!%p11423_p7)  ;;  %s14286_s27 = scalar_lea.vmem (!%p11423_p7), %s17747_s0, %s12093_s24 }
  0x16   : > { %157 = vst [vmem:[#allocation2 + $0x170] sm:$0xf] (!%p11423_p7), %v14207_v1  ;;  %158 = vst [vmem:[#allocation2 + $0x174] sm:$0xf] (!%p11423_p7), %v14207_v1  ;;  %v167_v4 = vld [vmem:[#allocation2 + $0x164] sm:$0x1] (!%p11423_p7) }
  0x17   : > { %164 = vst [vmem:[#allocation2 + $0x158] sm:$0xf] (!%p11423_p7), %v14207_v1  ;;  %165 = vst [vmem:[#allocation2 + $0x15c] sm:$0xf] (!%p11423_p7), %v14207_v1  ;;  %v174_v8 = vld [vmem:[#allocation2 + $0x2cc] sm:$0x1] (!%p11423_p7) }
  0x18   : > { %166 = vst [vmem:[#allocation2 + $0x160] sm:$0xf] (!%p11423_p7), %v14207_v1  ;;  %171 = vst [vmem:[#allocation2 + $0x2c0] sm:$0xf] (!%p11423_p7), %v14207_v1  ;;  %v178_v10 = vld [vmem:[#allocation2 + $0x24] sm:$0x1] (!%p11423_p7) }
  0x19   : > { %172 = vst [vmem:[#allocation2 + $0x2c4] sm:$0xf] (!%p11423_p7), %v14207_v1  ;;  %173 = vst [vmem:[#allocation2 + $0x2c8] sm:$0xf] (!%p11423_p7), %v14207_v1  ;;  %v181_v11 = vld [vmem:[#allocation2 + $0x38] sm:$0x1] (!%p11423_p7) }
  0x1a   : > { %275 = vst [vmem:[#allocation2 + $0x18] sm:$0xf] %v14207_v1  ;;  %277 = vst [vmem:[#allocation2 + $0x2c] sm:$0xf] %v14207_v1  ;;  %v437_v12 = vld [vmem:[%s14286_s27] sm:$0xff]  ;;  %v451_v2 = vld [vmem:[%s14286_s27 + $0x38] sm:$0xff] }
  0x1b   : > { %279 = vst [vmem:[#allocation2 + $0x40] sm:$0xf] %v14207_v1  ;;  %281 = vst [vmem:[#allocation2 + $0x54] sm:$0xf] %v14207_v1  ;;  %v184_v15 = vld [vmem:[#allocation2 + $0x4c] sm:$0x1] }
  0x1c   : > { %283 = vst [vmem:[#allocation2 + $0x68] sm:$0xf] %v14207_v1  ;;  %285 = vst [vmem:[#allocation2 + $0x7c] sm:$0xf] %v14207_v1  ;;  %v187_v16 = vld [vmem:[#allocation2 + $0x60] sm:$0x1] }
  0x1d   : > { %287 = vst [vmem:[#allocation2 + $0x90] sm:$0xf] %v14207_v1  ;;  %289 = vst [vmem:[#allocation2 + $0xa4] sm:$0xf] %v14207_v1  ;;  %v190_v19 = vld [vmem:[#allocation2 + $0x74] sm:$0x1] }
  0x1e   : > { %291 = vst [vmem:[#allocation2 + $0xb8] sm:$0xf] %v14207_v1  ;;  %293 = vst [vmem:[#allocation2 + $0xcc] sm:$0xf] %v14207_v1  ;;  %v193_v20 = vld [vmem:[#allocation2 + $0x88] sm:$0x1] }
  0x1f   : > { %295 = vst [vmem:[#allocation2 + $0xe0] sm:$0xf] %v14207_v1  ;;  %297 = vst [vmem:[#allocation2 + $0xf4] sm:$0xf] %v14207_v1  ;;  %v196_v23 = vld [vmem:[#allocation2 + $0x9c] sm:$0x1] }
  0x20   : > { %299 = vst [vmem:[#allocation2 + $0x108] sm:$0xf] %v14207_v1  ;;  %301 = vst [vmem:[#allocation2 + $0x11c] sm:$0xf] %v14207_v1  ;;  %v199_v24 = vld [vmem:[#allocation2 + $0xb0] sm:$0x1] }
  0x21   : > { %303 = vst [vmem:[#allocation2 + $0x130] sm:$0xf] %v14207_v1  ;;  %305 = vst [vmem:[#allocation2 + $0x144] sm:$0xf] %v14207_v1  ;;  %v202_v27 = vld [vmem:[#allocation2 + $0xc4] sm:$0x1] }
  0x22   : > { %307 = vst [vmem:[#allocation2 + $0x180] sm:$0xf] %v14207_v1  ;;  %309 = vst [vmem:[#allocation2 + $0x194] sm:$0xf] %v14207_v1  ;;  %v205_v28 = vld [vmem:[#allocation2 + $0xd8] sm:$0x1] }
  0x23   : > { %311 = vst [vmem:[#allocation2 + $0x1a8] sm:$0xf] %v14207_v1  ;;  %313 = vst [vmem:[#allocation2 + $0x1bc] sm:$0xf] %v14207_v1  ;;  %v208_v31 = vld [vmem:[#allocation2 + $0xec] sm:$0x1] }
  0x24   : > { %315 = vst [vmem:[#allocation2 + $0x1d0] sm:$0xf] %v14207_v1  ;;  %317 = vst [vmem:[#allocation2 + $0x1e4] sm:$0xf] %v14207_v1  ;;  %v211_v32 = vld [vmem:[#allocation2 + $0x100] sm:$0x1] }
  0x25   : > { %319 = vst [vmem:[#allocation2 + $0x1f8] sm:$0xf] %v14207_v1  ;;  %321 = vst [vmem:[#allocation2 + $0x20c] sm:$0xf] %v14207_v1  ;;  %v214_v35 = vld [vmem:[#allocation2 + $0x114] sm:$0x1] }
  0x26   : > { %323 = vst [vmem:[#allocation2 + $0x220] sm:$0xf] %v14207_v1  ;;  %325 = vst [vmem:[#allocation2 + $0x234] sm:$0xf] %v14207_v1  ;;  %v217_v36 = vld [vmem:[#allocation2 + $0x128] sm:$0x1] }
  0x27   : > { %327 = vst [vmem:[#allocation2 + $0x248] sm:$0xf] %v14207_v1  ;;  %329 = vst [vmem:[#allocation2 + $0x25c] sm:$0xf] %v14207_v1  ;;  %v220_v39 = vld [vmem:[#allocation2 + $0x13c] sm:$0x1] }
  0x28   : > { %331 = vst [vmem:[#allocation2 + $0x270] sm:$0xf] %v14207_v1  ;;  %333 = vst [vmem:[#allocation2 + $0x284] sm:$0xf] %v14207_v1  ;;  %v223_v40 = vld [vmem:[#allocation2 + $0x150] sm:$0x1] }
  0x29   : > { %335 = vst [vmem:[#allocation2 + $0x298] sm:$0xf] %v14207_v1  ;;  %337 = vst [vmem:[#allocation2 + $0x2ac] sm:$0xf] %v14207_v1  ;;  %v226_v43 = vld [vmem:[#allocation2 + $0x18c] sm:$0x1] }
  0x2a   : > { %vm14272_vm2 = vmand %vm149_vm0, %vm150_vm1  ;;  %438 = vst [vmem:[#allocation2 + $0x1c] sm:$0xff] %v437_v12  ;;  %v229_v44 = vld [vmem:[#allocation2 + $0x1a0] sm:$0x1]  ;;  %v232_v47 = vld [vmem:[#allocation2 + $0x1b4] sm:$0x1] }
  0x2b   : > { %v153_v5 = vsel %vm14272_vm2, 0, %v152_v0  ;;  %v160_v6 = vsel %vm14272_vm2, 0, %v159_v3  ;;  %v168_v7 = vsel %vm14272_vm2, 0, %v167_v4  ;;  %v175_v9 = vsel %vm14272_vm2, 0, %v174_v8  ;;  %v235_v48 = vld [vmem:[#allocation2 + $0x1c8] sm:$0x1] }
  0x2c   : > { %154 = vst [vmem:[#allocation2 + $0x10] sm:$0x1] %v153_v5  ;;  %161 = vst [vmem:[#allocation2 + $0x178] sm:$0x1] %v160_v6  ;;  %v179_v13 = vsel %vm14272_vm2, 0, %v178_v10  ;;  %v182_v14 = vsel %vm14272_vm2, 0, %v181_v11 }
  0x2d   : > { %169 = vst [vmem:[#allocation2 + $0x164] sm:$0x1] %v168_v7  ;;  %176 = vst [vmem:[#allocation2 + $0x2cc] sm:$0x1] %v175_v9  ;;  %v185_v17 = vsel %vm14272_vm2, 0, %v184_v15  ;;  %v188_v18 = vsel %vm14272_vm2, 0, %v187_v16 }
  0x2e   : > { %180 = vst [vmem:[#allocation2 + $0x24] sm:$0x1] %v179_v13  ;;  %183 = vst [vmem:[#allocation2 + $0x38] sm:$0x1] %v182_v14  ;;  %v191_v21 = vsel %vm14272_vm2, 0, %v190_v19  ;;  %v194_v22 = vsel %vm14272_vm2, 0, %v193_v20 }
  0x2f   : > { %186 = vst [vmem:[#allocation2 + $0x4c] sm:$0x1] %v185_v17  ;;  %189 = vst [vmem:[#allocation2 + $0x60] sm:$0x1] %v188_v18  ;;  %v197_v25 = vsel %vm14272_vm2, 0, %v196_v23  ;;  %v200_v26 = vsel %vm14272_vm2, 0, %v199_v24 }
  0x30   : > { %192 = vst [vmem:[#allocation2 + $0x74] sm:$0x1] %v191_v21  ;;  %195 = vst [vmem:[#allocation2 + $0x88] sm:$0x1] %v194_v22  ;;  %v203_v29 = vsel %vm14272_vm2, 0, %v202_v27  ;;  %v206_v30 = vsel %vm14272_vm2, 0, %v205_v28 }
  0x31   : > { %198 = vst [vmem:[#allocation2 + $0x9c] sm:$0x1] %v197_v25  ;;  %201 = vst [vmem:[#allocation2 + $0xb0] sm:$0x1] %v200_v26  ;;  %v209_v33 = vsel %vm14272_vm2, 0, %v208_v31  ;;  %v212_v34 = vsel %vm14272_vm2, 0, %v211_v32 }
  0x32   : > { %204 = vst [vmem:[#allocation2 + $0xc4] sm:$0x1] %v203_v29  ;;  %207 = vst [vmem:[#allocation2 + $0xd8] sm:$0x1] %v206_v30  ;;  %v215_v37 = vsel %vm14272_vm2, 0, %v214_v35  ;;  %v218_v38 = vsel %vm14272_vm2, 0, %v217_v36 }
  0x33   : > { %210 = vst [vmem:[#allocation2 + $0xec] sm:$0x1] %v209_v33  ;;  %213 = vst [vmem:[#allocation2 + $0x100] sm:$0x1] %v212_v34  ;;  %v221_v41 = vsel %vm14272_vm2, 0, %v220_v39  ;;  %v224_v42 = vsel %vm14272_vm2, 0, %v223_v40 }
  0x34   : > { %216 = vst [vmem:[#allocation2 + $0x114] sm:$0x1] %v215_v37  ;;  %219 = vst [vmem:[#allocation2 + $0x128] sm:$0x1] %v218_v38  ;;  %v227_v45 = vsel %vm14272_vm2, 0, %v226_v43  ;;  %v230_v46 = vsel %vm14272_vm2, 0, %v229_v44 }
  0x35   : > { %222 = vst [vmem:[#allocation2 + $0x13c] sm:$0x1] %v221_v41  ;;  %225 = vst [vmem:[#allocation2 + $0x150] sm:$0x1] %v224_v42  ;;  %v233_v49 = vsel %vm14272_vm2, 0, %v232_v47  ;;  %v236_v50 = vsel %vm14272_vm2, 0, %v235_v48 }
  0x36   : > { %228 = vst [vmem:[#allocation2 + $0x18c] sm:$0x1] %v227_v45  ;;  %231 = vst [vmem:[#allocation2 + $0x1a0] sm:$0x1] %v230_v46  ;;  %v238_v51 = vld [vmem:[#allocation2 + $0x1dc] sm:$0x1] }
  0x37   : > { %v241_v52 = vld [vmem:[#allocation2 + $0x1f0] sm:$0x1]  ;;  %234 = vst [vmem:[#allocation2 + $0x1b4] sm:$0x1] %v233_v49  ;;  %237 = vst [vmem:[#allocation2 + $0x1c8] sm:$0x1] %v236_v50 }
  0x38   : > { %v239_v53 = vsel %vm14272_vm2, 0, %v238_v51  ;;  %v242_v54 = vsel %vm14272_vm2, 0, %v241_v52  ;;  %v244_v55 = vld [vmem:[#allocation2 + $0x204] sm:$0x1]  ;;  %v247_v56 = vld [vmem:[#allocation2 + $0x218] sm:$0x1] }
  0x39   : > { %240 = vst [vmem:[#allocation2 + $0x1dc] sm:$0x1] %v239_v53  ;;  %243 = vst [vmem:[#allocation2 + $0x1f0] sm:$0x1] %v242_v54  ;;  %v245_v57 = vsel %vm14272_vm2, 0, %v244_v55  ;;  %v248_v58 = vsel %vm14272_vm2, 0, %v247_v56 }
  0x3a   : > { %v250_v59 = vld [vmem:[#allocation2 + $0x22c] sm:$0x1]  ;;  %v253_v60 = vld [vmem:[#allocation2 + $0x240] sm:$0x1]  ;;  %246 = vst [vmem:[#allocation2 + $0x204] sm:$0x1] %v245_v57 }
  0x3b   : > { %249 = vst [vmem:[#allocation2 + $0x218] sm:$0x1] %v248_v58  ;;  %v251_v61 = vsel %vm14272_vm2, 0, %v250_v59  ;;  %v254_v62 = vsel %vm14272_vm2, 0, %v253_v60  ;;  %v256_v63 = vld [vmem:[#allocation2 + $0x254] sm:$0x1] }
  0x3c   : > { %v259_v0 = vld [vmem:[#allocation2 + $0x268] sm:$0x1]  ;;  %252 = vst [vmem:[#allocation2 + $0x22c] sm:$0x1] %v251_v61  ;;  %255 = vst [vmem:[#allocation2 + $0x240] sm:$0x1] %v254_v62 }
  0x3d   : > { %v257_v1 = vsel %vm14272_vm2, 0, %v256_v63  ;;  %v260_v3 = vsel %vm14272_vm2, 0, %v259_v0  ;;  %v262_v4 = vld [vmem:[#allocation2 + $0x27c] sm:$0x1]  ;;  %v265_v5 = vld [vmem:[#allocation2 + $0x290] sm:$0x1] }
  0x3e   : > { %258 = vst [vmem:[#allocation2 + $0x254] sm:$0x1] %v257_v1  ;;  %261 = vst [vmem:[#allocation2 + $0x268] sm:$0x1] %v260_v3  ;;  %v263_v6 = vsel %vm14272_vm2, 0, %v262_v4  ;;  %v266_v7 = vsel %vm14272_vm2, 0, %v265_v5 }
  0x3f   : > { %v268_v8 = vld [vmem:[#allocation2 + $0x2a4] sm:$0x1]  ;;  %v271_v9 = vld [vmem:[#allocation2 + $0x2b8] sm:$0x1]  ;;  %264 = vst [vmem:[#allocation2 + $0x27c] sm:$0x1] %v263_v6 }
  0x40   : > { %267 = vst [vmem:[#allocation2 + $0x290] sm:$0x1] %v266_v7  ;;  %v269_v10 = vsel %vm14272_vm2, 0, %v268_v8  ;;  %v272_v11 = vsel %vm14272_vm2, 0, %v271_v9  ;;  %v439_v12 = vld [vmem:[%s14286_s27 + $0x8] sm:$0xff]  ;;  %v441_v13 = vld [vmem:[%s14286_s27 + $0x10] sm:$0xff] }
  0x41   : > { %v443_v14 = vld [vmem:[%s14286_s27 + $0x18] sm:$0xff]  ;;  %270 = vst [vmem:[#allocation2 + $0x2a4] sm:$0x1] %v269_v10  ;;  %273 = vst [vmem:[#allocation2 + $0x2b8] sm:$0x1] %v272_v11  ;;  %v445_v15 = vld [vmem:[%s14286_s27 + $0x20] sm:$0xff] }
  0x42   : > { %440 = vst [vmem:[#allocation2 + $0x30] sm:$0xff] %v439_v12  ;;  %442 = vst [vmem:[#allocation2 + $0x44] sm:$0xff] %v441_v13  ;;  %v447_v16 = vld [vmem:[%s14286_s27 + $0x28] sm:$0xff]  ;;  %v449_v17 = vld [vmem:[%s14286_s27 + $0x30] sm:$0xff] }
  0x43   : > { %444 = vst [vmem:[#allocation2 + $0x58] sm:$0xff] %v443_v14  ;;  %446 = vst [vmem:[#allocation2 + $0x6c] sm:$0xff] %v445_v15  ;;  %v453_v18 = vld [vmem:[%s14286_s27 + $0x40] sm:$0xff]  ;;  %v455_v19 = vld [vmem:[%s14286_s27 + $0x48] sm:$0xff] }
  0x44   : > { %448 = vst [vmem:[#allocation2 + $0x80] sm:$0xff] %v447_v16  ;;  %450 = vst [vmem:[#allocation2 + $0x94] sm:$0xff] %v449_v17  ;;  %v457_v20 = vld [vmem:[%s14286_s27 + $0x50] sm:$0xff]  ;;  %v459_v21 = vld [vmem:[%s14286_s27 + $0x58] sm:$0xff] }
  0x45   : > { %452 = vst [vmem:[#allocation2 + $0xa8] sm:$0xff] %v451_v2  ;;  %454 = vst [vmem:[#allocation2 + $0xbc] sm:$0xff] %v453_v18  ;;  %v461_v22 = vld [vmem:[%s14286_s27 + $0x60] sm:$0xff]  ;;  %v463_v23 = vld [vmem:[%s14286_s27 + $0x68] sm:$0xff] }
  0x46   : > { %456 = vst [vmem:[#allocation2 + $0xd0] sm:$0xff] %v455_v19  ;;  %458 = vst [vmem:[#allocation2 + $0xe4] sm:$0xff] %v457_v20  ;;  %v465_v24 = vld [vmem:[%s14286_s27 + $0x70] sm:$0xff]  ;;  %v467_v25 = vld [vmem:[%s14286_s27 + $0x78] sm:$0xff] }
  0x47   : > { %460 = vst [vmem:[#allocation2 + $0xf8] sm:$0xff] %v459_v21  ;;  %462 = vst [vmem:[#allocation2 + $0x10c] sm:$0xff] %v461_v22  ;;  %v469_v26 = vld [vmem:[%s14286_s27 + $0x80] sm:$0xff]  ;;  %v471_v27 = vld [vmem:[%s14286_s27 + $0x88] sm:$0xff] }
  0x48   : > { %464 = vst [vmem:[#allocation2 + $0x120] sm:$0xff] %v463_v23  ;;  %466 = vst [vmem:[#allocation2 + $0x134] sm:$0xff] %v465_v24  ;;  %v473_v28 = vld [vmem:[%s14286_s27 + $0x90] sm:$0xff]  ;;  %v475_v29 = vld [vmem:[%s14286_s27 + $0x98] sm:$0xff] }
  0x49   : > { %468 = vst [vmem:[#allocation2 + $0x148] sm:$0xff] %v467_v25  ;;  %470 = vst [vmem:[#allocation2 + $0x184] sm:$0xff] %v469_v26  ;;  %v477_v30 = vld [vmem:[%s14286_s27 + $0xa0] sm:$0xff]  ;;  %v479_v31 = vld [vmem:[%s14286_s27 + $0xa8] sm:$0xff] }
  0x4a   : > { %472 = vst [vmem:[#allocation2 + $0x198] sm:$0xff] %v471_v27  ;;  %474 = vst [vmem:[#allocation2 + $0x1ac] sm:$0xff] %v473_v28  ;;  %v481_v32 = vld [vmem:[%s14286_s27 + $0xb0] sm:$0xff]  ;;  %v483_v33 = vld [vmem:[%s14286_s27 + $0xb8] sm:$0xff] }
  0x4b   : > { %476 = vst [vmem:[#allocation2 + $0x1c0] sm:$0xff] %v475_v29  ;;  %478 = vst [vmem:[#allocation2 + $0x1d4] sm:$0xff] %v477_v30  ;;  %v485_v34 = vld [vmem:[%s14286_s27 + $0xc0] sm:$0xff]  ;;  %v487_v35 = vld [vmem:[%s14286_s27 + $0xc8] sm:$0xff] }
  0x4c   : > { %480 = vst [vmem:[#allocation2 + $0x1e8] sm:$0xff] %v479_v31  ;;  %482 = vst [vmem:[#allocation2 + $0x1fc] sm:$0xff] %v481_v32  ;;  %v489_v36 = vld [vmem:[%s14286_s27 + $0xd0] sm:$0xff]  ;;  %v491_v37 = vld [vmem:[%s14286_s27 + $0xd8] sm:$0xff] }
  0x4d   : > { %484 = vst [vmem:[#allocation2 + $0x210] sm:$0xff] %v483_v33  ;;  %486 = vst [vmem:[#allocation2 + $0x224] sm:$0xff] %v485_v34  ;;  %v493_v38 = vld [vmem:[%s14286_s27 + $0xe0] sm:$0xff]  ;;  %v495_v39 = vld [vmem:[%s14286_s27 + $0xe8] sm:$0xff] }
  0x4e   : > { %488 = vst [vmem:[#allocation2 + $0x238] sm:$0xff] %v487_v35  ;;  %490 = vst [vmem:[#allocation2 + $0x24c] sm:$0xff] %v489_v36  ;;  %v497_v40 = vld [vmem:[%s14286_s27 + $0xf0] sm:$0xff]  ;;  %v499_v41 = vld [vmem:[%s14286_s27 + $0xf8] sm:$0xff] }
  0x4f   : > { %492 = vst [vmem:[#allocation2 + $0x260] sm:$0xff] %v491_v37  ;;  %494 = vst [vmem:[#allocation2 + $0x274] sm:$0xff] %v493_v38 }
  0x50   : > { %496 = vst [vmem:[#allocation2 + $0x288] sm:$0xff] %v495_v39  ;;  %498 = vst [vmem:[#allocation2 + $0x29c] sm:$0xff] %v497_v40 }
  0x51   : > { %500 = vst [vmem:[#allocation2 + $0x2b0] sm:$0xff] %v499_v41 }
  0x52   : > { %508 = vsyncadd [#allocation3], 4096 }
  0x53   : > { %14185 = dma.done.wait [#allocation3], 4096 }
  0x54   : > { %14186 = vsyncadd [#allocation3], 4294963200 }
  0x55 PF: > { %s12094_s28 = smul.u32 576, %s14189_s12  ;;  %v14391_v44 = vld [vmem:[#allocation2 + $0x1c] sm:$0xf]  ;;  %v14400_v46 = vld [vmem:[#allocation2 + $0x20] sm:$0xf]  ;;  %s10520_s7 = scalar_lea.vmem %s17749_s2, %s14189_s12 }
  0x56   : > { %v14387_v42 = vld [vmem:[#allocation2 + $0x8] sm:$0xf]  ;;  %v11721_v48 = vcombine.low %v14391_v44, %v14400_v46  ;;  %v3871_v57 = vshrl.u32 %v14391_v44, 16  ;;  %v14414_v58 = vld [vmem:[#allocation2 + $0x1c] sm:$0xf]  ;;  %v3880_v3 = vshrl.u32 %v14400_v46, 16 }
  0x57   : > { %v14389_v43 = vld [vmem:[#allocation2 + $0xc] sm:$0xf]  ;;  %s14396_s4 = scalar_lea.vmem %s17748_s1, %s12094_s28  ;;  %v620_v56 = vshrl.u32 %v14387_v42, 16  ;;  %v642_v61 = vshrl.u32 %v14414_v58, 16  ;;  %v14427_v5 = vld [vmem:[#allocation2 + $0x20] sm:$0xf] }
  0x58   : > { %v11478_v45 = vcombine.low %v14387_v42, %v14389_v43  ;;  %v13904_v47 = vld [vmem:[%s14396_s4 + $0x40] sm:$0xff]   ;;  %v13906_v50 = vld [vmem:[%s14396_s4 + $0x48] sm:$0xff]   ;;  %12951 = vmatprep.mubr.bf16.mxu0 %v11721_v48  ;;  %v13908_v52 = vld [vmem:[%s14396_s4 + $0x50] sm:$0xff]   ;;  %v629_v62 = vshrl.u32 %v14389_v43, 16  ;;  %v14422_v0 = vrot.slane %v3871_v57, 7  ;;  %v651_v8 = vshrl.u32 %v14427_v5, 16 }
  0x59   : > { %v13905_v49 = vld [vmem:[%s14396_s4 + $0x100] sm:$0xff]   ;;  %12615 = vmatprep.subr.bf16.mxu1 %v13904_v47  ;;  %v13907_v51 = vld [vmem:[%s14396_s4 + $0x108] sm:$0xff]   ;;  %v13909_v53 = vld [vmem:[%s14396_s4 + $0x110] sm:$0xff]   ;;  %v14420_v63 = vrot.slane %v620_v56, 7  ;;  %v14429_v6 = vrot.slane %v642_v61, 7  ;;  %v14446_v18 = vrot.slane %v3880_v3, 7 }
  0x5a   : > { %12631 = vmatprep.mubr.bf16.mxu1 %v11478_v45  ;;  %12935 = vmatprep.subr.bf16.mxu0 %v13905_v49  ;;  %v13910_v54 = vld [vmem:[%s14396_s4 + $0x58] sm:$0xff]   ;;  %v13912_v59 = vld [vmem:[%s14396_s4 + $0x60] sm:$0xff]   ;;  %17936 = vst [vmem:[#allocation6_spill] sm:$0xff] %v14422_v0  ;;  %v13914_v1 = vld [vmem:[%s14396_s4 + $0x68] sm:$0xff]   ;;  %v14443_v17 = vrot.slane %v629_v62, 7  ;;  %v14454_v25 = vrot.slane %v651_v8, 7 }
  0x5b   : > { %12616 = vmatpush3.bf16.msra.mxu1 %v13904_v47  ;;  %12936 = vmatpush3.bf16.msra.mxu0 %v13905_v49  ;;  %v13911_v55 = vld [vmem:[%s14396_s4 + $0x118] sm:$0xff]   ;;  %v13913_v60 = vld [vmem:[%s14396_s4 + $0x120] sm:$0xff]   ;;  %v13915_v4 = vld [vmem:[%s14396_s4 + $0x128] sm:$0xff]   ;;  %v11479_v47 = vcombine.low %v14414_v58, %v14427_v5  ;;  %vm2448_vm3 = vsmask.f32 3328  ;;  %p12022_p8 = scmp.ge.s32.totalorder %s14189_s12, 2 }
  0x5c   : > { %12617 = vmatprep.subr.bf16.mxu1 %v13906_v50  ;;  %12937 = vmatprep.subr.bf16.mxu0 %v13907_v51  ;;  %v14431_v7 = vld [vmem:[#allocation2 + $0x30] sm:$0xf]  ;;  %v14434_v9 = vld [vmem:[#allocation2 + $0x34] sm:$0xf]  ;;  %v13918_v24 = vld [vmem:[%s14396_s4 + $0x78] sm:$0xff]  }
  0x5d   : > { %v3893_v10 = vshrl.u32 %v14431_v7, 16  ;;  %v3902_v14 = vshrl.u32 %v14434_v9, 16  ;;  %v13916_v15 = vld [vmem:[%s14396_s4 + $0x70] sm:$0xff]   ;;  %v13919_v30 = vld [vmem:[%s14396_s4 + $0x138] sm:$0xff]   ;;  %v14468_v34 = vld [vmem:[#allocation2 + $0x44] sm:$0xf] }
  0x5e   : > { %v13917_v19 = vld [vmem:[%s14396_s4 + $0x130] sm:$0xff]   ;;  %17938 = vst [vmem:[#allocation8_spill] sm:$0xff] %v14468_v34  ;;  %v14472_v37 = vld [vmem:[#allocation2 + $0x48] sm:$0xf]  ;;  %v14474_v38 = vld [vmem:[#allocation2 + $0x44] sm:$0xf] }
  0x5f   : > { %12618 = vmatpush3.bf16.msra.mxu1 %v13906_v50  ;;  %12938 = vmatpush3.bf16.msra.mxu0 %v13907_v51  ;;  %v14456_v26 = vrot.slane %v3893_v10, 7  ;;  %v14460_v29 = vld [vmem:[#allocation2 + $0x30] sm:$0xf]  ;;  %v14463_v31 = vrot.slane %v3902_v14, 7  ;;  %v14465_v32 = vld [vmem:[#allocation2 + $0x34] sm:$0xf] }
  0x60   : > { %12619 = vmatprep.subr.bf16.mxu1 %v13908_v52  ;;  %12939 = vmatprep.subr.bf16.mxu0 %v13909_v53  ;;  %v664_v33 = vshrl.u32 %v14460_v29, 16  ;;  %v673_v36 = vshrl.u32 %v14465_v32, 16  ;;  %17939 = vst [vmem:[#allocation9_spill] sm:$0xff] %v14472_v37  ;;  %v3915_v39 = vshrl.u32 %v14468_v34, 16  ;;  %v3924_v40 = vshrl.u32 %v14472_v37, 16  ;;  %v13925_v61 = vld [vmem:[%s14396_s4 + $0x140] sm:$0xff]  }
  0x61   : > { %17937 = vst [vmem:[#allocation7_spill] sm:$0xff] %v14456_v26  ;;  %v14478_v41 = vld [vmem:[#allocation2 + $0x48] sm:$0xf]  ;;  %v14480_v45 = vld [vmem:[#allocation2 + $0x58] sm:$0xf]  ;;  %v686_v48 = vshrl.u32 %v14474_v38, 16 }
  0x62   : > { %17940 = vst [vmem:[#allocation10_spill] sm:$0xff] %v14480_v45  ;;  %v695_v49 = vshrl.u32 %v14478_v41, 16  ;;  %v14486_v50 = vld [vmem:[#allocation2 + $0x5c] sm:$0xf]  ;;  %v14493_v56 = vrot.slane %v664_v33, 7  ;;  %v14495_v57 = vrot.slane %v673_v36, 7 }
  0x63   : > { %12620 = vmatpush3.bf16.msra.mxu1 %v13908_v52  ;;  %12940 = vmatpush3.bf16.msra.mxu0 %v13909_v53  ;;  %17941 = vst [vmem:[#allocation11_spill] sm:$0xff] %v14486_v50  ;;  %v3937_v53 = vshrl.u32 %v14480_v45, 16  ;;  %v14500_v62 = vrot.slane %v3915_v39, 7  ;;  %v14506_v8 = vrot.slane %v686_v48, 7  ;;  %v13930_v39 = vld [vmem:[%s14396_s4 + $0x148] sm:$0xff]   ;;  %v13936_v21 = vld [vmem:[%s14396_s4 + $0x150] sm:$0xff]  }
  0x64   : > { %12621 = vmatprep.subr.bf16.mxu1 %v13910_v54  ;;  %12941 = vmatprep.subr.bf16.mxu0 %v13911_v55  ;;  %v14508_v10 = vrot.slane %v695_v49, 7  ;;  %v14521_v48 = vld [vmem:[#allocation2 + $0x5c] sm:$0xf]  ;;  %v11480_v49 = vcombine.low %v14460_v29, %v14465_v32  ;;  %v14531_v14 = vld [vmem:[#allocation2 + $0x70] sm:$0xf] }
  0x65   : > { %17942 = vst [vmem:[#allocation12_spill] sm:$0xff] %v14500_v62  ;;  %v14514_v33 = vrot.slane %v3937_v53, 7  ;;  %17947 = vst [vmem:[#allocation17_spill] sm:$0xff] %v14531_v14  ;;  %v3968_v2 = vshrl.u32 %v14531_v14, 16  ;;  %v14538_v22 = vld [vmem:[#allocation2 + $0x6c] sm:$0xf] }
  0x66   : > { %v14540_v16 = vld [vmem:[#allocation2 + $0x70] sm:$0xf]  ;;  %v730_v3 = vshrl.u32 %v14538_v22, 16  ;;  %v14549_v52 = vld [vmem:[#allocation2 + $0x80] sm:$0xf]  ;;  %v13941_v11 = vld [vmem:[%s14396_s4 + $0x158] sm:$0xff]  }
  0x67   : > { %12622 = vmatpush3.bf16.msra.mxu1 %v13910_v54  ;;  %12942 = vmatpush3.bf16.msra.mxu0 %v13911_v55  ;;  %v3946_v54 = vshrl.u32 %v14486_v50, 16  ;;  %v13923_v55 = vld [vmem:[%s14396_s4] sm:$0xff]   ;;  %17944 = vst [vmem:[#allocation14_spill] sm:$0xff] %v14514_v33  ;;  %v14543_v53 = vld [vmem:[%s14396_s4 + $0x10] sm:$0xff]   ;;  %17948 = vst [vmem:[#allocation18_spill] sm:$0xff] %v14549_v52 }
  0x68   : > { %12623 = vmatprep.subr.bf16.mxu1 %v13912_v59  ;;  %12943 = vmatprep.subr.bf16.mxu0 %v13913_v60  ;;  %v14551_v35 = vld [vmem:[#allocation2 + $0x84] sm:$0xf]  ;;  %v14575_v23 = vrot.slane %v730_v3, 7  ;;  %v14663_v62 = vld [vmem:[#allocation2 + $0xbc] sm:$0xf] }
  0x69   : > { %v14516_v36 = vrot.slane %v3946_v54, 7  ;;  %v14529_v54 = vld [vmem:[#allocation2 + $0x6c] sm:$0xf]  ;;  %17949 = vst [vmem:[#allocation19_spill] sm:$0xff] %v14551_v35  ;;  %17966 = vst [vmem:[#allocation34_spill] sm:$0xff] %v14663_v62 }
  0x6a   : > { %17946 = vst [vmem:[#allocation16_spill] sm:$0xff] %v14529_v54  ;;  %v3959_v51 = vshrl.u32 %v14529_v54, 16  ;;  %v11725_v13 = vcombine.low %v14529_v54, %v14531_v14  ;;  %v14589_v54 = vld [vmem:[#allocation2 + $0x94] sm:$0xf]  ;;  %vm2449_vm4 = vsmask.f32 7440 }
  0x6b   : > { %12624 = vmatpush3.bf16.msra.mxu1 %v13912_v59  ;;  %12944 = vmatpush3.bf16.msra.mxu0 %v13913_v60  ;;  %17945 = vst [vmem:[#allocation15_spill] sm:$0xff] %v14516_v36  ;;  %v13934_v60 = vld [vmem:[%s14396_s4 + $0x8] sm:$0xff]   ;;  %v739_v59 = vshrl.u32 %v14540_v16, 16  ;;  %17954 = vst [vmem:[#allocation24_spill] sm:$0xff] %v14589_v54  ;;  %vm611_vm6 = vsmask.f32 256 }
  0x6c   : > { %12625 = vmatprep.subr.bf16.mxu1 %v13914_v1  ;;  %12945 = vmatprep.subr.bf16.mxu0 %v13915_v4  ;;  %v14566_v20 = vrot.slane %v3959_v51, 7  ;;  %v14580_v51 = vld [vmem:[#allocation2 + $0x84] sm:$0xf]  ;;  %v14623_v36 = vld [vmem:[#allocation2 + $0xac] sm:$0xf]  ;;  %vm15013_vm5 = vmor %vm2448_vm3, %vm2449_vm4 }
  0x6d   : > { %v14577_v12 = vrot.slane %v739_v59, 7  ;;  %17952 = vst [vmem:[#allocation22_spill] sm:$0xff] %v14580_v51  ;;  %v761_v3 = vshrl.u32 %v14580_v51, 16  ;;  %v13956_v59 = vld [vmem:[%s14396_s4 + $0x18] sm:$0xff]   ;;  %17960 = vst [vmem:[#allocation28_spill] sm:$0xff] %v14623_v36 }
  0x6e   : > { %17950 = vst [vmem:[#allocation20_spill] sm:$0xff] %v14566_v20  ;;  %v14621_v20 = vld [vmem:[#allocation2 + $0xa8] sm:$0xf]  ;;  %vm612_vm7 = vsmask.f32 4368 }
  0x6f   : > { %12626 = vmatpush3.bf16.msra.mxu1 %v13914_v1  ;;  %12946 = vmatpush3.bf16.msra.mxu0 %v13915_v4  ;;  %v14502_v1 = vrot.slane %v3924_v40, 7  ;;  %v14519_v40 = vld [vmem:[#allocation2 + $0x58] sm:$0xf]  ;;  %v11481_v4 = vcombine.low %v14474_v38, %v14478_v41  ;;  %17959 = vst [vmem:[#allocation27_spill] sm:$0xff] %v14621_v20  ;;  %v14626_v33 = vrot.slane %v761_v3, 7  ;;  %vm15288_vm8 = vmor %vm611_vm6, %vm612_vm7 }
  0x70   : > { %12627 = vmatprep.subr.bf16.mxu1 %v13916_v15  ;;  %12947 = vmatprep.subr.bf16.mxu0 %v13917_v19 }
  0x71   : > { %17943 = vst [vmem:[#allocation13_spill] sm:$0xff] %v14502_v1 }
  0x73   : > { %12628 = vmatpush3.bf16.msra.mxu1 %v13916_v15  ;;  %12948 = vmatpush3.bf16.msra.mxu0 %v13917_v19  ;;  %v11722_v19 = vcombine.low %v14431_v7, %v14434_v9  ;;  %v708_v15 = vshrl.u32 %v14519_v40, 16 }
  0x74   : > { %12629 = vmatprep.subr.bf16.mxu1 %v13918_v24  ;;  %12949 = vmatprep.subr.bf16.mxu0 %v13919_v30 }
  0x75   : > { %v14555_v28 = vrot.slane %v708_v15, 7  ;;  %v14568_v15 = vrot.slane %v3968_v2, 7 }
  0x77   : > { %12630 = vmatpush3.bf16.msra.mxu1 %v13918_v24  ;;  %12950 = vmatpush3.bf16.msra.mxu0 %v13919_v30  ;;  %v11723_v24 = vcombine.low %v14468_v34, %v14472_v37  ;;  %v717_v30 = vshrl.u32 %v14521_v48, 16  ;;  %17951 = vst [vmem:[#allocation21_spill] sm:$0xff] %v14568_v15  ;;  %v17957_v15 = vshll.u32 %v14387_v42, 16  ;;  %v11483_v42 = vcombine.low %v14538_v22, %v14540_v16 }
  0x78   : > { %12695 = vmatprep.subr.bf16.mxu1 %v13923_v55  ;;  %13015 = vmatprep.subr.bf16.mxu0 %v13925_v61 }
  0x79   : > { %v14560_v27 = vrot.slane %v717_v30, 7  ;;  %v14573_v30 = vld [vmem:[#allocation2 + $0x80] sm:$0xf] }
  0x7a   : > { %12632 = vmatmul.mubr.bf16.vlgmr.msra.gmra.mrb[0].mxu1 %v11479_v47  ;;  %12952 = vmatmul.mubr.bf16.vlgmr.msra.gmra.mrb[0].mxu0 %v11722_v19  ;;  %v11724_v47 = vcombine.low %v14480_v45, %v14486_v50  ;;  %v3981_v19 = vshrl.u32 %v14549_v52, 16  ;;  %v752_v2 = vshrl.u32 %v14573_v30, 16  ;;  %v13947_v45 = vld [vmem:[%s14396_s4 + $0x160] sm:$0xff]  }
  0x7b   : > { %12696 = vmatpush3.bf16.msra.mxu1 %v13923_v55  ;;  %13016 = vmatpush3.bf16.msra.mxu0 %v13925_v61  ;;  %v11482_v55 = vcombine.low %v14519_v40, %v14521_v48  ;;  %v14609_v61 = vld [vmem:[#allocation2 + $0x98] sm:$0xf] }
  0x7c   : > { %12635 = vmatprep.mubr.bf16.mxu1 %v11480_v49  ;;  %12955 = vmatprep.mubr.bf16.mxu0 %v11723_v24  ;;  %v3990_v49 = vshrl.u32 %v14551_v35, 16  ;;  %v14584_v14 = vrot.slane %v3981_v19, 7  ;;  %v14597_v19 = vld [vmem:[#allocation2 + $0x98] sm:$0xf]  ;;  %v4003_v24 = vshrl.u32 %v14589_v54, 16 }
  0x7d   : > { %13017 = vmatprep.subr.bf16.mxu0 %v13930_v39  ;;  %12697 = vmatprep.subr.bf16.mxu1 %v13934_v60  ;;  %17956 = vst [vmem:[#allocation26_spill] sm:$0xff] %v14597_v19  ;;  %v11727_v37 = vcombine.low %v14589_v54, %v14597_v19  ;;  %v13978_v54 = vld [vmem:[%s14396_s4 + $0x30] sm:$0xff]  }
  0x7e   : > { %17953 = vst [vmem:[#allocation23_spill] sm:$0xff] %v14584_v14  ;;  %v14603_v14 = vor.u32 %v17957_v15, %v14420_v63  ;;  %v14618_v15 = vrot.slane %v752_v2, 7  ;;  %v11484_v2 = vcombine.low %v14573_v30, %v14580_v51  ;;  %v14672_v51 = vld [vmem:[#allocation2 + $0xc0] sm:$0xf] }
  0x7f   : > { %12698 = vmatpush3.bf16.msra.mxu1 %v13934_v60  ;;  %13018 = vmatpush3.bf16.msra.mxu0 %v13930_v39  ;;  %v14593_v60 = vrot.slane %v3990_v49, 7  ;;  %v4012_v49 = vshrl.u32 %v14597_v19, 16  ;;  %v17958_v39 = vshll.u32 %v14389_v43, 16  ;;  %v783_v43 = vshrl.u32 %v14609_v61, 16  ;;  %17967 = vst [vmem:[#allocation35_spill] sm:$0xff] %v14672_v51 }
  0x80   : > { %12699 = vmatprep.subr.bf16.mxu1 %v14543_v53  ;;  %13019 = vmatprep.subr.bf16.mxu0 %v13936_v21  ;;  %v4056_v1 = vshrl.u32 %v14672_v51, 16 }
  0x81   : > { %17955 = vst [vmem:[#allocation25_spill] sm:$0xff] %v14593_v60  ;;  %v14607_v60 = vld [vmem:[#allocation2 + $0x94] sm:$0xf]  ;;  %v14614_v50 = vor.u32 %v17958_v39, %v14443_v17  ;;  %v4025_v17 = vshrl.u32 %v14621_v20, 16  ;;  %v14635_v39 = vrot.slane %v4003_v24, 7  ;;  %v14641_v3 = vrot.slane %v4012_v49, 7 }
  0x82   : > { %12636 = vmatmul.mubr.bf16.gmra.mrb[4].mxu1 %v11481_v4  ;;  %12956 = vmatmul.mubr.bf16.gmra.mrb[4].mxu0 %v11724_v47  ;;  %v774_v4 = vshrl.u32 %v14607_v60, 16  ;;  %v4034_v47 = vshrl.u32 %v14623_v36, 16  ;;  %v14656_v34 = vrot.slane %v783_v43, 7  ;;  %v4047_v43 = vshrl.u32 %v14663_v62, 16 }
  0x83   : > { %12639 = vmatprep.mubr.bf16.mxu1 %v11482_v55  ;;  %12959 = vmatprep.mubr.bf16.mxu0 %v11725_v13  ;;  %v11726_v55 = vcombine.low %v14549_v52, %v14551_v35  ;;  %17961 = vst [vmem:[#allocation29_spill] sm:$0xff] %v14635_v39  ;;  %17962 = vst [vmem:[#allocation30_spill] sm:$0xff] %v14641_v3  ;;  %v14646_v52 = vld [vmem:[#allocation2 + $0xac] sm:$0xf]  ;;  %v13966_v39 = vld [vmem:[%s14396_s4 + $0x20] sm:$0xff]   ;;  %v14658_v19 = vrot.slane %v4025_v17, 7 }
  0x84   : > { %13020 = vmatpush3.bf16.msra.mxu0 %v13936_v21  ;;  %v14638_v21 = vld [vmem:[#allocation2 + $0xa8] sm:$0xf]  ;;  %12700 = vmatpush3.bf16.msra.mxu1 %v14543_v53  ;;  %v14650_v13 = vrot.slane %v774_v4, 7  ;;  %v805_v49 = vshrl.u32 %v14646_v52, 16  ;;  %v14660_v35 = vrot.slane %v4034_v47, 7  ;;  %v17970_v47 = vshll.u32 %v14400_v46, 16 }
  0x85   : > { %13021 = vmatprep.subr.bf16.mxu0 %v13941_v11  ;;  %v796_v24 = vshrl.u32 %v14638_v21, 16  ;;  %12701 = vmatprep.subr.bf16.mxu1 %v13956_v59  ;;  %v13952_v3 = vld [vmem:[%s14396_s4 + $0x168] sm:$0xff]   ;;  %17964 = vst [vmem:[#allocation32_spill] sm:$0xff] %v14658_v19  ;;  %v14687_v53 = vld [vmem:[#allocation2 + $0xbc] sm:$0xf] }
  0x86   : > { %17963 = vst [vmem:[#allocation31_spill] sm:$0xff] %v14650_v13  ;;  %17965 = vst [vmem:[#allocation33_spill] sm:$0xff] %v14660_v35  ;;  %v14666_v4 = vld [vmem:[%s14396_s4 + $0x28] sm:$0xff]   ;;  %v14738_v19 = vld [vmem:[#allocation2 + $0xd0] sm:$0xf] }
  0x87   : > { %v14668_v13 = vrot.slane %v796_v24, 7  ;;  %v14683_v24 = vor.u32 %v17970_v47, %v14446_v18  ;;  %v14699_v18 = vrot.slane %v805_v49, 7  ;;  %v14705_v47 = vld [vmem:[%s14396_s4 + $0x170] sm:$0xff]  }
  0x88   : > { %13022 = vmatpush3.bf16.msra.mxu0 %v13941_v11  ;;  %12702 = vmatpush3.bf16.msra.mxu1 %v13956_v59  ;;  %v17968_v11 = vshll.u32 %v14391_v44, 16  ;;  %v17972_v59 = vshll.u32 %v14414_v58, 16  ;;  %v17973_v44 = vshll.u32 %v14427_v5, 16  ;;  %v17974_v58 = vshll.u32 %v14431_v7, 16  ;;  %v14719_v49 = vld [vmem:[#allocation2 + $0xd0] sm:$0xf] }
  0x89   : > { %13023 = vmatprep.subr.bf16.mxu0 %v13947_v45  ;;  %17971 = vst [vmem:[#allocation37_spill] sm:$0xff] %v14683_v24  ;;  %12703 = vmatprep.subr.bf16.mxu1 %v13966_v39  ;;  %v17976_v5 = vshll.u32 %v14434_v9, 16  ;;  %17978 = vst [vmem:[#allocation40_spill] sm:$0xff] %v14719_v49  ;;  %v11485_v7 = vcombine.low %v14607_v60, %v14609_v61  ;;  %v14728_v9 = vrot.slane %v4047_v43, 7  ;;  %v14740_v43 = vld [vmem:[#allocation2 + $0xd4] sm:$0xf] }
  0x8a   : > { %v14678_v17 = vor.u32 %v17968_v11, %v14422_v0  ;;  %12640 = vmatmul.mubr.bf16.gmra.mrb[8].mxu1 %v11483_v42  ;;  %v14692_v35 = vor.u32 %v17972_v59, %v14429_v6  ;;  %v14697_v46 = vor.u32 %v17973_v44, %v14454_v25  ;;  %12960 = vmatmul.mubr.bf16.gmra.mrb[8].mxu0 %v11726_v55  ;;  %v14701_v42 = vld [vmem:[#allocation2 + $0xc0] sm:$0xf]  ;;  %v818_v11 = vshrl.u32 %v14687_v53, 16  ;;  %v14721_v44 = vld [vmem:[#allocation2 + $0xd4] sm:$0xf] }
  0x8b   : > { %12643 = vmatprep.mubr.bf16.mxu1 %v11484_v2  ;;  %v14710_v59 = vor.u32 %v17974_v58, %v14456_v26  ;;  %v14715_v25 = vor.u32 %v17976_v5, %v14463_v31  ;;  %12963 = vmatprep.mubr.bf16.mxu0 %v11727_v37  ;;  %v827_v2 = vshrl.u32 %v14701_v42, 16  ;;  %17979 = vst [vmem:[#allocation41_spill] sm:$0xff] %v14721_v44  ;;  %17980 = vst [vmem:[#allocation42_spill] sm:$0xff] %v14728_v9  ;;  %v14765_v24 = vld [vmem:[#allocation2 + $0xe4] sm:$0xf] }
  0x8c   : > { %17969 = vst [vmem:[#allocation36_spill] sm:$0xff] %v14678_v17  ;;  %13024 = vmatpush3.bf16.msra.mxu0 %v13947_v45  ;;  %v11728_v58 = vcombine.low %v14621_v20, %v14623_v36  ;;  %v4069_v31 = vshrl.u32 %v14719_v49, 16  ;;  %12704 = vmatpush3.bf16.msra.mxu1 %v13966_v39  ;;  %v11486_v37 = vcombine.low %v14638_v21, %v14646_v52  ;;  %v14733_v5 = vrot.slane %v4056_v1, 7  ;;  %v14756_v17 = vld [vmem:[#allocation2 + $0xe8] sm:$0xf]  ;;  %v13984_v39 = vld [vmem:[%s14396_s4 + $0x38] sm:$0xff]  }
  0x8d   : > { %17975 = vst [vmem:[#allocation38_spill] sm:$0xff] %v14710_v59  ;;  %17977 = vst [vmem:[#allocation39_spill] sm:$0xff] %v14715_v25  ;;  %13025 = vmatprep.subr.bf16.mxu0 %v13952_v3  ;;  %v11729_v45 = vcombine.low %v14663_v62, %v14672_v51  ;;  %v4078_v55 = vshrl.u32 %v14721_v44, 16  ;;  %12705 = vmatprep.subr.bf16.mxu1 %v14666_v4  ;;  %v14743_v9 = vrot.slane %v818_v11, 7  ;;  %v840_v36 = vshrl.u32 %v14738_v19, 16  ;;  %v13963_v51 = vld [vmem:[%s14396_s4 + $0x178] sm:$0xff]  }
  0x8e   : > { %17981 = vst [vmem:[#allocation43_spill] sm:$0xff] %v14733_v5  ;;  %v849_v1 = vshrl.u32 %v14740_v43, 16  ;;  %v14748_v5 = vld [vmem:[#allocation2 + $0xe4] sm:$0xf]  ;;  %v14751_v62 = vrot.slane %v827_v2, 7  ;;  %17983 = vst [vmem:[#allocation45_spill] sm:$0xff] %v14756_v17 }
  0x8f   : > { %17982 = vst [vmem:[#allocation44_spill] sm:$0xff] %v14748_v5  ;;  %v4091_v11 = vshrl.u32 %v14748_v5, 16  ;;  %v14760_v26 = vrot.slane %v4069_v31, 7  ;;  %v4100_v2 = vshrl.u32 %v14756_v17, 16  ;;  %17985 = vst [vmem:[#allocation47_spill] sm:$0xff] %v14765_v24  ;;  %v14769_v20 = vrot.slane %v4078_v55, 7 }
  0x90   : > { %13026 = vmatpush3.bf16.msra.mxu0 %v13952_v3  ;;  %12706 = vmatpush3.bf16.msra.mxu1 %v14666_v4  ;;  %v14773_v59 = vld [vmem:[#allocation2 + $0xe8] sm:$0xf]  ;;  %v862_v0 = vshrl.u32 %v14765_v24, 16  ;;  %v14776_v25 = vrot.slane %v840_v36, 7  ;;  %v14785_v3 = vld [vmem:[%s14396_s4 + $0x180] sm:$0xff]  }
  0x91   : > { %17984 = vst [vmem:[#allocation46_spill] sm:$0xff] %v14760_v26  ;;  %13027 = vmatprep.subr.bf16.mxu0 %v14705_v47  ;;  %17986 = vst [vmem:[#allocation48_spill] sm:$0xff] %v14769_v20  ;;  %12707 = vmatprep.subr.bf16.mxu1 %v13978_v54  ;;  %v14778_v26 = vrot.slane %v849_v1, 7  ;;  %v871_v55 = vshrl.u32 %v14773_v59, 16  ;;  %v14787_v31 = vrot.slane %v4091_v11, 7  ;;  %v14795_v1 = vrot.slane %v4100_v2, 7 }
  0x92   : > { %12644 = vmatmul.mubr.bf16.gmra.mrb[12].mxu1 %v11485_v7  ;;  %17987 = vst [vmem:[#allocation49_spill] sm:$0xff] %v14773_v59  ;;  %12964 = vmatmul.mubr.bf16.gmra.mrb[12].mxu0 %v11728_v58  ;;  %v14782_v7 = vld [vmem:[#allocation2 + $0xf8] sm:$0xf]  ;;  %v14791_v36 = vld [vmem:[#allocation2 + $0xfc] sm:$0xf]  ;;  %v14797_v4 = vrot.slane %v862_v0, 7  ;;  %v11730_v11 = vcombine.low %v14719_v49, %v14721_v44  ;;  %v11488_v20 = vcombine.low %v14738_v19, %v14740_v43 }
  0x93   : > { %12647 = vmatprep.mubr.bf16.mxu1 %v11486_v37  ;;  %17988 = vst [vmem:[#allocation50_spill] sm:$0xff] %v14778_v26  ;;  %17989 = vst [vmem:[#allocation51_spill] sm:$0xff] %v14782_v7  ;;  %12967 = vmatprep.mubr.bf16.mxu0 %v11729_v45  ;;  %v4113_v37 = vshrl.u32 %v14782_v7, 16  ;;  %v4122_v45 = vshrl.u32 %v14791_v36, 16  ;;  %v11731_v58 = vcombine.low %v14748_v5, %v14756_v17  ;;  %v14808_v2 = vld [vmem:[#allocation2 + $0xf8] sm:$0xf] }
  0x94   : > { %17990 = vst [vmem:[#allocation52_spill] sm:$0xff] %v14787_v31  ;;  %17991 = vst [vmem:[#allocation53_spill] sm:$0xff] %v14791_v36  ;;  %13028 = vmatpush3.bf16.msra.mxu0 %v14705_v47  ;;  %12708 = vmatpush3.bf16.msra.mxu1 %v13978_v54  ;;  %v13988_v0 = vld [vmem:[%s14396_s4 + $0x80] sm:$0xff]   ;;  %v14811_v26 = vrot.slane %v871_v55, 7  ;;  %v14816_v31 = vld [vmem:[#allocation2 + $0xfc] sm:$0xf]  ;;  %v11489_v49 = vcombine.low %v14765_v24, %v14773_v59  ;;  %v11732_v47 = vcombine.low %v14782_v7, %v14791_v36 }
  0x95   : > { %17992 = vst [vmem:[#allocation54_spill] sm:$0xff] %v14795_v1  ;;  %17993 = vst [vmem:[#allocation55_spill] sm:$0xff] %v14797_v4  ;;  %13029 = vmatprep.subr.bf16.mxu0 %v13963_v51  ;;  %12709 = vmatprep.subr.bf16.mxu1 %v13984_v39  ;;  %v14813_v1 = vrot.slane %v4113_v37, 7  ;;  %v884_v44 = vshrl.u32 %v14808_v2, 16  ;;  %v14821_v17 = vrot.slane %v4122_v45, 7  ;;  %v893_v5 = vshrl.u32 %v14816_v31, 16 }
  0x96   : > { %17994 = vst [vmem:[#allocation56_spill] sm:$0xff] %v14808_v2  ;;  %17995 = vst [vmem:[#allocation57_spill] sm:$0xff] %v14811_v26  ;;  %v14826_v55 = vld [vmem:[#allocation2 + $0x10c] sm:$0xf]  ;;  %v14828_v37 = vld [vmem:[#allocation2 + $0x110] sm:$0xf]  ;;  %v18002_v36 = vcombine.low %v14687_v53, %v14701_v42 }
  0x97   : > { %17996 = vst [vmem:[#allocation58_spill] sm:$0xff] %v14813_v1  ;;  %17997 = vst [vmem:[#allocation59_spill] sm:$0xff] %v14816_v31  ;;  %v4135_v26 = vshrl.u32 %v14826_v55, 16  ;;  %v4144_v59 = vshrl.u32 %v14828_v37, 16  ;;  %v14834_v45 = vld [vmem:[#allocation2 + $0x10c] sm:$0xf] }
  0x98   : > { %17998 = vst [vmem:[#allocation60_spill] sm:$0xff] %v14821_v17  ;;  %17999 = vst [vmem:[#allocation61_spill] sm:$0xff] %v14826_v55  ;;  %13030 = vmatpush3.bf16.msra.mxu0 %v13963_v51  ;;  %12710 = vmatpush3.bf16.msra.mxu1 %v13984_v39  ;;  %v14840_v17 = vrot.slane %v884_v44, 7  ;;  %v14842_v51 = vrot.slane %v893_v5, 7  ;;  %v14845_v1 = vld [vmem:[#allocation2 + $0x110] sm:$0xf]  ;;  %v11490_v5 = vcombine.low %v14808_v2, %v14816_v31 }
  0x99   : > { %18000 = vst [vmem:[#allocation62_spill] sm:$0xff] %v14828_v37  ;;  %18001 = vst [vmem:[#allocation63_spill] sm:$0xff] %v14834_v45  ;;  %13095 = vmatprep.subr.bf16.mxu0 %v14785_v3  ;;  %v906_v7 = vshrl.u32 %v14834_v45, 16  ;;  %12775 = vmatprep.subr.bf16.mxu1 %v13988_v0  ;;  %v14848_v24 = vrot.slane %v4135_v26, 7  ;;  %v14850_v39 = vrot.slane %v4144_v59, 7  ;;  %v915_v44 = vshrl.u32 %v14845_v1, 16 }
  0x9a   : > { %12648 = vmatmul.mubr.bf16.gmra.mrb[16].mxu1 %v18002_v36  ;;  %18003 = vst [vmem:[#allocation64_spill] sm:$0xff] %v14840_v17  ;;  %18004 = vst [vmem:[#allocation65_spill] sm:$0xff] %v14842_v51  ;;  %12968 = vmatmul.mubr.bf16.gmra.mrb[16].mxu0 %v11730_v11  ;;  %v11733_v36 = vcombine.low %v14826_v55, %v14828_v37  ;;  %v14866_v0 = vld [vmem:[#allocation2 + $0x124] sm:$0xf]  ;;  %v18012_v11 = vshll.u32 %v14460_v29, 16  ;;  %v18018_v59 = vshll.u32 %v14474_v38, 16 }
  0x9b   : > { %18005 = vst [vmem:[#allocation66_spill] sm:$0xff] %v14845_v1  ;;  %12651 = vmatprep.mubr.bf16.mxu1 %v11488_v20  ;;  %18006 = vst [vmem:[#allocation67_spill] sm:$0xff] %v14848_v24  ;;  %12971 = vmatprep.mubr.bf16.mxu0 %v11731_v58  ;;  %v14858_v54 = vrot.slane %v906_v7, 7  ;;  %v14861_v20 = vld [vmem:[#allocation2 + $0x120] sm:$0xf]  ;;  %v14863_v26 = vrot.slane %v915_v44, 7 }
  0x9c   : > { %18007 = vst [vmem:[#allocation68_spill] sm:$0xff] %v14850_v39  ;;  %18009 = vst [vmem:[#allocation70_spill] sm:$0xff] %v14861_v20  ;;  %v4157_v58 = vshrl.u32 %v14861_v20, 16  ;;  %v4166_v7 = vshrl.u32 %v14866_v0, 16  ;;  %v14877_v44 = vor.u32 %v18012_v11, %v14493_v56  ;;  %v14883_v24 = vld [vmem:[#allocation2 + $0x120] sm:$0xf] }
  0x9d   : > { %18008 = vst [vmem:[#allocation69_spill] sm:$0xff] %v14858_v54  ;;  %18010 = vst [vmem:[#allocation71_spill] sm:$0xff] %v14863_v26  ;;  %v14885_v4 = vld [vmem:[#allocation2 + $0x124] sm:$0xf]  ;;  %v18016_v26 = vshll.u32 %v14465_v32, 16  ;;  %v928_v29 = vshrl.u32 %v14883_v24, 16 }
  0x9e   : > { %18011 = vst [vmem:[#allocation72_spill] sm:$0xff] %v14866_v0  ;;  %v14879_v55 = vrot.slane %v4157_v58, 7  ;;  %18014 = vst [vmem:[#allocation74_spill] sm:$0xff] %v14883_v24  ;;  %v937_v11 = vshrl.u32 %v14885_v4, 16  ;;  %v14895_v58 = vld [vmem:[#allocation2 + $0x134] sm:$0xf]  ;;  %v11492_v38 = vcombine.low %v14883_v24, %v14885_v4 }
  0x9f   : > { %18015 = vst [vmem:[#allocation75_spill] sm:$0xff] %v14885_v4  ;;  %v14891_v37 = vor.u32 %v18016_v26, %v14495_v57  ;;  %18017 = vst [vmem:[#allocation76_spill] sm:$0xff] %v14895_v58  ;;  %v18019_v54 = vshll.u32 %v14478_v41, 16  ;;  %v14907_v31 = vrot.slane %v4166_v7, 7  ;;  %v14911_v26 = vld [vmem:[#allocation2 + $0x138] sm:$0xf] }
  0xa0   : > { %18013 = vst [vmem:[#allocation73_spill] sm:$0xff] %v14879_v55  ;;  %v14900_v55 = vor.u32 %v18018_v59, %v14506_v8  ;;  %18021 = vst [vmem:[#allocation78_spill] sm:$0xff] %v14911_v26  ;;  %v4179_v51 = vshrl.u32 %v14895_v58, 16  ;;  %v14914_v2 = vrot.slane %v928_v29, 7  ;;  %v14922_v59 = vrot.slane %v937_v11, 7 }
  0xa1   : > { %v14905_v39 = vor.u32 %v18019_v54, %v14508_v10  ;;  %18020 = vst [vmem:[#allocation77_spill] sm:$0xff] %v14907_v31  ;;  %v4188_v10 = vshrl.u32 %v14911_v26, 16  ;;  %v14920_v54 = vld [vmem:[#allocation2 + $0x134] sm:$0xf]  ;;  %v11735_v41 = vcombine.low %v14895_v58, %v14911_v26  ;;  %v14956_v57 = vld [vmem:[#allocation2 + $0x170] sm:$0xf] }
  0xa2   : > { %12652 = vmatmul.mubr.bf16.gmra.mrb[20].mxu1 %v11489_v49  ;;  %18022 = vst [vmem:[#allocation79_spill] sm:$0xff] %v14914_v2  ;;  %18023 = vst [vmem:[#allocation80_spill] sm:$0xff] %v14920_v54  ;;  %12972 = vmatmul.mubr.bf16.gmra.mrb[20].mxu0 %v11732_v47  ;;  %v14924_v7 = vrot.slane %v4179_v51, 7  ;;  %v14927_v49 = vld [vmem:[#allocation2 + $0x138] sm:$0xf]  ;;  %v950_v29 = vshrl.u32 %v14920_v54, 16 }
  0xa3   : > { %12655 = vmatprep.mubr.bf16.mxu1 %v11490_v5  ;;  %18024 = vst [vmem:[#allocation81_spill] sm:$0xff] %v14922_v59  ;;  %18026 = vst [vmem:[#allocation83_spill] sm:$0xff] %v14927_v49  ;;  %12975 = vmatprep.mubr.bf16.mxu0 %v11733_v36  ;;  %v14930_v32 = vrot.slane %v4188_v10, 7  ;;  %v959_v47 = vshrl.u32 %v14927_v49, 16  ;;  %v14936_v5 = vld [vmem:[#allocation2 + $0x148] sm:$0xf] }
  0xa4   : > { %18025 = vst [vmem:[#allocation82_spill] sm:$0xff] %v14924_v7  ;;  %18028 = vst [vmem:[#allocation85_spill] sm:$0xff] %v14936_v5  ;;  %v14938_v51 = vrot.slane %v950_v29, 7  ;;  %v14943_v7 = vld [vmem:[#allocation2 + $0x14c] sm:$0xf]  ;;  %v4201_v36 = vshrl.u32 %v14936_v5, 16 }
  0xa5   : > { %18027 = vst [vmem:[#allocation84_spill] sm:$0xff] %v14930_v32  ;;  %18030 = vst [vmem:[#allocation87_spill] sm:$0xff] %v14943_v7  ;;  %v14946_v10 = vrot.slane %v959_v47, 7  ;;  %v4210_v31 = vshrl.u32 %v14943_v7, 16  ;;  %v11736_v11 = vcombine.low %v14936_v5, %v14943_v7  ;;  %v14965_v26 = vld [vmem:[#allocation2 + $0x174] sm:$0xf]  ;;  %v18040_v7 = vcombine.low %v14861_v20, %v14866_v0 }
  0xa6   : > { %18029 = vst [vmem:[#allocation86_spill] sm:$0xff] %v14938_v51  ;;  %v14951_v58 = vrot.slane %v4201_v36, 7  ;;  %18033 = vst [vmem:[#allocation90_spill] sm:$0xff] %v14956_v57  ;;  %v18034_v51 = vshll.u32 %v14519_v40, 16  ;;  %v972_v32 = vshrl.u32 %v14956_v57, 16  ;;  %v18037_v40 = vshll.u32 %v14521_v48, 16 }
  0xa7   : > { %18031 = vst [vmem:[#allocation88_spill] sm:$0xff] %v14946_v10  ;;  %v14963_v10 = vrot.slane %v4210_v31, 7  ;;  %18036 = vst [vmem:[#allocation92_spill] sm:$0xff] %v14965_v26  ;;  %v5731_v5 = vld [vmem:[#allocation2 + $0x1c] sm:$0xf]  ;;  %v18038_v31 = vcombine.low %v14834_v45, %v14845_v1  ;;  %v11494_v36 = vcombine.low %v14956_v57, %v14965_v26  ;;  %v18044_v57 = vshll.u32 %v14538_v22, 16 }
  0xa8   : > { %18032 = vst [vmem:[#allocation89_spill] sm:$0xff] %v14951_v58  ;;  %v14961_v47 = vor.u32 %v18034_v51, %v14555_v28  ;;  %v981_v58 = vshrl.u32 %v14965_v26, 16  ;;  %v14975_v51 = vor.u32 %v18037_v40, %v14560_v27  ;;  %v5732_v29 = vld [vmem:[#allocation2 + $0x20] sm:$0xf]  ;;  %v5828_v4 = vshrl.u32 %v5731_v5, 16 }
  0xa9   : > { %18035 = vst [vmem:[#allocation91_spill] sm:$0xff] %v14963_v10  ;;  %v14980_v10 = vrot.slane %v972_v32, 7  ;;  %v5733_v27 = vld [vmem:[#allocation2 + $0x24] sm:$0x1]  ;;  %v5831_v40 = vshll.u32 %v5731_v5, 16  ;;  %v5837_v59 = vshll.u32 %v5732_v29, 16  ;;  %v14996_v2 = vor.u32 %v18044_v57, %v14575_v23 }
  0xaa   : > { %12656 = vmatmul.mubr.bf16.gmra.mrb[24].mxu1 %v18038_v31  ;;  %12976 = vmatmul.mubr.bf16.gmra.mrb[24].mxu0 %v18040_v7  ;;  %v14987_v48 = vrot.slane %v981_v58, 7  ;;  %v5841_v24 = vshrl.u32 %v5732_v29, 16  ;;  %v5830_v32 = vrot.slane %v5828_v4, 4  ;;  %v5847_v31 = vshll.u32 %v5733_v27, 16  ;;  %v14991_v26 = vld [vmem:[#allocation2 + $0x188] sm:$0xf] }
  0xab   : > { %18039 = vst [vmem:[#allocation93_spill] sm:$0xff] %v14980_v10  ;;  %12659 = vmatprep.mubr.bf16.mxu1 %v11492_v38  ;;  %12979 = vmatprep.mubr.bf16.mxu0 %v11735_v41  ;;  %v14989_v10 = vld [vmem:[#allocation2 + $0x184] sm:$0xf]  ;;  %18043 = vst [vmem:[#allocation96_spill] sm:$0xff] %v14991_v26  ;;  %v18045_v58 = vshll.u32 %v14540_v16, 16  ;;  %v5833_v7 = vrot.slane %v5831_v40, 5 }
  0xac   : > { %18041 = vst [vmem:[#allocation94_spill] sm:$0xff] %v14987_v48  ;;  %18042 = vst [vmem:[#allocation95_spill] sm:$0xff] %v14989_v10  ;;  %v5839_v5 = vrot.slane %v5837_v59, 5  ;;  %v5843_v29 = vrot.slane %v5841_v24, 4  ;;  %v994_v4 = vshrl.u32 %v14989_v10, 16  ;;  %v5849_v41 = vrot.slane %v5847_v31, 5 }
  0xad   : > { %v15001_v38 = vor.u32 %v18045_v58, %v14577_v12  ;;  %v1003_v0 = vshrl.u32 %v14991_v26, 16  ;;  %v5834_v22 = vor.u32 %v5833_v7, %v5830_v32  ;;  %v11495_v12 = vcombine.low %v14989_v10, %v14991_v26  ;;  %v5734_v16 = vld [vmem:[#allocation2 + $0x30] sm:$0xf]  ;;  %v5735_v40 = vld [vmem:[#allocation2 + $0x34] sm:$0xf] }
  0xae   : > { %v5844_v57 = vor.u32 %v5843_v29, %v5839_v5  ;;  %v15007_v48 = vrot.slane %v994_v4, 7  ;;  %v5736_v31 = vld [vmem:[#allocation2 + $0x38] sm:$0x1]  ;;  %v5852_v58 = vshrl.u32 %v5734_v16, 16  ;;  %v5855_v20 = vshll.u32 %v5734_v16, 16 }
  0xaf   : > { %v15017_v59 = vrot.slane %v1003_v0, 7  ;;  %v5861_v32 = vshll.u32 %v5735_v40, 16  ;;  %v5835_v7 = vrot.slane %v5834_v22, 4  ;;  %v5865_v4 = vshrl.u32 %v5735_v40, 16  ;;  %v15027_v40 = vld [vmem:[#allocation2 + $0x198] sm:$0xf] }
  0xb0   : > { %18046 = vst [vmem:[#allocation97_spill] sm:$0xff] %v15007_v48  ;;  %v5845_v29 = vrot.slane %v5844_v57, 4  ;;  %v5871_v27 = vshll.u32 %v5736_v31, 16  ;;  %v18050_v26 = vcombine.low %v14920_v54, %v14927_v49  ;;  %v5854_v10 = vrot.slane %v5852_v58, 4  ;;  %18051 = vst [vmem:[#allocation99_spill] sm:$0xff] %v15027_v40 }
  0xb1   : > { %18049 = vst [vmem:[#allocation98_spill] sm:$0xff] %v15017_v59  ;;  %v5857_v48 = vrot.slane %v5855_v20, 5  ;;  %v5863_v1 = vrot.slane %v5861_v32, 5  ;;  %v5840_v0 = vsel %vm15013_vm5, %v5835_v7, %v5839_v5  ;;  %v5867_v57 = vrot.slane %v5865_v4, 4  ;;  %v15029_v31 = vld [vmem:[#allocation2 + $0x19c] sm:$0xf] }
  0xb2   : > { %12660 = vmatmul.mubr.bf16.gmra.mrb[28].mxu1 %v18050_v26  ;;  %12980 = vmatmul.mubr.bf16.gmra.mrb[28].mxu0 %v11736_v11  ;;  %v5850_v22 = vsel %vm15013_vm5, %v5845_v29, %v5849_v41  ;;  %v5873_v16 = vrot.slane %v5871_v27, 5  ;;  %18052 = vst [vmem:[#allocation100_spill] sm:$0xff] %v15029_v31  ;;  %v1016_v20 = vshrl.u32 %v15027_v40, 16  ;;  %v5737_v11 = vld [vmem:[#allocation2 + $0x44] sm:$0xf]  ;;  %v1025_v5 = vshrl.u32 %v15029_v31, 16 }
  0xb3   : > { %12663 = vmatprep.mubr.bf16.mxu1 %v11494_v36  ;;  %v11778_v26 = vcombine.low %v5840_v0, %v5850_v22  ;;  %v5858_v58 = vor.u32 %v5857_v48, %v5854_v10  ;;  %v5738_v36 = vld [vmem:[#allocation2 + $0x48] sm:$0xf]  ;;  %v5868_v45 = vor.u32 %v5867_v57, %v5863_v1  ;;  %v11496_v41 = vcombine.low %v15027_v40, %v15029_v31  ;;  %v5739_v27 = vld [vmem:[#allocation2 + $0x4c] sm:$0x1]  ;;  %v5747_v17 = vld [vmem:[#allocation2 + $0x84] sm:$0xf] }
  0xb4   : > { %v15037_v4 = vrot.slane %v1016_v20, 7  ;;  %v5876_v10 = vshrl.u32 %v5737_v11, 16  ;;  %v5879_v48 = vshll.u32 %v5737_v11, 16  ;;  %v15039_v22 = vrot.slane %v1025_v5, 7  ;;  %v15041_v57 = vld [vmem:[#allocation2 + $0x1ac] sm:$0xf] }
  0xb5   : > { %13031 = vmatprep.mubr.bf16.mxu0 %v11778_v26  ;;  %v5859_v29 = vrot.slane %v5858_v58, 4  ;;  %v5869_v0 = vrot.slane %v5868_v45, 4  ;;  %v5885_v32 = vshll.u32 %v5738_v36, 16  ;;  %v5889_v59 = vshrl.u32 %v5738_v36, 16  ;;  %18055 = vst [vmem:[#allocation103_spill] sm:$0xff] %v15041_v57 }
  0xb6   : > { %18053 = vst [vmem:[#allocation101_spill] sm:$0xff] %v15037_v4  ;;  %18054 = vst [vmem:[#allocation102_spill] sm:$0xff] %v15039_v22  ;;  %v5878_v49 = vrot.slane %v5876_v10, 4  ;;  %v5881_v31 = vrot.slane %v5879_v48, 5  ;;  %v5895_v40 = vshll.u32 %v5739_v27, 16  ;;  %v1038_v11 = vshrl.u32 %v15041_v57, 16 }
  0xb7   : > { %v5864_v7 = vsel %vm15013_vm5, %v5859_v29, %v5863_v1  ;;  %v15045_v26 = vld [vmem:[#allocation2 + $0x1b0] sm:$0xf]  ;;  %v5874_v58 = vsel %vm15013_vm5, %v5869_v0, %v5873_v16  ;;  %v5887_v20 = vrot.slane %v5885_v32, 5  ;;  %v5891_v45 = vrot.slane %v5889_v59, 4  ;;  %v5740_v5 = vld [vmem:[#allocation2 + $0x58] sm:$0xf] }
  0xb8   : > { %18056 = vst [vmem:[#allocation104_spill] sm:$0xff] %v15045_v26  ;;  %v11779_v36 = vcombine.low %v5864_v7, %v5874_v58  ;;  %v5882_v22 = vor.u32 %v5881_v31, %v5878_v49  ;;  %v5897_v4 = vrot.slane %v5895_v40, 5  ;;  %v5741_v29 = vld [vmem:[#allocation2 + $0x5c] sm:$0xf]  ;;  %v13973_v10 = vld [vmem:[%s14396_s4 + $0x188] sm:$0xff]   ;;  %v15052_v48 = vrot.slane %v1038_v11, 7 }
  0xb9   : > { %v5892_v27 = vor.u32 %v5891_v45, %v5887_v20  ;;  %v1047_v54 = vshrl.u32 %v15045_v26, 16  ;;  %v5742_v59 = vld [vmem:[#allocation2 + $0x60] sm:$0x1]  ;;  %v5900_v49 = vshrl.u32 %v5740_v5, 16  ;;  %v5903_v40 = vshll.u32 %v5740_v5, 16 }
  0xba   : > { %12664 = vmatmul.mubr.bf16.gmra.mrb[32].mxu1 %v11495_v12  ;;  %18057 = vst [vmem:[#allocation105_spill] sm:$0xff] %v15052_v48  ;;  %13032 = vmatmul.mubr.bf16.vlgmr.msra.gmra.mrb[0].mxu0 %v11779_v36  ;;  %v5883_v32 = vrot.slane %v5882_v22, 4  ;;  %v11497_v12 = vcombine.low %v15041_v57, %v15045_v26  ;;  %v15058_v31 = vld [vmem:[#allocation2 + $0x1c0] sm:$0xf]  ;;  %v5909_v0 = vshll.u32 %v5741_v29, 16  ;;  %v5913_v58 = vshrl.u32 %v5741_v29, 16 }
  0xbb   : > { %12667 = vmatprep.mubr.bf16.mxu1 %v11496_v41  ;;  %18058 = vst [vmem:[#allocation106_spill] sm:$0xff] %v15058_v31  ;;  %13096 = vmatpush3.bf16.msra.mxu0 %v14785_v3  ;;  %v5893_v7 = vrot.slane %v5892_v27, 4  ;;  %v15061_v41 = vrot.slane %v1047_v54, 7  ;;  %v15063_v45 = vld [vmem:[#allocation2 + $0x1c4] sm:$0xf]  ;;  %v5902_v11 = vrot.slane %v5900_v49, 4 }
  0xbc   : > { %18060 = vst [vmem:[#allocation108_spill] sm:$0xff] %v15063_v45  ;;  %v5888_v22 = vsel %vm15013_vm5, %v5883_v32, %v5887_v20  ;;  %v5905_v36 = vrot.slane %v5903_v40, 5  ;;  %v5919_v16 = vshll.u32 %v5742_v59, 16  ;;  %v5743_v1 = vld [vmem:[#allocation2 + $0x6c] sm:$0xf]  ;;  %13097 = vmatprep.subr.bf16.mxu0 %v13973_v10  ;;  %v5911_v3 = vrot.slane %v5909_v0, 5 }
  0xbd   : > { %18059 = vst [vmem:[#allocation107_spill] sm:$0xff] %v15061_v41  ;;  %v5898_v5 = vsel %vm15013_vm5, %v5893_v7, %v5897_v4  ;;  %v5915_v27 = vrot.slane %v5913_v58, 4  ;;  %v1060_v54 = vshrl.u32 %v15058_v31, 16  ;;  %v5744_v26 = vld [vmem:[#allocation2 + $0x70] sm:$0xf]  ;;  %v1069_v59 = vshrl.u32 %v15063_v45, 16 }
  0xbe   : > { %v13979_v41 = vld [vmem:[%s14396_s4 + $0x190] sm:$0xff]   ;;  %v11780_v29 = vcombine.low %v5888_v22, %v5898_v5  ;;  %v5906_v57 = vor.u32 %v5905_v36, %v5902_v11  ;;  %v5921_v48 = vrot.slane %v5919_v16, 5  ;;  %v11498_v0 = vcombine.low %v15058_v31, %v15063_v45  ;;  %v13985_v11 = vld [vmem:[%s14396_s4 + $0x198] sm:$0xff]   ;;  %v5746_v40 = vld [vmem:[#allocation2 + $0x80] sm:$0xf] }
  0xbf   : > { %v5916_v32 = vor.u32 %v5915_v27, %v5911_v3  ;;  %v15072_v49 = vrot.slane %v1060_v54, 7  ;;  %v5745_v4 = vld [vmem:[#allocation2 + $0x74] sm:$0x1]  ;;  %13098 = vmatpush3.bf16.msra.mxu0 %v13973_v10  ;;  %v5924_v58 = vshrl.u32 %v5743_v1, 16  ;;  %v5927_v22 = vshll.u32 %v5743_v1, 16 }
  0xc0   : > { %13035 = vmatprep.mubr.bf16.mxu0 %v11780_v29  ;;  %v5907_v7 = vrot.slane %v5906_v57, 4  ;;  %v15078_v16 = vld [vmem:[#allocation2 + $0x1d4] sm:$0xf]  ;;  %v15081_v5 = vrot.slane %v1069_v59, 7  ;;  %v5933_v27 = vshll.u32 %v5744_v26, 16  ;;  %v5937_v54 = vshrl.u32 %v5744_v26, 16  ;;  %13099 = vmatprep.subr.bf16.mxu0 %v13979_v41 }
  0xc1   : > { %18061 = vst [vmem:[#allocation109_spill] sm:$0xff] %v15072_v49  ;;  %18062 = vst [vmem:[#allocation110_spill] sm:$0xff] %v15078_v16  ;;  %v5917_v36 = vrot.slane %v5916_v32, 4  ;;  %v15083_v20 = vld [vmem:[#allocation2 + $0x1d8] sm:$0xf]  ;;  %v5926_v10 = vrot.slane %v5924_v58, 4 }
  0xc2   : > { %12668 = vmatmul.mubr.bf16.gmra.mrb[36].mxu1 %v11497_v12  ;;  %18063 = vst [vmem:[#allocation111_spill] sm:$0xff] %v15081_v5  ;;  %18064 = vst [vmem:[#allocation112_spill] sm:$0xff] %v15083_v20  ;;  %v5912_v57 = vsel %vm15013_vm5, %v5907_v7, %v5911_v3  ;;  %v5929_v12 = vrot.slane %v5927_v22, 5  ;;  %v5943_v1 = vshll.u32 %v5745_v4, 16  ;;  %v5935_v32 = vrot.slane %v5933_v27, 5  ;;  %v13989_v3 = vld [vmem:[%s14396_s4 + $0x1a0] sm:$0xff]  }
  0xc3   : > { %12671 = vmatprep.mubr.bf16.mxu1 %v11498_v0  ;;  %v5922_v29 = vsel %vm15013_vm5, %v5917_v36, %v5921_v48  ;;  %v5939_v59 = vrot.slane %v5937_v54, 4  ;;  %v1082_v45 = vshrl.u32 %v15078_v16, 16  ;;  %13100 = vmatpush3.bf16.msra.mxu0 %v13979_v41  ;;  %v1091_v4 = vshrl.u32 %v15083_v20, 16  ;;  %v5748_v58 = vld [vmem:[#allocation2 + $0x88] sm:$0x1] }
  0xc4   : > { %v11781_v26 = vcombine.low %v5912_v57, %v5922_v29  ;;  %v5930_v5 = vor.u32 %v5929_v12, %v5926_v10  ;;  %v5945_v31 = vrot.slane %v5943_v1, 5  ;;  %13101 = vmatprep.subr.bf16.mxu0 %v13985_v11  ;;  %v11499_v41 = vcombine.low %v15078_v16, %v15083_v20  ;;  %v13991_v48 = vld [vmem:[%s14396_s4 + $0x1a8] sm:$0xff]   ;;  %v5749_v49 = vld [vmem:[#allocation2 + $0x94] sm:$0xf]  ;;  %v5757_v16 = vld [vmem:[#allocation2 + $0xc4] sm:$0x1] }
  0xc5   : > { %v5940_v7 = vor.u32 %v5939_v59, %v5935_v32  ;;  %v15092_v0 = vrot.slane %v1082_v45, 7  ;;  %v5948_v36 = vshrl.u32 %v5746_v40, 16  ;;  %v5951_v27 = vshll.u32 %v5746_v40, 16  ;;  %v15100_v45 = vld [vmem:[#allocation2 + $0x1e8] sm:$0xf] }
  0xc6   : > { %13036 = vmatmul.mubr.bf16.gmra.mrb[4].mxu0 %v11781_v26  ;;  %v5931_v22 = vrot.slane %v5930_v5, 4  ;;  %v15098_v57 = vrot.slane %v1091_v4, 7  ;;  %v5957_v10 = vshll.u32 %v5747_v17, 16  ;;  %v5961_v12 = vshrl.u32 %v5747_v17, 16  ;;  %18067 = vst [vmem:[#allocation115_spill] sm:$0xff] %v15100_v45 }
  0xc7   : > { %18065 = vst [vmem:[#allocation113_spill] sm:$0xff] %v15092_v0  ;;  %v5941_v54 = vrot.slane %v5940_v7, 4  ;;  %13102 = vmatpush3.bf16.msra.mxu0 %v13985_v11  ;;  %v5950_v29 = vrot.slane %v5948_v36, 4  ;;  %v5953_v5 = vrot.slane %v5951_v27, 5  ;;  %v5967_v59 = vshll.u32 %v5748_v58, 16 }
  0xc8   : > { %18066 = vst [vmem:[#allocation114_spill] sm:$0xff] %v15098_v57  ;;  %v5936_v1 = vsel %vm15013_vm5, %v5931_v22, %v5935_v32  ;;  %v15104_v26 = vld [vmem:[#allocation2 + $0x1ec] sm:$0xf]  ;;  %13103 = vmatprep.subr.bf16.mxu0 %v13989_v3  ;;  %v5959_v7 = vrot.slane %v5957_v10, 5  ;;  %v5963_v4 = vrot.slane %v5961_v12, 4  ;;  %v1104_v17 = vshrl.u32 %v15100_v45, 16 }
  0xc9   : > { %18068 = vst [vmem:[#allocation116_spill] sm:$0xff] %v15104_v26  ;;  %v5946_v40 = vsel %vm15013_vm5, %v5941_v54, %v5945_v31  ;;  %v5954_v20 = vor.u32 %v5953_v5, %v5950_v29  ;;  %v5969_v32 = vrot.slane %v5967_v59, 5  ;;  %v1113_v27 = vshrl.u32 %v15104_v26, 16  ;;  %v5751_v31 = vld [vmem:[#allocation2 + $0x9c] sm:$0x1]  ;;  %v13993_v29 = vld [vmem:[%s14396_s4 + $0x1b0] sm:$0xff]  }
  0xca   : > { %12672 = vmatmul.mubr.bf16.gmra.mrb[40].mxu1 %v11499_v41  ;;  %v11782_v11 = vcombine.low %v5936_v1, %v5946_v40  ;;  %v5750_v41 = vld [vmem:[#allocation2 + $0x98] sm:$0xf]  ;;  %v5964_v58 = vor.u32 %v5963_v4, %v5959_v7  ;;  %v15111_v36 = vrot.slane %v1104_v17, 7  ;;  %v11500_v10 = vcombine.low %v15100_v45, %v15104_v26  ;;  %v15120_v17 = vld [vmem:[#allocation2 + $0x1fc] sm:$0xf] }
  0xcb   : > { %13104 = vmatpush3.bf16.msra.mxu0 %v13989_v3  ;;  %v5955_v54 = vrot.slane %v5954_v20, 4  ;;  %v5972_v12 = vshrl.u32 %v5749_v49, 16  ;;  %v5975_v1 = vshll.u32 %v5749_v49, 16  ;;  %v15118_v59 = vrot.slane %v1113_v27, 7  ;;  %18071 = vst [vmem:[#allocation119_spill] sm:$0xff] %v15120_v17 }
  0xcc   : > { %18069 = vst [vmem:[#allocation117_spill] sm:$0xff] %v15111_v36  ;;  %13039 = vmatprep.mubr.bf16.mxu0 %v11782_v11  ;;  %13105 = vmatprep.subr.bf16.mxu0 %v13991_v48  ;;  %v5965_v5 = vrot.slane %v5964_v58, 4  ;;  %v5981_v40 = vshll.u32 %v5750_v41, 16  ;;  %v5985_v4 = vshrl.u32 %v5750_v41, 16  ;;  %v5991_v11 = vshll.u32 %v5751_v31, 16 }
  0xcd   : > { %18070 = vst [vmem:[#allocation118_spill] sm:$0xff] %v15118_v59  ;;  %v5960_v57 = vsel %vm15013_vm5, %v5955_v54, %v5959_v7  ;;  %12675 = vmatprep.mubr.bf16.mxu1 %v11500_v10  ;;  %v5974_v3 = vrot.slane %v5972_v12, 4  ;;  %v5977_v20 = vrot.slane %v5975_v1, 5  ;;  %v15124_v22 = vld [vmem:[#allocation2 + $0x200] sm:$0xf]  ;;  %v1126_v27 = vshrl.u32 %v15120_v17, 16 }
  0xce   : > { %18072 = vst [vmem:[#allocation120_spill] sm:$0xff] %v15124_v22  ;;  %v5970_v49 = vsel %vm15013_vm5, %v5965_v5, %v5969_v32  ;;  %v5983_v26 = vrot.slane %v5981_v40, 5  ;;  %v5987_v58 = vrot.slane %v5985_v4, 4  ;;  %v5752_v59 = vld [vmem:[#allocation2 + $0xa8] sm:$0xf]  ;;  %v5993_v36 = vrot.slane %v5991_v11, 5 }
  0xcf   : > { %13106 = vmatpush3.bf16.msra.mxu0 %v13991_v48  ;;  %v11783_v41 = vcombine.low %v5960_v57, %v5970_v49  ;;  %v5978_v45 = vor.u32 %v5977_v20, %v5974_v3  ;;  %v5753_v54 = vld [vmem:[#allocation2 + $0xac] sm:$0xf]  ;;  %v15130_v31 = vrot.slane %v1126_v27, 7  ;;  %v1135_v12 = vshrl.u32 %v15124_v22, 16  ;;  %v5754_v1 = vld [vmem:[#allocation2 + $0xb0] sm:$0x1] }
  0xd0   : > { %13107 = vmatprep.subr.bf16.mxu0 %v13993_v29  ;;  %v5988_v10 = vor.u32 %v5987_v58, %v5983_v26  ;;  %v11501_v48 = vcombine.low %v15120_v17, %v15124_v22  ;;  %v5996_v57 = vshrl.u32 %v5752_v59, 16  ;;  %v5999_v40 = vshll.u32 %v5752_v59, 16  ;;  %v15136_v4 = vld [vmem:[#allocation2 + $0x210] sm:$0xf]  ;;  %v15140_v58 = vld [vmem:[#allocation2 + $0x214] sm:$0xf] }
  0xd1   : > { %18073 = vst [vmem:[#allocation121_spill] sm:$0xff] %v15130_v31  ;;  %13040 = vmatmul.mubr.bf16.gmra.mrb[8].mxu0 %v11783_v41  ;;  %v5979_v5 = vrot.slane %v5978_v45, 4  ;;  %18074 = vst [vmem:[#allocation122_spill] sm:$0xff] %v15136_v4  ;;  %v15138_v20 = vrot.slane %v1135_v12, 7  ;;  %v6005_v11 = vshll.u32 %v5753_v54, 16  ;;  %v6009_v49 = vshrl.u32 %v5753_v54, 16 }
  0xd2   : > { %v5989_v3 = vrot.slane %v5988_v10, 4  ;;  %18076 = vst [vmem:[#allocation124_spill] sm:$0xff] %v15140_v58  ;;  %12676 = vmatmul.mubr.bf16.gmra.mrb[44].mxu1 %v11501_v48  ;;  %v5998_v45 = vrot.slane %v5996_v57, 4  ;;  %v6001_v41 = vrot.slane %v5999_v40, 5  ;;  %v6015_v32 = vshll.u32 %v5754_v1, 16 }
  0xd3   : > { %18075 = vst [vmem:[#allocation123_spill] sm:$0xff] %v15138_v20  ;;  %13108 = vmatpush3.bf16.msra.mxu0 %v13993_v29  ;;  %v5984_v27 = vsel %vm15013_vm5, %v5979_v5, %v5983_v26  ;;  %v5755_v7 = vld [vmem:[#allocation2 + $0xbc] sm:$0xf]  ;;  %v6007_v22 = vrot.slane %v6005_v11, 5  ;;  %v6011_v10 = vrot.slane %v6009_v49, 4  ;;  %v1148_v12 = vshrl.u32 %v15136_v4, 16 }
  0xd4   : > { %v5994_v59 = vsel %vm15013_vm5, %v5989_v3, %v5993_v36  ;;  %v5756_v20 = vld [vmem:[#allocation2 + $0xc0] sm:$0xf]  ;;  %v6002_v17 = vor.u32 %v6001_v41, %v5998_v45  ;;  %v6017_v31 = vrot.slane %v6015_v32, 5  ;;  %v1157_v1 = vshrl.u32 %v15140_v58, 16  ;;  %v15156_v45 = vld [vmem:[#allocation2 + $0x224] sm:$0xf] }
  0xd5   : > { %v11784_v54 = vcombine.low %v5984_v27, %v5994_v59  ;;  %v6012_v26 = vor.u32 %v6011_v10, %v6007_v22  ;;  %v15148_v5 = vrot.slane %v1148_v12, 7  ;;  %v11502_v57 = vcombine.low %v15136_v4, %v15140_v58  ;;  %18079 = vst [vmem:[#allocation127_spill] sm:$0xff] %v15156_v45  ;;  %v5758_v48 = vld [vmem:[#allocation2 + $0xd0] sm:$0xf]  ;;  %v5765_v4 = vld [vmem:[#allocation2 + $0xfc] sm:$0xf] }
  0xd6   : > { %v6003_v36 = vrot.slane %v6002_v17, 4  ;;  %v6020_v40 = vshrl.u32 %v5755_v7, 16  ;;  %v6023_v3 = vshll.u32 %v5755_v7, 16  ;;  %v15154_v49 = vrot.slane %v1157_v1, 7  ;;  %v15160_v17 = vld [vmem:[#allocation2 + $0x228] sm:$0xf] }
  0xd7   : > { %18077 = vst [vmem:[#allocation125_spill] sm:$0xff] %v15148_v5  ;;  %13043 = vmatprep.mubr.bf16.mxu0 %v11784_v54  ;;  %v6013_v11 = vrot.slane %v6012_v26, 4  ;;  %v6029_v32 = vshll.u32 %v5756_v20, 16  ;;  %v6033_v27 = vshrl.u32 %v5756_v20, 16  ;;  %12679 = vmatprep.mubr.bf16.mxu1 %v11502_v57  ;;  %v6039_v12 = vshll.u32 %v5757_v16, 16  ;;  %18080 = vst [vmem:[#allocation128_spill] sm:$0xff] %v15160_v17 }
  0xd8   : > { %18078 = vst [vmem:[#allocation126_spill] sm:$0xff] %v15154_v49  ;;  %v6008_v41 = vsel %vm15013_vm5, %v6003_v36, %v6007_v22  ;;  %v6022_v59 = vrot.slane %v6020_v40, 4  ;;  %v6025_v10 = vrot.slane %v6023_v3, 5  ;;  %v1170_v1 = vshrl.u32 %v15156_v45, 16  ;;  %v5759_v22 = vld [vmem:[#allocation2 + $0xd4] sm:$0xf] }
  0xd9   : > { %v6018_v54 = vsel %vm15013_vm5, %v6013_v11, %v6017_v31  ;;  %v6031_v7 = vrot.slane %v6029_v32, 5  ;;  %v6035_v26 = vrot.slane %v6033_v27, 4  ;;  %v6041_v58 = vrot.slane %v6039_v12, 5  ;;  %v5760_v3 = vld [vmem:[#allocation2 + $0xd8] sm:$0x1] }
  0xda   : > { %v11785_v20 = vcombine.low %v6008_v41, %v6018_v54  ;;  %v6026_v29 = vor.u32 %v6025_v10, %v6022_v59  ;;  %v15166_v57 = vrot.slane %v1170_v1, 7  ;;  %v1179_v16 = vshrl.u32 %v15160_v17, 16  ;;  %v15174_v54 = vld [vmem:[#allocation2 + $0x238] sm:$0xf]  ;;  %v15178_v40 = vld [vmem:[#allocation2 + $0x23c] sm:$0xf] }
  0xdb   : > { %v6036_v36 = vor.u32 %v6035_v26, %v6031_v7  ;;  %v11503_v11 = vcombine.low %v15156_v45, %v15160_v17  ;;  %v6044_v32 = vshrl.u32 %v5758_v48, 16  ;;  %v6047_v27 = vshll.u32 %v5758_v48, 16  ;;  %18083 = vst [vmem:[#allocation131_spill] sm:$0xff] %v15174_v54  ;;  %18084 = vst [vmem:[#allocation132_spill] sm:$0xff] %v15178_v40  ;;  %v5761_v17 = vld [vmem:[#allocation2 + $0xe4] sm:$0xf] }
  0xdc   : > { %18081 = vst [vmem:[#allocation129_spill] sm:$0xff] %v15166_v57  ;;  %13044 = vmatmul.mubr.bf16.gmra.mrb[12].mxu0 %v11785_v20  ;;  %v6027_v31 = vrot.slane %v6026_v29, 4  ;;  %v15172_v59 = vrot.slane %v1179_v16, 7  ;;  %v6053_v10 = vshll.u32 %v5759_v22, 16  ;;  %v6057_v12 = vshrl.u32 %v5759_v22, 16  ;;  %v13995_v22 = vld [vmem:[%s14396_s4 + $0x1b8] sm:$0xff]  }
  0xdd   : > { %v6037_v41 = vrot.slane %v6036_v36, 4  ;;  %12680 = vmatmul.mubr.bf16.gmra.mrb[48].mxu1 %v11503_v11  ;;  %v6046_v1 = vrot.slane %v6044_v32, 4  ;;  %v6049_v20 = vrot.slane %v6047_v27, 5  ;;  %v6063_v29 = vshll.u32 %v5760_v3, 16  ;;  %13109 = vmatprep.subr.bf16.mxu0 %v13995_v22 }
  0xde   : > { %18082 = vst [vmem:[#allocation130_spill] sm:$0xff] %v15172_v59  ;;  %v6032_v26 = vsel %vm15013_vm5, %v6027_v31, %v6031_v7  ;;  %v6055_v36 = vrot.slane %v6053_v10, 5  ;;  %v6059_v49 = vrot.slane %v6057_v12, 4  ;;  %v1192_v16 = vshrl.u32 %v15174_v54, 16  ;;  %v5762_v31 = vld [vmem:[#allocation2 + $0xe8] sm:$0xf]  ;;  %13110 = vmatpush3.bf16.msra.mxu0 %v13995_v22 }
  0xdf   : > { %v6042_v48 = vsel %vm15013_vm5, %v6037_v41, %v6041_v58  ;;  %v6050_v45 = vor.u32 %v6049_v20, %v6046_v1  ;;  %v6065_v57 = vrot.slane %v6063_v29, 5  ;;  %v1201_v3 = vshrl.u32 %v15178_v40, 16  ;;  %v5763_v58 = vld [vmem:[#allocation2 + $0xec] sm:$0x1] }
  0xe0   : > { %v11786_v59 = vcombine.low %v6032_v26, %v6042_v48  ;;  %v6060_v11 = vor.u32 %v6059_v49, %v6055_v36  ;;  %v15185_v32 = vrot.slane %v1192_v16, 7  ;;  %v11504_v10 = vcombine.low %v15174_v54, %v15178_v40  ;;  %v15191_v1 = vld [vmem:[#allocation2 + $0x24c] sm:$0xf]  ;;  %v15195_v16 = vld [vmem:[#allocation2 + $0x250] sm:$0xf] }
  0xe1   : > { %v6051_v41 = vrot.slane %v6050_v45, 4  ;;  %v6068_v12 = vshrl.u32 %v5761_v17, 16  ;;  %v6071_v26 = vshll.u32 %v5761_v17, 16  ;;  %18086 = vst [vmem:[#allocation134_spill] sm:$0xff] %v15191_v1  ;;  %v15193_v49 = vrot.slane %v1201_v3, 7  ;;  %18088 = vst [vmem:[#allocation136_spill] sm:$0xff] %v15195_v16 }
  0xe2   : > { %18085 = vst [vmem:[#allocation133_spill] sm:$0xff] %v15185_v32  ;;  %13047 = vmatprep.mubr.bf16.mxu0 %v11786_v59  ;;  %v6061_v20 = vrot.slane %v6060_v11, 4  ;;  %v6077_v29 = vshll.u32 %v5762_v31, 16  ;;  %v6081_v48 = vshrl.u32 %v5762_v31, 16  ;;  %12683 = vmatprep.mubr.bf16.mxu1 %v11504_v10  ;;  %v6087_v7 = vshll.u32 %v5763_v58, 16 }
  0xe3   : > { %18087 = vst [vmem:[#allocation135_spill] sm:$0xff] %v15193_v49  ;;  %v6056_v27 = vsel %vm15013_vm5, %v6051_v41, %v6055_v36  ;;  %v6070_v45 = vrot.slane %v6068_v12, 4  ;;  %v6073_v59 = vrot.slane %v6071_v26, 5  ;;  %v5764_v40 = vld [vmem:[#allocation2 + $0xf8] sm:$0xf]  ;;  %v1214_v11 = vshrl.u32 %v15191_v1, 16 }
  0xe4   : > { %v6066_v17 = vsel %vm15013_vm5, %v6061_v20, %v6065_v57  ;;  %v6079_v54 = vrot.slane %v6077_v29, 5  ;;  %v6083_v22 = vrot.slane %v6081_v48, 4  ;;  %v6089_v31 = vrot.slane %v6087_v7, 5  ;;  %v5766_v10 = vld [vmem:[#allocation2 + $0x100] sm:$0x1] }
  0xe5   : > { %v11787_v3 = vcombine.low %v6056_v27, %v6066_v17  ;;  %v6074_v49 = vor.u32 %v6073_v59, %v6070_v45  ;;  %v15203_v36 = vrot.slane %v1214_v11, 7  ;;  %v1223_v41 = vshrl.u32 %v15195_v16, 16  ;;  %v15209_v20 = vld [vmem:[#allocation2 + $0x260] sm:$0xf]  ;;  %v15213_v59 = vld [vmem:[#allocation2 + $0x264] sm:$0xf] }
  0xe6   : > { %v6084_v5 = vor.u32 %v6083_v22, %v6079_v54  ;;  %v11505_v12 = vcombine.low %v15191_v1, %v15195_v16  ;;  %v6092_v26 = vshrl.u32 %v5764_v40, 16  ;;  %v6095_v27 = vshll.u32 %v5764_v40, 16  ;;  %18090 = vst [vmem:[#allocation138_spill] sm:$0xff] %v15209_v20  ;;  %18092 = vst [vmem:[#allocation140_spill] sm:$0xff] %v15213_v59  ;;  %v5768_v1 = vld [vmem:[#allocation2 + $0x110] sm:$0xf] }
  0xe7   : > { %18089 = vst [vmem:[#allocation137_spill] sm:$0xff] %v15203_v36  ;;  %13048 = vmatmul.mubr.bf16.gmra.mrb[16].mxu0 %v11787_v3  ;;  %v6075_v57 = vrot.slane %v6074_v49, 4  ;;  %v15211_v29 = vrot.slane %v1223_v41, 7  ;;  %v6101_v48 = vshll.u32 %v5765_v4, 16  ;;  %v6105_v45 = vshrl.u32 %v5765_v4, 16 }
  0xe8   : > { %v6085_v7 = vrot.slane %v6084_v5, 4  ;;  %12684 = vmatmul.mubr.bf16.gmra.mrb[52].mxu1 %v11505_v12  ;;  %v6094_v22 = vrot.slane %v6092_v26, 4  ;;  %v6097_v49 = vrot.slane %v6095_v27, 5  ;;  %v6111_v11 = vshll.u32 %v5766_v10, 16  ;;  %v5767_v41 = vld [vmem:[#allocation2 + $0x10c] sm:$0xf] }
  0xe9   : > { %18091 = vst [vmem:[#allocation139_spill] sm:$0xff] %v15211_v29  ;;  %v6080_v17 = vsel %vm15013_vm5, %v6075_v57, %v6079_v54  ;;  %v6103_v40 = vrot.slane %v6101_v48, 5  ;;  %v6107_v58 = vrot.slane %v6105_v45, 4  ;;  %v1236_v5 = vshrl.u32 %v15209_v20, 16  ;;  %v5769_v12 = vld [vmem:[#allocation2 + $0x114] sm:$0x1] }
  0xea   : > { %v6090_v3 = vsel %vm15013_vm5, %v6085_v7, %v6089_v31  ;;  %v6098_v16 = vor.u32 %v6097_v49, %v6094_v22  ;;  %v6113_v4 = vrot.slane %v6111_v11, 5  ;;  %v1245_v57 = vshrl.u32 %v15213_v59, 16  ;;  %v5770_v10 = vld [vmem:[#allocation2 + $0x120] sm:$0xf] }
  0xeb   : > { %v11788_v32 = vcombine.low %v6080_v17, %v6090_v3  ;;  %v6108_v36 = vor.u32 %v6107_v58, %v6103_v40  ;;  %v15221_v54 = vrot.slane %v1236_v5, 7  ;;  %v11506_v26 = vcombine.low %v15209_v20, %v15213_v59  ;;  %v15229_v58 = vld [vmem:[#allocation2 + $0x274] sm:$0xf] }
  0xec   : > { %v6099_v31 = vrot.slane %v6098_v16, 4  ;;  %v6116_v27 = vshrl.u32 %v5767_v41, 16  ;;  %v6119_v7 = vshll.u32 %v5767_v41, 16  ;;  %v15227_v45 = vrot.slane %v1245_v57, 7  ;;  %18095 = vst [vmem:[#allocation143_spill] sm:$0xff] %v15229_v58 }
  0xed   : > { %18093 = vst [vmem:[#allocation141_spill] sm:$0xff] %v15221_v54  ;;  %13051 = vmatprep.mubr.bf16.mxu0 %v11788_v32  ;;  %v6109_v48 = vrot.slane %v6108_v36, 4  ;;  %v6125_v17 = vshll.u32 %v5768_v1, 16  ;;  %v6129_v22 = vshrl.u32 %v5768_v1, 16  ;;  %12687 = vmatprep.mubr.bf16.mxu1 %v11506_v26  ;;  %v6135_v32 = vshll.u32 %v5769_v12, 16 }
  0xee   : > { %18094 = vst [vmem:[#allocation142_spill] sm:$0xff] %v15227_v45  ;;  %v6104_v49 = vsel %vm15013_vm5, %v6099_v31, %v6103_v40  ;;  %v6118_v11 = vrot.slane %v6116_v27, 4  ;;  %v6121_v3 = vrot.slane %v6119_v7, 5  ;;  %v15233_v16 = vld [vmem:[#allocation2 + $0x278] sm:$0xf]  ;;  %v1258_v57 = vshrl.u32 %v15229_v58, 16 }
  0xef   : > { %18096 = vst [vmem:[#allocation144_spill] sm:$0xff] %v15233_v16  ;;  %v6114_v5 = vsel %vm15013_vm5, %v6109_v48, %v6113_v4  ;;  %v6127_v41 = vrot.slane %v6125_v17, 5  ;;  %v6131_v36 = vrot.slane %v6129_v22, 4  ;;  %v6137_v59 = vrot.slane %v6135_v32, 5  ;;  %v5771_v40 = vld [vmem:[#allocation2 + $0x124] sm:$0xf] }
  0xf0   : > { %v11789_v1 = vcombine.low %v6104_v49, %v6114_v5  ;;  %v6122_v29 = vor.u32 %v6121_v3, %v6118_v11  ;;  %v15239_v26 = vrot.slane %v1258_v57, 7  ;;  %v1267_v12 = vshrl.u32 %v15233_v16, 16  ;;  %v5772_v7 = vld [vmem:[#allocation2 + $0x128] sm:$0x1]  ;;  %v5773_v45 = vld [vmem:[#allocation2 + $0x134] sm:$0xf] }
  0xf1   : > { %v6132_v31 = vor.u32 %v6131_v36, %v6127_v41  ;;  %v11507_v48 = vcombine.low %v15229_v58, %v15233_v16  ;;  %v6140_v17 = vshrl.u32 %v5770_v10, 16  ;;  %v6143_v22 = vshll.u32 %v5770_v10, 16  ;;  %v15245_v49 = vld [vmem:[#allocation2 + $0x288] sm:$0xf]  ;;  %v15249_v36 = vld [vmem:[#allocation2 + $0x28c] sm:$0xf] }
  0xf2   : > { %18097 = vst [vmem:[#allocation145_spill] sm:$0xff] %v15239_v26  ;;  %13052 = vmatmul.mubr.bf16.gmra.mrb[20].mxu0 %v11789_v1  ;;  %v6123_v4 = vrot.slane %v6122_v29, 4  ;;  %18098 = vst [vmem:[#allocation146_spill] sm:$0xff] %v15245_v49  ;;  %v15247_v3 = vrot.slane %v1267_v12, 7  ;;  %v6149_v32 = vshll.u32 %v5771_v40, 16  ;;  %v6153_v5 = vshrl.u32 %v5771_v40, 16 }
  0xf3   : > { %v6133_v11 = vrot.slane %v6132_v31, 4  ;;  %18100 = vst [vmem:[#allocation148_spill] sm:$0xff] %v15249_v36  ;;  %12688 = vmatmul.mubr.bf16.gmra.mrb[56].mxu1 %v11507_v48  ;;  %v6142_v29 = vrot.slane %v6140_v17, 4  ;;  %v6145_v1 = vrot.slane %v6143_v22, 5  ;;  %v6159_v27 = vshll.u32 %v5772_v7, 16  ;;  %v13997_v16 = vld [vmem:[%s14396_s4 + $0x1c0] sm:$0xff]  }
  0xf4   : > { %18099 = vst [vmem:[#allocation147_spill] sm:$0xff] %v15247_v3  ;;  %v6128_v57 = vsel %vm15013_vm5, %v6123_v4, %v6127_v41  ;;  %v6151_v58 = vrot.slane %v6149_v32, 5  ;;  %v6155_v31 = vrot.slane %v6153_v5, 4  ;;  %v1280_v12 = vshrl.u32 %v15245_v49, 16  ;;  %v5774_v3 = vld [vmem:[#allocation2 + $0x138] sm:$0xf]  ;;  %13175 = vmatprep.subr.bf16.mxu0 %v13997_v16 }
  0xf5   : > { %v6138_v10 = vsel %vm15013_vm5, %v6133_v11, %v6137_v59  ;;  %v6146_v26 = vor.u32 %v6145_v1, %v6142_v29  ;;  %v6161_v20 = vrot.slane %v6159_v27, 5  ;;  %v1289_v7 = vshrl.u32 %v15249_v36, 16  ;;  %v5775_v17 = vld [vmem:[#allocation2 + $0x13c] sm:$0x1]  ;;  %v15268_v1 = vld [vmem:[#allocation2 + $0x2a0] sm:$0xf] }
  0xf6   : > { %v11790_v40 = vcombine.low %v6128_v57, %v6138_v10  ;;  %v6156_v41 = vor.u32 %v6155_v31, %v6151_v58  ;;  %v15258_v4 = vrot.slane %v1280_v12, 7  ;;  %v11508_v22 = vcombine.low %v15245_v49, %v15249_v36  ;;  %v15264_v5 = vld [vmem:[#allocation2 + $0x29c] sm:$0xf]  ;;  %18103 = vst [vmem:[#allocation151_spill] sm:$0xff] %v15268_v1  ;;  %v5776_v10 = vld [vmem:[#allocation2 + $0x148] sm:$0xf] }
  0xf7   : > { %v6147_v59 = vrot.slane %v6146_v26, 4  ;;  %v6164_v11 = vshrl.u32 %v5773_v45, 16  ;;  %v6167_v32 = vshll.u32 %v5773_v45, 16  ;;  %v15266_v57 = vrot.slane %v1289_v7, 7  ;;  %v5777_v49 = vld [vmem:[#allocation2 + $0x14c] sm:$0xf] }
  0xf8   : > { %18101 = vst [vmem:[#allocation149_spill] sm:$0xff] %v15258_v4  ;;  %13055 = vmatprep.mubr.bf16.mxu0 %v11790_v40  ;;  %v6157_v27 = vrot.slane %v6156_v41, 4  ;;  %v6173_v16 = vshll.u32 %v5774_v3, 16  ;;  %v6177_v29 = vshrl.u32 %v5774_v3, 16  ;;  %12691 = vmatprep.mubr.bf16.mxu1 %v11508_v22  ;;  %v6183_v40 = vshll.u32 %v5775_v17, 16 }
  0xf9   : > { %18102 = vst [vmem:[#allocation150_spill] sm:$0xff] %v15266_v57  ;;  %v6152_v31 = vsel %vm15013_vm5, %v6147_v59, %v6151_v58  ;;  %v6166_v26 = vrot.slane %v6164_v11, 4  ;;  %v6169_v12 = vrot.slane %v6167_v32, 5  ;;  %v1302_v41 = vshrl.u32 %v15264_v5, 16  ;;  %v5778_v59 = vld [vmem:[#allocation2 + $0x150] sm:$0x1] }
  0xfa   : > { %v6162_v45 = vsel %vm15013_vm5, %v6157_v27, %v6161_v20  ;;  %v6175_v48 = vrot.slane %v6173_v16, 5  ;;  %v6179_v54 = vrot.slane %v6177_v29, 4  ;;  %v6185_v3 = vrot.slane %v6183_v40, 5 }
  0xfb   : > { %v11791_v7 = vcombine.low %v6152_v31, %v6162_v45  ;;  %v6170_v36 = vor.u32 %v6169_v12, %v6166_v26  ;;  %v15276_v0 = vrot.slane %v1302_v41, 7  ;;  %v1311_v58 = vshrl.u32 %v15268_v1, 16  ;;  %v5779_v41 = vld [vmem:[#allocation2 + $0x184] sm:$0xf] }
  0xfc   : > { %v6180_v4 = vor.u32 %v6179_v54, %v6175_v48  ;;  %v11509_v22 = vcombine.low %v15264_v5, %v15268_v1  ;;  %v6188_v11 = vshrl.u32 %v5776_v10, 16  ;;  %v6191_v32 = vshll.u32 %v5776_v10, 16  ;;  %v515_v54 = vld [vmem:[#allocation2 + $0x4] sm:$0x8] }
  0xfd   : > { %13056 = vmatmul.mubr.bf16.gmra.mrb[24].mxu0 %v11791_v7  ;;  %v6171_v20 = vrot.slane %v6170_v36, 4  ;;  %v15282_v16 = vrot.slane %v1311_v58, 7  ;;  %v6197_v29 = vshll.u32 %v5777_v49, 16  ;;  %v6201_v31 = vshrl.u32 %v5777_v49, 16 }
  0xfe   : > { %v6181_v27 = vrot.slane %v6180_v4, 4  ;;  %12692 = vmatmul.mubr.bf16.gmra.mrb[60].mxu1 %v11509_v22  ;;  %v6190_v12 = vrot.slane %v6188_v11, 4  ;;  %v6193_v40 = vrot.slane %v6191_v32, 5  ;;  %v6207_v45 = vshll.u32 %v5778_v59, 16  ;;  %v5780_v4 = vld [vmem:[#allocation2 + $0x188] sm:$0xf] }
  0xff   : > { %18104 = vst [vmem:[#allocation152_spill] sm:$0xff] %v15282_v16  ;;  %v6176_v26 = vsel %vm15013_vm5, %v6171_v20, %v6175_v48  ;;  %v6199_v7 = vrot.slane %v6197_v29, 5  ;;  %v6203_v17 = vrot.slane %v6201_v31, 4  ;;  %v615_v48 = vshrl.u32 %v515_v54, 16  ;;  %v5781_v20 = vld [vmem:[#allocation2 + $0x18c] sm:$0x1] }
 0x100   : > { %v6186_v36 = vsel %vm15013_vm5, %v6181_v27, %v6185_v3  ;;  %v6194_v58 = vor.u32 %v6193_v40, %v6190_v12  ;;  %v6209_v57 = vrot.slane %v6207_v45, 5  ;;  %v6212_v59 = vshrl.u32 %v5779_v41, 16  ;;  %v518_v31 = vld [vmem:[#allocation2 + $0x18] sm:$0x8]  ;;  %v5784_v16 = vld [vmem:[#allocation2 + $0x1a0] sm:$0x1] }
 0x101   : > { %v11792_v10 = vcombine.low %v6176_v26, %v6186_v36  ;;  %v6204_v49 = vor.u32 %v6203_v17, %v6199_v7  ;;  %v6215_v22 = vshll.u32 %v5779_v41, 16  ;;  %v18107_v3 = vrot.slane %v14420_v63, 4 }
 0x102   : > { %v6195_v11 = vrot.slane %v6194_v58, 4  ;;  %v6221_v27 = vshll.u32 %v5780_v4, 16  ;;  %v6225_v29 = vshrl.u32 %v5780_v4, 16  ;;  %v11427_v26 = vrot.slane %v615_v48, 11 }
 0x103   : > { %13059 = vmatprep.mubr.bf16.mxu0 %v11792_v10  ;;  %v635_v32 = vsel %vm15288_vm8, %v18107_v3, %v14614_v50  ;;  %v6205_v17 = vrot.slane %v6204_v49, 4  ;;  %v6214_v12 = vrot.slane %v6212_v59, 4  ;;  %v6217_v40 = vrot.slane %v6215_v22, 5  ;;  %v5782_v10 = vld [vmem:[#allocation2 + $0x198] sm:$0xf] }
 0x104   : > { %v6200_v54 = vsel %vm15013_vm5, %v6195_v11, %v6199_v7  ;;  %v6223_v45 = vrot.slane %v6221_v27, 5  ;;  %v6227_v41 = vrot.slane %v6225_v29, 4  ;;  %v6231_v36 = vshll.u32 %v5781_v20, 16  ;;  %v5783_v49 = vld [vmem:[#allocation2 + $0x19c] sm:$0xf] }
 0x105   : > { %v6210_v63 = vsel %vm15013_vm5, %v6205_v17, %v6209_v57  ;;  %v626_v50 = vsel %vm15288_vm8, %v11427_v26, %v14603_v14  ;;  %v6218_v4 = vor.u32 %v6217_v40, %v6214_v12  ;;  %v637_v58 = vshrl.u32 %v518_v31, 16  ;;  %v521_v29 = vld [vmem:[#allocation2 + $0x2c] sm:$0x8] }
 0x106   : > { %v11793_v48 = vcombine.low %v6200_v54, %v6210_v63  ;;  %v11518_v59 = vcombine.low %v626_v50, %v635_v32  ;;  %v6228_v22 = vor.u32 %v6227_v41, %v6223_v45  ;;  %v6233_v3 = vrot.slane %v6231_v36, 5  ;;  %v5785_v26 = vld [vmem:[#allocation2 + $0x1ac] sm:$0xf] }
 0x107   : > { %v6219_v7 = vrot.slane %v6218_v4, 4  ;;  %v11428_v11 = vrot.slane %v637_v58, 11  ;;  %v18108_v20 = vrot.slane %v14429_v6, 4  ;;  %v6236_v27 = vshrl.u32 %v5782_v10, 16  ;;  %v13990_v50 = vld [vmem:[%s14396_s4 + $0x88] sm:$0xff]  }
 0x108   : > { %13060 = vmatmul.mubr.bf16.gmra.mrb[28].mxu0 %v11793_v48  ;;  %12711 = vmatprep.mubr.bf16.mxu1 %v11518_v59  ;;  %v6229_v14 = vrot.slane %v6228_v22, 4  ;;  %v6239_v31 = vshll.u32 %v5782_v10, 16  ;;  %v6245_v17 = vshll.u32 %v5783_v49, 16  ;;  %v6249_v32 = vshrl.u32 %v5783_v49, 16  ;;  %v5786_v10 = vld [vmem:[#allocation2 + $0x1b0] sm:$0xf] }
 0x109   : > { %v657_v57 = vsel %vm15288_vm8, %v18108_v20, %v14697_v46  ;;  %v6224_v12 = vsel %vm15013_vm5, %v6219_v7, %v6223_v45  ;;  %v648_v6 = vsel %vm15288_vm8, %v11428_v11, %v14692_v35  ;;  %v6238_v40 = vrot.slane %v6236_v27, 4  ;;  %v5787_v48 = vld [vmem:[#allocation2 + $0x1b4] sm:$0x1]  ;;  %v14072_v11 = vld [vmem:[%s14396_s4 + $0x80] sm:$0xff]  }
 0x10a   : > { %v6255_v54 = vshll.u32 %v5784_v16, 16  ;;  %v6234_v46 = vsel %vm15013_vm5, %v6229_v14, %v6233_v3  ;;  %v11519_v41 = vcombine.low %v648_v6, %v657_v57  ;;  %v6241_v36 = vrot.slane %v6239_v31, 5  ;;  %v13992_v14 = vld [vmem:[%s14396_s4 + $0x90] sm:$0xff]  }
 0x10b   : > { %v6247_v63 = vrot.slane %v6245_v17, 5  ;;  %v11794_v4 = vcombine.low %v6224_v12, %v6234_v46  ;;  %v6251_v58 = vrot.slane %v6249_v32, 4  ;;  %v659_v45 = vshrl.u32 %v521_v29, 16  ;;  %v524_v12 = vld [vmem:[#allocation2 + $0x40] sm:$0x8] }
 0x10c   : > { %v6257_v49 = vrot.slane %v6255_v54, 5  ;;  %12712 = vmatmul.mubr.bf16.vlgmr.msra.gmra.mrb[0].mxu1 %v11519_v41  ;;  %v6242_v59 = vor.u32 %v6241_v36, %v6238_v40  ;;  %v18109_v35 = vrot.slane %v14493_v56, 4  ;;  %v6260_v22 = vshrl.u32 %v5785_v26, 16  ;;  %v5788_v40 = vld [vmem:[#allocation2 + $0x1c0] sm:$0xf] }
 0x10d   : > { %v6263_v3 = vshll.u32 %v5785_v26, 16  ;;  %13063 = vmatprep.mubr.bf16.mxu0 %v11794_v4  ;;  %v6252_v7 = vor.u32 %v6251_v58, %v6247_v63  ;;  %12776 = vmatpush3.bf16.msra.mxu1 %v14072_v11  ;;  %v11429_v20 = vrot.slane %v659_v45, 11  ;;  %v6269_v57 = vshll.u32 %v5786_v10, 16  ;;  %v13994_v11 = vld [vmem:[%s14396_s4 + $0x98] sm:$0xff]  }
 0x10e   : > { %v679_v16 = vsel %vm15288_vm8, %v18109_v35, %v14891_v37  ;;  %v6273_v27 = vshrl.u32 %v5786_v10, 16  ;;  %v6243_v29 = vrot.slane %v6242_v59, 4  ;;  %v6262_v31 = vrot.slane %v6260_v22, 4  ;;  %12777 = vmatprep.subr.bf16.mxu1 %v13990_v50  ;;  %v5789_v10 = vld [vmem:[#allocation2 + $0x1c4] sm:$0xf] }
 0x10f   : > { %v6265_v17 = vrot.slane %v6263_v3, 5  ;;  %v6279_v32 = vshll.u32 %v5787_v48, 16  ;;  %v6253_v56 = vrot.slane %v6252_v7, 4  ;;  %v670_v37 = vsel %vm15288_vm8, %v11429_v20, %v14877_v44  ;;  %v5790_v59 = vld [vmem:[#allocation2 + $0x1c8] sm:$0x1] }
 0x110   : > { %v6271_v26 = vrot.slane %v6269_v57, 5  ;;  %v6275_v6 = vrot.slane %v6273_v27, 4  ;;  %v6248_v54 = vsel %vm15013_vm5, %v6243_v29, %v6247_v63  ;;  %v11520_v46 = vcombine.low %v670_v37, %v679_v16  ;;  %v527_v3 = vld [vmem:[#allocation2 + $0x54] sm:$0x8] }
 0x111   : > { %v6266_v41 = vor.u32 %v6265_v17, %v6262_v31  ;;  %v6281_v36 = vrot.slane %v6279_v32, 5  ;;  %v6258_v4 = vsel %vm15013_vm5, %v6253_v56, %v6257_v49  ;;  %v681_v45 = vshrl.u32 %v524_v12, 16  ;;  %12778 = vmatpush3.bf16.msra.mxu1 %v13990_v50  ;;  %v5791_v7 = vld [vmem:[#allocation2 + $0x1d4] sm:$0xf]  ;;  %v5792_v56 = vld [vmem:[#allocation2 + $0x1d8] sm:$0xf] }
 0x112   : > { %v6276_v58 = vor.u32 %v6275_v6, %v6271_v26  ;;  %v18110_v48 = vrot.slane %v14506_v8, 4  ;;  %v11795_v35 = vcombine.low %v6248_v54, %v6258_v4  ;;  %12715 = vmatprep.mubr.bf16.mxu1 %v11520_v46  ;;  %v6284_v16 = vshrl.u32 %v5788_v40, 16  ;;  %12779 = vmatprep.subr.bf16.mxu1 %v13992_v14  ;;  %v13996_v46 = vld [vmem:[%s14396_s4 + $0xa0] sm:$0xff]  }
 0x113   : > { %v6267_v63 = vrot.slane %v6266_v41, 4  ;;  %v6287_v22 = vshll.u32 %v5788_v40, 16  ;;  %v11430_v20 = vrot.slane %v681_v45, 11  ;;  %v6293_v57 = vshll.u32 %v5789_v10, 16 }
 0x114   : > { %v701_v44 = vsel %vm15288_vm8, %v18110_v48, %v14905_v39  ;;  %v6277_v49 = vrot.slane %v6276_v58, 4  ;;  %v6297_v27 = vshrl.u32 %v5789_v10, 16  ;;  %13064 = vmatmul.mubr.bf16.gmra.mrb[32].mxu0 %v11795_v35  ;;  %v6286_v39 = vrot.slane %v6284_v16, 4 }
 0x115   : > { %v6272_v8 = vsel %vm15013_vm5, %v6267_v63, %v6271_v26  ;;  %v6289_v50 = vrot.slane %v6287_v22, 5  ;;  %v6303_v29 = vshll.u32 %v5790_v59, 16  ;;  %v692_v17 = vsel %vm15288_vm8, %v11430_v20, %v14900_v55  ;;  %12780 = vmatpush3.bf16.msra.mxu1 %v13992_v14  ;;  %v5793_v26 = vld [vmem:[#allocation2 + $0x1dc] sm:$0x1] }
 0x116   : > { %v6282_v31 = vsel %vm15013_vm5, %v6277_v49, %v6281_v36  ;;  %v6295_v32 = vrot.slane %v6293_v57, 5  ;;  %v6299_v12 = vrot.slane %v6297_v27, 4  ;;  %v11521_v6 = vcombine.low %v692_v17, %v701_v44  ;;  %12781 = vmatprep.subr.bf16.mxu1 %v13994_v11  ;;  %v530_v44 = vld [vmem:[#allocation2 + $0x68] sm:$0x8]  ;;  %v5796_v17 = vld [vmem:[#allocation2 + $0x1f0] sm:$0x1] }
 0x117   : > { %v11796_v37 = vcombine.low %v6272_v8, %v6282_v31  ;;  %v6290_v40 = vor.u32 %v6289_v50, %v6286_v39  ;;  %v6305_v54 = vrot.slane %v6303_v29, 5  ;;  %v703_v10 = vshrl.u32 %v527_v3, 16  ;;  %v5794_v49 = vld [vmem:[#allocation2 + $0x1e8] sm:$0xf]  ;;  %v5795_v8 = vld [vmem:[#allocation2 + $0x1ec] sm:$0xf] }
 0x118   : > { %v6300_v41 = vor.u32 %v6299_v12, %v6295_v32  ;;  %v18111_v36 = vrot.slane %v14555_v28, 4  ;;  %v6308_v55 = vshrl.u32 %v5791_v7, 16  ;;  %12716 = vmatmul.mubr.bf16.gmra.mrb[4].mxu1 %v11521_v6  ;;  %v6311_v14 = vshll.u32 %v5791_v7, 16  ;;  %v13998_v39 = vld [vmem:[%s14396_s4 + $0xa8] sm:$0xff]  }
 0x119   : > { %13067 = vmatprep.mubr.bf16.mxu0 %v11796_v37  ;;  %v6291_v58 = vrot.slane %v6290_v40, 4  ;;  %v6317_v45 = vshll.u32 %v5792_v56, 16  ;;  %v6321_v48 = vshrl.u32 %v5792_v56, 16  ;;  %v11431_v35 = vrot.slane %v703_v10, 11  ;;  %12782 = vmatpush3.bf16.msra.mxu1 %v13994_v11 }
 0x11a   : > { %v723_v4 = vsel %vm15288_vm8, %v18111_v36, %v14975_v51  ;;  %v6301_v59 = vrot.slane %v6300_v41, 4  ;;  %v6310_v63 = vrot.slane %v6308_v55, 4  ;;  %v6327_v16 = vshll.u32 %v5793_v26, 16  ;;  %12783 = vmatprep.subr.bf16.mxu1 %v13996_v46  ;;  %v14000_v41 = vld [vmem:[%s14396_s4 + $0xb0] sm:$0xff]   ;;  %v533_v55 = vld [vmem:[#allocation2 + $0x7c] sm:$0x8] }
 0x11b   : > { %v6296_v28 = vsel %vm15013_vm5, %v6291_v58, %v6295_v32  ;;  %v6313_v22 = vrot.slane %v6311_v14, 5  ;;  %v6319_v3 = vrot.slane %v6317_v45, 5  ;;  %v6323_v51 = vrot.slane %v6321_v48, 4  ;;  %v5797_v45 = vld [vmem:[#allocation2 + $0x1fc] sm:$0xf] }
 0x11c   : > { %v6306_v7 = vsel %vm15013_vm5, %v6301_v59, %v6305_v54  ;;  %v714_v20 = vsel %vm15288_vm8, %v11431_v35, %v14961_v47  ;;  %v6329_v57 = vrot.slane %v6327_v16, 5  ;;  %v725_v27 = vshrl.u32 %v530_v44, 16 }
 0x11d   : > { %v11797_v11 = vcombine.low %v6296_v28, %v6306_v7  ;;  %v11522_v50 = vcombine.low %v714_v20, %v723_v4  ;;  %v6314_v29 = vor.u32 %v6313_v22, %v6310_v63  ;;  %v6324_v31 = vor.u32 %v6323_v51, %v6319_v3  ;;  %12784 = vmatpush3.bf16.msra.mxu1 %v13996_v46  ;;  %v5798_v63 = vld [vmem:[#allocation2 + $0x200] sm:$0xf]  ;;  %v5799_v7 = vld [vmem:[#allocation2 + $0x204] sm:$0x1]  ;;  %v536_v20 = vld [vmem:[#allocation2 + $0x90] sm:$0x8] }
 0x11e   : > { %v11432_v32 = vrot.slane %v725_v27, 11  ;;  %v18112_v12 = vrot.slane %v14575_v23, 4  ;;  %v6332_v37 = vshrl.u32 %v5794_v49, 16  ;;  %v6335_v6 = vshll.u32 %v5794_v49, 16  ;;  %12785 = vmatprep.subr.bf16.mxu1 %v13998_v39 }
 0x11f   : > { %13068 = vmatmul.mubr.bf16.gmra.mrb[36].mxu0 %v11797_v11  ;;  %12719 = vmatprep.mubr.bf16.mxu1 %v11522_v50  ;;  %v6315_v47 = vrot.slane %v6314_v29, 4  ;;  %v6325_v40 = vrot.slane %v6324_v31, 4  ;;  %v6341_v54 = vshll.u32 %v5795_v8, 16  ;;  %v6345_v26 = vshrl.u32 %v5795_v8, 16 }
 0x120   : > { %v745_v56 = vsel %vm15288_vm8, %v18112_v12, %v15001_v38  ;;  %v736_v10 = vsel %vm15288_vm8, %v11432_v32, %v14996_v2  ;;  %v6334_v36 = vrot.slane %v6332_v37, 4  ;;  %v6337_v4 = vrot.slane %v6335_v6, 5 }
 0x121   : > { %v6351_v23 = vshll.u32 %v5796_v17, 16  ;;  %v6320_v38 = vsel %vm15013_vm5, %v6315_v47, %v6319_v3  ;;  %v6330_v46 = vsel %vm15013_vm5, %v6325_v40, %v6329_v57  ;;  %v11523_v58 = vcombine.low %v736_v10, %v745_v56  ;;  %12786 = vmatpush3.bf16.msra.mxu1 %v13998_v39  ;;  %v18114_v3 = vld [vmem:[#allocation22_spill] sm:$0xff] }
 0x122   : > { %v6343_v14 = vrot.slane %v6341_v54, 5  ;;  %v11798_v48 = vcombine.low %v6320_v38, %v6330_v46  ;;  %v6338_v44 = vor.u32 %v6337_v4, %v6334_v36  ;;  %v6347_v59 = vrot.slane %v6345_v26, 4  ;;  %12787 = vmatprep.subr.bf16.mxu1 %v14000_v41  ;;  %v5800_v26 = vld [vmem:[#allocation2 + $0x210] sm:$0xf]  ;;  %v5801_v10 = vld [vmem:[#allocation2 + $0x214] sm:$0xf] }
 0x123   : > { %v6353_v35 = vrot.slane %v6351_v23, 5  ;;  %12720 = vmatmul.mubr.bf16.gmra.mrb[8].mxu1 %v11523_v58  ;;  %v747_v2 = vshrl.u32 %v533_v55, 16  ;;  %v18113_v16 = vshll.u32 %v14573_v30, 16  ;;  %v759_v22 = vrot.slane %v14618_v15, 4  ;;  %v18116_v55 = vld [vmem:[#allocation31_spill] sm:$0xff] }
 0x124   : > { %v18115_v51 = vshll.u32 %v18114_v3, 16  ;;  %13071 = vmatprep.mubr.bf16.mxu0 %v11798_v48  ;;  %v6339_v57 = vrot.slane %v6338_v44, 4  ;;  %v6348_v27 = vor.u32 %v6347_v59, %v6343_v14  ;;  %v6356_v8 = vshrl.u32 %v5797_v45, 16  ;;  %v5802_v59 = vld [vmem:[#allocation2 + $0x218] sm:$0x1] }
 0x125   : > { %v757_v28 = vor.u32 %v18113_v16, %v14618_v15  ;;  %v6359_v39 = vshll.u32 %v5797_v45, 16  ;;  %v11433_v11 = vrot.slane %v747_v2, 11  ;;  %v6365_v30 = vshll.u32 %v5798_v63, 16  ;;  %12788 = vmatpush3.bf16.msra.mxu1 %v14000_v41  ;;  %v539_v3 = vld [vmem:[#allocation2 + $0xa4] sm:$0x8] }
 0x126   : > { %v766_v49 = vor.u32 %v18115_v51, %v14626_v33  ;;  %v6369_v29 = vshrl.u32 %v5798_v63, 16  ;;  %v6344_v15 = vsel %vm15013_vm5, %v6339_v57, %v6343_v14  ;;  %v6349_v31 = vrot.slane %v6348_v27, 4 }
 0x127   : > { %v6358_v17 = vrot.slane %v6356_v8, 4  ;;  %v6361_v33 = vrot.slane %v6359_v39, 5  ;;  %v758_v32 = vsel %vm15288_vm8, %v11433_v11, %v757_v28  ;;  %v6367_v12 = vrot.slane %v6365_v30, 5  ;;  %v5804_v39 = vld [vmem:[#allocation2 + $0x228] sm:$0xf] }
 0x128   : > { %v767_v50 = vsel %vm15288_vm8, %v759_v22, %v766_v49  ;;  %v6371_v56 = vrot.slane %v6369_v29, 4  ;;  %v6375_v37 = vshll.u32 %v5799_v7, 16  ;;  %v6354_v6 = vsel %vm15013_vm5, %v6349_v31, %v6353_v35  ;;  %v5803_v7 = vld [vmem:[#allocation2 + $0x224] sm:$0xf] }
 0x129   : > { %v11524_v47 = vcombine.low %v758_v32, %v767_v50  ;;  %v6362_v40 = vor.u32 %v6361_v33, %v6358_v17  ;;  %v769_v54 = vshrl.u32 %v536_v20, 16  ;;  %v11799_v36 = vcombine.low %v6344_v15, %v6354_v6 }
 0x12a   : > { %v6372_v4 = vor.u32 %v6371_v56, %v6367_v12  ;;  %v6377_v23 = vrot.slane %v6375_v37, 5  ;;  %v18117_v41 = vshll.u32 %v14607_v60, 16  ;;  %v781_v14 = vrot.slane %v18116_v55, 4 }
 0x12b   : > { %12723 = vmatprep.mubr.bf16.mxu1 %v11524_v47  ;;  %v6363_v46 = vrot.slane %v6362_v40, 4  ;;  %v11434_v58 = vrot.slane %v769_v54, 11  ;;  %v18118_v45 = vshll.u32 %v14609_v61, 16  ;;  %13072 = vmatmul.mubr.bf16.gmra.mrb[40].mxu0 %v11799_v36  ;;  %v6380_v35 = vshrl.u32 %v5800_v26, 16  ;;  %v542_v54 = vld [vmem:[#allocation2 + $0xb8] sm:$0x8] }
 0x12c   : > { %v779_v38 = vor.u32 %v18117_v41, %v18116_v55  ;;  %v6373_v44 = vrot.slane %v6372_v4, 4  ;;  %v6383_v63 = vshll.u32 %v5800_v26, 16  ;;  %v6389_v2 = vshll.u32 %v5801_v10, 16  ;;  %v14002_v36 = vld [vmem:[%s14396_s4 + $0xb8] sm:$0xff]  }
 0x12d   : > { %v788_v48 = vor.u32 %v18118_v45, %v14656_v34  ;;  %v6368_v16 = vsel %vm15013_vm5, %v6363_v46, %v6367_v12  ;;  %v6393_v22 = vshrl.u32 %v5801_v10, 16  ;;  %v6382_v51 = vrot.slane %v6380_v35, 4  ;;  %v5805_v12 = vld [vmem:[#allocation2 + $0x22c] sm:$0x1]  ;;  %12789 = vmatprep.subr.bf16.mxu1 %v14002_v36  ;;  %v5807_v35 = vld [vmem:[#allocation2 + $0x23c] sm:$0xf] }
 0x12e   : > { %v780_v60 = vsel %vm15288_vm8, %v11434_v58, %v779_v38  ;;  %v6378_v34 = vsel %vm15013_vm5, %v6373_v44, %v6377_v23  ;;  %v6385_v49 = vrot.slane %v6383_v63, 5  ;;  %v6391_v57 = vrot.slane %v6389_v2, 5  ;;  %v5806_v58 = vld [vmem:[#allocation2 + $0x238] sm:$0xf]  ;;  %12790 = vmatpush3.bf16.msra.mxu1 %v14002_v36  ;;  %v548_v36 = vld [vmem:[#allocation2 + $0xe0] sm:$0x8] }
 0x12f   : > { %v789_v28 = vsel %vm15288_vm8, %v781_v14, %v788_v48  ;;  %v11800_v20 = vcombine.low %v6368_v16, %v6378_v34  ;;  %v6395_v27 = vrot.slane %v6393_v22, 4  ;;  %v6399_v8 = vshll.u32 %v5802_v59, 16  ;;  %v5808_v34 = vld [vmem:[#allocation2 + $0x240] sm:$0x1] }
 0x130   : > { %v11525_v61 = vcombine.low %v780_v60, %v789_v28  ;;  %v6386_v11 = vor.u32 %v6385_v49, %v6382_v51  ;;  %v791_v50 = vshrl.u32 %v539_v3, 16  ;;  %v18119_v30 = vshll.u32 %v14638_v21, 16 }
 0x131   : > { %v803_v15 = vrot.slane %v14668_v13, 4  ;;  %13075 = vmatprep.mubr.bf16.mxu0 %v11800_v20  ;;  %v6396_v31 = vor.u32 %v6395_v27, %v6391_v57  ;;  %v6401_v17 = vrot.slane %v6399_v8, 5  ;;  %v18120_v33 = vshll.u32 %v14646_v52, 16 }
 0x132   : > { %12724 = vmatmul.mubr.bf16.gmra.mrb[12].mxu1 %v11525_v61  ;;  %v801_v29 = vor.u32 %v18119_v30, %v14668_v13  ;;  %v6404_v56 = vshrl.u32 %v5803_v7, 16  ;;  %v6387_v37 = vrot.slane %v6386_v11, 4  ;;  %v11435_v6 = vrot.slane %v791_v50, 11  ;;  %v5809_v30 = vld [vmem:[#allocation2 + $0x24c] sm:$0xf] }
 0x133   : > { %v810_v32 = vor.u32 %v18120_v33, %v14699_v18  ;;  %v6407_v47 = vshll.u32 %v5803_v7, 16  ;;  %v6413_v40 = vshll.u32 %v5804_v39, 16  ;;  %v6397_v26 = vrot.slane %v6396_v31, 4 }
 0x134   : > { %v6406_v13 = vrot.slane %v6404_v56, 4  ;;  %v6417_v10 = vshrl.u32 %v5804_v39, 16  ;;  %v6392_v4 = vsel %vm15013_vm5, %v6387_v37, %v6391_v57  ;;  %v802_v52 = vsel %vm15288_vm8, %v11435_v6, %v801_v29  ;;  %v545_v57 = vld [vmem:[#allocation2 + $0xcc] sm:$0x8]  ;;  %v5810_v29 = vld [vmem:[#allocation2 + $0x250] sm:$0xf] }
 0x135   : > { %v811_v21 = vsel %vm15288_vm8, %v803_v15, %v810_v32  ;;  %v6409_v18 = vrot.slane %v6407_v47, 5  ;;  %v6415_v23 = vrot.slane %v6413_v40, 5  ;;  %v6402_v55 = vsel %vm15013_vm5, %v6397_v26, %v6401_v17  ;;  %v18124_v6 = vld [vmem:[#allocation50_spill] sm:$0xff] }
 0x136   : > { %v11526_v41 = vcombine.low %v802_v52, %v811_v21  ;;  %v6419_v38 = vrot.slane %v6417_v10, 4  ;;  %v6423_v46 = vshll.u32 %v5805_v12, 16  ;;  %v11801_v14 = vcombine.low %v6392_v4, %v6402_v55 }
 0x137   : > { %v6410_v45 = vor.u32 %v6409_v18, %v6406_v13  ;;  %v813_v48 = vshrl.u32 %v542_v54, 16  ;;  %v18121_v44 = vshll.u32 %v14687_v53, 16  ;;  %v825_v16 = vrot.slane %v14743_v9, 4  ;;  %v5811_v54 = vld [vmem:[#allocation2 + $0x254] sm:$0x1] }
 0x138   : > { %12727 = vmatprep.mubr.bf16.mxu1 %v11526_v41  ;;  %v6420_v63 = vor.u32 %v6419_v38, %v6415_v23  ;;  %v6425_v2 = vrot.slane %v6423_v46, 5  ;;  %v18122_v60 = vshll.u32 %v14701_v42, 16  ;;  %13076 = vmatmul.mubr.bf16.gmra.mrb[44].mxu0 %v11801_v14  ;;  %v6428_v61 = vshrl.u32 %v5806_v58, 16  ;;  %v5812_v14 = vld [vmem:[#allocation2 + $0x260] sm:$0xf] }
 0x139   : > { %v823_v59 = vor.u32 %v18121_v44, %v14743_v9  ;;  %v6411_v22 = vrot.slane %v6410_v45, 4  ;;  %v11436_v3 = vrot.slane %v813_v48, 11  ;;  %v6431_v51 = vshll.u32 %v5806_v58, 16 }
 0x13a   : > { %v832_v28 = vor.u32 %v18122_v60, %v14751_v62  ;;  %v6421_v49 = vrot.slane %v6420_v63, 4  ;;  %v6437_v7 = vshll.u32 %v5807_v35, 16  ;;  %v6441_v20 = vshrl.u32 %v5807_v35, 16  ;;  %v5813_v35 = vld [vmem:[#allocation2 + $0x264] sm:$0xf] }
 0x13b   : > { %v6416_v9 = vsel %vm15013_vm5, %v6411_v22, %v6415_v23  ;;  %v824_v42 = vsel %vm15288_vm8, %v11436_v3, %v823_v59  ;;  %v6430_v62 = vrot.slane %v6428_v61, 4  ;;  %v6433_v27 = vrot.slane %v6431_v51, 5  ;;  %v18129_v3 = vld [vmem:[#allocation57_spill] sm:$0xff] }
 0x13c   : > { %v833_v53 = vsel %vm15288_vm8, %v825_v16, %v832_v28  ;;  %v6426_v8 = vsel %vm15013_vm5, %v6421_v49, %v6425_v2  ;;  %v6439_v11 = vrot.slane %v6437_v7, 5  ;;  %v6443_v50 = vrot.slane %v6441_v20, 4  ;;  %v18126_v2 = vld [vmem:[#allocation55_spill] sm:$0xff]  ;;  %v5814_v20 = vld [vmem:[#allocation2 + $0x268] sm:$0x1] }
 0x13d   : > { %v11527_v39 = vcombine.low %v824_v42, %v833_v53  ;;  %v11802_v15 = vcombine.low %v6416_v9, %v6426_v8  ;;  %v6434_v31 = vor.u32 %v6433_v27, %v6430_v62  ;;  %v6447_v17 = vshll.u32 %v5808_v34, 16  ;;  %v18127_v16 = vld [vmem:[#allocation47_spill] sm:$0xff]  ;;  %v18130_v34 = vld [vmem:[#allocation49_spill] sm:$0xff]  ;;  %v551_v8 = vld [vmem:[#allocation2 + $0xf4] sm:$0x8] }
 0x13e   : > { %v835_v33 = vshrl.u32 %v545_v57, 16  ;;  %v6444_v32 = vor.u32 %v6443_v50, %v6439_v11  ;;  %v18123_v12 = vshll.u32 %v14738_v19, 16  ;;  %v847_v37 = vrot.slane %v14776_v25, 4 }
 0x13f   : > { %12728 = vmatmul.mubr.bf16.gmra.mrb[16].mxu1 %v11527_v39  ;;  %v18125_v47 = vshll.u32 %v14740_v43, 16  ;;  %13079 = vmatprep.mubr.bf16.mxu0 %v11802_v15  ;;  %v6435_v26 = vrot.slane %v6434_v31, 4  ;;  %v6449_v21 = vrot.slane %v6447_v17, 5  ;;  %v6452_v10 = vshrl.u32 %v5809_v30, 16 }
 0x140   : > { %v845_v56 = vor.u32 %v18123_v12, %v14776_v25  ;;  %v11437_v13 = vrot.slane %v835_v33, 11  ;;  %v6445_v4 = vrot.slane %v6444_v32, 4  ;;  %v6455_v18 = vshll.u32 %v5809_v30, 16  ;;  %v5815_v33 = vld [vmem:[#allocation2 + $0x274] sm:$0xf] }
 0x141   : > { %v854_v40 = vor.u32 %v18125_v47, %v18124_v6  ;;  %v6461_v19 = vshll.u32 %v5810_v29, 16  ;;  %v6440_v25 = vsel %vm15013_vm5, %v6435_v26, %v6439_v11  ;;  %v6454_v23 = vrot.slane %v6452_v10, 4  ;;  %v5816_v6 = vld [vmem:[#allocation2 + $0x278] sm:$0xf]  ;;  %v18133_v26 = vld [vmem:[#allocation56_spill] sm:$0xff] }
 0x142   : > { %v846_v43 = vsel %vm15288_vm8, %v11437_v13, %v845_v56  ;;  %v6465_v55 = vshrl.u32 %v5810_v29, 16  ;;  %v6450_v41 = vsel %vm15013_vm5, %v6445_v4, %v6449_v21  ;;  %v6457_v46 = vrot.slane %v6455_v18, 5  ;;  %v18135_v18 = vld [vmem:[#allocation65_spill] sm:$0xff] }
 0x143   : > { %v855_v52 = vsel %vm15288_vm8, %v847_v37, %v854_v40  ;;  %v6463_v58 = vrot.slane %v6461_v19, 5  ;;  %v11803_v45 = vcombine.low %v6440_v25, %v6450_v41  ;;  %v6471_v44 = vshll.u32 %v5811_v54, 16  ;;  %v18132_v54 = vld [vmem:[#allocation64_spill] sm:$0xff]  ;;  %v18136_v19 = vld [vmem:[#allocation59_spill] sm:$0xff] }
 0x144   : > { %v11528_v38 = vcombine.low %v846_v43, %v855_v52  ;;  %v6467_v48 = vrot.slane %v6465_v55, 4  ;;  %v857_v59 = vshrl.u32 %v548_v36, 16  ;;  %v6458_v63 = vor.u32 %v6457_v46, %v6454_v23  ;;  %v5817_v55 = vld [vmem:[#allocation2 + $0x27c] sm:$0x1] }
 0x145   : > { %v18128_v60 = vshll.u32 %v18127_v16, 16  ;;  %v869_v22 = vrot.slane %v18126_v2, 4  ;;  %v18131_v61 = vshll.u32 %v18130_v34, 16  ;;  %13080 = vmatmul.mubr.bf16.gmra.mrb[48].mxu0 %v11803_v45  ;;  %v6473_v53 = vrot.slane %v6471_v44, 5  ;;  %v554_v44 = vld [vmem:[#allocation2 + $0x108] sm:$0x8] }
 0x146   : > { %12731 = vmatprep.mubr.bf16.mxu1 %v11528_v38  ;;  %v6468_v49 = vor.u32 %v6467_v48, %v6463_v58  ;;  %v11438_v7 = vrot.slane %v857_v59, 11  ;;  %v6476_v57 = vshrl.u32 %v5812_v14, 16  ;;  %v6459_v9 = vrot.slane %v6458_v63, 4 }
 0x147   : > { %v867_v28 = vor.u32 %v18128_v60, %v18126_v2  ;;  %v876_v51 = vor.u32 %v18131_v61, %v18129_v3  ;;  %v6479_v62 = vshll.u32 %v5812_v14, 16  ;;  %v6485_v27 = vshll.u32 %v5813_v35, 16  ;;  %v5818_v3 = vld [vmem:[#allocation2 + $0x288] sm:$0xf] }
 0x148   : > { %v6469_v39 = vrot.slane %v6468_v49, 4  ;;  %v6478_v50 = vrot.slane %v6476_v57, 4  ;;  %v6489_v30 = vshrl.u32 %v5813_v35, 16  ;;  %v6464_v29 = vsel %vm15013_vm5, %v6459_v9, %v6463_v58  ;;  %v18138_v49 = vld [vmem:[#allocation69_spill] sm:$0xff]  ;;  %v14004_v9 = vld [vmem:[%s14396_s4 + $0xc0] sm:$0xff]  }
 0x149   : > { %v877_v42 = vsel %vm15288_vm8, %v869_v22, %v876_v51  ;;  %v868_v11 = vsel %vm15288_vm8, %v11438_v7, %v867_v28  ;;  %v6481_v31 = vrot.slane %v6479_v62, 5  ;;  %v6487_v17 = vrot.slane %v6485_v27, 5  ;;  %v5819_v57 = vld [vmem:[#allocation2 + $0x28c] sm:$0xf]  ;;  %12855 = vmatprep.subr.bf16.mxu1 %v14004_v9  ;;  %v5824_v9 = vld [vmem:[#allocation2 + $0x2b0] sm:$0xf] }
 0x14a   : > { %v11529_v15 = vcombine.low %v868_v11, %v877_v42  ;;  %v6474_v32 = vsel %vm15013_vm5, %v6469_v39, %v6473_v53  ;;  %v6491_v12 = vrot.slane %v6489_v30, 4  ;;  %v6495_v56 = vshll.u32 %v5814_v20, 16  ;;  %v18139_v53 = vld [vmem:[#allocation63_spill] sm:$0xff]  ;;  %v18142_v39 = vld [vmem:[#allocation66_spill] sm:$0xff] }
 0x14b   : > { %v879_v37 = vshrl.u32 %v551_v8, 16  ;;  %v11804_v47 = vcombine.low %v6464_v29, %v6474_v32  ;;  %v6482_v40 = vor.u32 %v6481_v31, %v6478_v50  ;;  %v18134_v21 = vshll.u32 %v18133_v26, 16  ;;  %v18141_v8 = vld [vmem:[#allocation71_spill] sm:$0xff] }
 0x14c   : > { %12732 = vmatmul.mubr.bf16.gmra.mrb[20].mxu1 %v11529_v15  ;;  %v891_v10 = vrot.slane %v18132_v54, 4  ;;  %v6492_v36 = vor.u32 %v6491_v12, %v6487_v17  ;;  %v6497_v4 = vrot.slane %v6495_v56, 5  ;;  %v18137_v25 = vshll.u32 %v18136_v19, 16  ;;  %v5820_v15 = vld [vmem:[#allocation2 + $0x290] sm:$0x1] }
 0x14d   : > { %v889_v13 = vor.u32 %v18134_v21, %v18132_v54  ;;  %v11439_v52 = vrot.slane %v879_v37, 11  ;;  %13083 = vmatprep.mubr.bf16.mxu0 %v11804_v47  ;;  %v6483_v23 = vrot.slane %v6482_v40, 4  ;;  %v6500_v41 = vshrl.u32 %v5815_v33, 16  ;;  %v557_v37 = vld [vmem:[#allocation2 + $0x11c] sm:$0x8] }
 0x14e   : > { %v898_v43 = vor.u32 %v18137_v25, %v18135_v18  ;;  %v6503_v38 = vshll.u32 %v5815_v33, 16  ;;  %v6509_v46 = vshll.u32 %v5816_v6, 16  ;;  %v6493_v58 = vrot.slane %v6492_v36, 4  ;;  %v5821_v36 = vld [vmem:[#allocation2 + $0x29c] sm:$0xf] }
 0x14f   : > { %v890_v14 = vsel %vm15288_vm8, %v11439_v52, %v889_v13  ;;  %v6513_v48 = vshrl.u32 %v5816_v6, 16  ;;  %v6488_v59 = vsel %vm15013_vm5, %v6483_v23, %v6487_v17  ;;  %v6502_v63 = vrot.slane %v6500_v41, 4  ;;  %v5822_v25 = vld [vmem:[#allocation2 + $0x2a0] sm:$0xf]  ;;  %v18144_v23 = vld [vmem:[#allocation79_spill] sm:$0xff] }
 0x150   : > { %v899_v45 = vsel %vm15288_vm8, %v891_v10, %v898_v43  ;;  %v6505_v2 = vrot.slane %v6503_v38, 5  ;;  %v6498_v16 = vsel %vm15013_vm5, %v6493_v58, %v6497_v4  ;;  %v6511_v60 = vrot.slane %v6509_v46, 5  ;;  %v18147_v58 = vld [vmem:[#allocation81_spill] sm:$0xff] }
 0x151   : > { %v11530_v35 = vcombine.low %v890_v14, %v899_v45  ;;  %v6515_v28 = vrot.slane %v6513_v48, 4  ;;  %v6519_v22 = vshll.u32 %v5817_v55, 16  ;;  %v11805_v34 = vcombine.low %v6488_v59, %v6498_v16  ;;  %v18145_v55 = vld [vmem:[#allocation74_spill] sm:$0xff]  ;;  %v18148_v14 = vld [vmem:[#allocation75_spill] sm:$0xff] }
 0x152   : > { %v6506_v61 = vor.u32 %v6505_v2, %v6502_v63  ;;  %v901_v51 = vshrl.u32 %v554_v44, 16  ;;  %v18140_v7 = vshll.u32 %v18139_v53, 16  ;;  %v913_v27 = vrot.slane %v18138_v49, 4  ;;  %v5823_v63 = vld [vmem:[#allocation2 + $0x2a4] sm:$0x1] }
 0x153   : > { %12735 = vmatprep.mubr.bf16.mxu1 %v11530_v35  ;;  %v6516_v42 = vor.u32 %v6515_v28, %v6511_v60  ;;  %v6521_v62 = vrot.slane %v6519_v22, 5  ;;  %v18143_v11 = vshll.u32 %v18142_v39, 16  ;;  %13084 = vmatmul.mubr.bf16.gmra.mrb[52].mxu0 %v11805_v34  ;;  %v6524_v31 = vshrl.u32 %v5818_v3, 16  ;;  %v5825_v39 = vld [vmem:[#allocation2 + $0x2b4] sm:$0xf] }
 0x154   : > { %v911_v20 = vor.u32 %v18140_v7, %v18138_v49  ;;  %v6507_v30 = vrot.slane %v6506_v61, 4  ;;  %v11440_v29 = vrot.slane %v901_v51, 11  ;;  %v6527_v17 = vshll.u32 %v5818_v3, 16  ;;  %v560_v3 = vld [vmem:[#allocation2 + $0x130] sm:$0x8] }
 0x155   : > { %v920_v50 = vor.u32 %v18143_v11, %v18141_v8  ;;  %v6517_v33 = vrot.slane %v6516_v42, 4  ;;  %v6533_v12 = vshll.u32 %v5819_v57, 16  ;;  %v6537_v56 = vshrl.u32 %v5819_v57, 16 }
 0x156   : > { %v6512_v6 = vsel %vm15013_vm5, %v6507_v30, %v6511_v60  ;;  %v912_v47 = vsel %vm15288_vm8, %v11440_v29, %v911_v20  ;;  %v6526_v40 = vrot.slane %v6524_v31, 4  ;;  %v6529_v54 = vrot.slane %v6527_v17, 5  ;;  %v18151_v30 = vld [vmem:[#allocation80_spill] sm:$0xff] }
 0x157   : > { %v921_v32 = vsel %vm15288_vm8, %v913_v27, %v920_v50  ;;  %v6522_v26 = vsel %vm15013_vm5, %v6517_v33, %v6521_v62  ;;  %v6535_v13 = vrot.slane %v6533_v12, 5  ;;  %v6539_v10 = vrot.slane %v6537_v56, 4  ;;  %v18150_v50 = vld [vmem:[#allocation86_spill] sm:$0xff]  ;;  %v18153_v17 = vld [vmem:[#allocation88_spill] sm:$0xff]  ;;  %v18154_v33 = vld [vmem:[#allocation83_spill] sm:$0xff] }
 0x158   : > { %v11531_v21 = vcombine.low %v912_v47, %v921_v32  ;;  %v11806_v4 = vcombine.low %v6512_v6, %v6522_v26  ;;  %v6530_v52 = vor.u32 %v6529_v54, %v6526_v40  ;;  %v6543_v18 = vshll.u32 %v5820_v15, 16  ;;  %v5826_v47 = vld [vmem:[#allocation2 + $0x2b8] sm:$0x1] }
 0x159   : > { %v923_v19 = vshrl.u32 %v557_v37, 16  ;;  %v6540_v43 = vor.u32 %v6539_v10, %v6535_v13  ;;  %v18146_v41 = vshll.u32 %v18145_v55, 16  ;;  %v935_v46 = vrot.slane %v18144_v23, 4  ;;  %v563_v10 = vld [vmem:[#allocation2 + $0x16c] sm:$0x8] }
 0x15a   : > { %12736 = vmatmul.mubr.bf16.gmra.mrb[24].mxu1 %v11531_v21  ;;  %v18149_v45 = vshll.u32 %v18148_v14, 16  ;;  %13087 = vmatprep.mubr.bf16.mxu0 %v11806_v4  ;;  %v6531_v44 = vrot.slane %v6530_v52, 4  ;;  %v6545_v59 = vrot.slane %v6543_v18, 5  ;;  %v6548_v2 = vshrl.u32 %v5821_v36, 16  ;;  %v7145_v55 = vld [vmem:[#allocation2 + $0x2c] sm:$0x8] }
 0x15b   : > { %v933_v38 = vor.u32 %v18146_v41, %v18144_v23  ;;  %v11441_v35 = vrot.slane %v923_v19, 11  ;;  %v6541_v16 = vrot.slane %v6540_v43, 4  ;;  %v6551_v28 = vshll.u32 %v5821_v36, 16  ;;  %v7146_v14 = vld [vmem:[#allocation2 + $0x30] sm:$0xf] }
 0x15c   : > { %v942_v48 = vor.u32 %v18149_v45, %v18147_v58  ;;  %v6557_v22 = vshll.u32 %v5822_v25, 16  ;;  %v6536_v34 = vsel %vm15013_vm5, %v6531_v44, %v6535_v13  ;;  %v6550_v51 = vrot.slane %v6548_v2, 4  ;;  %v18156_v44 = vld [vmem:[#allocation93_spill] sm:$0xff] }
 0x15d   : > { %v934_v61 = vsel %vm15288_vm8, %v11441_v35, %v933_v38  ;;  %v6561_v49 = vshrl.u32 %v5822_v25, 16  ;;  %v6546_v53 = vsel %vm15013_vm5, %v6541_v16, %v6545_v59  ;;  %v6553_v20 = vrot.slane %v6551_v28, 5  ;;  %v18157_v59 = vld [vmem:[#allocation90_spill] sm:$0xff] }
 0x15e   : > { %v943_v60 = vsel %vm15288_vm8, %v935_v46, %v942_v48  ;;  %v6559_v57 = vrot.slane %v6557_v22, 5  ;;  %v11807_v42 = vcombine.low %v6536_v34, %v6546_v53  ;;  %v6567_v27 = vshll.u32 %v5823_v63, 16  ;;  %v7147_v16 = vld [vmem:[#allocation2 + $0x34] sm:$0xf]  ;;  %v18160_v34 = vld [vmem:[#allocation92_spill] sm:$0xff] }
 0x15f   : > { %v11532_v7 = vcombine.low %v934_v61, %v943_v60  ;;  %v6563_v62 = vrot.slane %v6561_v49, 4  ;;  %v945_v8 = vshrl.u32 %v560_v3, 16  ;;  %v6554_v11 = vor.u32 %v6553_v20, %v6550_v51  ;;  %v18159_v3 = vld [vmem:[#allocation94_spill] sm:$0xff] }
 0x160   : > { %v18152_v29 = vshll.u32 %v18151_v30, 16  ;;  %v957_v31 = vrot.slane %v18150_v50, 4  ;;  %v18155_v32 = vshll.u32 %v18154_v33, 16  ;;  %13088 = vmatmul.mubr.bf16.gmra.mrb[56].mxu0 %v11807_v42  ;;  %v6569_v37 = vrot.slane %v6567_v27, 5  ;;  %v7148_v30 = vld [vmem:[#allocation2 + $0x40] sm:$0x8] }
 0x161   : > { %12739 = vmatprep.mubr.bf16.mxu1 %v11532_v7  ;;  %v6564_v56 = vor.u32 %v6563_v62, %v6559_v57  ;;  %v11442_v6 = vrot.slane %v945_v8, 11  ;;  %v6572_v40 = vshrl.u32 %v5824_v9, 16  ;;  %v6555_v54 = vrot.slane %v6554_v11, 4  ;;  %v7149_v33 = vld [vmem:[#allocation2 + $0x44] sm:$0xf] }
 0x162   : > { %v955_v15 = vor.u32 %v18152_v29, %v18150_v50  ;;  %v964_v12 = vor.u32 %v18155_v32, %v18153_v17  ;;  %v6575_v21 = vshll.u32 %v5824_v9, 16  ;;  %v6581_v13 = vshll.u32 %v5825_v39, 16 }
 0x163   : > { %v6565_v36 = vrot.slane %v6564_v56, 4  ;;  %v6574_v52 = vrot.slane %v6572_v40, 4  ;;  %v6585_v18 = vshrl.u32 %v5825_v39, 16  ;;  %v6560_v19 = vsel %vm15013_vm5, %v6555_v54, %v6559_v57  ;;  %v566_v57 = vld [vmem:[#allocation2 + $0x180] sm:$0x8] }
 0x164   : > { %v965_v26 = vsel %vm15288_vm8, %v957_v31, %v964_v12  ;;  %v956_v4 = vsel %vm15288_vm8, %v11442_v6, %v955_v15  ;;  %v6577_v43 = vrot.slane %v6575_v21, 5  ;;  %v6583_v23 = vrot.slane %v6581_v13, 5  ;;  %v18163_v6 = vld [vmem:[#allocation95_spill] sm:$0xff]  ;;  %v7150_v54 = vld [vmem:[#allocation2 + $0x48] sm:$0xf] }
 0x165   : > { %v11533_v25 = vcombine.low %v956_v4, %v965_v26  ;;  %v6570_v41 = vsel %vm15013_vm5, %v6565_v36, %v6569_v37  ;;  %v6587_v38 = vrot.slane %v6585_v18, 4  ;;  %v6591_v46 = vshll.u32 %v5826_v47, 16  ;;  %v18162_v37 = vld [vmem:[#allocation97_spill] sm:$0xff]  ;;  %v18166_v36 = vld [vmem:[#allocation96_spill] sm:$0xff] }
 0x166   : > { %v967_v58 = vshrl.u32 %v563_v10, 16  ;;  %v11808_v45 = vcombine.low %v6560_v19, %v6570_v41  ;;  %v6578_v48 = vor.u32 %v6577_v43, %v6574_v52  ;;  %v18158_v35 = vshll.u32 %v18157_v59, 16  ;;  %v18165_v10 = vld [vmem:[#allocation98_spill] sm:$0xff]  ;;  %v7152_v59 = vld [vmem:[#allocation2 + $0x58] sm:$0xf] }
 0x167   : > { %12740 = vmatmul.mubr.bf16.gmra.mrb[28].mxu1 %v11533_v25  ;;  %v979_v2 = vrot.slane %v18156_v44, 4  ;;  %v6588_v60 = vor.u32 %v6587_v38, %v6583_v23  ;;  %v6593_v28 = vrot.slane %v6591_v46, 5  ;;  %v18161_v61 = vshll.u32 %v18160_v34, 16 }
 0x168   : > { %v977_v63 = vor.u32 %v18158_v35, %v18156_v44  ;;  %v11443_v22 = vrot.slane %v967_v58, 11  ;;  %13091 = vmatprep.mubr.bf16.mxu0 %v11808_v45  ;;  %v6579_v49 = vrot.slane %v6578_v48, 4  ;;  %v7242_v53 = vshrl.u32 %v7145_v55, 16  ;;  %v7151_v44 = vld [vmem:[#allocation2 + $0x54] sm:$0x8] }
 0x169   : > { %v986_v51 = vor.u32 %v18161_v61, %v18159_v3  ;;  %v7247_v7 = vshrl.u32 %v7146_v14, 16  ;;  %v7250_v20 = vshll.u32 %v7146_v14, 16  ;;  %v6589_v9 = vrot.slane %v6588_v60, 4  ;;  %v18169_v60 = vld [vmem:[#allocation99_spill] sm:$0xff] }
 0x16a   : > { %v978_v42 = vsel %vm15288_vm8, %v11443_v22, %v977_v63  ;;  %v7256_v27 = vshrl.u32 %v7147_v16, 16  ;;  %v6584_v8 = vsel %vm15013_vm5, %v6579_v49, %v6583_v23  ;;  %v11818_v11 = vrot.slane %v7242_v53, 11  ;;  %v569_v23 = vld [vmem:[#allocation2 + $0x194] sm:$0x8]  ;;  %v7153_v3 = vld [vmem:[#allocation2 + $0x5c] sm:$0xf] }
 0x16b   : > { %v987_v62 = vsel %vm15288_vm8, %v979_v2, %v986_v51  ;;  %v7249_v50 = vrot.slane %v7247_v7, 7  ;;  %v6594_v29 = vsel %vm15013_vm5, %v6589_v9, %v6593_v28  ;;  %v7259_v31 = vshll.u32 %v7147_v16, 16  ;;  %v18168_v16 = vld [vmem:[#allocation101_spill] sm:$0xff]  ;;  %v18171_v49 = vld [vmem:[#allocation102_spill] sm:$0xff]  ;;  %v18172_v53 = vld [vmem:[#allocation100_spill] sm:$0xff] }
 0x16c   : > { %v11534_v39 = vcombine.low %v978_v42, %v987_v62  ;;  %v7258_v15 = vrot.slane %v7256_v27, 7  ;;  %v989_v17 = vshrl.u32 %v566_v57, 16  ;;  %v11809_v32 = vcombine.low %v6584_v8, %v6594_v29 }
 0x16d   : > { %v7252_v12 = vor.u32 %v7250_v20, %v7249_v50  ;;  %v7254_v56 = vrot.slane %v7249_v50, 4  ;;  %v18164_v47 = vshll.u32 %v18163_v6, 16  ;;  %v1001_v13 = vrot.slane %v18162_v37, 4  ;;  %v572_v50 = vld [vmem:[#allocation2 + $0x1a8] sm:$0x8] }
 0x16e   : > { %12743 = vmatprep.mubr.bf16.mxu1 %v11534_v39  ;;  %v7261_v26 = vor.u32 %v7259_v31, %v7258_v15  ;;  %v11444_v21 = vrot.slane %v989_v17, 11  ;;  %v18167_v4 = vshll.u32 %v18166_v36, 16  ;;  %13092 = vmatmul.mubr.bf16.gmra.mrb[60].mxu0 %v11809_v32  ;;  %v7264_v19 = vshrl.u32 %v7148_v30, 16  ;;  %v7154_v17 = vld [vmem:[#allocation2 + $0x68] sm:$0x8] }
 0x16f   : > { %v999_v40 = vor.u32 %v18164_v47, %v18162_v37  ;;  %v7253_v18 = vsel %vm15288_vm8, %v11818_v11, %v7252_v12  ;;  %v7269_v25 = vshrl.u32 %v7149_v33, 16  ;;  %v7272_v43 = vshll.u32 %v7149_v33, 16  ;;  %v7155_v37 = vld [vmem:[#allocation2 + $0x6c] sm:$0xf]  ;;  %v7156_v36 = vld [vmem:[#allocation2 + $0x70] sm:$0xf] }
 0x170   : > { %v1008_v52 = vor.u32 %v18167_v4, %v18165_v10  ;;  %v7262_v55 = vsel %vm15288_vm8, %v7254_v56, %v7261_v26  ;;  %v7278_v46 = vshrl.u32 %v7150_v54, 16  ;;  %v11819_v45 = vrot.slane %v7264_v19, 11  ;;  %v13999_v6 = vld [vmem:[%s14396_s4 + $0x1c8] sm:$0xff]   ;;  %v18178_v19 = vld [vmem:[#allocation104_spill] sm:$0xff] }
 0x171   : > { %v1000_v41 = vsel %vm15288_vm8, %v11444_v21, %v999_v40  ;;  %v11867_v58 = vcombine.low %v7253_v18, %v7262_v55  ;;  %v7271_v48 = vrot.slane %v7269_v25, 7  ;;  %v7281_v63 = vshll.u32 %v7150_v54, 16  ;;  %v18174_v26 = vld [vmem:[#allocation105_spill] sm:$0xff]  ;;  %v18175_v21 = vld [vmem:[#allocation103_spill] sm:$0xff]  ;;  %v14073_v55 = vld [vmem:[%s14396_s4 + $0x1c0] sm:$0xff]  }
 0x172   : > { %v1009_v38 = vsel %vm15288_vm8, %v1001_v13, %v1008_v52  ;;  %v7280_v35 = vrot.slane %v7278_v46, 7  ;;  %v1011_v2 = vshrl.u32 %v569_v23, 16  ;;  %v18170_v28 = vshll.u32 %v18169_v60, 16  ;;  %v18177_v18 = vld [vmem:[#allocation107_spill] sm:$0xff] }
 0x173   : > { %v11535_v14 = vcombine.low %v1000_v41, %v1009_v38  ;;  %13111 = vmatprep.mubr.bf16.mxu0 %v11867_v58  ;;  %v7274_v34 = vor.u32 %v7272_v43, %v7271_v48  ;;  %v7276_v61 = vrot.slane %v7271_v48, 4  ;;  %v1023_v51 = vrot.slane %v18168_v16, 4 }
 0x174   : > { %v1021_v22 = vor.u32 %v18170_v28, %v18168_v16  ;;  %v18173_v7 = vshll.u32 %v18172_v53, 16  ;;  %v7283_v57 = vor.u32 %v7281_v63, %v7280_v35  ;;  %v11445_v9 = vrot.slane %v1011_v2, 11  ;;  %v7157_v28 = vld [vmem:[#allocation2 + $0x7c] sm:$0x8] }
 0x175   : > { %12744 = vmatmul.mubr.bf16.gmra.mrb[32].mxu1 %v11535_v14  ;;  %v7286_v42 = vshrl.u32 %v7151_v44, 16  ;;  %v7291_v62 = vshrl.u32 %v7152_v59, 16  ;;  %v7275_v27 = vsel %vm15288_vm8, %v11819_v45, %v7274_v34  ;;  %v7294_v39 = vshll.u32 %v7152_v59, 16  ;;  %v575_v14 = vld [vmem:[#allocation2 + $0x1bc] sm:$0x8]  ;;  %v14001_v45 = vld [vmem:[%s14396_s4 + $0x1d0] sm:$0xff]  }
 0x176   : > { %v1030_v20 = vor.u32 %v18173_v7, %v18171_v49  ;;  %v7300_v11 = vshrl.u32 %v7153_v3, 16  ;;  %v7284_v30 = vsel %vm15288_vm8, %v7276_v61, %v7283_v57  ;;  %v1022_v29 = vsel %vm15288_vm8, %v11445_v9, %v1021_v22  ;;  %v7158_v22 = vld [vmem:[#allocation2 + $0x80] sm:$0xf]  ;;  %v18181_v49 = vld [vmem:[#allocation106_spill] sm:$0xff] }
 0x177   : > { %v11820_v15 = vrot.slane %v7286_v42, 11  ;;  %v7293_v31 = vrot.slane %v7291_v62, 7  ;;  %v11868_v33 = vcombine.low %v7275_v27, %v7284_v30  ;;  %v7303_v56 = vshll.u32 %v7153_v3, 16  ;;  %v18183_v62 = vld [vmem:[#allocation111_spill] sm:$0xff]  ;;  %v18184_v27 = vld [vmem:[#allocation108_spill] sm:$0xff] }
 0x178   : > { %v1031_v8 = vsel %vm15288_vm8, %v1023_v51, %v1030_v20  ;;  %v7302_v12 = vrot.slane %v7300_v11, 7  ;;  %v1033_v54 = vshrl.u32 %v572_v50, 16  ;;  %v18176_v13 = vshll.u32 %v18175_v21, 16  ;;  %v18180_v51 = vld [vmem:[#allocation109_spill] sm:$0xff]  ;;  %v7159_v20 = vld [vmem:[#allocation2 + $0x84] sm:$0xf] }
 0x179   : > { %v11536_v32 = vcombine.low %v1022_v29, %v1031_v8  ;;  %v7296_v47 = vor.u32 %v7294_v39, %v7293_v31  ;;  %v7298_v40 = vrot.slane %v7293_v31, 4  ;;  %13112 = vmatmul.mubr.bf16.vlgmr.msra.gmra.mrb[0].mxu0 %v11868_v33  ;;  %v1045_v52 = vrot.slane %v18174_v26, 4 }
 0x17a   : > { %v1043_v10 = vor.u32 %v18176_v13, %v18174_v26  ;;  %v7305_v4 = vor.u32 %v7303_v56, %v7302_v12  ;;  %v18179_v25 = vshll.u32 %v18178_v19, 16  ;;  %v7308_v23 = vshrl.u32 %v7154_v17, 16  ;;  %13176 = vmatpush3.bf16.msra.mxu0 %v14073_v55  ;;  %v578_v12 = vld [vmem:[#allocation2 + $0x1d0] sm:$0x8]  ;;  %v14005_v55 = vld [vmem:[%s14396_s4 + $0x1e0] sm:$0xff]  }
 0x17b   : > { %12747 = vmatprep.mubr.bf16.mxu1 %v11536_v32  ;;  %v7297_v41 = vsel %vm15288_vm8, %v11820_v15, %v7296_v47  ;;  %v11446_v38 = vrot.slane %v1033_v54, 11  ;;  %v7313_v46 = vshrl.u32 %v7155_v37, 16  ;;  %v7316_v58 = vshll.u32 %v7155_v37, 16  ;;  %13177 = vmatprep.subr.bf16.mxu0 %v13999_v6  ;;  %v14003_v15 = vld [vmem:[%s14396_s4 + $0x1d8] sm:$0xff]   ;;  %v18187_v19 = vld [vmem:[#allocation110_spill] sm:$0xff] }
 0x17c   : > { %v1052_v43 = vor.u32 %v18179_v25, %v18177_v18  ;;  %v7306_v48 = vsel %vm15288_vm8, %v7298_v40, %v7305_v4  ;;  %v11821_v59 = vrot.slane %v7308_v23, 11  ;;  %v7322_v35 = vshrl.u32 %v7156_v36, 16  ;;  %v7160_v40 = vld [vmem:[#allocation2 + $0x90] sm:$0x8]  ;;  %v18186_v18 = vld [vmem:[#allocation113_spill] sm:$0xff] }
 0x17d   : > { %v11869_v63 = vcombine.low %v7297_v41, %v7306_v48  ;;  %v1044_v2 = vsel %vm15288_vm8, %v11446_v38, %v1043_v10  ;;  %v7315_v16 = vrot.slane %v7313_v46, 7  ;;  %v7325_v60 = vshll.u32 %v7156_v36, 16  ;;  %v7161_v10 = vld [vmem:[#allocation2 + $0x94] sm:$0xf]  ;;  %v7162_v23 = vld [vmem:[#allocation2 + $0x98] sm:$0xf] }
 0x17e   : > { %v1053_v44 = vsel %vm15288_vm8, %v1045_v52, %v1052_v43  ;;  %v7324_v34 = vrot.slane %v7322_v35, 7  ;;  %v1055_v61 = vshrl.u32 %v575_v14, 16  ;;  %v18182_v53 = vshll.u32 %v18181_v49, 16  ;;  %13178 = vmatpush3.bf16.msra.mxu0 %v13999_v6  ;;  %v18189_v46 = vld [vmem:[#allocation114_spill] sm:$0xff] }
 0x17f   : > { %v11537_v3 = vcombine.low %v1044_v2, %v1053_v44  ;;  %13115 = vmatprep.mubr.bf16.mxu0 %v11869_v63  ;;  %v7318_v57 = vor.u32 %v7316_v58, %v7315_v16  ;;  %v7320_v9 = vrot.slane %v7315_v16, 4  ;;  %v1067_v42 = vrot.slane %v18180_v51, 4  ;;  %13179 = vmatprep.subr.bf16.mxu0 %v14001_v45  ;;  %v18190_v58 = vld [vmem:[#allocation112_spill] sm:$0xff] }
 0x180   : > { %v1065_v7 = vor.u32 %v18182_v53, %v18180_v51  ;;  %v18185_v8 = vshll.u32 %v18184_v27, 16  ;;  %v7327_v11 = vor.u32 %v7325_v60, %v7324_v34  ;;  %v11447_v50 = vrot.slane %v1055_v61, 11  ;;  %v581_v2 = vld [vmem:[#allocation2 + $0x1e4] sm:$0x8]  ;;  %v7164_v53 = vld [vmem:[#allocation2 + $0xa8] sm:$0xf] }
 0x181   : > { %12748 = vmatmul.mubr.bf16.gmra.mrb[36].mxu1 %v11537_v3  ;;  %v7330_v30 = vshrl.u32 %v7157_v28, 16  ;;  %v7335_v29 = vshrl.u32 %v7158_v22, 16  ;;  %v7319_v31 = vsel %vm15288_vm8, %v11821_v59, %v7318_v57  ;;  %v7338_v33 = vshll.u32 %v7158_v22, 16  ;;  %v7163_v3 = vld [vmem:[#allocation2 + $0xa4] sm:$0x8] }
 0x182   : > { %v1074_v39 = vor.u32 %v18185_v8, %v18183_v62  ;;  %v7344_v32 = vshrl.u32 %v7159_v20, 16  ;;  %v7328_v56 = vsel %vm15288_vm8, %v7320_v9, %v7327_v11  ;;  %v1066_v37 = vsel %vm15288_vm8, %v11447_v50, %v1065_v7  ;;  %13180 = vmatpush3.bf16.msra.mxu0 %v14001_v45  ;;  %v14007_v7 = vld [vmem:[%s14396_s4 + $0x1e8] sm:$0xff]   ;;  %v18193_v62 = vld [vmem:[#allocation115_spill] sm:$0xff] }
 0x183   : > { %v11822_v6 = vrot.slane %v7330_v30, 11  ;;  %v7337_v47 = vrot.slane %v7335_v29, 7  ;;  %v11870_v54 = vcombine.low %v7319_v31, %v7328_v56  ;;  %v7347_v13 = vshll.u32 %v7159_v20, 16  ;;  %13181 = vmatprep.subr.bf16.mxu0 %v14003_v15  ;;  %v18195_v29 = vld [vmem:[#allocation118_spill] sm:$0xff] }
 0x184   : > { %v1075_v17 = vsel %vm15288_vm8, %v1067_v42, %v1074_v39  ;;  %v7346_v21 = vrot.slane %v7344_v32, 7  ;;  %v1077_v52 = vshrl.u32 %v578_v12, 16  ;;  %v18188_v25 = vshll.u32 %v18187_v19, 16  ;;  %v18192_v42 = vld [vmem:[#allocation117_spill] sm:$0xff] }
 0x185   : > { %v11538_v26 = vcombine.low %v1066_v37, %v1075_v17  ;;  %v7340_v36 = vor.u32 %v7338_v33, %v7337_v47  ;;  %v7342_v4 = vrot.slane %v7337_v47, 4  ;;  %13116 = vmatmul.mubr.bf16.gmra.mrb[4].mxu0 %v11870_v54  ;;  %v1089_v38 = vrot.slane %v18186_v18, 4  ;;  %v7165_v39 = vld [vmem:[#allocation2 + $0xac] sm:$0xf]  ;;  %v584_v54 = vld [vmem:[#allocation2 + $0x1f8] sm:$0x8] }
 0x186   : > { %v1087_v43 = vor.u32 %v18188_v25, %v18186_v18  ;;  %v7349_v41 = vor.u32 %v7347_v13, %v7346_v21  ;;  %v18191_v14 = vshll.u32 %v18190_v58, 16  ;;  %v7352_v45 = vshrl.u32 %v7160_v40, 16  ;;  %13182 = vmatpush3.bf16.msra.mxu0 %v14003_v15  ;;  %v18196_v15 = vld [vmem:[#allocation116_spill] sm:$0xff] }
 0x187   : > { %12751 = vmatprep.mubr.bf16.mxu1 %v11538_v26  ;;  %v7341_v44 = vsel %vm15288_vm8, %v11822_v6, %v7340_v36  ;;  %v11448_v59 = vrot.slane %v1077_v52, 11  ;;  %v7357_v35 = vshrl.u32 %v7161_v10, 16  ;;  %v7360_v63 = vshll.u32 %v7161_v10, 16  ;;  %13183 = vmatprep.subr.bf16.mxu0 %v14005_v55  ;;  %v7166_v36 = vld [vmem:[#allocation2 + $0xb8] sm:$0x8] }
 0x188   : > { %v1096_v48 = vor.u32 %v18191_v14, %v18189_v46  ;;  %v7350_v16 = vsel %vm15288_vm8, %v7342_v4, %v7349_v41  ;;  %v11823_v28 = vrot.slane %v7352_v45, 11  ;;  %v7366_v22 = vshrl.u32 %v7162_v23, 16  ;;  %v7167_v4 = vld [vmem:[#allocation2 + $0xbc] sm:$0xf]  ;;  %v18198_v41 = vld [vmem:[#allocation121_spill] sm:$0xff] }
 0x189   : > { %v11871_v34 = vcombine.low %v7341_v44, %v7350_v16  ;;  %v1088_v61 = vsel %vm15288_vm8, %v11448_v59, %v1087_v43  ;;  %v7359_v51 = vrot.slane %v7357_v35, 7  ;;  %v7369_v49 = vshll.u32 %v7162_v23, 16  ;;  %v7168_v14 = vld [vmem:[#allocation2 + $0xc0] sm:$0xf]  ;;  %v18201_v44 = vld [vmem:[#allocation123_spill] sm:$0xff] }
 0x18a   : > { %v1097_v60 = vsel %vm15288_vm8, %v1089_v38, %v1096_v48  ;;  %v7368_v57 = vrot.slane %v7366_v22, 7  ;;  %v1099_v9 = vshrl.u32 %v581_v2, 16  ;;  %v18194_v27 = vshll.u32 %v18193_v62, 16  ;;  %13184 = vmatpush3.bf16.msra.mxu0 %v14005_v55  ;;  %v18199_v38 = vld [vmem:[#allocation119_spill] sm:$0xff]  ;;  %v18202_v59 = vld [vmem:[#allocation120_spill] sm:$0xff] }
 0x18b   : > { %v11539_v20 = vcombine.low %v1088_v61, %v1097_v60  ;;  %13119 = vmatprep.mubr.bf16.mxu0 %v11871_v34  ;;  %v7362_v11 = vor.u32 %v7360_v63, %v7359_v51  ;;  %v7364_v50 = vrot.slane %v7359_v51, 4  ;;  %v1111_v30 = vrot.slane %v18192_v42, 4  ;;  %13185 = vmatprep.subr.bf16.mxu0 %v14007_v7 }
 0x18c   : > { %v1109_v8 = vor.u32 %v18194_v27, %v18192_v42  ;;  %v18197_v31 = vshll.u32 %v18196_v15, 16  ;;  %v7371_v33 = vor.u32 %v7369_v49, %v7368_v57  ;;  %v11449_v32 = vrot.slane %v1099_v9, 11  ;;  %v7169_v9 = vld [vmem:[#allocation2 + $0xcc] sm:$0x8]  ;;  %v7170_v42 = vld [vmem:[#allocation2 + $0xd0] sm:$0xf] }
 0x18d   : > { %12752 = vmatmul.mubr.bf16.gmra.mrb[40].mxu1 %v11539_v20  ;;  %v7374_v12 = vshrl.u32 %v7163_v3, 16  ;;  %v7379_v56 = vshrl.u32 %v7164_v53, 16  ;;  %v7363_v37 = vsel %vm15288_vm8, %v11823_v28, %v7362_v11  ;;  %v7382_v47 = vshll.u32 %v7164_v53, 16  ;;  %v587_v3 = vld [vmem:[#allocation2 + $0x20c] sm:$0x8]  ;;  %v18205_v11 = vld [vmem:[#allocation122_spill] sm:$0xff] }
 0x18e   : > { %v1118_v17 = vor.u32 %v18197_v31, %v18195_v29  ;;  %v7388_v40 = vshrl.u32 %v7165_v39, 16  ;;  %v7372_v26 = vsel %vm15288_vm8, %v7364_v50, %v7371_v33  ;;  %v1110_v21 = vsel %vm15288_vm8, %v11449_v32, %v1109_v8  ;;  %13186 = vmatpush3.bf16.msra.mxu0 %v14007_v7  ;;  %v7171_v29 = vld [vmem:[#allocation2 + $0xd4] sm:$0xf] }
 0x18f   : > { %v11824_v13 = vrot.slane %v7374_v12, 11  ;;  %v7381_v10 = vrot.slane %v7379_v56, 7  ;;  %v11872_v52 = vcombine.low %v7363_v37, %v7372_v26  ;;  %v7391_v25 = vshll.u32 %v7165_v39, 16  ;;  %v18204_v39 = vld [vmem:[#allocation125_spill] sm:$0xff]  ;;  %v14009_v15 = vld [vmem:[%s14396_s4 + $0x1f0] sm:$0xff]   ;;  %v18208_v12 = vld [vmem:[#allocation124_spill] sm:$0xff] }
 0x190   : > { %v1119_v6 = vsel %vm15288_vm8, %v1111_v30, %v1118_v17  ;;  %v7390_v19 = vrot.slane %v7388_v40, 7  ;;  %v1121_v55 = vshrl.u32 %v584_v54, 16  ;;  %v18200_v46 = vshll.u32 %v18199_v38, 16  ;;  %v18207_v32 = vld [vmem:[#allocation126_spill] sm:$0xff]  ;;  %13187 = vmatprep.subr.bf16.mxu0 %v14009_v15 }
 0x191   : > { %v11540_v18 = vcombine.low %v1110_v21, %v1119_v6  ;;  %v7384_v43 = vor.u32 %v7382_v47, %v7381_v10  ;;  %v7386_v23 = vrot.slane %v7381_v10, 4  ;;  %13120 = vmatmul.mubr.bf16.gmra.mrb[8].mxu0 %v11872_v52  ;;  %v1133_v45 = vrot.slane %v18198_v41, 4  ;;  %v590_v6 = vld [vmem:[#allocation2 + $0x220] sm:$0x8] }
 0x192   : > { %v1131_v58 = vor.u32 %v18200_v46, %v18198_v41  ;;  %v7393_v48 = vor.u32 %v7391_v25, %v7390_v19  ;;  %v18203_v35 = vshll.u32 %v18202_v59, 16  ;;  %v7396_v2 = vshrl.u32 %v7166_v36, 16  ;;  %v7172_v21 = vld [vmem:[#allocation2 + $0xe0] sm:$0x8]  ;;  %13188 = vmatpush3.bf16.msra.mxu0 %v14009_v15  ;;  %v18216_v15 = vld [vmem:[#allocation133_spill] sm:$0xff] }
 0x193   : > { %12755 = vmatprep.mubr.bf16.mxu1 %v11540_v18  ;;  %v7385_v16 = vsel %vm15288_vm8, %v11824_v13, %v7384_v43  ;;  %v11450_v60 = vrot.slane %v1121_v55, 11  ;;  %v7401_v28 = vshrl.u32 %v7167_v4, 16  ;;  %v7404_v22 = vshll.u32 %v7167_v4, 16  ;;  %v7173_v43 = vld [vmem:[#allocation2 + $0xe4] sm:$0xf] }
 0x194   : > { %v1140_v63 = vor.u32 %v18203_v35, %v18201_v44  ;;  %v7394_v34 = vsel %vm15288_vm8, %v7386_v23, %v7393_v48  ;;  %v11825_v51 = vrot.slane %v7396_v2, 11  ;;  %v7410_v49 = vshrl.u32 %v7168_v14, 16  ;;  %v7174_v23 = vld [vmem:[#allocation2 + $0xe8] sm:$0xf]  ;;  %v18211_v44 = vld [vmem:[#allocation127_spill] sm:$0xff] }
 0x195   : > { %v11873_v53 = vcombine.low %v7385_v16, %v7394_v34  ;;  %v1132_v7 = vsel %vm15288_vm8, %v11450_v60, %v1131_v58  ;;  %v7403_v20 = vrot.slane %v7401_v28, 7  ;;  %v7413_v57 = vshll.u32 %v7168_v14, 16  ;;  %v18213_v60 = vld [vmem:[#allocation130_spill] sm:$0xff]  ;;  %v18214_v28 = vld [vmem:[#allocation128_spill] sm:$0xff] }
 0x196   : > { %v1141_v61 = vsel %vm15288_vm8, %v1133_v45, %v1140_v63  ;;  %v7412_v27 = vrot.slane %v7410_v49, 7  ;;  %v1143_v8 = vshrl.u32 %v587_v3, 16  ;;  %v18206_v50 = vshll.u32 %v18205_v11, 16  ;;  %v18210_v45 = vld [vmem:[#allocation129_spill] sm:$0xff]  ;;  %v593_v63 = vld [vmem:[#allocation2 + $0x234] sm:$0x8] }
 0x197   : > { %v11541_v62 = vcombine.low %v1132_v7, %v1141_v61  ;;  %13123 = vmatprep.mubr.bf16.mxu0 %v11873_v53  ;;  %v7406_v31 = vor.u32 %v7404_v22, %v7403_v20  ;;  %v7408_v17 = vrot.slane %v7403_v20, 4  ;;  %v1155_v33 = vrot.slane %v18204_v39, 4  ;;  %v7175_v7 = vld [vmem:[#allocation2 + $0xf4] sm:$0x8]  ;;  %v7176_v20 = vld [vmem:[#allocation2 + $0xf8] sm:$0xf] }
 0x198   : > { %v1153_v30 = vor.u32 %v18206_v50, %v18204_v39  ;;  %v18209_v56 = vshll.u32 %v18208_v12, 16  ;;  %v7415_v47 = vor.u32 %v7413_v57, %v7412_v27  ;;  %v11451_v40 = vrot.slane %v1143_v8, 11 }
 0x199   : > { %12756 = vmatmul.mubr.bf16.gmra.mrb[44].mxu1 %v11541_v62  ;;  %v7418_v54 = vshrl.u32 %v7169_v9, 16  ;;  %v7423_v26 = vshrl.u32 %v7170_v42, 16  ;;  %v7407_v13 = vsel %vm15288_vm8, %v11825_v51, %v7406_v31  ;;  %v7426_v36 = vshll.u32 %v7170_v42, 16  ;;  %v18217_v31 = vld [vmem:[#allocation131_spill] sm:$0xff] }
 0x19a   : > { %v1162_v37 = vor.u32 %v18209_v56, %v18207_v32  ;;  %v7432_v4 = vshrl.u32 %v7171_v29, 16  ;;  %v7416_v52 = vsel %vm15288_vm8, %v7408_v17, %v7415_v47  ;;  %v1154_v18 = vsel %vm15288_vm8, %v11451_v40, %v1153_v30  ;;  %v7177_v32 = vld [vmem:[#allocation2 + $0xfc] sm:$0xf]  ;;  %v18220_v47 = vld [vmem:[#allocation132_spill] sm:$0xff] }
 0x19b   : > { %v11826_v19 = vrot.slane %v7418_v54, 11  ;;  %v7425_v25 = vrot.slane %v7423_v26, 7  ;;  %v11874_v55 = vcombine.low %v7407_v13, %v7416_v52  ;;  %v7435_v46 = vshll.u32 %v7171_v29, 16 }
 0x19c   : > { %v1163_v10 = vsel %vm15288_vm8, %v1155_v33, %v1162_v37  ;;  %v7434_v38 = vrot.slane %v7432_v4, 7  ;;  %v1165_v48 = vshrl.u32 %v590_v6, 16  ;;  %v18212_v59 = vshll.u32 %v18211_v44, 16  ;;  %v18219_v6 = vld [vmem:[#allocation135_spill] sm:$0xff] }
 0x19d   : > { %v11542_v41 = vcombine.low %v1154_v18, %v1163_v10  ;;  %v7428_v58 = vor.u32 %v7426_v36, %v7425_v25  ;;  %v7430_v14 = vrot.slane %v7425_v25, 4  ;;  %13124 = vmatmul.mubr.bf16.gmra.mrb[12].mxu0 %v11874_v55  ;;  %v1177_v16 = vrot.slane %v18210_v45, 4 }
 0x19e   : > { %v1175_v35 = vor.u32 %v18212_v59, %v18210_v45  ;;  %v7437_v2 = vor.u32 %v7435_v46, %v7434_v38  ;;  %v18215_v22 = vshll.u32 %v18214_v28, 16  ;;  %v7440_v34 = vshrl.u32 %v7172_v21, 16  ;;  %v7179_v38 = vld [vmem:[#allocation2 + $0x10c] sm:$0xf]  ;;  %v7180_v45 = vld [vmem:[#allocation2 + $0x110] sm:$0xf] }
 0x19f   : > { %12759 = vmatprep.mubr.bf16.mxu1 %v11542_v41  ;;  %v7429_v61 = vsel %vm15288_vm8, %v11826_v19, %v7428_v58  ;;  %v11452_v51 = vrot.slane %v1165_v48, 11  ;;  %v7445_v49 = vshrl.u32 %v7173_v43, 16  ;;  %v7448_v53 = vshll.u32 %v7173_v43, 16  ;;  %v596_v19 = vld [vmem:[#allocation2 + $0x248] sm:$0x8] }
 0x1a0   : > { %v1184_v3 = vor.u32 %v18215_v22, %v18213_v60  ;;  %v7438_v57 = vsel %vm15288_vm8, %v7430_v14, %v7437_v2  ;;  %v11827_v42 = vrot.slane %v7440_v34, 11  ;;  %v7454_v62 = vshrl.u32 %v7174_v23, 16  ;;  %v7178_v41 = vld [vmem:[#allocation2 + $0x108] sm:$0x8]  ;;  %v18223_v2 = vld [vmem:[#allocation134_spill] sm:$0xff]  ;;  %v18225_v34 = vld [vmem:[#allocation139_spill] sm:$0xff] }
 0x1a1   : > { %v11875_v27 = vcombine.low %v7429_v61, %v7438_v57  ;;  %v1176_v8 = vsel %vm15288_vm8, %v11452_v51, %v1175_v35  ;;  %v7447_v39 = vrot.slane %v7445_v49, 7  ;;  %v7457_v11 = vshll.u32 %v7174_v23, 16  ;;  %v599_v28 = vld [vmem:[#allocation2 + $0x25c] sm:$0x8]  ;;  %v18226_v61 = vld [vmem:[#allocation136_spill] sm:$0xff] }
 0x1a2   : > { %v1185_v9 = vsel %vm15288_vm8, %v1177_v16, %v1184_v3  ;;  %v7456_v30 = vrot.slane %v7454_v62, 7  ;;  %v1187_v29 = vshrl.u32 %v593_v63, 16  ;;  %v18218_v17 = vshll.u32 %v18217_v31, 16  ;;  %v18222_v63 = vld [vmem:[#allocation137_spill] sm:$0xff] }
 0x1a3   : > { %v11543_v50 = vcombine.low %v1176_v8, %v1185_v9  ;;  %13127 = vmatprep.mubr.bf16.mxu0 %v11875_v27  ;;  %v7450_v12 = vor.u32 %v7448_v53, %v7447_v39  ;;  %v7452_v56 = vrot.slane %v7447_v39, 4  ;;  %v1199_v37 = vrot.slane %v18216_v15, 4  ;;  %v7181_v39 = vld [vmem:[#allocation2 + $0x11c] sm:$0x8] }
 0x1a4   : > { %v1197_v33 = vor.u32 %v18218_v17, %v18216_v15  ;;  %v18221_v40 = vshll.u32 %v18220_v47, 16  ;;  %v7459_v26 = vor.u32 %v7457_v11, %v7456_v30  ;;  %v11453_v21 = vrot.slane %v1187_v29, 11  ;;  %v7182_v11 = vld [vmem:[#allocation2 + $0x120] sm:$0xf] }
 0x1a5   : > { %12760 = vmatmul.mubr.bf16.gmra.mrb[48].mxu1 %v11543_v50  ;;  %v7462_v13 = vshrl.u32 %v7175_v7, 16  ;;  %v7467_v10 = vshrl.u32 %v7176_v20, 16  ;;  %v7451_v36 = vsel %vm15288_vm8, %v11827_v42, %v7450_v12  ;;  %v7470_v52 = vshll.u32 %v7176_v20, 16  ;;  %v18229_v12 = vld [vmem:[#allocation138_spill] sm:$0xff] }
 0x1a6   : > { %v1206_v54 = vor.u32 %v18221_v40, %v18219_v6  ;;  %v7476_v18 = vshrl.u32 %v7177_v32, 16  ;;  %v7460_v25 = vsel %vm15288_vm8, %v7452_v56, %v7459_v26  ;;  %v1198_v43 = vsel %vm15288_vm8, %v11453_v21, %v1197_v33  ;;  %v7183_v6 = vld [vmem:[#allocation2 + $0x124] sm:$0xf]  ;;  %v18231_v26 = vld [vmem:[#allocation142_spill] sm:$0xff] }
 0x1a7   : > { %v11828_v23 = vrot.slane %v7462_v13, 11  ;;  %v7469_v55 = vrot.slane %v7467_v10, 7  ;;  %v11876_v46 = vcombine.low %v7451_v36, %v7460_v25  ;;  %v7479_v48 = vshll.u32 %v7177_v32, 16  ;;  %v18228_v32 = vld [vmem:[#allocation141_spill] sm:$0xff]  ;;  %v18232_v21 = vld [vmem:[#allocation140_spill] sm:$0xff] }
 0x1a8   : > { %v1207_v4 = vsel %vm15288_vm8, %v1199_v37, %v1206_v54  ;;  %v7478_v14 = vrot.slane %v7476_v18, 7  ;;  %v1209_v35 = vshrl.u32 %v596_v19, 16  ;;  %v18224_v16 = vshll.u32 %v18223_v2, 16 }
 0x1a9   : > { %v11544_v58 = vcombine.low %v1198_v43, %v1207_v4  ;;  %v7472_v44 = vor.u32 %v7470_v52, %v7469_v55  ;;  %v7474_v59 = vrot.slane %v7469_v55, 4  ;;  %13128 = vmatmul.mubr.bf16.gmra.mrb[16].mxu0 %v11876_v46  ;;  %v1221_v3 = vrot.slane %v18222_v63, 4  ;;  %v602_v55 = vld [vmem:[#allocation2 + $0x270] sm:$0x8] }
 0x1aa   : > { %v1219_v60 = vor.u32 %v18224_v16, %v18222_v63  ;;  %v7481_v22 = vor.u32 %v7479_v48, %v7478_v14  ;;  %v18227_v51 = vshll.u32 %v18226_v61, 16  ;;  %v7484_v53 = vshrl.u32 %v7178_v41, 16  ;;  %v7184_v14 = vld [vmem:[#allocation2 + $0x130] sm:$0x8] }
 0x1ab   : > { %12763 = vmatprep.mubr.bf16.mxu1 %v11544_v58  ;;  %v7473_v7 = vsel %vm15288_vm8, %v11828_v23, %v7472_v44  ;;  %v11454_v20 = vrot.slane %v1209_v35, 11  ;;  %v7489_v57 = vshrl.u32 %v7179_v38, 16  ;;  %v7492_v9 = vshll.u32 %v7179_v38, 16  ;;  %v7185_v35 = vld [vmem:[#allocation2 + $0x134] sm:$0xf] }
 0x1ac   : > { %v1228_v49 = vor.u32 %v18227_v51, %v18225_v34  ;;  %v7482_v42 = vsel %vm15288_vm8, %v7474_v59, %v7481_v22  ;;  %v11829_v27 = vrot.slane %v7484_v53, 11  ;;  %v7498_v8 = vshrl.u32 %v7180_v45, 16  ;;  %v7186_v34 = vld [vmem:[#allocation2 + $0x138] sm:$0xf]  ;;  %v18238_v53 = vld [vmem:[#allocation144_spill] sm:$0xff] }
 0x1ad   : > { %v11877_v50 = vcombine.low %v7473_v7, %v7482_v42  ;;  %v1220_v30 = vsel %vm15288_vm8, %v11454_v20, %v1219_v60  ;;  %v7491_v29 = vrot.slane %v7489_v57, 7  ;;  %v7501_v15 = vshll.u32 %v7180_v45, 16  ;;  %v18234_v60 = vld [vmem:[#allocation145_spill] sm:$0xff] }
 0x1ae   : > { %v1229_v62 = vsel %vm15288_vm8, %v1221_v3, %v1228_v49  ;;  %v7500_v17 = vrot.slane %v7498_v8, 7  ;;  %v1231_v33 = vshrl.u32 %v599_v28, 16  ;;  %v18230_v56 = vshll.u32 %v18229_v12, 16  ;;  %v18235_v28 = vld [vmem:[#allocation143_spill] sm:$0xff]  ;;  %v605_v8 = vld [vmem:[#allocation2 + $0x284] sm:$0x8] }
 0x1af   : > { %v11545_v31 = vcombine.low %v1220_v30, %v1229_v62  ;;  %13131 = vmatprep.mubr.bf16.mxu0 %v11877_v50  ;;  %v7494_v47 = vor.u32 %v7492_v9, %v7491_v29  ;;  %v7496_v40 = vrot.slane %v7491_v29, 4  ;;  %v1243_v54 = vrot.slane %v18228_v32, 4  ;;  %v18237_v49 = vld [vmem:[#allocation147_spill] sm:$0xff]  ;;  %v7187_v29 = vld [vmem:[#allocation2 + $0x144] sm:$0x8] }
 0x1b0   : > { %v1241_v37 = vor.u32 %v18230_v56, %v18228_v32  ;;  %v18233_v13 = vshll.u32 %v18232_v21, 16  ;;  %v7503_v36 = vor.u32 %v7501_v15, %v7500_v17  ;;  %v11455_v4 = vrot.slane %v1231_v33, 11  ;;  %v7188_v32 = vld [vmem:[#allocation2 + $0x148] sm:$0xf]  ;;  %v14011_v12 = vld [vmem:[%s14396_s4 + $0x1f8] sm:$0xff]  }
 0x1b1   : > { %12764 = vmatmul.mubr.bf16.gmra.mrb[52].mxu1 %v11545_v31  ;;  %v7506_v52 = vshrl.u32 %v7181_v39, 16  ;;  %v7511_v18 = vshrl.u32 %v7182_v11, 16  ;;  %v7495_v19 = vsel %vm15288_vm8, %v11829_v27, %v7494_v47  ;;  %v7514_v43 = vshll.u32 %v7182_v11, 16  ;;  %v18240_v47 = vld [vmem:[#allocation149_spill] sm:$0xff]  ;;  %13189 = vmatprep.subr.bf16.mxu0 %v14011_v12 }
 0x1b2   : > { %v1250_v10 = vor.u32 %v18233_v13, %v18231_v26  ;;  %v7520_v23 = vshrl.u32 %v7183_v6, 16  ;;  %v7504_v41 = vsel %vm15288_vm8, %v7496_v40, %v7503_v36  ;;  %v1242_v38 = vsel %vm15288_vm8, %v11455_v4, %v1241_v37  ;;  %v18241_v40 = vld [vmem:[#allocation146_spill] sm:$0xff]  ;;  %v7189_v21 = vld [vmem:[#allocation2 + $0x14c] sm:$0xf]  ;;  %13190 = vmatpush3.bf16.msra.mxu0 %v14011_v12 }
 0x1b3   : > { %v11830_v46 = vrot.slane %v7506_v52, 11  ;;  %v7513_v58 = vrot.slane %v7511_v18, 7  ;;  %v11878_v48 = vcombine.low %v7495_v19, %v7504_v41  ;;  %v7523_v59 = vshll.u32 %v7183_v6, 16  ;;  %v18243_v4 = vld [vmem:[#allocation150_spill] sm:$0xff]  ;;  %v18244_v52 = vld [vmem:[#allocation148_spill] sm:$0xff] }
 0x1b4   : > { %v1251_v25 = vsel %vm15288_vm8, %v1243_v54, %v1250_v10  ;;  %v7522_v44 = vrot.slane %v7520_v23, 7  ;;  %v1253_v16 = vshrl.u32 %v602_v55, 16  ;;  %v18236_v22 = vshll.u32 %v18235_v28, 16  ;;  %v7191_v28 = vld [vmem:[#allocation2 + $0x15c] sm:$0xf] }
 0x1b5   : > { %v11546_v45 = vcombine.low %v1242_v38, %v1251_v25  ;;  %v7516_v63 = vor.u32 %v7514_v43, %v7513_v58  ;;  %v7518_v2 = vrot.slane %v7513_v58, 4  ;;  %13132 = vmatmul.mubr.bf16.gmra.mrb[20].mxu0 %v11878_v48  ;;  %v1265_v51 = vrot.slane %v18234_v60, 4  ;;  %v2354_v12 = vld [vmem:[#allocation2 + $0x10] sm:$0x1] }
 0x1b6   : > { %v1263_v3 = vor.u32 %v18236_v22, %v18234_v60  ;;  %v7525_v61 = vor.u32 %v7523_v59, %v7522_v44  ;;  %v18239_v7 = vshll.u32 %v18238_v53, 16  ;;  %v7528_v57 = vshrl.u32 %v7184_v14, 16  ;;  %v608_v14 = vld [vmem:[#allocation2 + $0x298] sm:$0x8] }
 0x1b7   : > { %12767 = vmatprep.mubr.bf16.mxu1 %v11546_v45  ;;  %v7517_v9 = vsel %vm15288_vm8, %v11830_v46, %v7516_v63  ;;  %v11456_v42 = vrot.slane %v1253_v16, 11  ;;  %v7533_v62 = vshrl.u32 %v7185_v35, 16  ;;  %v7536_v27 = vshll.u32 %v7185_v35, 16  ;;  %v7190_v35 = vld [vmem:[#allocation2 + $0x158] sm:$0x8] }
 0x1b8   : > { %v1272_v20 = vor.u32 %v18239_v7, %v18237_v49  ;;  %v7526_v39 = vsel %vm15288_vm8, %v7518_v2, %v7525_v61  ;;  %v11831_v50 = vrot.slane %v7528_v57, 11  ;;  %v7542_v30 = vshrl.u32 %v7186_v34, 16  ;;  %v7192_v49 = vld [vmem:[#allocation2 + $0x160] sm:$0xf]  ;;  %v18248_v57 = vld [vmem:[#allocation151_spill] sm:$0xff] }
 0x1b9   : > { %v11879_v15 = vcombine.low %v7517_v9, %v7526_v39  ;;  %v1264_v31 = vsel %vm15288_vm8, %v11456_v42, %v1263_v3  ;;  %v7535_v17 = vrot.slane %v7533_v62, 7  ;;  %v7545_v33 = vshll.u32 %v7186_v34, 16 }
 0x1ba   : > { %v1273_v11 = vsel %vm15288_vm8, %v1265_v51, %v1272_v20  ;;  %v7544_v37 = vrot.slane %v7542_v30, 7  ;;  %v1275_v6 = vshrl.u32 %v605_v8, 16  ;;  %v18242_v54 = vshll.u32 %v18241_v40, 16  ;;  %v18247_v20 = vld [vmem:[#allocation152_spill] sm:$0xff]  ;;  %v7193_v40 = vld [vmem:[#allocation2 + $0x194] sm:$0x8] }
 0x1bb   : > { %v11547_v56 = vcombine.low %v1264_v31, %v1273_v11  ;;  %13135 = vmatprep.mubr.bf16.mxu0 %v11879_v15  ;;  %v7538_v13 = vor.u32 %v7536_v27, %v7535_v17  ;;  %v7540_v10 = vrot.slane %v7535_v17, 4  ;;  %v1287_v36 = vrot.slane %v18240_v47, 4  ;;  %v2353_v15 = vld [vmem:[#allocation2 + $0xc] sm:$0xf] }
 0x1bc   : > { %v1285_v26 = vor.u32 %v18242_v54, %v18240_v47  ;;  %v18245_v18 = vshll.u32 %v18244_v52, 16  ;;  %v7547_v25 = vor.u32 %v7545_v33, %v7544_v37  ;;  %v11457_v43 = vrot.slane %v1275_v6, 11 }
 0x1bd   : > { %12768 = vmatmul.mubr.bf16.gmra.mrb[56].mxu1 %v11547_v56  ;;  %v7550_v23 = vshrl.u32 %v7187_v29, 16  ;;  %v7555_v55 = vshrl.u32 %v7188_v32, 16  ;;  %v7539_v41 = vsel %vm15288_vm8, %v11831_v50, %v7538_v13  ;;  %v7558_v46 = vshll.u32 %v7188_v32, 16  ;;  %v2352_v50 = vld [vmem:[#allocation2 + $0x8] sm:$0xf] }
 0x1be   : > { %v1294_v19 = vor.u32 %v18245_v18, %v18243_v4  ;;  %v7564_v58 = vshrl.u32 %v7189_v21, 16  ;;  %v7548_v48 = vsel %vm15288_vm8, %v7540_v10, %v7547_v25  ;;  %v1286_v45 = vsel %vm15288_vm8, %v11457_v43, %v1285_v26  ;;  %v7194_v10 = vld [vmem:[#allocation2 + $0x198] sm:$0xf] }
 0x1bf   : > { %v11832_v44 = vrot.slane %v7550_v23, 11  ;;  %v7557_v59 = vrot.slane %v7555_v55, 7  ;;  %v11880_v63 = vcombine.low %v7539_v41, %v7548_v48  ;;  %v7567_v60 = vshll.u32 %v7189_v21, 16  ;;  %v7195_v23 = vld [vmem:[#allocation2 + $0x19c] sm:$0xf] }
 0x1c0   : > { %v1295_v38 = vsel %vm15288_vm8, %v1287_v36, %v1294_v19  ;;  %v7566_v16 = vrot.slane %v7564_v58, 7  ;;  %v1297_v34 = vshrl.u32 %v608_v14, 16  ;;  %v18246_v61 = vshll.u32 %v15264_v5, 16  ;;  %v2355_v14 = vld [vmem:[#allocation2 + $0x1c] sm:$0xf] }
 0x1c1   : > { %v11548_v2 = vcombine.low %v1286_v45, %v1295_v38  ;;  %v7560_v22 = vor.u32 %v7558_v46, %v7557_v59  ;;  %v7562_v3 = vrot.slane %v7557_v59, 4  ;;  %13136 = vmatmul.mubr.bf16.gmra.mrb[24].mxu0 %v11880_v63  ;;  %v1309_v7 = vrot.slane %v15276_v0, 4  ;;  %v2356_v48 = vld [vmem:[#allocation2 + $0x20] sm:$0xf] }
 0x1c2   : > { %v1307_v51 = vor.u32 %v18246_v61, %v15276_v0  ;;  %v7569_v53 = vor.u32 %v7567_v60, %v7566_v16  ;;  %v18249_v9 = vshll.u32 %v18248_v57, 16  ;;  %v7572_v62 = vshrl.u32 %v7190_v35, 16  ;;  %v7197_v57 = vld [vmem:[#allocation2 + $0x1ac] sm:$0xf] }
 0x1c3   : > { %12771 = vmatprep.mubr.bf16.mxu1 %v11548_v2  ;;  %v7561_v27 = vsel %vm15288_vm8, %v11832_v44, %v7560_v22  ;;  %v11458_v8 = vrot.slane %v1297_v34, 11  ;;  %v7577_v39 = vshrl.u32 %v7191_v28, 16  ;;  %v7580_v11 = vshll.u32 %v7191_v28, 16  ;;  %v2357_v22 = vld [vmem:[#allocation2 + $0x24] sm:$0x1] }
 0x1c4   : > { %v1316_v42 = vor.u32 %v18249_v9, %v18247_v20  ;;  %v7570_v5 = vsel %vm15288_vm8, %v7562_v3, %v7569_v53  ;;  %v11833_v29 = vrot.slane %v7572_v62, 11  ;;  %v7586_v0 = vshrl.u32 %v7192_v49, 16  ;;  %v7196_v20 = vld [vmem:[#allocation2 + $0x1a8] sm:$0x8] }
 0x1c5   : > { %v11881_v31 = vcombine.low %v7561_v27, %v7570_v5  ;;  %v1308_v17 = vsel %vm15288_vm8, %v11458_v8, %v1307_v51  ;;  %v7579_v33 = vrot.slane %v7577_v39, 7  ;;  %v7589_v32 = vshll.u32 %v7192_v49, 16  ;;  %v7198_v8 = vld [vmem:[#allocation2 + $0x1b0] sm:$0xf] }
 0x1c6   : > { %v1317_v30 = vsel %vm15288_vm8, %v1309_v7, %v1316_v42  ;;  %v7588_v37 = vrot.slane %v7586_v0, 7  ;;  %v2452_v6 = vshrl.u32 %v2352_v50, 16  ;;  %v2455_v47 = vshll.u32 %v2352_v50, 16 }
 0x1c7   : > { %v11549_v56 = vcombine.low %v1308_v17, %v1317_v30  ;;  %13139 = vmatprep.mubr.bf16.mxu0 %v11881_v31  ;;  %v7582_v54 = vor.u32 %v7580_v11, %v7579_v33  ;;  %v7584_v26 = vrot.slane %v7579_v33, 4  ;;  %v2461_v21 = vshll.u32 %v2353_v15, 16  ;;  %v2358_v31 = vld [vmem:[#allocation2 + $0x30] sm:$0xf] }
 0x1c8   : > { %v2465_v13 = vshrl.u32 %v2353_v15, 16  ;;  %v7591_v36 = vor.u32 %v7589_v32, %v7588_v37  ;;  %v2454_v4 = vrot.slane %v2452_v6, 4  ;;  %v2457_v52 = vrot.slane %v2455_v47, 5 }
 0x1c9   : > { %12772 = vmatmul.mubr.bf16.gmra.mrb[60].mxu1 %v11549_v56  ;;  %v2471_v18 = vshll.u32 %v2354_v12, 16  ;;  %v7583_v19 = vsel %vm15288_vm8, %v11833_v29, %v7582_v54  ;;  %v2463_v25 = vrot.slane %v2461_v21, 5  ;;  %v7594_v55 = vshrl.u32 %v7193_v40, 16  ;;  %v2359_v56 = vld [vmem:[#allocation2 + $0x34] sm:$0xf]  ;;  %v14015_v54 = vld [vmem:[%s14396_s4 + $0x200] sm:$0xff]  }
 0x1ca   : > { %v2467_v43 = vrot.slane %v2465_v13, 4  ;;  %v7592_v41 = vsel %vm15288_vm8, %v7584_v26, %v7591_v36  ;;  %v2458_v38 = vor.u32 %v2457_v52, %v2454_v4  ;;  %v7599_v58 = vshrl.u32 %v7194_v10, 16  ;;  %v2360_v4 = vld [vmem:[#allocation2 + $0x38] sm:$0x1]  ;;  %13255 = vmatprep.subr.bf16.mxu0 %v14015_v54 }
 0x1cb   : > { %v2473_v46 = vrot.slane %v2471_v18, 5  ;;  %v11882_v45 = vcombine.low %v7583_v19, %v7592_v41  ;;  %v11834_v59 = vrot.slane %v7594_v55, 11  ;;  %v7602_v35 = vshll.u32 %v7194_v10, 16  ;;  %v7199_v41 = vld [vmem:[#allocation2 + $0x1bc] sm:$0x8] }
 0x1cc   : > { %v2468_v44 = vor.u32 %v2467_v43, %v2463_v25  ;;  %v2459_v63 = vrot.slane %v2458_v38, 4  ;;  %v7601_v2 = vrot.slane %v7599_v58, 7  ;;  %v7608_v16 = vshrl.u32 %v7195_v23, 16 }
 0x1cd   : > { %v7611_v60 = vshll.u32 %v7195_v23, 16  ;;  %13140 = vmatmul.mubr.bf16.gmra.mrb[28].mxu0 %v11882_v45  ;;  %v2476_v3 = vshrl.u32 %v2355_v14, 16  ;;  %v2479_v34 = vshll.u32 %v2355_v14, 16  ;;  %v2485_v61 = vshll.u32 %v2356_v48, 16 }
 0x1ce   : > { %v2469_v28 = vrot.slane %v2468_v44, 4  ;;  %v2464_v51 = vsel %vm15013_vm5, %v2459_v63, %v2463_v25  ;;  %v7604_v49 = vor.u32 %v7602_v35, %v7601_v2  ;;  %v7606_v53 = vrot.slane %v7601_v2, 4  ;;  %v7201_v63 = vld [vmem:[#allocation2 + $0x1c4] sm:$0xf] }
 0x1cf   : > { %v7610_v7 = vrot.slane %v7608_v16, 7  ;;  %v2478_v42 = vrot.slane %v2476_v3, 4  ;;  %v2481_v62 = vrot.slane %v2479_v34, 5  ;;  %v2487_v27 = vrot.slane %v2485_v61, 5  ;;  %v14006_v3 = vld [vmem:[%s14396_s4 + $0xc8] sm:$0xff]  }
 0x1d0   : > { %v2474_v9 = vsel %vm15013_vm5, %v2469_v28, %v2473_v46  ;;  %v7605_v11 = vsel %vm15288_vm8, %v11834_v59, %v7604_v49  ;;  %v2489_v5 = vshrl.u32 %v2356_v48, 16  ;;  %v2495_v29 = vshll.u32 %v2357_v22, 16  ;;  %v7200_v48 = vld [vmem:[#allocation2 + $0x1c0] sm:$0xf]  ;;  %v2361_v22 = vld [vmem:[#allocation2 + $0x44] sm:$0xf] }
 0x1d1   : > { %v11575_v39 = vcombine.low %v2464_v51, %v2474_v9  ;;  %v7613_v50 = vor.u32 %v7611_v60, %v7610_v7  ;;  %v2482_v30 = vor.u32 %v2481_v62, %v2478_v42  ;;  %v7616_v0 = vshrl.u32 %v7196_v20, 16  ;;  %v14074_v42 = vld [vmem:[%s14396_s4 + $0xc0] sm:$0xff]  }
 0x1d2   : > { %v7621_v15 = vshrl.u32 %v7197_v57, 16  ;;  %v2491_v33 = vrot.slane %v2489_v5, 4  ;;  %v7624_v32 = vshll.u32 %v7197_v57, 16  ;;  %v7630_v12 = vshrl.u32 %v7198_v8, 16 }
 0x1d3   : > { %12791 = vmatprep.mubr.bf16.mxu1 %v11575_v39  ;;  %v7614_v17 = vsel %vm15288_vm8, %v7606_v53, %v7613_v50  ;;  %v2483_v6 = vrot.slane %v2482_v30, 4  ;;  %v2497_v47 = vrot.slane %v2495_v29, 5  ;;  %v11835_v40 = vrot.slane %v7616_v0, 11  ;;  %v2362_v53 = vld [vmem:[#allocation2 + $0x48] sm:$0xf] }
 0x1d4   : > { %v11883_v37 = vcombine.low %v7605_v11, %v7614_v17  ;;  %v2492_v26 = vor.u32 %v2491_v33, %v2487_v27  ;;  %v7623_v21 = vrot.slane %v7621_v15, 7  ;;  %v7632_v13 = vrot.slane %v7630_v12, 7  ;;  %v7202_v0 = vld [vmem:[#allocation2 + $0x1d0] sm:$0x8]  ;;  %v7203_v12 = vld [vmem:[#allocation2 + $0x1d4] sm:$0xf] }
 0x1d5   : > { %v7633_v10 = vshll.u32 %v7198_v8, 16  ;;  %v2488_v36 = vsel %vm15013_vm5, %v2483_v6, %v2487_v27  ;;  %v2500_v52 = vshrl.u32 %v2358_v31, 16  ;;  %v2503_v18 = vshll.u32 %v2358_v31, 16  ;;  %v2363_v8 = vld [vmem:[#allocation2 + $0x4c] sm:$0x1]  ;;  %v14008_v15 = vld [vmem:[%s14396_s4 + $0xd0] sm:$0xff]  }
 0x1d6   : > { %13143 = vmatprep.mubr.bf16.mxu0 %v11883_v37  ;;  %v2509_v19 = vshll.u32 %v2359_v56, 16  ;;  %v2493_v25 = vrot.slane %v2492_v26, 4  ;;  %v7626_v43 = vor.u32 %v7624_v32, %v7623_v21  ;;  %v7628_v23 = vrot.slane %v7623_v21, 4 }
 0x1d7   : > { %v7635_v55 = vor.u32 %v7633_v10, %v7632_v13  ;;  %v2502_v38 = vrot.slane %v2500_v52, 4  ;;  %v2505_v46 = vrot.slane %v2503_v18, 5  ;;  %v2513_v14 = vshrl.u32 %v2359_v56, 16  ;;  %v7204_v13 = vld [vmem:[#allocation2 + $0x1d8] sm:$0xf] }
 0x1d8   : > { %v2511_v58 = vrot.slane %v2509_v19, 5  ;;  %v2498_v45 = vsel %vm15013_vm5, %v2493_v25, %v2497_v47  ;;  %v7627_v44 = vsel %vm15288_vm8, %v11835_v40, %v7626_v43  ;;  %v2519_v35 = vshll.u32 %v2360_v4, 16  ;;  %v2364_v18 = vld [vmem:[#allocation2 + $0x58] sm:$0xf] }
 0x1d9   : > { %v7636_v59 = vsel %vm15288_vm8, %v7628_v23, %v7635_v55  ;;  %v11576_v2 = vcombine.low %v2488_v36, %v2498_v45  ;;  %v2506_v60 = vor.u32 %v2505_v46, %v2502_v38  ;;  %v2515_v28 = vrot.slane %v2513_v14, 4  ;;  %v14010_v19 = vld [vmem:[%s14396_s4 + $0xd8] sm:$0xff]  }
 0x1da   : > { %v11884_v16 = vcombine.low %v7627_v44, %v7636_v59  ;;  %v2521_v34 = vrot.slane %v2519_v35, 5  ;;  %v7638_v61 = vshrl.u32 %v7199_v41, 16  ;;  %v7643_v51 = vshrl.u32 %v7200_v48, 16  ;;  %v2365_v14 = vld [vmem:[#allocation2 + $0x5c] sm:$0xf] }
 0x1db   : > { %v7646_v49 = vshll.u32 %v7200_v48, 16  ;;  %12792 = vmatmul.mubr.bf16.vlgmr.msra.gmra.mrb[0].mxu1 %v11576_v2  ;;  %v2507_v7 = vrot.slane %v2506_v60, 4  ;;  %v2516_v20 = vor.u32 %v2515_v28, %v2511_v58  ;;  %v7652_v57 = vshrl.u32 %v7201_v63, 16  ;;  %v2366_v44 = vld [vmem:[#allocation2 + $0x60] sm:$0x1] }
 0x1dc   : > { %13144 = vmatmul.mubr.bf16.gmra.mrb[32].mxu0 %v11884_v16  ;;  %v7655_v9 = vshll.u32 %v7201_v63, 16  ;;  %12856 = vmatpush3.bf16.msra.mxu1 %v14074_v42  ;;  %v11836_v62 = vrot.slane %v7638_v61, 11  ;;  %v7645_v27 = vrot.slane %v7643_v51, 7  ;;  %v2524_v39 = vshrl.u32 %v2361_v22, 16  ;;  %v7205_v28 = vld [vmem:[#allocation2 + $0x1e4] sm:$0x8] }
 0x1dd   : > { %v2527_v11 = vshll.u32 %v2361_v22, 16  ;;  %v2512_v50 = vsel %vm15013_vm5, %v2507_v7, %v2511_v58  ;;  %v2517_v5 = vrot.slane %v2516_v20, 4  ;;  %v7654_v30 = vrot.slane %v7652_v57, 7  ;;  %12857 = vmatprep.subr.bf16.mxu1 %v14006_v3  ;;  %v14013_v22 = vld [vmem:[%s14396_s4 + $0xe0] sm:$0xff]  }
 0x1de   : > { %v2533_v29 = vshll.u32 %v2362_v53, 16  ;;  %v7648_v31 = vor.u32 %v7646_v49, %v7645_v27  ;;  %v7650_v17 = vrot.slane %v7645_v27, 4  ;;  %v2526_v33 = vrot.slane %v2524_v39, 4  ;;  %v7206_v49 = vld [vmem:[#allocation2 + $0x1e8] sm:$0xf] }
 0x1df   : > { %v2529_v32 = vrot.slane %v2527_v11, 5  ;;  %v2522_v56 = vsel %vm15013_vm5, %v2517_v5, %v2521_v34  ;;  %v7657_v37 = vor.u32 %v7655_v9, %v7654_v30  ;;  %v2537_v47 = vshrl.u32 %v2362_v53, 16  ;;  %v2367_v30 = vld [vmem:[#allocation2 + $0x6c] sm:$0xf] }
 0x1e0   : > { %v2535_v6 = vrot.slane %v2533_v29, 5  ;;  %v11577_v40 = vcombine.low %v2512_v50, %v2522_v56  ;;  %v7649_v54 = vsel %vm15288_vm8, %v11836_v62, %v7648_v31  ;;  %v2543_v21 = vshll.u32 %v2363_v8, 16  ;;  %12858 = vmatpush3.bf16.msra.mxu1 %v14006_v3  ;;  %v7207_v8 = vld [vmem:[#allocation2 + $0x1ec] sm:$0xf] }
 0x1e1   : > { %v2530_v26 = vor.u32 %v2529_v32, %v2526_v33  ;;  %v7658_v10 = vsel %vm15288_vm8, %v7650_v17, %v7657_v37  ;;  %v2539_v36 = vrot.slane %v2537_v47, 4  ;;  %v7660_v4 = vshrl.u32 %v7202_v0, 16  ;;  %12859 = vmatprep.subr.bf16.mxu1 %v14008_v15  ;;  %v14019_v29 = vld [vmem:[%s14396_s4 + $0xe8] sm:$0xff]   ;;  %v2368_v33 = vld [vmem:[#allocation2 + $0x70] sm:$0xf] }
 0x1e2   : > { %v7665_v52 = vshrl.u32 %v7203_v12, 16  ;;  %12795 = vmatprep.mubr.bf16.mxu1 %v11577_v40  ;;  %v11885_v25 = vcombine.low %v7649_v54, %v7658_v10  ;;  %v2545_v23 = vrot.slane %v2543_v21, 5  ;;  %v7668_v55 = vshll.u32 %v7203_v12, 16  ;;  %v7208_v21 = vld [vmem:[#allocation2 + $0x1f8] sm:$0x8] }
 0x1e3   : > { %v2531_v43 = vrot.slane %v2530_v26, 4  ;;  %v2540_v41 = vor.u32 %v2539_v36, %v2535_v6  ;;  %v11837_v38 = vrot.slane %v7660_v4, 11  ;;  %v7674_v58 = vshrl.u32 %v7204_v13, 16 }
 0x1e4   : > { %v7667_v46 = vrot.slane %v7665_v52, 7  ;;  %13147 = vmatprep.mubr.bf16.mxu0 %v11885_v25  ;;  %v7677_v45 = vshll.u32 %v7204_v13, 16  ;;  %v2548_v59 = vshrl.u32 %v2364_v18, 16  ;;  %v2551_v35 = vshll.u32 %v2364_v18, 16  ;;  %12860 = vmatpush3.bf16.msra.mxu1 %v14008_v15  ;;  %v7209_v52 = vld [vmem:[#allocation2 + $0x1fc] sm:$0xf] }
 0x1e5   : > { %v2536_v48 = vsel %vm15013_vm5, %v2531_v43, %v2535_v6  ;;  %v2541_v63 = vrot.slane %v2540_v41, 4  ;;  %v7676_v60 = vrot.slane %v7674_v58, 7  ;;  %12861 = vmatprep.subr.bf16.mxu1 %v14010_v19  ;;  %v2557_v61 = vshll.u32 %v2365_v14, 16  ;;  %v2369_v6 = vld [vmem:[#allocation2 + $0x74] sm:$0x1] }
 0x1e6   : > { %v7670_v2 = vor.u32 %v7668_v55, %v7667_v46  ;;  %v7672_v16 = vrot.slane %v7667_v46, 4  ;;  %v2550_v3 = vrot.slane %v2548_v59, 4  ;;  %v2553_v34 = vrot.slane %v2551_v35, 5 }
 0x1e7   : > { %v2561_v51 = vshrl.u32 %v2365_v14, 16  ;;  %v2546_v53 = vsel %vm15013_vm5, %v2541_v63, %v2545_v23  ;;  %v7679_v20 = vor.u32 %v7677_v45, %v7676_v60  ;;  %v2567_v57 = vshll.u32 %v2366_v44, 16  ;;  %v7210_v23 = vld [vmem:[#allocation2 + $0x200] sm:$0xf] }
 0x1e8   : > { %v7671_v7 = vsel %vm15288_vm8, %v11837_v38, %v7670_v2  ;;  %v11578_v9 = vcombine.low %v2536_v48, %v2546_v53  ;;  %v2554_v42 = vor.u32 %v2553_v34, %v2550_v3  ;;  %v2559_v62 = vrot.slane %v2557_v61, 5  ;;  %12862 = vmatpush3.bf16.msra.mxu1 %v14010_v19  ;;  %v2370_v2 = vld [vmem:[#allocation2 + $0x80] sm:$0xf]  ;;  %v2371_v3 = vld [vmem:[#allocation2 + $0x84] sm:$0xf] }
 0x1e9   : > { %v2563_v27 = vrot.slane %v2561_v51, 4  ;;  %v7680_v39 = vsel %vm15288_vm8, %v7672_v16, %v7679_v20  ;;  %v2569_v11 = vrot.slane %v2567_v57, 5  ;;  %v7682_v50 = vshrl.u32 %v7205_v28, 16  ;;  %12863 = vmatprep.subr.bf16.mxu1 %v14013_v22  ;;  %v2372_v20 = vld [vmem:[#allocation2 + $0x88] sm:$0x1] }
 0x1ea   : > { %v7687_v5 = vshrl.u32 %v7206_v49, 16  ;;  %12796 = vmatmul.mubr.bf16.gmra.mrb[4].mxu1 %v11578_v9  ;;  %v11886_v0 = vcombine.low %v7671_v7, %v7680_v39  ;;  %v2555_v15 = vrot.slane %v2554_v42, 4  ;;  %v7690_v17 = vshll.u32 %v7206_v49, 16  ;;  %v7211_v39 = vld [vmem:[#allocation2 + $0x20c] sm:$0x8] }
 0x1eb   : > { %v2564_v31 = vor.u32 %v2563_v27, %v2559_v62  ;;  %v11838_v32 = vrot.slane %v7682_v50, 11  ;;  %v7696_v56 = vshrl.u32 %v7207_v8, 16  ;;  %v7699_v37 = vshll.u32 %v7207_v8, 16 }
 0x1ec   : > { %v7689_v12 = vrot.slane %v7687_v5, 7  ;;  %13148 = vmatmul.mubr.bf16.gmra.mrb[36].mxu0 %v11886_v0  ;;  %v2560_v47 = vsel %vm15013_vm5, %v2555_v15, %v2559_v62  ;;  %v2572_v54 = vshrl.u32 %v2367_v30, 16  ;;  %v2575_v26 = vshll.u32 %v2367_v30, 16  ;;  %12864 = vmatpush3.bf16.msra.mxu1 %v14013_v22  ;;  %v7213_v0 = vld [vmem:[#allocation2 + $0x214] sm:$0xf] }
 0x1ed   : > { %v2565_v40 = vrot.slane %v2564_v31, 4  ;;  %v7698_v36 = vrot.slane %v7696_v56, 7  ;;  %v2581_v4 = vshll.u32 %v2368_v33, 16  ;;  %12865 = vmatprep.subr.bf16.mxu1 %v14019_v29  ;;  %v2585_v43 = vshrl.u32 %v2368_v33, 16  ;;  %v14025_v15 = vld [vmem:[%s14396_s4 + $0xf0] sm:$0xff]  }
 0x1ee   : > { %v7692_v13 = vor.u32 %v7690_v17, %v7689_v12  ;;  %v7694_v10 = vrot.slane %v7689_v12, 4  ;;  %v2574_v19 = vrot.slane %v2572_v54, 4  ;;  %v2577_v25 = vrot.slane %v2575_v26, 5 }
 0x1ef   : > { %v2570_v18 = vsel %vm15013_vm5, %v2565_v40, %v2569_v11  ;;  %v7701_v38 = vor.u32 %v7699_v37, %v7698_v36  ;;  %v2583_v46 = vrot.slane %v2581_v4, 5  ;;  %v2587_v14 = vrot.slane %v2585_v43, 4  ;;  %v7212_v11 = vld [vmem:[#allocation2 + $0x210] sm:$0xf] }
 0x1f0   : > { %v11579_v55 = vcombine.low %v2560_v47, %v2570_v18  ;;  %v7693_v41 = vsel %vm15288_vm8, %v11838_v32, %v7692_v13  ;;  %v2578_v58 = vor.u32 %v2577_v25, %v2574_v19  ;;  %v2591_v48 = vshll.u32 %v2369_v6, 16  ;;  %12866 = vmatpush3.bf16.msra.mxu1 %v14019_v29  ;;  %v2373_v47 = vld [vmem:[#allocation2 + $0x94] sm:$0xf]  ;;  %v2374_v13 = vld [vmem:[#allocation2 + $0x98] sm:$0xf] }
 0x1f1   : > { %v7704_v45 = vshrl.u32 %v7208_v21, 16  ;;  %v7702_v44 = vsel %vm15288_vm8, %v7694_v10, %v7701_v38  ;;  %v7709_v59 = vshrl.u32 %v7209_v52, 16  ;;  %v7712_v35 = vshll.u32 %v7209_v52, 16  ;;  %12867 = vmatprep.subr.bf16.mxu1 %v14025_v15 }
 0x1f2   : > { %12799 = vmatprep.mubr.bf16.mxu1 %v11579_v55  ;;  %v7718_v63 = vshrl.u32 %v7210_v23, 16  ;;  %v11887_v16 = vcombine.low %v7693_v41, %v7702_v44  ;;  %v2579_v60 = vrot.slane %v2578_v58, 4  ;;  %v2588_v28 = vor.u32 %v2587_v14, %v2583_v46  ;;  %v2375_v41 = vld [vmem:[#allocation2 + $0x9c] sm:$0x1]  ;;  %v7214_v44 = vld [vmem:[#allocation2 + $0x220] sm:$0x8] }
 0x1f3   : > { %v2593_v22 = vrot.slane %v2591_v48, 5  ;;  %v11839_v34 = vrot.slane %v7704_v45, 11  ;;  %v7711_v61 = vrot.slane %v7709_v59, 7  ;;  %v7721_v49 = vshll.u32 %v7210_v23, 16  ;;  %v7215_v59 = vld [vmem:[#allocation2 + $0x224] sm:$0xf] }
 0x1f4   : > { %v7720_v51 = vrot.slane %v7718_v63, 7  ;;  %13151 = vmatprep.mubr.bf16.mxu0 %v11887_v16  ;;  %v2584_v53 = vsel %vm15013_vm5, %v2579_v60, %v2583_v46  ;;  %v2589_v7 = vrot.slane %v2588_v28, 4  ;;  %v2596_v57 = vshrl.u32 %v2370_v2, 16  ;;  %12868 = vmatpush3.bf16.msra.mxu1 %v14025_v15  ;;  %v7216_v60 = vld [vmem:[#allocation2 + $0x228] sm:$0xf] }
 0x1f5   : > { %v2599_v9 = vshll.u32 %v2370_v2, 16  ;;  %v7714_v42 = vor.u32 %v7712_v35, %v7711_v61  ;;  %v7716_v62 = vrot.slane %v7711_v61, 4  ;;  %v2605_v8 = vshll.u32 %v2371_v3, 16 }
 0x1f6   : > { %v7723_v27 = vor.u32 %v7721_v49, %v7720_v51  ;;  %v2594_v50 = vsel %vm15013_vm5, %v2589_v7, %v2593_v22  ;;  %v2598_v5 = vrot.slane %v2596_v57, 4  ;;  %v2609_v29 = vshrl.u32 %v2371_v3, 16  ;;  %v2376_v7 = vld [vmem:[#allocation2 + $0xa8] sm:$0xf] }
 0x1f7   : > { %v2601_v30 = vrot.slane %v2599_v9, 5  ;;  %v11580_v31 = vcombine.low %v2584_v53, %v2594_v50  ;;  %v7715_v17 = vsel %vm15288_vm8, %v11839_v34, %v7714_v42  ;;  %v2607_v32 = vrot.slane %v2605_v8, 5 }
 0x1f8   : > { %v7724_v33 = vsel %vm15288_vm8, %v7716_v62, %v7723_v27  ;;  %v2611_v37 = vrot.slane %v2609_v29, 4  ;;  %v2615_v6 = vshll.u32 %v2372_v20, 16  ;;  %v7726_v40 = vshrl.u32 %v7211_v39, 16  ;;  %v2377_v62 = vld [vmem:[#allocation2 + $0xac] sm:$0xf] }
 0x1f9   : > { %v11888_v12 = vcombine.low %v7715_v17, %v7724_v33  ;;  %v2602_v56 = vor.u32 %v2601_v30, %v2598_v5  ;;  %12800 = vmatmul.mubr.bf16.gmra.mrb[8].mxu1 %v11580_v31  ;;  %v7731_v54 = vshrl.u32 %v7212_v11, 16  ;;  %v7734_v26 = vshll.u32 %v7212_v11, 16  ;;  %v2378_v31 = vld [vmem:[#allocation2 + $0xb0] sm:$0x1] }
 0x1fa   : > { %v7740_v21 = vshrl.u32 %v7213_v0, 16  ;;  %v2612_v36 = vor.u32 %v2611_v37, %v2607_v32  ;;  %v2617_v4 = vrot.slane %v2615_v6, 5  ;;  %v7743_v52 = vshll.u32 %v7213_v0, 16  ;;  %v7217_v6 = vld [vmem:[#allocation2 + $0x234] sm:$0x8] }
 0x1fb   : > { %13152 = vmatmul.mubr.bf16.gmra.mrb[40].mxu0 %v11888_v12  ;;  %v2603_v10 = vrot.slane %v2602_v56, 4  ;;  %v11840_v18 = vrot.slane %v7726_v40, 11  ;;  %v7733_v19 = vrot.slane %v7731_v54, 7  ;;  %v2620_v43 = vshrl.u32 %v2373_v47, 16 }
 0x1fc   : > { %v7742_v25 = vrot.slane %v7740_v21, 7  ;;  %v2613_v55 = vrot.slane %v2612_v36, 4  ;;  %v2623_v38 = vshll.u32 %v2373_v47, 16  ;;  %v2629_v46 = vshll.u32 %v2374_v13, 16  ;;  %v7218_v47 = vld [vmem:[#allocation2 + $0x238] sm:$0xf] }
 0x1fd   : > { %v2608_v23 = vsel %vm15013_vm5, %v2603_v10, %v2607_v32  ;;  %v7736_v58 = vor.u32 %v7734_v26, %v7733_v19  ;;  %v7738_v14 = vrot.slane %v7733_v19, 4  ;;  %v2622_v45 = vrot.slane %v2620_v43, 4 }
 0x1fe   : > { %v7745_v48 = vor.u32 %v7743_v52, %v7742_v25  ;;  %v2618_v35 = vsel %vm15013_vm5, %v2613_v55, %v2617_v4  ;;  %v2625_v63 = vrot.slane %v2623_v38, 5  ;;  %v2631_v2 = vrot.slane %v2629_v46, 5  ;;  %v14031_v55 = vld [vmem:[%s14396_s4 + $0xf8] sm:$0xff]  }
 0x1ff   : > { %v2633_v16 = vshrl.u32 %v2374_v13, 16  ;;  %v11581_v28 = vcombine.low %v2608_v23, %v2618_v35  ;;  %v7737_v22 = vsel %vm15288_vm8, %v11840_v18, %v7736_v58  ;;  %v2639_v34 = vshll.u32 %v2375_v41, 16  ;;  %v7219_v13 = vld [vmem:[#allocation2 + $0x23c] sm:$0xf]  ;;  %12869 = vmatprep.subr.bf16.mxu1 %v14031_v55 }
 0x200   : > { %v7746_v3 = vsel %vm15288_vm8, %v7738_v14, %v7745_v48  ;;  %v2626_v51 = vor.u32 %v2625_v63, %v2622_v45  ;;  %v7748_v53 = vshrl.u32 %v7214_v44, 16  ;;  %v7753_v57 = vshrl.u32 %v7215_v59, 16  ;;  %v2379_v23 = vld [vmem:[#allocation2 + $0xbc] sm:$0xf]  ;;  %v2380_v14 = vld [vmem:[#allocation2 + $0xc0] sm:$0xf]  ;;  %12870 = vmatpush3.bf16.msra.mxu1 %v14031_v55 }
 0x201   : > { %v11889_v61 = vcombine.low %v7737_v22, %v7746_v3  ;;  %v2635_v49 = vrot.slane %v2633_v16, 4  ;;  %12803 = vmatprep.mubr.bf16.mxu1 %v11581_v28  ;;  %v2641_v20 = vrot.slane %v2639_v34, 5  ;;  %v7756_v9 = vshll.u32 %v7215_v59, 16  ;;  %v2381_v22 = vld [vmem:[#allocation2 + $0xc4] sm:$0x1] }
 0x202   : > { %v7762_v42 = vshrl.u32 %v7216_v60, 16  ;;  %v2627_v27 = vrot.slane %v2626_v51, 4  ;;  %v11841_v39 = vrot.slane %v7748_v53, 11  ;;  %v7765_v11 = vshll.u32 %v7216_v60, 16  ;;  %v14075_v51 = vld [vmem:[%s14396_s4 + $0x100] sm:$0xff]  }
 0x203   : > { %13155 = vmatprep.mubr.bf16.mxu0 %v11889_v61  ;;  %v2636_v8 = vor.u32 %v2635_v49, %v2631_v2  ;;  %v7755_v50 = vrot.slane %v7753_v57, 7  ;;  %v2644_v30 = vshrl.u32 %v2376_v7, 16  ;;  %v2647_v29 = vshll.u32 %v2376_v7, 16  ;;  %v7220_v61 = vld [vmem:[#allocation2 + $0x248] sm:$0x8]  ;;  %13335 = vmatprep.subr.bf16.mxu1 %v14075_v51 }
 0x204   : > { %v7764_v5 = vrot.slane %v7762_v42, 7  ;;  %v2632_v0 = vsel %vm15013_vm5, %v2627_v27, %v2631_v2  ;;  %v2653_v17 = vshll.u32 %v2377_v62, 16  ;;  %v2657_v33 = vshrl.u32 %v2377_v62, 16  ;;  %v7221_v57 = vld [vmem:[#allocation2 + $0x24c] sm:$0xf] }
 0x205   : > { %v2637_v15 = vrot.slane %v2636_v8, 4  ;;  %v7758_v32 = vor.u32 %v7756_v9, %v7755_v50  ;;  %v7760_v12 = vrot.slane %v7755_v50, 4  ;;  %v2646_v37 = vrot.slane %v2644_v30, 4  ;;  %v7222_v8 = vld [vmem:[#allocation2 + $0x250] sm:$0xf] }
 0x206   : > { %v7767_v56 = vor.u32 %v7765_v11, %v7764_v5  ;;  %v2649_v54 = vrot.slane %v2647_v29, 5  ;;  %v2655_v26 = vrot.slane %v2653_v17, 5  ;;  %v2659_v21 = vrot.slane %v2657_v33, 4  ;;  %v2383_v17 = vld [vmem:[#allocation2 + $0xd4] sm:$0xf] }
 0x207   : > { %v2642_v40 = vsel %vm15013_vm5, %v2637_v15, %v2641_v20  ;;  %v7759_v36 = vsel %vm15288_vm8, %v11841_v39, %v7758_v32  ;;  %v2663_v52 = vshll.u32 %v2378_v31, 16  ;;  %v7770_v43 = vshrl.u32 %v7217_v6, 16  ;;  %v2382_v31 = vld [vmem:[#allocation2 + $0xd0] sm:$0xf]  ;;  %v2386_v51 = vld [vmem:[#allocation2 + $0xe8] sm:$0xf] }
 0x208   : > { %v11582_v10 = vcombine.low %v2632_v0, %v2642_v40  ;;  %v7768_v4 = vsel %vm15288_vm8, %v7760_v12, %v7767_v56  ;;  %v2650_v19 = vor.u32 %v2649_v54, %v2646_v37  ;;  %v2660_v25 = vor.u32 %v2659_v21, %v2655_v26 }
 0x209   : > { %v11890_v18 = vcombine.low %v7759_v36, %v7768_v4  ;;  %v2665_v41 = vrot.slane %v2663_v52, 5  ;;  %v7775_v38 = vshrl.u32 %v7218_v47, 16  ;;  %v7778_v46 = vshll.u32 %v7218_v47, 16 }
 0x20a   : > { %12804 = vmatmul.mubr.bf16.gmra.mrb[12].mxu1 %v11582_v10  ;;  %v7784_v58 = vshrl.u32 %v7219_v13, 16  ;;  %v2651_v48 = vrot.slane %v2650_v19, 4  ;;  %v2661_v45 = vrot.slane %v2660_v25, 4  ;;  %v11842_v44 = vrot.slane %v7770_v43, 11  ;;  %v7223_v19 = vld [vmem:[#allocation2 + $0x25c] sm:$0x8] }
 0x20b   : > { %13156 = vmatmul.mubr.bf16.gmra.mrb[44].mxu0 %v11890_v18  ;;  %v7787_v59 = vshll.u32 %v7219_v13, 16  ;;  %v7777_v35 = vrot.slane %v7775_v38, 7  ;;  %v2668_v2 = vshrl.u32 %v2379_v23, 16  ;;  %v2671_v16 = vshll.u32 %v2379_v23, 16  ;;  %v7224_v25 = vld [vmem:[#allocation2 + $0x260] sm:$0xf] }
 0x20c   : > { %v7786_v63 = vrot.slane %v7784_v58, 7  ;;  %v2656_v60 = vsel %vm15013_vm5, %v2651_v48, %v2655_v26  ;;  %v2666_v28 = vsel %vm15013_vm5, %v2661_v45, %v2665_v41  ;;  %v2677_v3 = vshll.u32 %v2380_v14, 16  ;;  %v2384_v26 = vld [vmem:[#allocation2 + $0xd8] sm:$0x1]  ;;  %v7225_v48 = vld [vmem:[#allocation2 + $0x264] sm:$0xf] }
 0x20d   : > { %v2681_v34 = vshrl.u32 %v2380_v14, 16  ;;  %v11583_v49 = vcombine.low %v2656_v60, %v2666_v28  ;;  %v7780_v53 = vor.u32 %v7778_v46, %v7777_v35  ;;  %v7782_v7 = vrot.slane %v7777_v35, 4 }
 0x20e   : > { %v7789_v20 = vor.u32 %v7787_v59, %v7786_v63  ;;  %v2670_v9 = vrot.slane %v2668_v2, 4  ;;  %v2673_v42 = vrot.slane %v2671_v16, 5  ;;  %v2679_v62 = vrot.slane %v2677_v3, 5  ;;  %v2385_v63 = vld [vmem:[#allocation2 + $0xe4] sm:$0xf] }
 0x20f   : > { %v2683_v27 = vrot.slane %v2681_v34, 4  ;;  %12807 = vmatprep.mubr.bf16.mxu1 %v11583_v49  ;;  %v7781_v39 = vsel %vm15288_vm8, %v11842_v44, %v7780_v53  ;;  %v2687_v50 = vshll.u32 %v2381_v22, 16  ;;  %v7792_v5 = vshrl.u32 %v7220_v61, 16 }
 0x210   : > { %v7790_v11 = vsel %vm15288_vm8, %v7782_v7, %v7789_v20  ;;  %v2674_v29 = vor.u32 %v2673_v42, %v2670_v9  ;;  %v7797_v15 = vshrl.u32 %v7221_v57, 16  ;;  %v7800_v12 = vshll.u32 %v7221_v57, 16  ;;  %v2387_v7 = vld [vmem:[#allocation2 + $0xec] sm:$0x1] }
 0x211   : > { %v11891_v30 = vcombine.low %v7781_v39, %v7790_v11  ;;  %v2684_v0 = vor.u32 %v2683_v27, %v2679_v62  ;;  %v2689_v33 = vrot.slane %v2687_v50, 5  ;;  %v11843_v32 = vrot.slane %v7792_v5, 11 }
 0x212   : > { %v7806_v56 = vshrl.u32 %v7222_v8, 16  ;;  %v2675_v37 = vrot.slane %v2674_v29, 4  ;;  %v7799_v47 = vrot.slane %v7797_v15, 7  ;;  %v7809_v40 = vshll.u32 %v7222_v8, 16  ;;  %v7226_v8 = vld [vmem:[#allocation2 + $0x270] sm:$0x8] }
 0x213   : > { %13159 = vmatprep.mubr.bf16.mxu0 %v11891_v30  ;;  %v2685_v6 = vrot.slane %v2684_v0, 4  ;;  %v2692_v21 = vshrl.u32 %v2382_v31, 16  ;;  %v2695_v13 = vshll.u32 %v2382_v31, 16  ;;  %v2701_v10 = vshll.u32 %v2383_v17, 16  ;;  %v7227_v31 = vld [vmem:[#allocation2 + $0x274] sm:$0xf] }
 0x214   : > { %v7808_v54 = vrot.slane %v7806_v56, 7  ;;  %v2680_v36 = vsel %vm15013_vm5, %v2675_v37, %v2679_v62  ;;  %v7802_v52 = vor.u32 %v7800_v12, %v7799_v47  ;;  %v7804_v18 = vrot.slane %v7799_v47, 4  ;;  %v7228_v12 = vld [vmem:[#allocation2 + $0x278] sm:$0xf] }
 0x215   : > { %v2690_v4 = vsel %vm15013_vm5, %v2685_v6, %v2689_v33  ;;  %v2694_v55 = vrot.slane %v2692_v21, 4  ;;  %v2697_v41 = vrot.slane %v2695_v13, 5  ;;  %v2703_v46 = vrot.slane %v2701_v10, 5 }
 0x216   : > { %v11584_v43 = vcombine.low %v2680_v36, %v2690_v4  ;;  %v7811_v23 = vor.u32 %v7809_v40, %v7808_v54  ;;  %v7803_v38 = vsel %vm15288_vm8, %v11843_v32, %v7802_v52  ;;  %v2705_v58 = vshrl.u32 %v2383_v17, 16  ;;  %v2388_v54 = vld [vmem:[#allocation2 + $0xf8] sm:$0xf]  ;;  %v2389_v36 = vld [vmem:[#allocation2 + $0xfc] sm:$0xf] }
 0x217   : > { %v2711_v14 = vshll.u32 %v2384_v26, 16  ;;  %v2698_v44 = vor.u32 %v2697_v41, %v2694_v55  ;;  %v7814_v59 = vshrl.u32 %v7223_v19, 16  ;;  %v7819_v35 = vshrl.u32 %v7224_v25, 16  ;;  %v7230_v41 = vld [vmem:[#allocation2 + $0x288] sm:$0xf] }
 0x218   : > { %12808 = vmatmul.mubr.bf16.gmra.mrb[16].mxu1 %v11584_v43  ;;  %v7812_v45 = vsel %vm15288_vm8, %v7804_v18, %v7811_v23  ;;  %v2707_v16 = vrot.slane %v2705_v58, 4  ;;  %v7822_v28 = vshll.u32 %v7224_v25, 16  ;;  %v7828_v61 = vshrl.u32 %v7225_v48, 16  ;;  %v2390_v58 = vld [vmem:[#allocation2 + $0x100] sm:$0x1] }
 0x219   : > { %v11892_v2 = vcombine.low %v7803_v38, %v7812_v45  ;;  %v2713_v60 = vrot.slane %v2711_v14, 5  ;;  %v2699_v22 = vrot.slane %v2698_v44, 4  ;;  %v11844_v3 = vrot.slane %v7814_v59, 11 }
 0x21a   : > { %v7821_v34 = vrot.slane %v7819_v35, 7  ;;  %v2708_v49 = vor.u32 %v2707_v16, %v2703_v46  ;;  %v7831_v53 = vshll.u32 %v7225_v48, 16  ;;  %v2716_v20 = vshrl.u32 %v2385_v63, 16 }
 0x21b   : > { %13160 = vmatmul.mubr.bf16.gmra.mrb[48].mxu0 %v11892_v2  ;;  %v2719_v57 = vshll.u32 %v2385_v63, 16  ;;  %v2704_v9 = vsel %vm15013_vm5, %v2699_v22, %v2703_v46  ;;  %v7830_v27 = vrot.slane %v7828_v61, 7  ;;  %v2725_v5 = vshll.u32 %v2386_v51, 16  ;;  %v7229_v63 = vld [vmem:[#allocation2 + $0x284] sm:$0x8] }
 0x21c   : > { %v7824_v42 = vor.u32 %v7822_v28, %v7821_v34  ;;  %v7826_v62 = vrot.slane %v7821_v34, 4  ;;  %v2709_v39 = vrot.slane %v2708_v49, 4  ;;  %v2718_v11 = vrot.slane %v2716_v20, 4 }
 0x21d   : > { %v2721_v50 = vrot.slane %v2719_v57, 5  ;;  %v7833_v29 = vor.u32 %v7831_v53, %v7830_v27  ;;  %v2729_v0 = vshrl.u32 %v2386_v51, 16  ;;  %v2735_v15 = vshll.u32 %v2387_v7, 16  ;;  %v7231_v51 = vld [vmem:[#allocation2 + $0x28c] sm:$0xf] }
 0x21e   : > { %v7825_v30 = vsel %vm15288_vm8, %v11844_v3, %v7824_v42  ;;  %v2714_v17 = vsel %vm15013_vm5, %v2709_v39, %v2713_v60  ;;  %v2727_v32 = vrot.slane %v2725_v5, 5  ;;  %v7836_v56 = vshrl.u32 %v7226_v8, 16  ;;  %v2391_v57 = vld [vmem:[#allocation2 + $0x10c] sm:$0xf]  ;;  %v2392_v5 = vld [vmem:[#allocation2 + $0x110] sm:$0xf] }
 0x21f   : > { %v2722_v33 = vor.u32 %v2721_v50, %v2718_v11  ;;  %v11585_v37 = vcombine.low %v2704_v9, %v2714_v17  ;;  %v7834_v6 = vsel %vm15288_vm8, %v7826_v62, %v7833_v29  ;;  %v2731_v47 = vrot.slane %v2729_v0, 4  ;;  %v2393_v0 = vld [vmem:[#allocation2 + $0x114] sm:$0x1] }
 0x220   : > { %v2737_v40 = vrot.slane %v2735_v15, 5  ;;  %v11893_v26 = vcombine.low %v7825_v30, %v7834_v6  ;;  %v11845_v13 = vrot.slane %v7836_v56, 11  ;;  %v7841_v10 = vshrl.u32 %v7227_v31, 16  ;;  %v7232_v56 = vld [vmem:[#allocation2 + $0x298] sm:$0x8] }
 0x221   : > { %v2723_v21 = vrot.slane %v2722_v33, 4  ;;  %12811 = vmatprep.mubr.bf16.mxu1 %v11585_v37  ;;  %v2732_v4 = vor.u32 %v2731_v47, %v2727_v32  ;;  %v7844_v52 = vshll.u32 %v7227_v31, 16  ;;  %v7850_v18 = vshrl.u32 %v7228_v12, 16  ;;  %v7233_v37 = vld [vmem:[#allocation2 + $0x29c] sm:$0xf] }
 0x222   : > { %v7853_v19 = vshll.u32 %v7228_v12, 16  ;;  %13163 = vmatprep.mubr.bf16.mxu0 %v11893_v26  ;;  %v7843_v43 = vrot.slane %v7841_v10, 7  ;;  %v2740_v23 = vshrl.u32 %v2388_v54, 16  ;;  %v2743_v55 = vshll.u32 %v2388_v54, 16 }
 0x223   : > { %v2728_v25 = vsel %vm15013_vm5, %v2723_v21, %v2727_v32  ;;  %v2733_v38 = vrot.slane %v2732_v4, 4  ;;  %v7852_v46 = vrot.slane %v7850_v18, 7  ;;  %v2749_v14 = vshll.u32 %v2389_v36, 16 }
 0x224   : > { %v2753_v48 = vshrl.u32 %v2389_v36, 16  ;;  %v7846_v45 = vor.u32 %v7844_v52, %v7843_v43  ;;  %v7848_v44 = vrot.slane %v7843_v43, 4  ;;  %v2742_v59 = vrot.slane %v2740_v23, 4  ;;  %v7234_v36 = vld [vmem:[#allocation2 + $0x2a0] sm:$0xf] }
 0x225   : > { %v2745_v35 = vrot.slane %v2743_v55, 5  ;;  %v2738_v2 = vsel %vm15013_vm5, %v2733_v38, %v2737_v40  ;;  %v7855_v16 = vor.u32 %v7853_v19, %v7852_v46  ;;  %v2751_v60 = vrot.slane %v2749_v14, 5 }
 0x226   : > { %v2755_v28 = vrot.slane %v2753_v48, 4  ;;  %v11586_v22 = vcombine.low %v2728_v25, %v2738_v2  ;;  %v7847_v3 = vsel %vm15288_vm8, %v11845_v13, %v7846_v45  ;;  %v2759_v61 = vshll.u32 %v2390_v58, 16  ;;  %v2394_v25 = vld [vmem:[#allocation2 + $0x120] sm:$0xf]  ;;  %v2395_v48 = vld [vmem:[#allocation2 + $0x124] sm:$0xf] }
 0x227   : > { %v2746_v34 = vor.u32 %v2745_v35, %v2742_v59  ;;  %v7856_v49 = vsel %vm15288_vm8, %v7848_v44, %v7855_v16  ;;  %v7858_v7 = vshrl.u32 %v7229_v63, 16  ;;  %v7863_v20 = vshrl.u32 %v7230_v41, 16  ;;  %v2396_v35 = vld [vmem:[#allocation2 + $0x128] sm:$0x1] }
 0x228   : > { %v2756_v53 = vor.u32 %v2755_v28, %v2751_v60  ;;  %12812 = vmatmul.mubr.bf16.gmra.mrb[20].mxu1 %v11586_v22  ;;  %v11894_v9 = vcombine.low %v7847_v3, %v7856_v49  ;;  %v2761_v62 = vrot.slane %v2759_v61, 5  ;;  %v7866_v27 = vshll.u32 %v7230_v41, 16  ;;  %v7235_v22 = vld [vmem:[#allocation2 + $0x2ac] sm:$0x8] }
 0x229   : > { %v2747_v42 = vrot.slane %v2746_v34, 4  ;;  %v11846_v39 = vrot.slane %v7858_v7, 11  ;;  %v7865_v11 = vrot.slane %v7863_v20, 7  ;;  %v7872_v50 = vshrl.u32 %v7231_v51, 16 }
 0x22a   : > { %v2757_v8 = vrot.slane %v2756_v53, 4  ;;  %13164 = vmatmul.mubr.bf16.gmra.mrb[52].mxu0 %v11894_v9  ;;  %v7875_v29 = vshll.u32 %v7231_v51, 16  ;;  %v2764_v15 = vshrl.u32 %v2391_v57, 16  ;;  %v2767_v31 = vshll.u32 %v2391_v57, 16  ;;  %v7236_v57 = vld [vmem:[#allocation2 + $0x2b0] sm:$0xf] }
 0x22b   : > { %v2752_v30 = vsel %vm15013_vm5, %v2747_v42, %v2751_v60  ;;  %v7868_v33 = vor.u32 %v7866_v27, %v7865_v11  ;;  %v7870_v32 = vrot.slane %v7865_v11, 4  ;;  %v7874_v12 = vrot.slane %v7872_v50, 7  ;;  %v7237_v27 = vld [vmem:[#allocation2 + $0x2b4] sm:$0xf] }
 0x22c   : > { %v2762_v17 = vsel %vm15013_vm5, %v2757_v8, %v2761_v62  ;;  %v2766_v47 = vrot.slane %v2764_v15, 4  ;;  %v2769_v40 = vrot.slane %v2767_v31, 5  ;;  %v2773_v54 = vshll.u32 %v2392_v5, 16 }
 0x22d   : > { %v11587_v6 = vcombine.low %v2752_v30, %v2762_v17  ;;  %v7869_v26 = vsel %vm15288_vm8, %v11846_v39, %v7868_v33  ;;  %v7877_v21 = vor.u32 %v7875_v29, %v7874_v12  ;;  %v2777_v13 = vshrl.u32 %v2392_v5, 16  ;;  %v2397_v30 = vld [vmem:[#allocation2 + $0x134] sm:$0xf]  ;;  %v2398_v17 = vld [vmem:[#allocation2 + $0x138] sm:$0xf] }
 0x22e   : > { %v2783_v10 = vshll.u32 %v2393_v0, 16  ;;  %v2770_v4 = vor.u32 %v2769_v40, %v2766_v47  ;;  %v2775_v52 = vrot.slane %v2773_v54, 5  ;;  %v7880_v18 = vshrl.u32 %v7232_v56, 16  ;;  %v2399_v47 = vld [vmem:[#allocation2 + $0x13c] sm:$0x1] }
 0x22f   : > { %12815 = vmatprep.mubr.bf16.mxu1 %v11587_v6  ;;  %v7885_v19 = vshrl.u32 %v7233_v37, 16  ;;  %v7878_v43 = vsel %vm15288_vm8, %v7870_v32, %v7877_v21  ;;  %v2779_v23 = vrot.slane %v2777_v13, 4  ;;  %v7888_v41 = vshll.u32 %v7233_v37, 16 }
 0x230   : > { %v2785_v55 = vrot.slane %v2783_v10, 5  ;;  %v11895_v38 = vcombine.low %v7869_v26, %v7878_v43  ;;  %v2771_v46 = vrot.slane %v2770_v4, 4  ;;  %v11847_v58 = vrot.slane %v7880_v18, 11 }
 0x231   : > { %v7887_v14 = vrot.slane %v7885_v19, 7  ;;  %v2780_v45 = vor.u32 %v2779_v23, %v2775_v52  ;;  %v7894_v44 = vshrl.u32 %v7234_v36, 16  ;;  %v7897_v59 = vshll.u32 %v7234_v36, 16  ;;  %v7239_v36 = vld [vmem:[#allocation2 + $0x2c4] sm:$0xf] }
 0x232   : > { %v2788_v63 = vshrl.u32 %v2394_v25, 16  ;;  %13167 = vmatprep.mubr.bf16.mxu0 %v11895_v38  ;;  %v2776_v2 = vsel %vm15013_vm5, %v2771_v46, %v2775_v52  ;;  %v2791_v28 = vshll.u32 %v2394_v25, 16  ;;  %v2797_v51 = vshll.u32 %v2395_v48, 16  ;;  %v7238_v25 = vld [vmem:[#allocation2 + $0x2c0] sm:$0x8] }
 0x233   : > { %v7890_v16 = vor.u32 %v7888_v41, %v7887_v14  ;;  %v7892_v60 = vrot.slane %v7887_v14, 4  ;;  %v2781_v3 = vrot.slane %v2780_v45, 4  ;;  %v7896_v34 = vrot.slane %v7894_v44, 7 }
 0x234   : > { %v2790_v61 = vrot.slane %v2788_v63, 4  ;;  %v2793_v53 = vrot.slane %v2791_v28, 5  ;;  %v2801_v7 = vshrl.u32 %v2395_v48, 16  ;;  %v2807_v20 = vshll.u32 %v2396_v35, 16  ;;  %v7240_v48 = vld [vmem:[#allocation2 + $0x2c8] sm:$0xf] }
 0x235   : > { %v7891_v49 = vsel %vm15288_vm8, %v11847_v58, %v7890_v16  ;;  %v2786_v9 = vsel %vm15013_vm5, %v2781_v3, %v2785_v55  ;;  %v7899_v42 = vor.u32 %v7897_v59, %v7896_v34  ;;  %v2799_v62 = vrot.slane %v2797_v51, 5  ;;  %v2400_v63 = vld [vmem:[#allocation2 + $0x170] sm:$0xf]  ;;  %v2401_v51 = vld [vmem:[#allocation2 + $0x174] sm:$0xf] }
 0x236   : > { %v7902_v8 = vshrl.u32 %v7235_v22, 16  ;;  %v11588_v39 = vcombine.low %v2776_v2, %v2786_v9  ;;  %v2794_v11 = vor.u32 %v2793_v53, %v2790_v61  ;;  %v2803_v50 = vrot.slane %v2801_v7, 4  ;;  %v2402_v7 = vld [vmem:[#allocation2 + $0x178] sm:$0x1] }
 0x237   : > { %v2809_v5 = vrot.slane %v2807_v20, 5  ;;  %v7900_v29 = vsel %vm15288_vm8, %v7892_v60, %v7899_v42  ;;  %v7907_v15 = vshrl.u32 %v7236_v57, 16  ;;  %v7910_v31 = vshll.u32 %v7236_v57, 16 }
 0x238   : > { %v11848_v0 = vrot.slane %v7902_v8, 11  ;;  %12816 = vmatmul.mubr.bf16.gmra.mrb[24].mxu1 %v11588_v39  ;;  %v11896_v33 = vcombine.low %v7891_v49, %v7900_v29  ;;  %v2795_v32 = vrot.slane %v2794_v11, 4  ;;  %v2804_v12 = vor.u32 %v2803_v50, %v2799_v62 }
 0x239   : > { %v7916_v56 = vshrl.u32 %v7237_v27, 16  ;;  %v7909_v37 = vrot.slane %v7907_v15, 7  ;;  %v7919_v6 = vshll.u32 %v7237_v27, 16  ;;  %v2812_v40 = vshrl.u32 %v2397_v30, 16 }
 0x23a   : > { %v2815_v54 = vshll.u32 %v2397_v30, 16  ;;  %13168 = vmatmul.mubr.bf16.gmra.mrb[56].mxu0 %v11896_v33  ;;  %v2800_v26 = vsel %vm15013_vm5, %v2795_v32, %v2799_v62  ;;  %v2805_v21 = vrot.slane %v2804_v12, 4  ;;  %v2821_v10 = vshll.u32 %v2398_v17, 16  ;;  %v2404_v12 = vld [vmem:[#allocation2 + $0x188] sm:$0xf] }
 0x23b   : > { %v7918_v13 = vrot.slane %v7916_v56, 7  ;;  %v7912_v4 = vor.u32 %v7910_v31, %v7909_v37  ;;  %v7914_v52 = vrot.slane %v7909_v37, 4  ;;  %v2814_v18 = vrot.slane %v2812_v40, 4  ;;  %v2405_v56 = vld [vmem:[#allocation2 + $0x18c] sm:$0x1] }
 0x23c   : > { %v2817_v19 = vrot.slane %v2815_v54, 5  ;;  %v2810_v43 = vsel %vm15013_vm5, %v2805_v21, %v2809_v5  ;;  %v2823_v55 = vrot.slane %v2821_v10, 5  ;;  %v2825_v41 = vshrl.u32 %v2398_v17, 16  ;;  %v2403_v5 = vld [vmem:[#allocation2 + $0x184] sm:$0xf] }
 0x23d   : > { %v7921_v23 = vor.u32 %v7919_v6, %v7918_v13  ;;  %v11589_v38 = vcombine.low %v2800_v26, %v2810_v43  ;;  %v7913_v46 = vsel %vm15288_vm8, %v11848_v0, %v7912_v4  ;;  %v2831_v14 = vshll.u32 %v2399_v47, 16  ;;  %v14076_v47 = vld [vmem:[#allocation2 + $0x30] sm:$0xf]  ;;  %v14077_v40 = vld [vmem:[#allocation2 + $0x34] sm:$0xf] }
 0x23e   : > { %v2818_v58 = vor.u32 %v2817_v19, %v2814_v18  ;;  %v2827_v44 = vrot.slane %v2825_v41, 4  ;;  %v7924_v59 = vshrl.u32 %v7238_v25, 16  ;;  %v7929_v35 = vshrl.u32 %v7239_v36, 16  ;;  %v2406_v4 = vld [vmem:[#allocation2 + $0x198] sm:$0xf] }
 0x23f   : > { %v7922_v45 = vsel %vm15288_vm8, %v7914_v52, %v7921_v23  ;;  %12819 = vmatprep.mubr.bf16.mxu1 %v11589_v38  ;;  %v2833_v60 = vrot.slane %v2831_v14, 5  ;;  %v7932_v28 = vshll.u32 %v7239_v36, 16  ;;  %v7938_v61 = vshrl.u32 %v7240_v48, 16  ;;  %v2407_v43 = vld [vmem:[#allocation2 + $0x19c] sm:$0xf] }
 0x240   : > { %v11897_v2 = vcombine.low %v7913_v46, %v7922_v45  ;;  %v2819_v16 = vrot.slane %v2818_v58, 4  ;;  %v2828_v22 = vor.u32 %v2827_v44, %v2823_v55  ;;  %v11849_v3 = vrot.slane %v7924_v59, 11  ;;  %v14078_v38 = vld [vmem:[#allocation2 + $0x44] sm:$0xf]  ;;  %v14079_v46 = vld [vmem:[#allocation2 + $0x48] sm:$0xf] }
 0x241   : > { %v7931_v34 = vrot.slane %v7929_v35, 7  ;;  %v7941_v53 = vshll.u32 %v7240_v48, 16  ;;  %v2836_v20 = vshrl.u32 %v2400_v63, 16  ;;  %v2839_v57 = vshll.u32 %v2400_v63, 16  ;;  %v2408_v44 = vld [vmem:[#allocation2 + $0x1a0] sm:$0x1] }
 0x242   : > { %13171 = vmatprep.mubr.bf16.mxu0 %v11897_v2  ;;  %v2824_v49 = vsel %vm15013_vm5, %v2819_v16, %v2823_v55  ;;  %v2829_v9 = vrot.slane %v2828_v22, 4  ;;  %v7940_v27 = vrot.slane %v7938_v61, 7  ;;  %v2845_v11 = vshll.u32 %v2401_v51, 16 }
 0x243   : > { %v7934_v42 = vor.u32 %v7932_v28, %v7931_v34  ;;  %v7936_v62 = vrot.slane %v7931_v34, 4  ;;  %v2838_v8 = vrot.slane %v2836_v20, 4  ;;  %v2841_v39 = vrot.slane %v2839_v57, 5 }
 0x244   : > { %v2849_v50 = vshrl.u32 %v2401_v51, 16  ;;  %v2834_v30 = vsel %vm15013_vm5, %v2829_v9, %v2833_v60  ;;  %v7943_v0 = vor.u32 %v7941_v53, %v7940_v27  ;;  %v2855_v15 = vshll.u32 %v2402_v7, 16  ;;  %v2409_v60 = vld [vmem:[#allocation2 + $0x1ac] sm:$0xf]  ;;  %v2410_v7 = vld [vmem:[#allocation2 + $0x1b0] sm:$0xf] }
 0x245   : > { %v7935_v29 = vsel %vm15288_vm8, %v11849_v3, %v7934_v42  ;;  %v11590_v31 = vcombine.low %v2824_v49, %v2834_v30  ;;  %v2842_v17 = vor.u32 %v2841_v39, %v2838_v8  ;;  %v2847_v33 = vrot.slane %v2845_v11, 5  ;;  %v14080_v9 = vld [vmem:[#allocation2 + $0x58] sm:$0xf]  ;;  %v14081_v42 = vld [vmem:[#allocation2 + $0x5c] sm:$0xf]  ;;  %v14021_v30 = vld [vmem:[%s14396_s4 + $0x208] sm:$0xff]  }
 0x246   : > { %v2851_v32 = vrot.slane %v2849_v50, 4  ;;  %v7944_v37 = vsel %vm15288_vm8, %v7936_v62, %v7943_v0  ;;  %v2857_v6 = vrot.slane %v2855_v15, 5  ;;  %v11924_v54 = vcombine.low %v14076_v47, %v14077_v40  ;;  %v2411_v50 = vld [vmem:[#allocation2 + $0x1b4] sm:$0x1] }
 0x247   : > { %v2860_v26 = vshrl.u32 %v2403_v5, 16  ;;  %12820 = vmatmul.mubr.bf16.gmra.mrb[28].mxu1 %v11590_v31  ;;  %v11898_v21 = vcombine.low %v7935_v29, %v7944_v37  ;;  %v2843_v13 = vrot.slane %v2842_v17, 4  ;;  %v2863_v36 = vshll.u32 %v2403_v5, 16  ;;  %v2412_v17 = vld [vmem:[#allocation2 + $0x1c0] sm:$0xf] }
 0x248   : > { %v2852_v10 = vor.u32 %v2851_v32, %v2847_v33  ;;  %v2869_v18 = vshll.u32 %v2404_v12, 16  ;;  %v2873_v19 = vshrl.u32 %v2404_v12, 16  ;;  %v2879_v25 = vshll.u32 %v2405_v56, 16  ;;  %v2413_v37 = vld [vmem:[#allocation2 + $0x1c4] sm:$0xf] }
 0x249   : > { %v2862_v52 = vrot.slane %v2860_v26, 4  ;;  %13172 = vmatmul.mubr.bf16.gmra.mrb[60].mxu0 %v11898_v21  ;;  %v2848_v23 = vsel %vm15013_vm5, %v2843_v13, %v2847_v33  ;;  %v2865_v41 = vrot.slane %v2863_v36, 5  ;;  %v11925_v58 = vcombine.low %v14078_v38, %v14079_v46  ;;  %v14083_v26 = vld [vmem:[#allocation2 + $0x6c] sm:$0xf]  ;;  %v14084_v21 = vld [vmem:[#allocation2 + $0x70] sm:$0xf] }
 0x24a   : > { %v2853_v55 = vrot.slane %v2852_v10, 4  ;;  %13191 = vmatprep.mubr.bf16.mxu0 %v11924_v54  ;;  %v2871_v14 = vrot.slane %v2869_v18, 5  ;;  %v2875_v48 = vrot.slane %v2873_v19, 4  ;;  %v2881_v45 = vrot.slane %v2879_v25, 5  ;;  %v14027_v19 = vld [vmem:[%s14396_s4 + $0x210] sm:$0xff]  }
 0x24b   : > { %v2884_v59 = vshrl.u32 %v2406_v4, 16  ;;  %v2866_v63 = vor.u32 %v2865_v41, %v2862_v52  ;;  %v2887_v2 = vshll.u32 %v2406_v4, 16  ;;  %v2893_v16 = vshll.u32 %v2407_v43, 16  ;;  %v2414_v52 = vld [vmem:[#allocation2 + $0x1c8] sm:$0x1] }
 0x24c   : > { %v2858_v35 = vsel %vm15013_vm5, %v2853_v55, %v2857_v6  ;;  %v2876_v22 = vor.u32 %v2875_v48, %v2871_v14  ;;  %v2897_v34 = vshrl.u32 %v2407_v43, 16  ;;  %v2903_v53 = vshll.u32 %v2408_v44, 16  ;;  %v14082_v6 = vld [vmem:[%s14396_s4 + $0x200] sm:$0xff]   ;;  %v2415_v41 = vld [vmem:[#allocation2 + $0x1d4] sm:$0xf] }
 0x24d   : > { %v11591_v28 = vcombine.low %v2848_v23, %v2858_v35  ;;  %v2886_v3 = vrot.slane %v2884_v59, 4  ;;  %v2867_v61 = vrot.slane %v2866_v63, 4  ;;  %v2889_v51 = vrot.slane %v2887_v2, 5  ;;  %v2416_v35 = vld [vmem:[#allocation2 + $0x1d8] sm:$0xf] }
 0x24e   : > { %v2895_v49 = vrot.slane %v2893_v16, 5  ;;  %v2877_v20 = vrot.slane %v2876_v22, 4  ;;  %v2899_v57 = vrot.slane %v2897_v34, 4  ;;  %v11926_v62 = vcombine.low %v14080_v9, %v14081_v42  ;;  %v14085_v16 = vld [vmem:[#allocation2 + $0x80] sm:$0xf] }
 0x24f   : > { %12823 = vmatprep.mubr.bf16.mxu1 %v11591_v28  ;;  %v2908_v27 = vshrl.u32 %v2409_v60, 16  ;;  %v2872_v8 = vsel %vm15013_vm5, %v2867_v61, %v2871_v14  ;;  %v2890_v39 = vor.u32 %v2889_v51, %v2886_v3  ;;  %v2905_v11 = vrot.slane %v2903_v53, 5  ;;  %v14033_v3 = vld [vmem:[%s14396_s4 + $0x218] sm:$0xff]   ;;  %v2418_v42 = vld [vmem:[#allocation2 + $0x1e8] sm:$0xf] }
 0x250   : > { %v2911_v5 = vshll.u32 %v2409_v60, 16  ;;  %v2882_v29 = vsel %vm15013_vm5, %v2877_v20, %v2881_v45  ;;  %v2900_v0 = vor.u32 %v2899_v57, %v2895_v49  ;;  %v2917_v31 = vshll.u32 %v2410_v7, 16  ;;  %v14086_v60 = vld [vmem:[#allocation2 + $0x84] sm:$0xf] }
 0x251   : > { %v2910_v15 = vrot.slane %v2908_v27, 4  ;;  %v11592_v33 = vcombine.low %v2872_v8, %v2882_v29  ;;  %13192 = vmatmul.mubr.bf16.vlgmr.msra.gmra.mrb[0].mxu0 %v11925_v58  ;;  %v2891_v32 = vrot.slane %v2890_v39, 4  ;;  %v2921_v56 = vshrl.u32 %v2410_v7, 16  ;;  %v14087_v29 = vld [vmem:[#allocation2 + $0x94] sm:$0xf] }
 0x252   : > { %v2913_v12 = vrot.slane %v2911_v5, 5  ;;  %13256 = vmatpush3.bf16.msra.mxu0 %v14082_v6  ;;  %v2901_v47 = vrot.slane %v2900_v0, 4  ;;  %13195 = vmatprep.mubr.bf16.mxu0 %v11926_v62  ;;  %v2919_v40 = vrot.slane %v2917_v31, 5  ;;  %v2927_v54 = vshll.u32 %v2411_v50, 16  ;;  %v14088_v0 = vld [vmem:[#allocation2 + $0x98] sm:$0xf] }
 0x253   : > { %v11927_v13 = vcombine.low %v14083_v26, %v14084_v21  ;;  %12824 = vmatmul.mubr.bf16.gmra.mrb[32].mxu1 %v11592_v33  ;;  %v2896_v10 = vsel %vm15013_vm5, %v2891_v32, %v2895_v49  ;;  %v2923_v4 = vrot.slane %v2921_v56, 4  ;;  %v2932_v18 = vshrl.u32 %v2412_v17, 16  ;;  %13257 = vmatprep.subr.bf16.mxu0 %v14021_v30  ;;  %v2417_v49 = vld [vmem:[#allocation2 + $0x1dc] sm:$0x1]  ;;  %v14038_v31 = vld [vmem:[%s14396_s4 + $0x220] sm:$0xff]  }
 0x254   : > { %v2914_v36 = vor.u32 %v2913_v12, %v2910_v15  ;;  %v2906_v25 = vsel %vm15013_vm5, %v2901_v47, %v2905_v11  ;;  %v2929_v43 = vrot.slane %v2927_v54, 5  ;;  %v2935_v23 = vshll.u32 %v2412_v17, 16  ;;  %v2419_v11 = vld [vmem:[#allocation2 + $0x1ec] sm:$0xf]  ;;  %v2420_v6 = vld [vmem:[#allocation2 + $0x1f0] sm:$0x1] }
 0x255   : > { %v2941_v55 = vshll.u32 %v2413_v37, 16  ;;  %v11593_v38 = vcombine.low %v2896_v10, %v2906_v25  ;;  %v2924_v58 = vor.u32 %v2923_v4, %v2919_v40  ;;  %v2934_v14 = vrot.slane %v2932_v18, 4  ;;  %v2421_v10 = vld [vmem:[#allocation2 + $0x1fc] sm:$0xf]  ;;  %v14043_v25 = vld [vmem:[%s14396_s4 + $0x228] sm:$0xff]  }
 0x256   : > { %v2915_v46 = vrot.slane %v2914_v36, 4  ;;  %v2937_v48 = vrot.slane %v2935_v23, 5  ;;  %v2945_v44 = vshrl.u32 %v2413_v37, 16  ;;  %v2951_v59 = vshll.u32 %v2414_v52, 16  ;;  %13258 = vmatpush3.bf16.msra.mxu0 %v14021_v30 }
 0x257   : > { %v2943_v45 = vrot.slane %v2941_v55, 5  ;;  %12827 = vmatprep.mubr.bf16.mxu1 %v11593_v38  ;;  %v2925_v2 = vrot.slane %v2924_v58, 4  ;;  %v11928_v28 = vcombine.low %v14085_v16, %v14086_v60  ;;  %v2956_v22 = vshrl.u32 %v2415_v41, 16  ;;  %13259 = vmatprep.subr.bf16.mxu0 %v14027_v19  ;;  %v14090_v38 = vld [vmem:[#allocation2 + $0xac] sm:$0xf] }
 0x258   : > { %v2920_v63 = vsel %vm15013_vm5, %v2915_v46, %v2919_v40  ;;  %v2938_v34 = vor.u32 %v2937_v48, %v2934_v14  ;;  %v2947_v61 = vrot.slane %v2945_v44, 4  ;;  %v2953_v51 = vrot.slane %v2951_v59, 5  ;;  %v2423_v48 = vld [vmem:[#allocation2 + $0x204] sm:$0x1]  ;;  %v2424_v16 = vld [vmem:[#allocation2 + $0x210] sm:$0xf] }
 0x259   : > { %v2959_v53 = vshll.u32 %v2415_v41, 16  ;;  %v2930_v7 = vsel %vm15013_vm5, %v2925_v2, %v2929_v43  ;;  %13196 = vmatmul.mubr.bf16.gmra.mrb[4].mxu0 %v11927_v13  ;;  %v2958_v20 = vrot.slane %v2956_v22, 4  ;;  %v2965_v57 = vshll.u32 %v2416_v35, 16  ;;  %v14089_v41 = vld [vmem:[#allocation2 + $0xa8] sm:$0xf] }
 0x25a   : > { %v2969_v9 = vshrl.u32 %v2416_v35, 16  ;;  %v11594_v62 = vcombine.low %v2920_v63, %v2930_v7  ;;  %v2939_v27 = vrot.slane %v2938_v34, 4  ;;  %v2948_v8 = vor.u32 %v2947_v61, %v2943_v45  ;;  %13199 = vmatprep.mubr.bf16.mxu0 %v11928_v28  ;;  %13260 = vmatpush3.bf16.msra.mxu0 %v14027_v19  ;;  %v2422_v19 = vld [vmem:[#allocation2 + $0x200] sm:$0xf]  ;;  %v2425_v60 = vld [vmem:[#allocation2 + $0x214] sm:$0xf] }
 0x25b   : > { %v2961_v39 = vrot.slane %v2959_v53, 5  ;;  %v2967_v50 = vrot.slane %v2965_v57, 5  ;;  %v2975_v30 = vshll.u32 %v2417_v49, 16  ;;  %v11929_v15 = vcombine.low %v14087_v29, %v14088_v0  ;;  %13261 = vmatprep.subr.bf16.mxu0 %v14033_v3  ;;  %v14048_v61 = vld [vmem:[%s14396_s4 + $0x230] sm:$0xff]   ;;  %v14091_v7 = vld [vmem:[#allocation2 + $0xbc] sm:$0xf] }
 0x25c   : > { %v2971_v5 = vrot.slane %v2969_v9, 4  ;;  %12828 = vmatmul.mubr.bf16.gmra.mrb[36].mxu1 %v11594_v62  ;;  %v2944_v17 = vsel %vm15013_vm5, %v2939_v27, %v2943_v45  ;;  %v2949_v33 = vrot.slane %v2948_v8, 4  ;;  %v2980_v12 = vshrl.u32 %v2418_v42, 16  ;;  %v2426_v27 = vld [vmem:[#allocation2 + $0x218] sm:$0x1] }
 0x25d   : > { %v2962_v32 = vor.u32 %v2961_v39, %v2958_v20  ;;  %v2977_v37 = vrot.slane %v2975_v30, 5  ;;  %v2983_v47 = vshll.u32 %v2418_v42, 16  ;;  %v2989_v40 = vshll.u32 %v2419_v11, 16  ;;  %v14092_v20 = vld [vmem:[#allocation2 + $0xc0] sm:$0xf] }
 0x25e   : > { %v2972_v56 = vor.u32 %v2971_v5, %v2967_v50  ;;  %v2954_v54 = vsel %vm15013_vm5, %v2949_v33, %v2953_v51  ;;  %v2982_v21 = vrot.slane %v2980_v12, 4  ;;  %v2993_v13 = vshrl.u32 %v2419_v11, 16  ;;  %13262 = vmatpush3.bf16.msra.mxu0 %v14033_v3  ;;  %v2427_v30 = vld [vmem:[#allocation2 + $0x224] sm:$0xf] }
 0x25f   : > { %v2963_v26 = vrot.slane %v2962_v32, 4  ;;  %v11595_v36 = vcombine.low %v2944_v17, %v2954_v54  ;;  %v2985_v52 = vrot.slane %v2983_v47, 5  ;;  %v2991_v18 = vrot.slane %v2989_v40, 5  ;;  %13263 = vmatprep.subr.bf16.mxu0 %v14038_v31  ;;  %v14053_v17 = vld [vmem:[%s14396_s4 + $0x238] sm:$0xff]   ;;  %v14093_v40 = vld [vmem:[#allocation2 + $0xd0] sm:$0xf] }
 0x260   : > { %v2973_v4 = vrot.slane %v2972_v56, 4  ;;  %v2995_v23 = vrot.slane %v2993_v13, 4  ;;  %v2999_v55 = vshll.u32 %v2420_v6, 16  ;;  %v11930_v46 = vcombine.low %v14089_v41, %v14090_v38  ;;  %v14094_v54 = vld [vmem:[#allocation2 + $0xd4] sm:$0xf] }
 0x261   : > { %v2968_v43 = vsel %vm15013_vm5, %v2963_v26, %v2967_v50  ;;  %12831 = vmatprep.mubr.bf16.mxu1 %v11595_v36  ;;  %13200 = vmatmul.mubr.bf16.gmra.mrb[8].mxu0 %v11929_v15  ;;  %v2986_v14 = vor.u32 %v2985_v52, %v2982_v21  ;;  %v3004_v45 = vshrl.u32 %v2421_v10, 16  ;;  %v3007_v44 = vshll.u32 %v2421_v10, 16 }
 0x262   : > { %v2978_v58 = vsel %vm15013_vm5, %v2973_v4, %v2977_v37  ;;  %v2996_v35 = vor.u32 %v2995_v23, %v2991_v18  ;;  %v3001_v63 = vrot.slane %v2999_v55, 5  ;;  %13203 = vmatprep.mubr.bf16.mxu0 %v11930_v46  ;;  %v3013_v2 = vshll.u32 %v2422_v19, 16  ;;  %13264 = vmatpush3.bf16.msra.mxu0 %v14038_v31  ;;  %v2428_v37 = vld [vmem:[#allocation2 + $0x228] sm:$0xf]  ;;  %v2429_v4 = vld [vmem:[#allocation2 + $0x22c] sm:$0x1] }
 0x263   : > { %v11596_v59 = vcombine.low %v2968_v43, %v2978_v58  ;;  %v2987_v28 = vrot.slane %v2986_v14, 4  ;;  %v3006_v22 = vrot.slane %v3004_v45, 4  ;;  %v3009_v3 = vrot.slane %v3007_v44, 5  ;;  %13265 = vmatprep.subr.bf16.mxu0 %v14043_v25  ;;  %v2430_v23 = vld [vmem:[#allocation2 + $0x238] sm:$0xf] }
 0x264   : > { %v3017_v34 = vshrl.u32 %v2422_v19, 16  ;;  %v2997_v51 = vrot.slane %v2996_v35, 4  ;;  %v3015_v49 = vrot.slane %v3013_v2, 5  ;;  %v3023_v53 = vshll.u32 %v2423_v48, 16  ;;  %v2431_v58 = vld [vmem:[#allocation2 + $0x23c] sm:$0xf] }
 0x265   : > { %12832 = vmatmul.mubr.bf16.gmra.mrb[40].mxu1 %v11596_v59  ;;  %v11931_v57 = vcombine.low %v14091_v7, %v14092_v20  ;;  %v2992_v9 = vsel %vm15013_vm5, %v2987_v28, %v2991_v18  ;;  %v3010_v42 = vor.u32 %v3009_v3, %v3006_v22  ;;  %v3028_v8 = vshrl.u32 %v2424_v16, 16  ;;  %v14095_v44 = vld [vmem:[#allocation2 + $0xe4] sm:$0xf]  ;;  %v14096_v59 = vld [vmem:[#allocation2 + $0xe8] sm:$0xf] }
 0x266   : > { %v3019_v62 = vrot.slane %v3017_v34, 4  ;;  %v3002_v39 = vsel %vm15013_vm5, %v2997_v51, %v3001_v63  ;;  %v3025_v11 = vrot.slane %v3023_v53, 5  ;;  %v3031_v50 = vshll.u32 %v2424_v16, 16  ;;  %13266 = vmatpush3.bf16.msra.mxu0 %v14043_v25  ;;  %v2432_v3 = vld [vmem:[#allocation2 + $0x240] sm:$0x1] }
 0x267   : > { %v3037_v5 = vshll.u32 %v2425_v60, 16  ;;  %v11597_v29 = vcombine.low %v2992_v9, %v3002_v39  ;;  %v3011_v0 = vrot.slane %v3010_v42, 4  ;;  %v3030_v31 = vrot.slane %v3028_v8, 4  ;;  %13267 = vmatprep.subr.bf16.mxu0 %v14048_v61  ;;  %v2433_v20 = vld [vmem:[#allocation2 + $0x24c] sm:$0xf] }
 0x268   : > { %v3020_v15 = vor.u32 %v3019_v62, %v3015_v49  ;;  %v3033_v33 = vrot.slane %v3031_v50, 5  ;;  %v3041_v12 = vshrl.u32 %v2425_v60, 16  ;;  %v3047_v56 = vshll.u32 %v2426_v27, 16  ;;  %v2434_v27 = vld [vmem:[#allocation2 + $0x250] sm:$0xf] }
 0x269   : > { %v3039_v32 = vrot.slane %v3037_v5, 5  ;;  %12835 = vmatprep.mubr.bf16.mxu1 %v11597_v29  ;;  %v3016_v6 = vsel %vm15013_vm5, %v3011_v0, %v3015_v49  ;;  %13204 = vmatmul.mubr.bf16.gmra.mrb[12].mxu0 %v11931_v57  ;;  %v11932_v26 = vcombine.low %v14093_v40, %v14094_v54  ;;  %v3052_v21 = vshrl.u32 %v2427_v30, 16  ;;  %v14097_v50 = vld [vmem:[#allocation2 + $0xf8] sm:$0xf]  ;;  %v14098_v5 = vld [vmem:[#allocation2 + $0xfc] sm:$0xf] }
 0x26a   : > { %v3021_v47 = vrot.slane %v3020_v15, 4  ;;  %v3034_v13 = vor.u32 %v3033_v33, %v3030_v31  ;;  %v3043_v10 = vrot.slane %v3041_v12, 4  ;;  %v3049_v36 = vrot.slane %v3047_v56, 5  ;;  %13268 = vmatpush3.bf16.msra.mxu0 %v14048_v61  ;;  %v2435_v15 = vld [vmem:[#allocation2 + $0x254] sm:$0x1] }
 0x26b   : > { %v3055_v52 = vshll.u32 %v2427_v30, 16  ;;  %13207 = vmatprep.mubr.bf16.mxu0 %v11932_v26  ;;  %v3054_v19 = vrot.slane %v3052_v21, 4  ;;  %v3061_v25 = vshll.u32 %v2428_v37, 16  ;;  %v3065_v43 = vshrl.u32 %v2428_v37, 16  ;;  %13269 = vmatprep.subr.bf16.mxu0 %v14053_v17  ;;  %v2436_v37 = vld [vmem:[#allocation2 + $0x260] sm:$0xf] }
 0x26c   : > { %v3026_v18 = vsel %vm15013_vm5, %v3021_v47, %v3025_v11  ;;  %v3035_v41 = vrot.slane %v3034_v13, 4  ;;  %v3044_v38 = vor.u32 %v3043_v10, %v3039_v32  ;;  %v3071_v45 = vshll.u32 %v2429_v4, 16  ;;  %v2437_v26 = vld [vmem:[#allocation2 + $0x264] sm:$0xf]  ;;  %v14100_v4 = vld [vmem:[#allocation2 + $0x110] sm:$0xf] }
 0x26d   : > { %v11598_v55 = vcombine.low %v3016_v6, %v3026_v18  ;;  %v3057_v46 = vrot.slane %v3055_v52, 5  ;;  %v3063_v14 = vrot.slane %v3061_v25, 5  ;;  %v3067_v48 = vrot.slane %v3065_v43, 4  ;;  %v2438_v43 = vld [vmem:[#allocation2 + $0x268] sm:$0x1] }
 0x26e   : > { %v11933_v35 = vcombine.low %v14095_v44, %v14096_v59  ;;  %v3040_v63 = vsel %vm15013_vm5, %v3035_v41, %v3039_v32  ;;  %v3045_v2 = vrot.slane %v3044_v38, 4  ;;  %v3076_v60 = vshrl.u32 %v2430_v23, 16  ;;  %13270 = vmatpush3.bf16.msra.mxu0 %v14053_v17 }
 0x26f   : > { %12836 = vmatmul.mubr.bf16.gmra.mrb[44].mxu1 %v11598_v55  ;;  %v3058_v16 = vor.u32 %v3057_v46, %v3054_v19  ;;  %v3068_v28 = vor.u32 %v3067_v48, %v3063_v14  ;;  %v3073_v22 = vrot.slane %v3071_v45, 5  ;;  %v3079_v34 = vshll.u32 %v2430_v23, 16 }
 0x270   : > { %v3085_v61 = vshll.u32 %v2431_v58, 16  ;;  %v3050_v51 = vsel %vm15013_vm5, %v3045_v2, %v3049_v36  ;;  %v3078_v53 = vrot.slane %v3076_v60, 4  ;;  %v3089_v7 = vshrl.u32 %v2431_v58, 16  ;;  %v14099_v36 = vld [vmem:[#allocation2 + $0x10c] sm:$0xf] }
 0x271   : > { %v3059_v49 = vrot.slane %v3058_v16, 4  ;;  %v11599_v57 = vcombine.low %v3040_v63, %v3050_v51  ;;  %v3069_v9 = vrot.slane %v3068_v28, 4  ;;  %13208 = vmatmul.mubr.bf16.gmra.mrb[16].mxu0 %v11933_v35  ;;  %v3081_v42 = vrot.slane %v3079_v34, 5  ;;  %v2439_v58 = vld [vmem:[#allocation2 + $0x274] sm:$0xf] }
 0x272   : > { %v3087_v62 = vrot.slane %v3085_v61, 5  ;;  %v3091_v39 = vrot.slane %v3089_v7, 4  ;;  %v3095_v11 = vshll.u32 %v2432_v3, 16  ;;  %v11934_v30 = vcombine.low %v14097_v50, %v14098_v5  ;;  %v2440_v16 = vld [vmem:[#allocation2 + $0x278] sm:$0xf] }
 0x273   : > { %v3064_v8 = vsel %vm15013_vm5, %v3059_v49, %v3063_v14  ;;  %12839 = vmatprep.mubr.bf16.mxu1 %v11599_v57  ;;  %v3074_v29 = vsel %vm15013_vm5, %v3069_v9, %v3073_v22  ;;  %v3082_v0 = vor.u32 %v3081_v42, %v3078_v53  ;;  %v3100_v31 = vshrl.u32 %v2433_v20, 16  ;;  %v14101_v22 = vld [vmem:[#allocation2 + $0x120] sm:$0xf]  ;;  %v14102_v3 = vld [vmem:[#allocation2 + $0x124] sm:$0xf] }
 0x274   : > { %v3103_v17 = vshll.u32 %v2433_v20, 16  ;;  %v11600_v33 = vcombine.low %v3064_v8, %v3074_v29  ;;  %v3092_v32 = vor.u32 %v3091_v39, %v3087_v62  ;;  %v3097_v12 = vrot.slane %v3095_v11, 5  ;;  %13211 = vmatprep.mubr.bf16.mxu0 %v11934_v30  ;;  %v2441_v7 = vld [vmem:[#allocation2 + $0x27c] sm:$0x1]  ;;  %v2443_v5 = vld [vmem:[#allocation2 + $0x28c] sm:$0xf] }
 0x275   : > { %v3109_v56 = vshll.u32 %v2434_v27, 16  ;;  %v3083_v6 = vrot.slane %v3082_v0, 4  ;;  %v3102_v47 = vrot.slane %v3100_v31, 4  ;;  %v3113_v54 = vshrl.u32 %v2434_v27, 16  ;;  %v2442_v27 = vld [vmem:[#allocation2 + $0x288] sm:$0xf] }
 0x276   : > { %v3105_v40 = vrot.slane %v3103_v17, 5  ;;  %v3093_v21 = vrot.slane %v3092_v32, 4  ;;  %v3119_v10 = vshll.u32 %v2435_v15, 16  ;;  %v11935_v52 = vcombine.low %v14099_v36, %v14100_v4  ;;  %v14103_v15 = vld [vmem:[#allocation2 + $0x134] sm:$0xf] }
 0x277   : > { %12840 = vmatmul.mubr.bf16.gmra.mrb[48].mxu1 %v11600_v33  ;;  %v3111_v13 = vrot.slane %v3109_v56, 5  ;;  %v3088_v18 = vsel %vm15013_vm5, %v3083_v6, %v3087_v62  ;;  %v3115_v25 = vrot.slane %v3113_v54, 4  ;;  %v3124_v23 = vshrl.u32 %v2436_v37, 16  ;;  %v14104_v31 = vld [vmem:[#allocation2 + $0x138] sm:$0xf] }
 0x278   : > { %v3106_v19 = vor.u32 %v3105_v40, %v3102_v47  ;;  %v3098_v55 = vsel %vm15013_vm5, %v3093_v21, %v3097_v12  ;;  %v3121_v41 = vrot.slane %v3119_v10, 5  ;;  %v3127_v38 = vshll.u32 %v2436_v37, 16  ;;  %v2444_v47 = vld [vmem:[#allocation2 + $0x290] sm:$0x1]  ;;  %v2445_v36 = vld [vmem:[#allocation2 + $0x29c] sm:$0xf] }
 0x279   : > { %v3133_v46 = vshll.u32 %v2437_v26, 16  ;;  %v11601_v14 = vcombine.low %v3088_v18, %v3098_v55  ;;  %v3116_v45 = vor.u32 %v3115_v25, %v3111_v13  ;;  %13212 = vmatmul.mubr.bf16.gmra.mrb[20].mxu0 %v11935_v52  ;;  %v3126_v44 = vrot.slane %v3124_v23, 4  ;;  %v2446_v25 = vld [vmem:[#allocation2 + $0x2a0] sm:$0xf] }
 0x27a   : > { %v3107_v48 = vrot.slane %v3106_v19, 4  ;;  %v3129_v59 = vrot.slane %v3127_v38, 5  ;;  %v3137_v63 = vshrl.u32 %v2437_v26, 16  ;;  %v3143_v2 = vshll.u32 %v2438_v43, 16  ;;  %v14106_v38 = vld [vmem:[#allocation2 + $0x14c] sm:$0xf] }
 0x27b   : > { %v3135_v35 = vrot.slane %v3133_v46, 5  ;;  %12843 = vmatprep.mubr.bf16.mxu1 %v11601_v14  ;;  %v3117_v28 = vrot.slane %v3116_v45, 4  ;;  %v11936_v34 = vcombine.low %v14101_v22, %v14102_v3  ;;  %v3148_v61 = vshrl.u32 %v2439_v58, 16 }
 0x27c   : > { %v3112_v60 = vsel %vm15013_vm5, %v3107_v48, %v3111_v13  ;;  %v3130_v51 = vor.u32 %v3129_v59, %v3126_v44  ;;  %v3139_v49 = vrot.slane %v3137_v63, 4  ;;  %v3145_v53 = vrot.slane %v3143_v2, 5  ;;  %v2447_v48 = vld [vmem:[#allocation2 + $0x2a4] sm:$0x1] }
 0x27d   : > { %v3151_v20 = vshll.u32 %v2439_v58, 16  ;;  %v3122_v57 = vsel %vm15013_vm5, %v3117_v28, %v3121_v41  ;;  %13215 = vmatprep.mubr.bf16.mxu0 %v11936_v34  ;;  %v3150_v9 = vrot.slane %v3148_v61, 4  ;;  %v3157_v42 = vshll.u32 %v2440_v16, 16  ;;  %v14105_v41 = vld [vmem:[#allocation2 + $0x148] sm:$0xf] }
 0x27e   : > { %v3161_v62 = vshrl.u32 %v2440_v16, 16  ;;  %v11602_v8 = vcombine.low %v3112_v60, %v3122_v57  ;;  %v3131_v39 = vrot.slane %v3130_v51, 4  ;;  %v3140_v11 = vor.u32 %v3139_v49, %v3135_v35  ;;  %v3769_v16 = vld [vmem:[#allocation2 + $0x18] sm:$0x8]  ;;  %v14107_v49 = vld [vmem:[#allocation2 + $0x15c] sm:$0xf] }
 0x27f   : > { %v3153_v50 = vrot.slane %v3151_v20, 5  ;;  %v3159_v30 = vrot.slane %v3157_v42, 5  ;;  %v3167_v0 = vshll.u32 %v2441_v7, 16  ;;  %v11937_v17 = vcombine.low %v14103_v15, %v14104_v31 }
 0x280   : > { %v3163_v29 = vrot.slane %v3161_v62, 4  ;;  %12844 = vmatmul.mubr.bf16.gmra.mrb[52].mxu1 %v11602_v8  ;;  %v3136_v33 = vsel %vm15013_vm5, %v3131_v39, %v3135_v35  ;;  %v3141_v32 = vrot.slane %v3140_v11, 4  ;;  %v3172_v56 = vshrl.u32 %v2442_v27, 16  ;;  %v3772_v62 = vld [vmem:[#allocation2 + $0x2c] sm:$0x8] }
 0x281   : > { %v3154_v12 = vor.u32 %v3153_v50, %v3150_v9  ;;  %v3169_v6 = vrot.slane %v3167_v0, 5  ;;  %13216 = vmatmul.mubr.bf16.gmra.mrb[24].mxu0 %v11937_v17  ;;  %v3175_v40 = vshll.u32 %v2442_v27, 16  ;;  %v3181_v54 = vshll.u32 %v2443_v5, 16  ;;  %v3775_v27 = vld [vmem:[#allocation2 + $0x40] sm:$0x8]  ;;  %v18250_v11 = vld [vmem:[#allocation37_spill] sm:$0xff] }
 0x282   : > { %v3164_v37 = vor.u32 %v3163_v29, %v3159_v30  ;;  %v3146_v26 = vsel %vm15013_vm5, %v3141_v32, %v3145_v53  ;;  %v3174_v13 = vrot.slane %v3172_v56, 4  ;;  %v3185_v10 = vshrl.u32 %v2443_v5, 16  ;;  %v14108_v53 = vld [vmem:[#allocation2 + $0x160] sm:$0xf]  ;;  %v18251_v50 = vld [vmem:[#allocation6_spill] sm:$0xff]  ;;  %v18253_v56 = vld [vmem:[#allocation39_spill] sm:$0xff] }
 0x283   : > { %v3155_v21 = vrot.slane %v3154_v12, 4  ;;  %v11603_v4 = vcombine.low %v3136_v33, %v3146_v26  ;;  %v3177_v18 = vrot.slane %v3175_v40, 5  ;;  %v3183_v19 = vrot.slane %v3181_v54, 5  ;;  %v14109_v29 = vld [vmem:[#allocation2 + $0x198] sm:$0xf] }
 0x284   : > { %v3165_v52 = vrot.slane %v3164_v37, 4  ;;  %v3187_v23 = vrot.slane %v3185_v10, 4  ;;  %v3191_v55 = vshll.u32 %v2444_v47, 16  ;;  %v11938_v46 = vcombine.low %v14105_v41, %v14106_v38  ;;  %v14110_v0 = vld [vmem:[#allocation2 + $0x19c] sm:$0xf] }
 0x285   : > { %v3160_v43 = vsel %vm15013_vm5, %v3155_v21, %v3159_v30  ;;  %12847 = vmatprep.mubr.bf16.mxu1 %v11603_v4  ;;  %v3178_v14 = vor.u32 %v3177_v18, %v3174_v13  ;;  %v3196_v45 = vshrl.u32 %v2445_v36, 16  ;;  %v3199_v44 = vshll.u32 %v2445_v36, 16  ;;  %v18254_v37 = vld [vmem:[#allocation7_spill] sm:$0xff]  ;;  %v14111_v40 = vld [vmem:[#allocation2 + $0x1ac] sm:$0xf]  ;;  %v18256_v4 = vld [vmem:[#allocation36_spill] sm:$0xff] }
 0x286   : > { %v3170_v58 = vsel %vm15013_vm5, %v3165_v52, %v3169_v6  ;;  %v3188_v35 = vor.u32 %v3187_v23, %v3183_v19  ;;  %v3193_v63 = vrot.slane %v3191_v55, 5  ;;  %13219 = vmatprep.mubr.bf16.mxu0 %v11938_v46  ;;  %v3205_v2 = vshll.u32 %v2446_v25, 16  ;;  %v14112_v54 = vld [vmem:[#allocation2 + $0x1b0] sm:$0xf]  ;;  %v3778_v13 = vld [vmem:[#allocation2 + $0x54] sm:$0x8] }
 0x287   : > { %v11604_v59 = vcombine.low %v3160_v43, %v3170_v58  ;;  %v3179_v60 = vrot.slane %v3178_v14, 4  ;;  %v3198_v28 = vrot.slane %v3196_v45, 4  ;;  %v3201_v22 = vrot.slane %v3199_v44, 5  ;;  %v18257_v18 = vld [vmem:[#allocation12_spill] sm:$0xff]  ;;  %v18260_v58 = vld [vmem:[#allocation13_spill] sm:$0xff] }
 0x288   : > { %v3209_v3 = vshrl.u32 %v2446_v25, 16  ;;  %v3189_v34 = vrot.slane %v3188_v35, 4  ;;  %v3207_v61 = vrot.slane %v3205_v2, 5  ;;  %v3215_v51 = vshll.u32 %v2447_v48, 16  ;;  %v18261_v14 = vld [vmem:[#allocation9_spill] sm:$0xff] }
 0x289   : > { %12848 = vmatmul.mubr.bf16.gmra.mrb[56].mxu1 %v11604_v59  ;;  %v11939_v7 = vcombine.low %v14107_v49, %v14108_v53  ;;  %v3184_v20 = vsel %vm15013_vm5, %v3179_v60, %v3183_v19  ;;  %v3202_v57 = vor.u32 %v3201_v22, %v3198_v28  ;;  %v3866_v42 = vshrl.u32 %v3769_v16, 16  ;;  %v18258_v19 = vld [vmem:[#allocation8_spill] sm:$0xff]  ;;  %v3781_v2 = vld [vmem:[#allocation2 + $0x68] sm:$0x8]  ;;  %v18263_v60 = vld [vmem:[#allocation38_spill] sm:$0xff] }
 0x28a   : > { %v3211_v9 = vrot.slane %v3209_v3, 4  ;;  %v3194_v8 = vsel %vm15013_vm5, %v3189_v34, %v3193_v63  ;;  %v3217_v39 = vrot.slane %v3215_v51, 5  ;;  %v18252_v5 = vrot.slane %v18251_v50, 4  ;;  %v14113_v44 = vld [vmem:[#allocation2 + $0x1c0] sm:$0xf]  ;;  %v18264_v3 = vld [vmem:[#allocation14_spill] sm:$0xff] }
 0x28b   : > { %13220 = vmatmul.mubr.bf16.gmra.mrb[28].mxu0 %v11939_v7  ;;  %v11940_v15 = vcombine.low %v14109_v29, %v14110_v0  ;;  %v11605_v31 = vcombine.low %v3184_v20, %v3194_v8  ;;  %v3203_v17 = vrot.slane %v3202_v57, 4  ;;  %v11615_v32 = vrot.slane %v3866_v42, 11  ;;  %v14114_v59 = vld [vmem:[#allocation2 + $0x1c4] sm:$0xf]  ;;  %v18265_v34 = vld [vmem:[#allocation10_spill] sm:$0xff]  ;;  %v18267_v42 = vld [vmem:[#allocation15_spill] sm:$0xff] }
 0x28c   : > { %v3886_v30 = vsel %vm15288_vm8, %v18252_v5, %v18250_v11  ;;  %v3212_v33 = vor.u32 %v3211_v9, %v3207_v61  ;;  %v3888_v12 = vshrl.u32 %v3772_v62, 16  ;;  %v18255_v6 = vrot.slane %v18254_v37, 4  ;;  %v3784_v57 = vld [vmem:[#allocation2 + $0x7c] sm:$0x8]  ;;  %v14116_v11 = vld [vmem:[#allocation2 + $0x1d8] sm:$0xf] }
 0x28d   : > { %13223 = vmatprep.mubr.bf16.mxu0 %v11940_v15  ;;  %v11941_v26 = vcombine.low %v14111_v40, %v14112_v54  ;;  %v3910_v21 = vshrl.u32 %v3775_v27, 16  ;;  %12851 = vmatprep.mubr.bf16.mxu1 %v11605_v31  ;;  %v3208_v10 = vsel %vm15013_vm5, %v3203_v17, %v3207_v61  ;;  %v3877_v52 = vsel %vm15288_vm8, %v11615_v32, %v18256_v4  ;;  %v18268_v62 = vld [vmem:[#allocation11_spill] sm:$0xff]  ;;  %v18270_v29 = vld [vmem:[#allocation20_spill] sm:$0xff]  ;;  %v18274_v32 = vld [vmem:[#allocation17_spill] sm:$0xff] }
 0x28e   : > { %v3908_v47 = vsel %vm15288_vm8, %v18255_v6, %v18253_v56  ;;  %v3213_v36 = vrot.slane %v3212_v33, 4  ;;  %v18259_v25 = vshll.u32 %v18258_v19, 16  ;;  %v11664_v23 = vcombine.low %v3877_v52, %v3886_v30  ;;  %v18271_v0 = vld [vmem:[#allocation16_spill] sm:$0xff]  ;;  %v18273_v33 = vld [vmem:[#allocation21_spill] sm:$0xff]  ;;  %v18277_v4 = vld [vmem:[#allocation18_spill] sm:$0xff] }
 0x28f   : > { %v11616_v55 = vrot.slane %v3888_v12, 11  ;;  %v11617_v41 = vrot.slane %v3910_v21, 11  ;;  %v3922_v38 = vrot.slane %v18257_v18, 4  ;;  %v18262_v48 = vshll.u32 %v18261_v14, 16  ;;  %v14118_v40 = vld [vmem:[#allocation2 + $0x1ec] sm:$0xf] }
 0x290   : > { %v3920_v43 = vor.u32 %v18259_v25, %v18257_v18  ;;  %v3218_v46 = vsel %vm15013_vm5, %v3213_v36, %v3217_v39  ;;  %v11942_v35 = vcombine.low %v14113_v44, %v14114_v59  ;;  %v3932_v63 = vshrl.u32 %v3778_v13, 16  ;;  %v14115_v39 = vld [vmem:[#allocation2 + $0x1d4] sm:$0xf]  ;;  %v3787_v21 = vld [vmem:[#allocation2 + $0x90] sm:$0x8]  ;;  %v18276_v36 = vld [vmem:[#allocation23_spill] sm:$0xff] }
 0x291   : > { %v3929_v45 = vor.u32 %v18262_v48, %v18260_v58  ;;  %v11606_v16 = vcombine.low %v3208_v10, %v3218_v46  ;;  %v3899_v28 = vsel %vm15288_vm8, %v11616_v55, %v18263_v60  ;;  %v18266_v61 = vshll.u32 %v18265_v34, 16  ;;  %v18280_v55 = vld [vmem:[#allocation19_spill] sm:$0xff]  ;;  %v16045_v58 = vld [vmem:[#allocation2 + $0x200] sm:$0xf]  ;;  %v3790_v48 = vld [vmem:[#allocation2 + $0xa4] sm:$0x8] }
 0x292   : > { %v3921_v22 = vsel %vm15288_vm8, %v11617_v41, %v3920_v43  ;;  %v11665_v49 = vcombine.low %v3899_v28, %v3908_v47  ;;  %v11618_v7 = vrot.slane %v3932_v63, 11  ;;  %v3944_v20 = vrot.slane %v18264_v3, 4  ;;  %v14117_v47 = vld [vmem:[#allocation2 + $0x1e8] sm:$0xf]  ;;  %v16043_v46 = vld [vmem:[#allocation2 + $0x1fc] sm:$0xf] }
 0x293   : > { %v3942_v51 = vor.u32 %v18266_v61, %v18264_v3  ;;  %v3930_v53 = vsel %vm15288_vm8, %v3922_v38, %v3929_v45  ;;  %12852 = vmatmul.mubr.bf16.gmra.mrb[60].mxu1 %v11606_v16  ;;  %13224 = vmatmul.mubr.bf16.gmra.mrb[32].mxu0 %v11941_v26  ;;  %v18269_v27 = vshll.u32 %v18268_v62, 16  ;;  %v11943_v50 = vcombine.low %v14115_v39, %v14116_v11  ;;  %v18282_v59 = vld [vmem:[#allocation29_spill] sm:$0xff]  ;;  %v18286_v3 = vld [vmem:[#allocation26_spill] sm:$0xff] }
 0x294   : > { %v11666_v9 = vcombine.low %v3921_v22, %v3930_v53  ;;  %v3954_v5 = vshrl.u32 %v3781_v2, 16  ;;  %12871 = vmatprep.mubr.bf16.mxu1 %v11664_v23  ;;  %13227 = vmatprep.mubr.bf16.mxu0 %v11942_v35  ;;  %v18272_v15 = vshll.u32 %v18271_v0, 16  ;;  %v3966_v17 = vrot.slane %v18270_v29, 4  ;;  %v18279_v23 = vld [vmem:[#allocation25_spill] sm:$0xff]  ;;  %v18283_v35 = vld [vmem:[#allocation24_spill] sm:$0xff]  ;;  %v18285_v22 = vld [vmem:[#allocation30_spill] sm:$0xff] }
 0x295   : > { %v3951_v8 = vor.u32 %v18269_v27, %v18267_v42  ;;  %v3943_v30 = vsel %vm15288_vm8, %v11618_v7, %v3942_v51  ;;  %v18275_v12 = vshll.u32 %v18274_v32, 16  ;;  %v11944_v54 = vcombine.low %v14117_v47, %v14118_v40  ;;  %v16062_v51 = vld [vmem:[#allocation2 + $0x210] sm:$0xf]  ;;  %v16064_v53 = vld [vmem:[#allocation2 + $0x214] sm:$0xf]  ;;  %v18288_v27 = vld [vmem:[#allocation32_spill] sm:$0xff] }
 0x296   : > { %v3964_v31 = vor.u32 %v18272_v15, %v18270_v29  ;;  %v11619_v6 = vrot.slane %v3954_v5, 11  ;;  %v3976_v26 = vshrl.u32 %v3784_v57, 16  ;;  %v18278_v52 = vshll.u32 %v18277_v4, 16  ;;  %v18291_v29 = vld [vmem:[#allocation33_spill] sm:$0xff]  ;;  %v18292_v0 = vld [vmem:[#allocation28_spill] sm:$0xff]  ;;  %v18295_v47 = vld [vmem:[#allocation34_spill] sm:$0xff] }
 0x297   : > { %v3973_v56 = vor.u32 %v18275_v12, %v18273_v33  ;;  %v3952_v37 = vsel %vm15288_vm8, %v3944_v20, %v3951_v8  ;;  %v3988_v19 = vrot.slane %v18276_v36, 4  ;;  %v18281_v41 = vshll.u32 %v18280_v55, 16  ;;  %v3793_v20 = vld [vmem:[#allocation2 + $0xb8] sm:$0x8]  ;;  %v16081_v33 = vld [vmem:[#allocation2 + $0x228] sm:$0xf] }
 0x298   : > { %v16030_v13 = vcombine.low %v3943_v30, %v3952_v37  ;;  %v3986_v18 = vor.u32 %v18278_v52, %v18276_v36  ;;  %v3965_v25 = vsel %vm15288_vm8, %v11619_v6, %v3964_v31  ;;  %v11620_v43 = vrot.slane %v3976_v26, 11  ;;  %v18289_v8 = vld [vmem:[#allocation27_spill] sm:$0xff]  ;;  %v3796_v12 = vld [vmem:[#allocation2 + $0xcc] sm:$0x8]  ;;  %v18294_v6 = vld [vmem:[#allocation42_spill] sm:$0xff] }
 0x299   : > { %v3974_v10 = vsel %vm15288_vm8, %v3966_v17, %v3973_v56  ;;  %v3995_v38 = vor.u32 %v18281_v41, %v18279_v23  ;;  %v11945_v14 = vcombine.low %v16043_v46, %v16045_v58  ;;  %v3998_v44 = vshrl.u32 %v3787_v21, 16  ;;  %v16079_v17 = vld [vmem:[#allocation2 + $0x224] sm:$0xf]  ;;  %v14126_v21 = vld [vmem:[%s14396_s4 + $0x108] sm:$0xff]   ;;  %v18298_v52 = vld [vmem:[#allocation35_spill] sm:$0xff] }
 0x29a   : > { %v16049_v45 = vcombine.low %v3965_v25, %v3974_v10  ;;  %v18284_v63 = vshll.u32 %v18283_v35, 16  ;;  %v4010_v16 = vrot.slane %v18282_v59, 4  ;;  %v3987_v60 = vsel %vm15288_vm8, %v11620_v43, %v3986_v18  ;;  %v16102_v23 = vld [vmem:[#allocation2 + $0x238] sm:$0xf]  ;;  %v18301_v35 = vld [vmem:[#allocation40_spill] sm:$0xff] }
 0x29b   : > { %v3996_v28 = vsel %vm15288_vm8, %v3988_v19, %v3995_v38  ;;  %v18287_v34 = vshll.u32 %v18286_v3, 16  ;;  %v11946_v7 = vcombine.low %v16062_v51, %v16064_v53  ;;  %v11621_v42 = vrot.slane %v3998_v44, 11  ;;  %12872 = vmatmul.mubr.bf16.vlgmr.msra.gmra.mrb[0].mxu1 %v11665_v49  ;;  %13228 = vmatmul.mubr.bf16.gmra.mrb[36].mxu0 %v11943_v50  ;;  %v14125_v49 = vld [vmem:[%s14396_s4 + $0x100] sm:$0xff]   ;;  %v18304_v3 = vld [vmem:[#allocation41_spill] sm:$0xff] }
 0x29c   : > { %v4008_v2 = vor.u32 %v18284_v63, %v18282_v59  ;;  %v16068_v57 = vcombine.low %v3987_v60, %v3996_v28  ;;  %v4020_v62 = vshrl.u32 %v3790_v48, 16  ;;  %v18290_v39 = vshll.u32 %v18289_v8, 16  ;;  %13343 = vmatpush3.bf16.msra.mxu1 %v14125_v49  ;;  %12875 = vmatprep.mubr.bf16.mxu1 %v11666_v9  ;;  %v18297_v9 = vld [vmem:[#allocation43_spill] sm:$0xff]  ;;  %v3799_v38 = vld [vmem:[#allocation2 + $0xe0] sm:$0x8]  ;;  %v18300_v59 = vld [vmem:[#allocation46_spill] sm:$0xff] }
 0x29d   : > { %v4017_v61 = vor.u32 %v18287_v34, %v18285_v22  ;;  %v4032_v30 = vrot.slane %v18288_v27, 4  ;;  %v18293_v15 = vshll.u32 %v18292_v0, 16  ;;  %v11947_v32 = vcombine.low %v16079_v17, %v16081_v33  ;;  %13231 = vmatprep.mubr.bf16.mxu0 %v11944_v54  ;;  %13336 = vmatprep.subr.bf16.mxu1 %v14126_v21  ;;  %v16104_v54 = vld [vmem:[#allocation2 + $0x23c] sm:$0xf]  ;;  %v18303_v22 = vld [vmem:[#allocation48_spill] sm:$0xff]  ;;  %v18309_v49 = vld [vmem:[#allocation54_spill] sm:$0xff] }
 0x29e   : > { %v4030_v11 = vor.u32 %v18290_v39, %v18288_v27  ;;  %v4009_v50 = vsel %vm15288_vm8, %v11621_v42, %v4008_v2  ;;  %v11622_v56 = vrot.slane %v4020_v62, 11  ;;  %v4042_v37 = vshrl.u32 %v3793_v20, 16  ;;  %v16121_v20 = vld [vmem:[#allocation2 + $0x24c] sm:$0xf]  ;;  %v16123_v42 = vld [vmem:[#allocation2 + $0x250] sm:$0xf] }
 0x29f   : > { %v4018_v5 = vsel %vm15288_vm8, %v4010_v16, %v4017_v61  ;;  %v4039_v31 = vor.u32 %v18293_v15, %v18291_v29  ;;  %v18296_v40 = vshll.u32 %v18295_v47, 16  ;;  %v4054_v4 = vrot.slane %v18294_v6, 4  ;;  %v3802_v27 = vld [vmem:[#allocation2 + $0xf4] sm:$0x8]  ;;  %v16143_v47 = vld [vmem:[#allocation2 + $0x264] sm:$0xf] }
 0x2a0   : > { %v16092_v10 = vcombine.low %v4009_v50, %v4018_v5  ;;  %v18299_v18 = vshll.u32 %v18298_v52, 16  ;;  %v4031_v25 = vsel %vm15288_vm8, %v11622_v56, %v4030_v11  ;;  %v11623_v43 = vrot.slane %v4042_v37, 11  ;;  %13344 = vmatpush3.bf16.msra.mxu1 %v14126_v21  ;;  %v14131_v39 = vld [vmem:[%s14396_s4 + $0x110] sm:$0xff]   ;;  %v18306_v5 = vld [vmem:[#allocation52_spill] sm:$0xff]  ;;  %v18310_v50 = vld [vmem:[#allocation45_spill] sm:$0xff] }
 0x2a1   : > { %v4052_v26 = vor.u32 %v18296_v40, %v18294_v6  ;;  %v4040_v36 = vsel %vm15288_vm8, %v4032_v30, %v4039_v31  ;;  %v11948_v55 = vcombine.low %v16102_v23, %v16104_v54  ;;  %v4064_v41 = vshrl.u32 %v3796_v12, 16  ;;  %13337 = vmatprep.subr.bf16.mxu1 %v14131_v39  ;;  %v18307_v30 = vld [vmem:[#allocation44_spill] sm:$0xff]  ;;  %v18313_v52 = vld [vmem:[#allocation51_spill] sm:$0xff]  ;;  %v16237_v33 = vld [vmem:[#allocation2 + $0x2b0] sm:$0xf] }
 0x2a2   : > { %v4061_v19 = vor.u32 %v18299_v18, %v18297_v9  ;;  %v16108_v48 = vcombine.low %v4031_v25, %v4040_v36  ;;  %v18302_v63 = vshll.u32 %v18301_v35, 16  ;;  %v4076_v16 = vrot.slane %v18300_v59, 4  ;;  %v16141_v6 = vld [vmem:[#allocation2 + $0x260] sm:$0xf]  ;;  %v18312_v9 = vld [vmem:[#allocation58_spill] sm:$0xff]  ;;  %v18319_v35 = vld [vmem:[#allocation61_spill] sm:$0xff] }
 0x2a3   : > { %v4053_v60 = vsel %vm15288_vm8, %v11623_v43, %v4052_v26  ;;  %v11624_v28 = vrot.slane %v4064_v41, 11  ;;  %v18305_v34 = vshll.u32 %v18304_v3, 16  ;;  %v11949_v62 = vcombine.low %v16121_v20, %v16123_v42  ;;  %v3805_v26 = vld [vmem:[#allocation2 + $0x108] sm:$0x8]  ;;  %12876 = vmatmul.mubr.bf16.gmra.mrb[4].mxu1 %v16030_v13  ;;  %13232 = vmatmul.mubr.bf16.gmra.mrb[40].mxu0 %v11945_v14  ;;  %v18315_v58 = vld [vmem:[#allocation60_spill] sm:$0xff]  ;;  %v18322_v3 = vld [vmem:[#allocation62_spill] sm:$0xff] }
 0x2a4   : > { %v4062_v44 = vsel %vm15288_vm8, %v4054_v4, %v4061_v19  ;;  %v4074_v2 = vor.u32 %v18302_v63, %v18300_v59  ;;  %v4086_v11 = vshrl.u32 %v3799_v38, 16  ;;  %v18308_v29 = vshll.u32 %v18307_v30, 16  ;;  %12879 = vmatprep.mubr.bf16.mxu1 %v16049_v45  ;;  %13235 = vmatprep.mubr.bf16.mxu0 %v11946_v7  ;;  %v18316_v14 = vld [vmem:[#allocation53_spill] sm:$0xff]  ;;  %v16166_v41 = vld [vmem:[#allocation2 + $0x274] sm:$0xf]  ;;  %v18318_v59 = vld [vmem:[#allocation67_spill] sm:$0xff] }
 0x2a5   : > { %v4083_v61 = vor.u32 %v18305_v34, %v18303_v22  ;;  %v16127_v8 = vcombine.low %v4053_v60, %v4062_v44  ;;  %v4098_v15 = vrot.slane %v18306_v5, 4  ;;  %v18311_v56 = vshll.u32 %v18310_v50, 16  ;;  %v16168_v38 = vld [vmem:[#allocation2 + $0x278] sm:$0xf]  ;;  %v3808_v44 = vld [vmem:[#allocation2 + $0x11c] sm:$0x8]  ;;  %13345 = vmatpush3.bf16.msra.mxu1 %v14131_v39 }
 0x2a6   : > { %v4096_v0 = vor.u32 %v18308_v29, %v18306_v5  ;;  %v4075_v31 = vsel %vm15288_vm8, %v11624_v28, %v4074_v2  ;;  %v11950_v40 = vcombine.low %v16141_v6, %v16143_v47  ;;  %v11625_v36 = vrot.slane %v4086_v11, 11  ;;  %v18321_v22 = vld [vmem:[#allocation68_spill] sm:$0xff]  ;;  %v16188_v5 = vld [vmem:[#allocation2 + $0x288] sm:$0xf]  ;;  %v16190_v30 = vld [vmem:[#allocation2 + $0x28c] sm:$0xf] }
 0x2a7   : > { %v4084_v12 = vsel %vm15288_vm8, %v4076_v16, %v4083_v61  ;;  %v4105_v37 = vor.u32 %v18311_v56, %v18309_v49  ;;  %v4108_v4 = vshrl.u32 %v3802_v27, 16  ;;  %v18314_v18 = vshll.u32 %v18313_v52, 16  ;;  %v14136_v27 = vld [vmem:[%s14396_s4 + $0x118] sm:$0xff]   ;;  %v18324_v49 = vld [vmem:[#allocation73_spill] sm:$0xff]  ;;  %v18325_v50 = vld [vmem:[#allocation70_spill] sm:$0xff] }
 0x2a8   : > { %v16151_v21 = vcombine.low %v4075_v31, %v4084_v12  ;;  %v4120_v46 = vrot.slane %v18312_v9, 4  ;;  %v18317_v25 = vshll.u32 %v18316_v14, 16  ;;  %v11951_v45 = vcombine.low %v16166_v41, %v16168_v38  ;;  %13338 = vmatprep.subr.bf16.mxu1 %v14136_v27  ;;  %v18327_v52 = vld [vmem:[#allocation77_spill] sm:$0xff] }
 0x2a9   : > { %v4118_v19 = vor.u32 %v18314_v18, %v18312_v9  ;;  %v4106_v13 = vsel %vm15288_vm8, %v4098_v15, %v4105_v37  ;;  %v4097_v51 = vsel %vm15288_vm8, %v11625_v36, %v4096_v0  ;;  %v11626_v53 = vrot.slane %v4108_v4, 11  ;;  %v3811_v15 = vld [vmem:[#allocation2 + $0x130] sm:$0x8]  ;;  %v3814_v36 = vld [vmem:[#allocation2 + $0x144] sm:$0x8]  ;;  %13346 = vmatpush3.bf16.msra.mxu1 %v14136_v27 }
 0x2aa   : > { %v4127_v43 = vor.u32 %v18317_v25, %v18315_v58  ;;  %v4130_v7 = vshrl.u32 %v3805_v26, 16  ;;  %v18320_v63 = vshll.u32 %v18319_v35, 16  ;;  %v16177_v16 = vcombine.low %v4097_v51, %v4106_v13  ;;  %v18328_v18 = vld [vmem:[#allocation72_spill] sm:$0xff]  ;;  %v9111_v47 = vld [vmem:[#allocation2 + $0x48] sm:$0xf] }
 0x2ab   : > { %v4142_v28 = vrot.slane %v18318_v59, 4  ;;  %v18323_v34 = vshll.u32 %v18322_v3, 16  ;;  %v4119_v39 = vsel %vm15288_vm8, %v11626_v53, %v4118_v19  ;;  %v11952_v29 = vcombine.low %v16188_v5, %v16190_v30  ;;  %v16209_v58 = vld [vmem:[#allocation2 + $0x2a0] sm:$0xf]  ;;  %12880 = vmatmul.mubr.bf16.gmra.mrb[8].mxu1 %v16068_v57  ;;  %13236 = vmatmul.mubr.bf16.gmra.mrb[44].mxu0 %v11947_v32  ;;  %v3818_v27 = vld [vmem:[#allocation2 + $0x184] sm:$0xf] }
 0x2ac   : > { %v4140_v2 = vor.u32 %v18320_v63, %v18318_v59  ;;  %v4128_v60 = vsel %vm15288_vm8, %v4120_v46, %v4127_v43  ;;  %v11627_v11 = vrot.slane %v4130_v7, 11  ;;  %v4152_v0 = vshrl.u32 %v3808_v44, 16  ;;  %v16207_v46 = vld [vmem:[#allocation2 + $0x29c] sm:$0xf]  ;;  %v18330_v44 = vld [vmem:[#allocation82_spill] sm:$0xff]  ;;  %v18331_v51 = vld [vmem:[#allocation76_spill] sm:$0xff]  ;;  %12883 = vmatprep.mubr.bf16.mxu1 %v16092_v10  ;;  %13239 = vmatprep.mubr.bf16.mxu0 %v11948_v55 }
 0x2ad   : > { %v4149_v61 = vor.u32 %v18323_v34, %v18321_v22  ;;  %v16194_v31 = vcombine.low %v4119_v39, %v4128_v60  ;;  %v18326_v56 = vshll.u32 %v18325_v50, 16  ;;  %v4164_v26 = vrot.slane %v18324_v49, 4  ;;  %v14141_v35 = vld [vmem:[%s14396_s4 + $0x120] sm:$0xff]   ;;  %v16239_v32 = vld [vmem:[#allocation2 + $0x2b4] sm:$0xf]  ;;  %v18339_v55 = vld [vmem:[#allocation91_spill] sm:$0xff] }
 0x2ae   : > { %v4141_v4 = vsel %vm15288_vm8, %v11627_v11, %v4140_v2  ;;  %v11628_v9 = vrot.slane %v4152_v0, 11  ;;  %v18329_v19 = vshll.u32 %v18328_v18, 16  ;;  %v11953_v14 = vcombine.low %v16207_v46, %v16209_v58  ;;  %13339 = vmatprep.subr.bf16.mxu1 %v14141_v35  ;;  %v18333_v60 = vld [vmem:[#allocation84_spill] sm:$0xff]  ;;  %v18336_v11 = vld [vmem:[#allocation89_spill] sm:$0xff] }
 0x2af   : > { %v4150_v12 = vsel %vm15288_vm8, %v4142_v28, %v4149_v61  ;;  %v4162_v37 = vor.u32 %v18326_v56, %v18324_v49  ;;  %v4174_v43 = vshrl.u32 %v3811_v15, 16  ;;  %v18332_v53 = vshll.u32 %v18331_v51, 16  ;;  %v18334_v28 = vld [vmem:[#allocation78_spill] sm:$0xff]  ;;  %v3817_v61 = vld [vmem:[#allocation2 + $0x180] sm:$0x8]  ;;  %v18337_v0 = vld [vmem:[#allocation85_spill] sm:$0xff]  ;;  %13347 = vmatpush3.bf16.msra.mxu1 %v14141_v35 }
 0x2b0   : > { %v4171_v13 = vor.u32 %v18329_v19, %v18327_v52  ;;  %v16213_v25 = vcombine.low %v4141_v4, %v4150_v12  ;;  %v4186_v59 = vrot.slane %v18330_v44, 4  ;;  %v18335_v22 = vshll.u32 %v18334_v28, 16  ;;  %v18340_v49 = vld [vmem:[#allocation87_spill] sm:$0xff]  ;;  %v16256_v4 = vld [vmem:[#allocation2 + $0x2c8] sm:$0xf] }
 0x2b1   : > { %v4184_v7 = vor.u32 %v18332_v53, %v18330_v44  ;;  %v4163_v63 = vsel %vm15288_vm8, %v11628_v9, %v4162_v37  ;;  %v4196_v34 = vshrl.u32 %v3814_v36, 16  ;;  %v11629_v17 = vrot.slane %v4174_v43, 11  ;;  %v3819_v37 = vld [vmem:[#allocation2 + $0x188] sm:$0xf]  ;;  %v16254_v36 = vld [vmem:[#allocation2 + $0x2c4] sm:$0xf] }
 0x2b2   : > { %v4172_v2 = vsel %vm15288_vm8, %v4164_v26, %v4171_v13  ;;  %v4193_v3 = vor.u32 %v18335_v22, %v18333_v60  ;;  %v11954_v39 = vcombine.low %v16237_v33, %v16239_v32  ;;  %v18338_v15 = vshll.u32 %v18337_v0, 16  ;;  %v9107_v19 = vld [vmem:[#allocation2 + $0x30] sm:$0xf]  ;;  %v9108_v13 = vld [vmem:[#allocation2 + $0x34] sm:$0xf]  ;;  %v14146_v43 = vld [vmem:[%s14396_s4 + $0x128] sm:$0xff]  }
 0x2b3   : > { %v16235_v57 = vcombine.low %v4163_v63, %v4172_v2  ;;  %v11630_v23 = vrot.slane %v4196_v34, 11  ;;  %v4208_v54 = vrot.slane %v18336_v11, 4  ;;  %v18341_v50 = vshll.u32 %v18340_v49, 16  ;;  %13340 = vmatprep.subr.bf16.mxu1 %v14146_v43  ;;  %v9109_v60 = vld [vmem:[#allocation2 + $0x38] sm:$0x1]  ;;  %12884 = vmatmul.mubr.bf16.gmra.mrb[12].mxu1 %v16108_v48 }
 0x2b4   : > { %v4206_v12 = vor.u32 %v18338_v15, %v18336_v11  ;;  %v4194_v10 = vsel %vm15288_vm8, %v4186_v59, %v4193_v3  ;;  %v4185_v26 = vsel %vm15288_vm8, %v11629_v17, %v4184_v7  ;;  %v11955_v9 = vcombine.low %v16254_v36, %v16256_v4  ;;  %13348 = vmatpush3.bf16.msra.mxu1 %v14146_v43  ;;  %v3822_v49 = vld [vmem:[#allocation2 + $0x19c] sm:$0xf] }
 0x2b5   : > { %v4215_v56 = vor.u32 %v18341_v50, %v18339_v55  ;;  %v4218_v52 = vshrl.u32 %v3817_v61, 16  ;;  %v4223_v18 = vshrl.u32 %v3818_v27, 16  ;;  %v16261_v44 = vcombine.low %v4185_v26, %v4194_v10  ;;  %v3820_v61 = vld [vmem:[#allocation2 + $0x194] sm:$0x8]  ;;  %13240 = vmatmul.mubr.bf16.gmra.mrb[48].mxu0 %v11949_v62  ;;  %12887 = vmatprep.mubr.bf16.mxu1 %v16127_v8 }
 0x2b6   : > { %v4207_v51 = vsel %vm15288_vm8, %v11630_v23, %v4206_v12  ;;  %v4226_v7 = vshll.u32 %v3818_v27, 16  ;;  %v4232_v2 = vshrl.u32 %v3819_v37, 16  ;;  %v4235_v28 = vshll.u32 %v3819_v37, 16  ;;  %v3821_v12 = vld [vmem:[#allocation2 + $0x198] sm:$0xf]  ;;  %v14147_v10 = vld [vmem:[%s14396_s4 + $0x130] sm:$0xff]   ;;  %13243 = vmatprep.mubr.bf16.mxu0 %v11950_v40 }
 0x2b7   : > { %v4216_v53 = vsel %vm15288_vm8, %v4208_v54, %v4215_v56  ;;  %v11631_v35 = vrot.slane %v4218_v52, 11  ;;  %v4225_v63 = vrot.slane %v4223_v18, 7  ;;  %v9204_v22 = vshrl.u32 %v9107_v19, 16  ;;  %13341 = vmatprep.subr.bf16.mxu1 %v14147_v10  ;;  %v9110_v52 = vld [vmem:[#allocation2 + $0x44] sm:$0xf]  ;;  %v14148_v40 = vld [vmem:[%s14396_s4 + $0x138] sm:$0xff]  }
 0x2b8   : > { %v16267_v59 = vcombine.low %v4207_v51, %v4216_v53  ;;  %v9207_v3 = vshll.u32 %v9107_v19, 16  ;;  %v9213_v34 = vshll.u32 %v9108_v13, 16  ;;  %v4234_v0 = vrot.slane %v4232_v2, 7  ;;  %13349 = vmatpush3.bf16.msra.mxu1 %v14147_v10 }
 0x2b9   : > { %v4228_v17 = vor.u32 %v4226_v7, %v4225_v63  ;;  %v4230_v11 = vrot.slane %v4225_v63, 4  ;;  %v9217_v15 = vshrl.u32 %v9108_v13, 16  ;;  %v9206_v27 = vrot.slane %v9204_v22, 4  ;;  %13342 = vmatprep.subr.bf16.mxu1 %v14148_v40 }
 0x2ba   : > { %v9209_v23 = vrot.slane %v9207_v3, 5  ;;  %v9215_v54 = vrot.slane %v9213_v34, 5  ;;  %v9223_v55 = vshll.u32 %v9109_v60, 16  ;;  %v4237_v48 = vor.u32 %v4235_v28, %v4234_v0  ;;  %v9112_v3 = vld [vmem:[#allocation2 + $0x4c] sm:$0x1] }
 0x2bb   : > { %v4229_v50 = vsel %vm15288_vm8, %v11631_v35, %v4228_v17  ;;  %v9219_v56 = vrot.slane %v9217_v15, 4  ;;  %v4240_v37 = vshrl.u32 %v3820_v61, 16  ;;  %v4245_v62 = vshrl.u32 %v3821_v12, 16  ;;  %v3823_v61 = vld [vmem:[#allocation2 + $0x1a8] sm:$0x8]  ;;  %12888 = vmatmul.mubr.bf16.gmra.mrb[16].mxu1 %v16151_v21 }
 0x2bc   : > { %v9210_v20 = vor.u32 %v9209_v23, %v9206_v27  ;;  %v9225_v42 = vrot.slane %v9223_v55, 5  ;;  %v4248_v26 = vshll.u32 %v3821_v12, 16  ;;  %v4238_v8 = vsel %vm15288_vm8, %v4230_v11, %v4237_v48  ;;  %13350 = vmatpush3.bf16.msra.mxu1 %v14148_v40  ;;  %v3824_v12 = vld [vmem:[#allocation2 + $0x1ac] sm:$0xf]  ;;  %v3825_v55 = vld [vmem:[#allocation2 + $0x1b0] sm:$0xf]  ;;  %12891 = vmatprep.mubr.bf16.mxu1 %v16177_v16 }
 0x2bd   : > { %v9220_v18 = vor.u32 %v9219_v56, %v9215_v54  ;;  %v11632_v19 = vrot.slane %v4240_v37, 11  ;;  %v4254_v6 = vshrl.u32 %v3822_v49, 16  ;;  %v16283_v13 = vcombine.low %v4229_v50, %v4238_v8  ;;  %13244 = vmatmul.mubr.bf16.gmra.mrb[52].mxu0 %v11951_v45  ;;  %v9113_v45 = vld [vmem:[#allocation2 + $0x58] sm:$0xf]  ;;  %v3826_v40 = vld [vmem:[#allocation2 + $0x1bc] sm:$0x8] }
 0x2be   : > { %v9211_v43 = vrot.slane %v9210_v20, 4  ;;  %v4247_v51 = vrot.slane %v4245_v62, 7  ;;  %v4257_v53 = vshll.u32 %v3822_v49, 16  ;;  %v9228_v63 = vshrl.u32 %v9110_v52, 16  ;;  %13247 = vmatprep.mubr.bf16.mxu0 %v11952_v29  ;;  %v9114_v20 = vld [vmem:[#allocation2 + $0x5c] sm:$0xf] }
 0x2bf   : > { %v9221_v7 = vrot.slane %v9220_v18, 4  ;;  %v4256_v35 = vrot.slane %v4254_v6, 7  ;;  %v9231_v2 = vshll.u32 %v9110_v52, 16  ;;  %v9237_v34 = vshll.u32 %v9111_v47, 16  ;;  %v9115_v29 = vld [vmem:[#allocation2 + $0x60] sm:$0x1] }
 0x2c0   : > { %v9216_v60 = vsel %vm15013_vm5, %v9211_v43, %v9215_v54  ;;  %v4250_v28 = vor.u32 %v4248_v26, %v4247_v51  ;;  %v4252_v22 = vrot.slane %v4247_v51, 4  ;;  %v9230_v0 = vrot.slane %v9228_v63, 4 }
 0x2c1   : > { %v9226_v17 = vsel %vm15013_vm5, %v9221_v7, %v9225_v42  ;;  %v4259_v11 = vor.u32 %v4257_v53, %v4256_v35  ;;  %v9233_v15 = vrot.slane %v9231_v2, 5  ;;  %v9239_v23 = vrot.slane %v9237_v34, 5 }
 0x2c2   : > { %v16293_v10 = vcombine.low %v9216_v60, %v9226_v17  ;;  %v4251_v27 = vsel %vm15288_vm8, %v11632_v19, %v4250_v28  ;;  %v9241_v54 = vshrl.u32 %v9111_v47, 16  ;;  %v9247_v41 = vshll.u32 %v9112_v3, 16  ;;  %v3827_v28 = vld [vmem:[#allocation2 + $0x1c0] sm:$0xf] }
 0x2c3   : > { %v4260_v21 = vsel %vm15288_vm8, %v4252_v22, %v4259_v11  ;;  %v9234_v49 = vor.u32 %v9233_v15, %v9230_v0  ;;  %v4262_v38 = vshrl.u32 %v3823_v61, 16  ;;  %v4267_v56 = vshrl.u32 %v3824_v12, 16  ;;  %12892 = vmatmul.mubr.bf16.gmra.mrb[20].mxu1 %v16194_v31  ;;  %v3828_v61 = vld [vmem:[#allocation2 + $0x1c4] sm:$0xf]  ;;  %v9116_v11 = vld [vmem:[#allocation2 + $0x6c] sm:$0xf] }
 0x2c4   : > { %v16303_v50 = vcombine.low %v4251_v27, %v4260_v21  ;;  %v9243_v48 = vrot.slane %v9241_v54, 4  ;;  %v4270_v37 = vshll.u32 %v3824_v12, 16  ;;  %v9249_v62 = vrot.slane %v9247_v41, 5  ;;  %12895 = vmatprep.mubr.bf16.mxu1 %v16213_v25 }
 0x2c5   : > { %v9235_v42 = vrot.slane %v9234_v49, 4  ;;  %v11633_v16 = vrot.slane %v4262_v38, 11  ;;  %v4276_v26 = vshrl.u32 %v3825_v55, 16  ;;  %v4269_v5 = vrot.slane %v4267_v56, 7  ;;  %13248 = vmatmul.mubr.bf16.gmra.mrb[56].mxu0 %v11953_v14 }
 0x2c6   : > { %v9244_v52 = vor.u32 %v9243_v48, %v9239_v23  ;;  %v4279_v30 = vshll.u32 %v3825_v55, 16  ;;  %v9252_v8 = vshrl.u32 %v9113_v45, 16  ;;  %v9255_v6 = vshll.u32 %v9113_v45, 16  ;;  %13251 = vmatprep.mubr.bf16.mxu0 %v11954_v39  ;;  %v9118_v39 = vld [vmem:[#allocation2 + $0x74] sm:$0x1] }
 0x2c7   : > { %v9240_v18 = vsel %vm15013_vm5, %v9235_v42, %v9239_v23  ;;  %v4278_v19 = vrot.slane %v4276_v26, 7  ;;  %v9261_v47 = vshll.u32 %v9114_v20, 16  ;;  %v4272_v51 = vor.u32 %v4270_v37, %v4269_v5  ;;  %v9117_v23 = vld [vmem:[#allocation2 + $0x70] sm:$0xf]  ;;  %v3830_v37 = vld [vmem:[#allocation2 + $0x1d4] sm:$0xf] }
 0x2c8   : > { %v9245_v43 = vrot.slane %v9244_v52, 4  ;;  %v4274_v53 = vrot.slane %v4269_v5, 4  ;;  %v9254_v7 = vrot.slane %v9252_v8, 4  ;;  %v9257_v63 = vrot.slane %v9255_v6, 5  ;;  %v3829_v26 = vld [vmem:[#allocation2 + $0x1d0] sm:$0x8] }
 0x2c9   : > { %v4281_v35 = vor.u32 %v4279_v30, %v4278_v19  ;;  %v9263_v2 = vrot.slane %v9261_v47, 5  ;;  %v9265_v60 = vshrl.u32 %v9114_v20, 16  ;;  %v4273_v3 = vsel %vm15288_vm8, %v11633_v16, %v4272_v51  ;;  %v3831_v47 = vld [vmem:[#allocation2 + $0x1d8] sm:$0xf] }
 0x2ca   : > { %v9250_v22 = vsel %vm15013_vm5, %v9245_v43, %v9249_v62  ;;  %v9271_v34 = vshll.u32 %v9115_v29, 16  ;;  %v4284_v17 = vshrl.u32 %v3826_v40, 16  ;;  %v9258_v58 = vor.u32 %v9257_v63, %v9254_v7 }
 0x2cb   : > { %v16319_v31 = vcombine.low %v9240_v18, %v9250_v22  ;;  %v4282_v46 = vsel %vm15288_vm8, %v4274_v53, %v4281_v35  ;;  %v9267_v14 = vrot.slane %v9265_v60, 4  ;;  %v4289_v27 = vshrl.u32 %v3827_v28, 16  ;;  %12896 = vmatmul.mubr.bf16.gmra.mrb[24].mxu1 %v16235_v57  ;;  %v9119_v53 = vld [vmem:[#allocation2 + $0x80] sm:$0xf]  ;;  %v9121_v22 = vld [vmem:[#allocation2 + $0x88] sm:$0x1] }
 0x2cc   : > { %v16323_v0 = vcombine.low %v4273_v3, %v4282_v46  ;;  %v9273_v15 = vrot.slane %v9271_v34, 5  ;;  %v11634_v12 = vrot.slane %v4284_v17, 11  ;;  %v9259_v54 = vrot.slane %v9258_v58, 4  ;;  %12899 = vmatprep.mubr.bf16.mxu1 %v16261_v44 }
 0x2cd   : > { %v9268_v25 = vor.u32 %v9267_v14, %v9263_v2  ;;  %v4292_v55 = vshll.u32 %v3827_v28, 16  ;;  %v4298_v21 = vshrl.u32 %v3828_v61, 16  ;;  %v4291_v33 = vrot.slane %v4289_v27, 7  ;;  %13252 = vmatmul.mubr.bf16.gmra.mrb[60].mxu0 %v11955_v9  ;;  %v9120_v28 = vld [vmem:[#allocation2 + $0x84] sm:$0xf] }
 0x2ce   : > { %v4301_v32 = vshll.u32 %v3828_v61, 16  ;;  %v9276_v49 = vshrl.u32 %v9116_v11, 16  ;;  %v9279_v41 = vshll.u32 %v9116_v11, 16  ;;  %v9264_v38 = vsel %vm15013_vm5, %v9259_v54, %v9263_v2  ;;  %13271 = vmatprep.mubr.bf16.mxu0 %v16293_v10  ;;  %v3832_v14 = vld [vmem:[#allocation2 + $0x1e4] sm:$0x8] }
 0x2cf   : > { %v9269_v45 = vrot.slane %v9268_v25, 4  ;;  %v4300_v48 = vrot.slane %v4298_v21, 7  ;;  %v9285_v56 = vshll.u32 %v9117_v23, 16  ;;  %v4294_v20 = vor.u32 %v4292_v55, %v4291_v33 }
 0x2d0   : > { %v4296_v42 = vrot.slane %v4291_v33, 4  ;;  %v9278_v62 = vrot.slane %v9276_v49, 4  ;;  %v9281_v16 = vrot.slane %v9279_v41, 5  ;;  %v9289_v29 = vshrl.u32 %v9117_v23, 16  ;;  %v3833_v23 = vld [vmem:[#allocation2 + $0x1e8] sm:$0xf] }
 0x2d1   : > { %v9274_v52 = vsel %vm15013_vm5, %v9269_v45, %v9273_v15  ;;  %v4303_v5 = vor.u32 %v4301_v32, %v4300_v48  ;;  %v9287_v30 = vrot.slane %v9285_v56, 5  ;;  %v4295_v18 = vsel %vm15288_vm8, %v11634_v12, %v4294_v20  ;;  %v3834_v41 = vld [vmem:[#allocation2 + $0x1ec] sm:$0xf] }
 0x2d2   : > { %v11983_v8 = vcombine.low %v9264_v38, %v9274_v52  ;;  %v9282_v19 = vor.u32 %v9281_v16, %v9278_v62  ;;  %v9295_v6 = vshll.u32 %v9118_v39, 16  ;;  %v9291_v43 = vrot.slane %v9289_v29, 4  ;;  %v9123_v62 = vld [vmem:[#allocation2 + $0x98] sm:$0xf] }
 0x2d3   : > { %v4304_v40 = vsel %vm15288_vm8, %v4296_v42, %v4303_v5  ;;  %v4306_v57 = vshrl.u32 %v3829_v26, 16  ;;  %v4311_v51 = vshrl.u32 %v3830_v37, 16  ;;  %v4314_v7 = vshll.u32 %v3830_v37, 16  ;;  %12900 = vmatmul.mubr.bf16.gmra.mrb[28].mxu1 %v16267_v59  ;;  %v9122_v37 = vld [vmem:[#allocation2 + $0x94] sm:$0xf] }
 0x2d4   : > { %v16339_v36 = vcombine.low %v4295_v18, %v4304_v40  ;;  %v9283_v4 = vrot.slane %v9282_v19, 4  ;;  %v9297_v9 = vrot.slane %v9295_v6, 5  ;;  %v9292_v35 = vor.u32 %v9291_v43, %v9287_v30  ;;  %12903 = vmatprep.mubr.bf16.mxu1 %v16283_v13  ;;  %v3836_v19 = vld [vmem:[#allocation2 + $0x1fc] sm:$0xf] }
 0x2d5   : > { %v11635_v63 = vrot.slane %v4306_v57, 11  ;;  %v4313_v2 = vrot.slane %v4311_v51, 7  ;;  %v4320_v60 = vshrl.u32 %v3831_v47, 16  ;;  %v4323_v10 = vshll.u32 %v3831_v47, 16  ;;  %13272 = vmatmul.mubr.bf16.vlgmr.msra.gmra.mrb[0].mxu0 %v16319_v31  ;;  %v3835_v57 = vld [vmem:[#allocation2 + $0x1f8] sm:$0x8] }
 0x2d6   : > { %v9288_v44 = vsel %vm15013_vm5, %v9283_v4, %v9287_v30  ;;  %v9300_v3 = vshrl.u32 %v9119_v53, 16  ;;  %v9303_v34 = vshll.u32 %v9119_v53, 16  ;;  %v9293_v61 = vrot.slane %v9292_v35, 4  ;;  %13275 = vmatprep.mubr.bf16.mxu0 %v11983_v8  ;;  %v9124_v30 = vld [vmem:[#allocation2 + $0x9c] sm:$0x1] }
 0x2d7   : > { %v4316_v17 = vor.u32 %v4314_v7, %v4313_v2  ;;  %v4318_v46 = vrot.slane %v4313_v2, 4  ;;  %v4322_v58 = vrot.slane %v4320_v60, 7  ;;  %v9309_v12 = vshll.u32 %v9120_v28, 16  ;;  %v3837_v7 = vld [vmem:[#allocation2 + $0x200] sm:$0xf] }
 0x2d8   : > { %v9302_v11 = vrot.slane %v9300_v3, 4  ;;  %v9305_v15 = vrot.slane %v9303_v34, 5  ;;  %v9313_v27 = vshrl.u32 %v9120_v28, 16  ;;  %v9298_v54 = vsel %vm15013_vm5, %v9293_v61, %v9297_v9 }
 0x2d9   : > { %v4317_v25 = vsel %vm15288_vm8, %v11635_v63, %v4316_v17  ;;  %v4325_v55 = vor.u32 %v4323_v10, %v4322_v58  ;;  %v9319_v21 = vshll.u32 %v9121_v22, 16  ;;  %v11984_v33 = vcombine.low %v9288_v44, %v9298_v54 }
 0x2da   : > { %v9306_v32 = vor.u32 %v9305_v15, %v9302_v11  ;;  %v9311_v39 = vrot.slane %v9309_v12, 5  ;;  %v9315_v49 = vrot.slane %v9313_v27, 4  ;;  %v4328_v48 = vshrl.u32 %v3832_v14, 16  ;;  %v9126_v15 = vld [vmem:[#allocation2 + $0xac] sm:$0xf] }
 0x2db   : > { %v4326_v38 = vsel %vm15288_vm8, %v4318_v46, %v4325_v55  ;;  %v9321_v45 = vrot.slane %v9319_v21, 5  ;;  %v4333_v56 = vshrl.u32 %v3833_v23, 16  ;;  %v4336_v31 = vshll.u32 %v3833_v23, 16  ;;  %12904 = vmatmul.mubr.bf16.gmra.mrb[32].mxu1 %v16303_v50  ;;  %v9125_v46 = vld [vmem:[#allocation2 + $0xa8] sm:$0xf] }
 0x2dc   : > { %v16352_v20 = vcombine.low %v4317_v25, %v4326_v38  ;;  %v9307_v59 = vrot.slane %v9306_v32, 4  ;;  %v9316_v42 = vor.u32 %v9315_v49, %v9311_v39  ;;  %v11636_v16 = vrot.slane %v4328_v48, 11  ;;  %12907 = vmatprep.mubr.bf16.mxu1 %v16323_v0  ;;  %v9127_v55 = vld [vmem:[#allocation2 + $0xb0] sm:$0x1]  ;;  %v3838_v38 = vld [vmem:[#allocation2 + $0x20c] sm:$0x8] }
 0x2dd   : > { %v4335_v26 = vrot.slane %v4333_v56, 7  ;;  %v4342_v52 = vshrl.u32 %v3834_v41, 16  ;;  %v4345_v5 = vshll.u32 %v3834_v41, 16  ;;  %v9324_v8 = vshrl.u32 %v9122_v37, 16  ;;  %13276 = vmatmul.mubr.bf16.gmra.mrb[4].mxu0 %v11984_v33 }
 0x2de   : > { %v9312_v13 = vsel %vm15013_vm5, %v9307_v59, %v9311_v39  ;;  %v9317_v29 = vrot.slane %v9316_v42, 4  ;;  %v9327_v18 = vshll.u32 %v9122_v37, 16  ;;  %v9333_v43 = vshll.u32 %v9123_v62, 16  ;;  %v3840_v42 = vld [vmem:[#allocation2 + $0x214] sm:$0xf] }
 0x2df   : > { %v4338_v6 = vor.u32 %v4336_v31, %v4335_v26  ;;  %v4340_v47 = vrot.slane %v4335_v26, 4  ;;  %v4344_v40 = vrot.slane %v4342_v52, 7  ;;  %v9326_v53 = vrot.slane %v9324_v8, 4 }
 0x2e0   : > { %v9322_v51 = vsel %vm15013_vm5, %v9317_v29, %v9321_v45  ;;  %v9329_v4 = vrot.slane %v9327_v18, 5  ;;  %v9337_v9 = vshrl.u32 %v9123_v62, 16  ;;  %v9335_v60 = vrot.slane %v9333_v43, 5  ;;  %v3839_v45 = vld [vmem:[#allocation2 + $0x210] sm:$0xf] }
 0x2e1   : > { %v11985_v35 = vcombine.low %v9312_v13, %v9322_v51  ;;  %v4339_v63 = vsel %vm15288_vm8, %v11636_v16, %v4338_v6  ;;  %v4347_v2 = vor.u32 %v4345_v5, %v4344_v40  ;;  %v9343_v10 = vshll.u32 %v9124_v30, 16  ;;  %v9128_v29 = vld [vmem:[#allocation2 + $0xbc] sm:$0xf] }
 0x2e2   : > { %v9330_v28 = vor.u32 %v9329_v4, %v9326_v53  ;;  %v9339_v44 = vrot.slane %v9337_v9, 4  ;;  %v4350_v22 = vshrl.u32 %v3835_v57, 16  ;;  %v4355_v34 = vshrl.u32 %v3836_v19, 16 }
 0x2e3   : > { %13279 = vmatprep.mubr.bf16.mxu0 %v11985_v35  ;;  %v4348_v3 = vsel %vm15288_vm8, %v4340_v47, %v4347_v2  ;;  %v4358_v61 = vshll.u32 %v3836_v19, 16  ;;  %v4364_v17 = vshrl.u32 %v3837_v7, 16  ;;  %v9345_v50 = vrot.slane %v9343_v10, 5  ;;  %12908 = vmatmul.mubr.bf16.gmra.mrb[36].mxu1 %v16339_v36  ;;  %v9129_v47 = vld [vmem:[#allocation2 + $0xc0] sm:$0xf] }
 0x2e4   : > { %v16364_v58 = vcombine.low %v4339_v63, %v4348_v3  ;;  %v9331_v14 = vrot.slane %v9330_v28, 4  ;;  %v9340_v11 = vor.u32 %v9339_v44, %v9335_v60  ;;  %v11637_v12 = vrot.slane %v4350_v22, 11  ;;  %12911 = vmatprep.mubr.bf16.mxu1 %v16352_v20  ;;  %v9130_v63 = vld [vmem:[#allocation2 + $0xc4] sm:$0x1]  ;;  %v3841_v22 = vld [vmem:[#allocation2 + $0x220] sm:$0x8] }
 0x2e5   : > { %v4357_v27 = vrot.slane %v4355_v34, 7  ;;  %v4366_v23 = vrot.slane %v4364_v17, 7  ;;  %v4367_v54 = vshll.u32 %v3837_v7, 16  ;;  %v9348_v21 = vshrl.u32 %v9125_v46, 16  ;;  %v16378_v3 = vld [vmem:[#allocation2 + $0x224] sm:$0xf] }
 0x2e6   : > { %v9336_v0 = vsel %vm15013_vm5, %v9331_v14, %v9335_v60  ;;  %v9341_v25 = vrot.slane %v9340_v11, 4  ;;  %v9351_v33 = vshll.u32 %v9125_v46, 16  ;;  %v9357_v41 = vshll.u32 %v9126_v15, 16  ;;  %v16382_v14 = vld [vmem:[#allocation2 + $0x228] sm:$0xf] }
 0x2e7   : > { %v4360_v32 = vor.u32 %v4358_v61, %v4357_v27  ;;  %v4362_v39 = vrot.slane %v4357_v27, 4  ;;  %v4369_v49 = vor.u32 %v4367_v54, %v4366_v23  ;;  %v9350_v56 = vrot.slane %v9348_v21, 4 }
 0x2e8   : > { %v9346_v48 = vsel %vm15013_vm5, %v9341_v25, %v9345_v50  ;;  %v9353_v37 = vrot.slane %v9351_v33, 5  ;;  %v9361_v59 = vshrl.u32 %v9126_v15, 16  ;;  %v9359_v26 = vrot.slane %v9357_v41, 5  ;;  %v9131_v25 = vld [vmem:[#allocation2 + $0xd0] sm:$0xf] }
 0x2e9   : > { %v11986_v31 = vcombine.low %v9336_v0, %v9346_v48  ;;  %v4361_v62 = vsel %vm15288_vm8, %v11637_v12, %v4360_v32  ;;  %v4370_v16 = vsel %vm15288_vm8, %v4362_v39, %v4369_v49  ;;  %v9367_v13 = vshll.u32 %v9127_v55, 16  ;;  %v9132_v39 = vld [vmem:[#allocation2 + $0xd4] sm:$0xf] }
 0x2ea   : > { %v11686_v52 = vcombine.low %v4361_v62, %v4370_v16  ;;  %v9354_v5 = vor.u32 %v9353_v37, %v9350_v56  ;;  %v9363_v30 = vrot.slane %v9361_v59, 4  ;;  %v4372_v8 = vshrl.u32 %v3838_v38, 16 }
 0x2eb   : > { %13280 = vmatmul.mubr.bf16.gmra.mrb[8].mxu0 %v11986_v31  ;;  %v4377_v18 = vshrl.u32 %v3839_v45, 16  ;;  %v4380_v19 = vshll.u32 %v3839_v45, 16  ;;  %v4386_v6 = vshrl.u32 %v3840_v42, 16  ;;  %v9369_v57 = vrot.slane %v9367_v13, 5  ;;  %12912 = vmatmul.mubr.bf16.gmra.mrb[40].mxu1 %v16364_v58  ;;  %v9133_v31 = vld [vmem:[#allocation2 + $0xd8] sm:$0x1] }
 0x2ec   : > { %v9355_v40 = vrot.slane %v9354_v5, 4  ;;  %v9364_v43 = vor.u32 %v9363_v30, %v9359_v26  ;;  %v4389_v51 = vshll.u32 %v3840_v42, 16  ;;  %v11638_v53 = vrot.slane %v4372_v8, 11  ;;  %12915 = vmatprep.mubr.bf16.mxu1 %v11686_v52  ;;  %v3844_v13 = vld [vmem:[#allocation2 + $0x234] sm:$0x8] }
 0x2ed   : > { %v4379_v4 = vrot.slane %v4377_v18, 7  ;;  %v4388_v36 = vrot.slane %v4386_v6, 7  ;;  %v9372_v9 = vshrl.u32 %v9128_v29, 16  ;;  %v9375_v20 = vshll.u32 %v9128_v29, 16  ;;  %v16395_v29 = vld [vmem:[#allocation2 + $0x238] sm:$0xf] }
 0x2ee   : > { %v9360_v7 = vsel %vm15013_vm5, %v9355_v40, %v9359_v26  ;;  %v9365_v35 = vrot.slane %v9364_v43, 4  ;;  %v9381_v2 = vshll.u32 %v9129_v47, 16  ;;  %v9385_v46 = vshrl.u32 %v9129_v47, 16  ;;  %v16399_v47 = vld [vmem:[#allocation2 + $0x23c] sm:$0xf] }
 0x2ef   : > { %v4382_v60 = vor.u32 %v4380_v19, %v4379_v4  ;;  %v4384_v28 = vrot.slane %v4379_v4, 4  ;;  %v4391_v44 = vor.u32 %v4389_v51, %v4388_v36  ;;  %v9374_v10 = vrot.slane %v9372_v9, 4 }
 0x2f0   : > { %v9370_v34 = vsel %vm15013_vm5, %v9365_v35, %v9369_v57  ;;  %v9377_v61 = vrot.slane %v9375_v20, 5  ;;  %v9383_v17 = vrot.slane %v9381_v2, 5  ;;  %v9391_v12 = vshll.u32 %v9130_v63, 16 }
 0x2f1   : > { %v11987_v11 = vcombine.low %v9360_v7, %v9370_v34  ;;  %v4383_v50 = vsel %vm15288_vm8, %v11638_v53, %v4382_v60  ;;  %v4392_v15 = vsel %vm15288_vm8, %v4384_v28, %v4391_v44  ;;  %v9387_v54 = vrot.slane %v9385_v46, 4  ;;  %v9134_v7 = vld [vmem:[#allocation2 + $0xe4] sm:$0xf]  ;;  %v9135_v60 = vld [vmem:[#allocation2 + $0xe8] sm:$0xf] }
 0x2f2   : > { %v11687_v27 = vcombine.low %v4383_v50, %v4392_v15  ;;  %v9378_v23 = vor.u32 %v9377_v61, %v9374_v10  ;;  %v4394_v0 = vshrl.u32 %v3841_v22, 16  ;;  %v9393_v55 = vrot.slane %v9391_v12, 5  ;;  %v9136_v15 = vld [vmem:[#allocation2 + $0xec] sm:$0x1] }
 0x2f3   : > { %13283 = vmatprep.mubr.bf16.mxu0 %v11987_v11  ;;  %v4399_v21 = vshrl.u32 %v16378_v3, 16  ;;  %v4402_v33 = vshll.u32 %v16378_v3, 16  ;;  %v4408_v32 = vshrl.u32 %v16382_v14, 16  ;;  %v9388_v41 = vor.u32 %v9387_v54, %v9383_v17 }
 0x2f4   : > { %v9379_v49 = vrot.slane %v9378_v23, 4  ;;  %v11639_v38 = vrot.slane %v4394_v0, 11  ;;  %v4411_v58 = vshll.u32 %v16382_v14, 16  ;;  %v9396_v56 = vshrl.u32 %v9131_v25, 16  ;;  %12916 = vmatmul.mubr.bf16.gmra.mrb[44].mxu1 %v11687_v27  ;;  %v3847_v23 = vld [vmem:[#allocation2 + $0x248] sm:$0x8] }
 0x2f5   : > { %v4401_v45 = vrot.slane %v4399_v21, 7  ;;  %v4410_v48 = vrot.slane %v4408_v32, 7  ;;  %v9399_v37 = vshll.u32 %v9131_v25, 16  ;;  %v9389_v42 = vrot.slane %v9388_v41, 4  ;;  %v16413_v21 = vld [vmem:[#allocation2 + $0x24c] sm:$0xf] }
 0x2f6   : > { %v9384_v59 = vsel %vm15013_vm5, %v9379_v49, %v9383_v17  ;;  %v9405_v62 = vshll.u32 %v9132_v39, 16  ;;  %v9409_v16 = vshrl.u32 %v9132_v39, 16  ;;  %v9398_v30 = vrot.slane %v9396_v56, 4  ;;  %v16415_v41 = vld [vmem:[#allocation2 + $0x250] sm:$0xf] }
 0x2f7   : > { %v4404_v26 = vor.u32 %v4402_v33, %v4401_v45  ;;  %v4406_v52 = vrot.slane %v4401_v45, 4  ;;  %v4413_v5 = vor.u32 %v4411_v58, %v4410_v48  ;;  %v9394_v8 = vsel %vm15013_vm5, %v9389_v42, %v9393_v55 }
 0x2f8   : > { %v9401_v18 = vrot.slane %v9399_v37, 5  ;;  %v9407_v19 = vrot.slane %v9405_v62, 5  ;;  %v9411_v6 = vrot.slane %v9409_v16, 4  ;;  %v11988_v40 = vcombine.low %v9384_v59, %v9394_v8  ;;  %v9138_v62 = vld [vmem:[#allocation2 + $0xfc] sm:$0xf] }
 0x2f9   : > { %v4405_v43 = vsel %vm15288_vm8, %v11639_v38, %v4404_v26  ;;  %v4414_v57 = vsel %vm15288_vm8, %v4406_v52, %v4413_v5  ;;  %v9415_v51 = vshll.u32 %v9133_v31, 16  ;;  %v4416_v9 = vshrl.u32 %v3844_v13, 16  ;;  %v9137_v31 = vld [vmem:[#allocation2 + $0xf8] sm:$0xf] }
 0x2fa   : > { %v11688_v53 = vcombine.low %v4405_v43, %v4414_v57  ;;  %v9402_v4 = vor.u32 %v9401_v18, %v9398_v30  ;;  %v9412_v36 = vor.u32 %v9411_v6, %v9407_v19  ;;  %13284 = vmatmul.mubr.bf16.gmra.mrb[12].mxu0 %v11988_v40  ;;  %v4421_v63 = vshrl.u32 %v16395_v29, 16  ;;  %v9139_v6 = vld [vmem:[#allocation2 + $0x100] sm:$0x1] }
 0x2fb   : > { %v9417_v35 = vrot.slane %v9415_v51, 5  ;;  %v4424_v20 = vshll.u32 %v16395_v29, 16  ;;  %v4430_v2 = vshrl.u32 %v16399_v47, 16  ;;  %v11640_v10 = vrot.slane %v4416_v9, 11  ;;  %v3850_v9 = vld [vmem:[#allocation2 + $0x25c] sm:$0x8] }
 0x2fc   : > { %12919 = vmatprep.mubr.bf16.mxu1 %v11688_v53  ;;  %v9403_v28 = vrot.slane %v9402_v4, 4  ;;  %v9413_v44 = vrot.slane %v9412_v36, 4  ;;  %v4433_v22 = vshll.u32 %v16399_v47, 16  ;;  %v4423_v34 = vrot.slane %v4421_v63, 7 }
 0x2fd   : > { %v4432_v61 = vrot.slane %v4430_v2, 7  ;;  %v9420_v17 = vshrl.u32 %v9134_v7, 16  ;;  %v9423_v46 = vshll.u32 %v9134_v7, 16  ;;  %v9429_v12 = vshll.u32 %v9135_v60, 16  ;;  %v16429_v7 = vld [vmem:[#allocation2 + $0x260] sm:$0xf] }
 0x2fe   : > { %v9408_v11 = vsel %vm15013_vm5, %v9403_v28, %v9407_v19  ;;  %v9418_v50 = vsel %vm15013_vm5, %v9413_v44, %v9417_v35  ;;  %v9433_v27 = vshrl.u32 %v9135_v60, 16  ;;  %v4426_v0 = vor.u32 %v4424_v20, %v4423_v34 }
 0x2ff   : > { %v11989_v54 = vcombine.low %v9408_v11, %v9418_v50  ;;  %v4428_v25 = vrot.slane %v4423_v34, 4  ;;  %v4435_v55 = vor.u32 %v4433_v22, %v4432_v61  ;;  %v9422_v33 = vrot.slane %v9420_v17, 4  ;;  %v16433_v22 = vld [vmem:[#allocation2 + $0x264] sm:$0xf]  ;;  %v9140_v11 = vld [vmem:[#allocation2 + $0x10c] sm:$0xf] }
 0x300   : > { %v9425_v32 = vrot.slane %v9423_v46, 5  ;;  %v9431_v39 = vrot.slane %v9429_v12, 5  ;;  %v9435_v49 = vrot.slane %v9433_v27, 4  ;;  %v4427_v38 = vsel %vm15288_vm8, %v11640_v10, %v4426_v0 }
 0x301   : > { %13287 = vmatprep.mubr.bf16.mxu0 %v11989_v54  ;;  %v4436_v58 = vsel %vm15288_vm8, %v4428_v25, %v4435_v55  ;;  %v9439_v45 = vshll.u32 %v9136_v15, 16  ;;  %v4438_v48 = vshrl.u32 %v3847_v23, 16  ;;  %v4443_v42 = vshrl.u32 %v16413_v21, 16  ;;  %v9141_v55 = vld [vmem:[#allocation2 + $0x110] sm:$0xf] }
 0x302   : > { %v11689_v56 = vcombine.low %v4427_v38, %v4436_v58  ;;  %v9426_v37 = vor.u32 %v9425_v32, %v9422_v33  ;;  %v9436_v59 = vor.u32 %v9435_v49, %v9431_v39  ;;  %v4446_v52 = vshll.u32 %v16413_v21, 16 }
 0x303   : > { %v9441_v16 = vrot.slane %v9439_v45, 5  ;;  %v11641_v26 = vrot.slane %v4438_v48, 11  ;;  %v4452_v5 = vshrl.u32 %v16415_v41, 16  ;;  %v4445_v8 = vrot.slane %v4443_v42, 7 }
 0x304   : > { %12920 = vmatmul.mubr.bf16.gmra.mrb[48].mxu1 %v11689_v56  ;;  %v9427_v30 = vrot.slane %v9426_v37, 4  ;;  %v9437_v13 = vrot.slane %v9436_v59, 4  ;;  %v4455_v18 = vshll.u32 %v16415_v41, 16  ;;  %v9444_v40 = vshrl.u32 %v9137_v31, 16  ;;  %v3853_v37 = vld [vmem:[#allocation2 + $0x270] sm:$0x8] }
 0x305   : > { %v4454_v19 = vrot.slane %v4452_v5, 7  ;;  %v9447_v43 = vshll.u32 %v9137_v31, 16  ;;  %v9453_v57 = vshll.u32 %v9138_v62, 16  ;;  %v4448_v4 = vor.u32 %v4446_v52, %v4445_v8 }
 0x306   : > { %v9432_v51 = vsel %vm15013_vm5, %v9427_v30, %v9431_v39  ;;  %v9442_v53 = vsel %vm15013_vm5, %v9437_v13, %v9441_v16  ;;  %v4450_v36 = vrot.slane %v4445_v8, 4  ;;  %v9446_v20 = vrot.slane %v9444_v40, 4  ;;  %v9142_v39 = vld [vmem:[#allocation2 + $0x114] sm:$0x1] }
 0x307   : > { %v11990_v35 = vcombine.low %v9432_v51, %v9442_v53  ;;  %v4457_v63 = vor.u32 %v4455_v18, %v4454_v19  ;;  %v9449_v2 = vrot.slane %v9447_v43, 5  ;;  %v4449_v60 = vsel %vm15288_vm8, %v11641_v26, %v4448_v4  ;;  %v16445_v30 = vld [vmem:[#allocation2 + $0x274] sm:$0xf]  ;;  %v16449_v19 = vld [vmem:[#allocation2 + $0x278] sm:$0xf] }
 0x308   : > { %v9455_v28 = vrot.slane %v9453_v57, 5  ;;  %v9457_v44 = vshrl.u32 %v9138_v62, 16  ;;  %v9463_v10 = vshll.u32 %v9139_v6, 16  ;;  %v4460_v17 = vshrl.u32 %v3850_v9, 16  ;;  %v9143_v53 = vld [vmem:[#allocation2 + $0x120] sm:$0xf] }
 0x309   : > { %13288 = vmatmul.mubr.bf16.gmra.mrb[16].mxu0 %v11990_v35  ;;  %v4458_v34 = vsel %vm15288_vm8, %v4450_v36, %v4457_v63  ;;  %v9450_v61 = vor.u32 %v9449_v2, %v9446_v20  ;;  %v4465_v46 = vshrl.u32 %v16429_v7, 16  ;;  %v4468_v27 = vshll.u32 %v16429_v7, 16  ;;  %v9144_v63 = vld [vmem:[#allocation2 + $0x124] sm:$0xf] }
 0x30a   : > { %v11690_v50 = vcombine.low %v4449_v60, %v4458_v34  ;;  %v9459_v15 = vrot.slane %v9457_v44, 4  ;;  %v9465_v12 = vrot.slane %v9463_v10, 5  ;;  %v11642_v54 = vrot.slane %v4460_v17, 11  ;;  %v16459_v17 = vld [vmem:[#allocation2 + $0x288] sm:$0xf] }
 0x30b   : > { %v9451_v23 = vrot.slane %v9450_v61, 4  ;;  %v4467_v0 = vrot.slane %v4465_v46, 7  ;;  %v4474_v25 = vshrl.u32 %v16433_v22, 16  ;;  %v4477_v32 = vshll.u32 %v16433_v22, 16 }
 0x30c   : > { %12923 = vmatprep.mubr.bf16.mxu1 %v11690_v50  ;;  %v9460_v33 = vor.u32 %v9459_v15, %v9455_v28  ;;  %v9468_v49 = vshrl.u32 %v9140_v11, 16  ;;  %v9471_v38 = vshll.u32 %v9140_v11, 16  ;;  %v9477_v62 = vshll.u32 %v9141_v55, 16  ;;  %v9145_v50 = vld [vmem:[#allocation2 + $0x128] sm:$0x1] }
 0x30d   : > { %v9456_v58 = vsel %vm15013_vm5, %v9451_v23, %v9455_v28  ;;  %v4470_v45 = vor.u32 %v4468_v27, %v4467_v0  ;;  %v4472_v48 = vrot.slane %v4467_v0, 4  ;;  %v4476_v56 = vrot.slane %v4474_v25, 7  ;;  %v3856_v25 = vld [vmem:[#allocation2 + $0x284] sm:$0x8] }
 0x30e   : > { %v9461_v59 = vrot.slane %v9460_v33, 4  ;;  %v9470_v42 = vrot.slane %v9468_v49, 4  ;;  %v9473_v31 = vrot.slane %v9471_v38, 5  ;;  %v9481_v52 = vshrl.u32 %v9141_v55, 16 }
 0x30f   : > { %v4471_v16 = vsel %vm15288_vm8, %v11642_v54, %v4470_v45  ;;  %v4479_v26 = vor.u32 %v4477_v32, %v4476_v56  ;;  %v9487_v5 = vshll.u32 %v9142_v39, 16  ;;  %v9479_v18 = vrot.slane %v9477_v62, 5 }
 0x310   : > { %v9466_v13 = vsel %vm15013_vm5, %v9461_v59, %v9465_v12  ;;  %v9474_v8 = vor.u32 %v9473_v31, %v9470_v42  ;;  %v4482_v6 = vshrl.u32 %v3853_v37, 16  ;;  %v9483_v57 = vrot.slane %v9481_v52, 4  ;;  %v9146_v31 = vld [vmem:[#allocation2 + $0x134] sm:$0xf] }
 0x311   : > { %v11991_v40 = vcombine.low %v9456_v58, %v9466_v13  ;;  %v4480_v43 = vsel %vm15288_vm8, %v4472_v48, %v4479_v26  ;;  %v9489_v51 = vrot.slane %v9487_v5, 5  ;;  %v4487_v35 = vshrl.u32 %v16445_v30, 16  ;;  %v16465_v48 = vld [vmem:[#allocation2 + $0x28c] sm:$0xf] }
 0x312   : > { %v11691_v4 = vcombine.low %v4471_v16, %v4480_v43  ;;  %v9475_v36 = vrot.slane %v9474_v8, 4  ;;  %v11643_v9 = vrot.slane %v4482_v6, 11  ;;  %v9484_v20 = vor.u32 %v9483_v57, %v9479_v18  ;;  %v9147_v6 = vld [vmem:[#allocation2 + $0x138] sm:$0xf]  ;;  %v9148_v57 = vld [vmem:[#allocation2 + $0x13c] sm:$0x1] }
 0x313   : > { %13291 = vmatprep.mubr.bf16.mxu0 %v11991_v40  ;;  %v4490_v2 = vshll.u32 %v16445_v30, 16  ;;  %v4496_v60 = vshrl.u32 %v16449_v19, 16  ;;  %v4499_v28 = vshll.u32 %v16449_v19, 16  ;;  %v4489_v10 = vrot.slane %v4487_v35, 7 }
 0x314   : > { %12924 = vmatmul.mubr.bf16.gmra.mrb[52].mxu1 %v11691_v4  ;;  %v9480_v44 = vsel %vm15013_vm5, %v9475_v36, %v9479_v18  ;;  %v9492_v34 = vshrl.u32 %v9143_v53, 16  ;;  %v9495_v61 = vshll.u32 %v9143_v53, 16  ;;  %v9485_v46 = vrot.slane %v9484_v20, 4  ;;  %v16477_v20 = vld [vmem:[#allocation2 + $0x29c] sm:$0xf] }
 0x315   : > { %v4498_v11 = vrot.slane %v4496_v60, 7  ;;  %v9501_v15 = vshll.u32 %v9144_v63, 16  ;;  %v9505_v12 = vshrl.u32 %v9144_v63, 16  ;;  %v4492_v27 = vor.u32 %v4490_v2, %v4489_v10  ;;  %v3859_v63 = vld [vmem:[#allocation2 + $0x298] sm:$0x8] }
 0x316   : > { %v4494_v23 = vrot.slane %v4489_v10, 4  ;;  %v9494_v54 = vrot.slane %v9492_v34, 4  ;;  %v9497_v0 = vrot.slane %v9495_v61, 5  ;;  %v9490_v55 = vsel %vm15013_vm5, %v9485_v46, %v9489_v51 }
 0x317   : > { %v4501_v33 = vor.u32 %v4499_v28, %v4498_v11  ;;  %v9503_v32 = vrot.slane %v9501_v15, 5  ;;  %v9507_v39 = vrot.slane %v9505_v12, 4  ;;  %v11992_v49 = vcombine.low %v9480_v44, %v9490_v55  ;;  %v9149_v11 = vld [vmem:[#allocation2 + $0x148] sm:$0xf]  ;;  %v16481_v12 = vld [vmem:[#allocation2 + $0x2a0] sm:$0xf] }
 0x318   : > { %v4493_v38 = vsel %vm15288_vm8, %v11643_v9, %v4492_v27  ;;  %v9498_v58 = vor.u32 %v9497_v0, %v9494_v54  ;;  %v9511_v45 = vshll.u32 %v9145_v50, 16  ;;  %v4504_v59 = vshrl.u32 %v3856_v25, 16 }
 0x319   : > { %v4502_v56 = vsel %vm15288_vm8, %v4494_v23, %v4501_v33  ;;  %v9508_v37 = vor.u32 %v9507_v39, %v9503_v32  ;;  %v4509_v42 = vshrl.u32 %v16459_v17, 16  ;;  %13292 = vmatmul.mubr.bf16.gmra.mrb[20].mxu0 %v11992_v49  ;;  %v4512_v52 = vshll.u32 %v16459_v17, 16 }
 0x31a   : > { %v11692_v62 = vcombine.low %v4493_v38, %v4502_v56  ;;  %v9499_v16 = vrot.slane %v9498_v58, 4  ;;  %v9513_v26 = vrot.slane %v9511_v45, 5  ;;  %v11644_v13 = vrot.slane %v4504_v59, 11  ;;  %v9150_v38 = vld [vmem:[#allocation2 + $0x14c] sm:$0xf] }
 0x31b   : > { %v9509_v5 = vrot.slane %v9508_v37, 4  ;;  %v4511_v8 = vrot.slane %v4509_v42, 7  ;;  %v4518_v18 = vshrl.u32 %v16465_v48, 16  ;;  %v4521_v43 = vshll.u32 %v16465_v48, 16  ;;  %v9151_v37 = vld [vmem:[#allocation2 + $0x150] sm:$0x1] }
 0x31c   : > { %12927 = vmatprep.mubr.bf16.mxu1 %v11692_v62  ;;  %v9504_v40 = vsel %vm15013_vm5, %v9499_v16, %v9503_v32  ;;  %v9516_v51 = vshrl.u32 %v9146_v31, 16  ;;  %v9519_v53 = vshll.u32 %v9146_v31, 16  ;;  %v9525_v44 = vshll.u32 %v9147_v6, 16 }
 0x31d   : > { %v9514_v4 = vsel %vm15013_vm5, %v9509_v5, %v9513_v26  ;;  %v4514_v36 = vor.u32 %v4512_v52, %v4511_v8  ;;  %v4516_v9 = vrot.slane %v4511_v8, 4  ;;  %v4520_v35 = vrot.slane %v4518_v18, 7  ;;  %v3862_v26 = vld [vmem:[#allocation2 + $0x2ac] sm:$0x8] }
 0x31e   : > { %v11993_v2 = vcombine.low %v9504_v40, %v9514_v4  ;;  %v9518_v60 = vrot.slane %v9516_v51, 4  ;;  %v9521_v28 = vrot.slane %v9519_v53, 5  ;;  %v9529_v61 = vshrl.u32 %v9147_v6, 16 }
 0x31f   : > { %v4515_v10 = vsel %vm15288_vm8, %v11644_v13, %v4514_v36  ;;  %v4523_v34 = vor.u32 %v4521_v43, %v4520_v35  ;;  %v9535_v46 = vshll.u32 %v9148_v57, 16  ;;  %v9527_v15 = vrot.slane %v9525_v44, 5  ;;  %v16493_v57 = vld [vmem:[#allocation2 + $0x2b0] sm:$0xf]  ;;  %v16497_v36 = vld [vmem:[#allocation2 + $0x2b4] sm:$0xf] }
 0x320   : > { %13295 = vmatprep.mubr.bf16.mxu0 %v11993_v2  ;;  %v9522_v50 = vor.u32 %v9521_v28, %v9518_v60  ;;  %v4526_v27 = vshrl.u32 %v3859_v63, 16  ;;  %v4531_v23 = vshrl.u32 %v16477_v20, 16  ;;  %v9531_v0 = vrot.slane %v9529_v61, 4  ;;  %v9152_v28 = vld [vmem:[#allocation2 + $0x15c] sm:$0xf] }
 0x321   : > { %v4524_v54 = vsel %vm15288_vm8, %v4516_v9, %v4523_v34  ;;  %v9537_v25 = vrot.slane %v9535_v46, 5  ;;  %v4534_v55 = vshll.u32 %v16477_v20, 16  ;;  %v4540_v45 = vshrl.u32 %v16481_v12, 16  ;;  %v9153_v46 = vld [vmem:[#allocation2 + $0x160] sm:$0xf] }
 0x322   : > { %v11693_v33 = vcombine.low %v4515_v10, %v4524_v54  ;;  %v9523_v32 = vrot.slane %v9522_v50, 4  ;;  %v11645_v39 = vrot.slane %v4526_v27, 11  ;;  %v4533_v49 = vrot.slane %v4531_v23, 7 }
 0x323   : > { %v9532_v58 = vor.u32 %v9531_v0, %v9527_v15  ;;  %v4543_v56 = vshll.u32 %v16481_v12, 16  ;;  %v9540_v59 = vshrl.u32 %v9149_v11, 16  ;;  %v9543_v16 = vshll.u32 %v9149_v11, 16 }
 0x324   : > { %12928 = vmatmul.mubr.bf16.gmra.mrb[56].mxu1 %v11693_v33  ;;  %v9528_v42 = vsel %vm15013_vm5, %v9523_v32, %v9527_v15  ;;  %v4536_v31 = vor.u32 %v4534_v55, %v4533_v49  ;;  %v4538_v62 = vrot.slane %v4533_v49, 4  ;;  %v4542_v5 = vrot.slane %v4540_v45, 7 }
 0x325   : > { %v9533_v52 = vrot.slane %v9532_v58, 4  ;;  %v9542_v13 = vrot.slane %v9540_v59, 4  ;;  %v9549_v8 = vshll.u32 %v9150_v38, 16  ;;  %v9545_v6 = vrot.slane %v9543_v16, 5 }
 0x326   : > { %v4537_v18 = vsel %vm15288_vm8, %v11645_v39, %v4536_v31  ;;  %v9553_v40 = vshrl.u32 %v9150_v38, 16  ;;  %v9559_v43 = vshll.u32 %v9151_v37, 16  ;;  %v4545_v53 = vor.u32 %v4543_v56, %v4542_v5  ;;  %v9154_v39 = vld [vmem:[#allocation2 + $0x164] sm:$0x1]  ;;  %v9155_v37 = vld [vmem:[#allocation2 + $0x198] sm:$0xf] }
 0x327   : > { %v9538_v51 = vsel %vm15013_vm5, %v9533_v52, %v9537_v25  ;;  %v9551_v4 = vrot.slane %v9549_v8, 5  ;;  %v4548_v9 = vshrl.u32 %v3862_v26, 16  ;;  %v9546_v63 = vor.u32 %v9545_v6, %v9542_v13  ;;  %v9156_v13 = vld [vmem:[#allocation2 + $0x19c] sm:$0xf]  ;;  %v14149_v6 = vld [vmem:[#allocation2 + $0x184] sm:$0xf] }
 0x328   : > { %v11994_v35 = vcombine.low %v9528_v42, %v9538_v51  ;;  %v9555_v2 = vrot.slane %v9553_v40, 4  ;;  %v9561_v60 = vrot.slane %v9559_v43, 5  ;;  %v4546_v44 = vsel %vm15288_vm8, %v4538_v62, %v4545_v53  ;;  %v14150_v40 = vld [vmem:[#allocation2 + $0x188] sm:$0xf]  ;;  %v9157_v51 = vld [vmem:[#allocation2 + $0x1a0] sm:$0x1] }
 0x329   : > { %v11646_v10 = vrot.slane %v4548_v9, 11  ;;  %v4553_v34 = vshrl.u32 %v16493_v57, 16  ;;  %v4556_v61 = vshll.u32 %v16493_v57, 16  ;;  %v11694_v11 = vcombine.low %v4537_v18, %v4546_v44 }
 0x32a   : > { %13296 = vmatmul.mubr.bf16.gmra.mrb[24].mxu0 %v11994_v35  ;;  %v9547_v50 = vrot.slane %v9546_v63, 4  ;;  %v9556_v15 = vor.u32 %v9555_v2, %v9551_v4  ;;  %v4562_v27 = vshrl.u32 %v16497_v36, 16  ;;  %v4565_v54 = vshll.u32 %v16497_v36, 16  ;;  %v9158_v2 = vld [vmem:[#allocation2 + $0x1ac] sm:$0xf] }
 0x32b   : > { %v4555_v23 = vrot.slane %v4553_v34, 7  ;;  %v9564_v0 = vshrl.u32 %v9152_v28, 16  ;;  %v9567_v25 = vshll.u32 %v9152_v28, 16  ;;  %12931 = vmatprep.mubr.bf16.mxu1 %v11694_v11  ;;  %v9573_v49 = vshll.u32 %v9153_v46, 16  ;;  %v9159_v34 = vld [vmem:[#allocation2 + $0x1b0] sm:$0xf] }
 0x32c   : > { %v9552_v55 = vsel %vm15013_vm5, %v9547_v50, %v9551_v4  ;;  %v9557_v33 = vrot.slane %v9556_v15, 4  ;;  %v4564_v32 = vrot.slane %v4562_v27, 7  ;;  %v9577_v62 = vshrl.u32 %v9153_v46, 16  ;;  %v14151_v11 = vld [vmem:[#allocation2 + $0x198] sm:$0xf] }
 0x32d   : > { %v4558_v38 = vor.u32 %v4556_v61, %v4555_v23  ;;  %v4560_v58 = vrot.slane %v4555_v23, 4  ;;  %v9566_v45 = vrot.slane %v9564_v0, 4  ;;  %v9569_v56 = vrot.slane %v9567_v25, 5  ;;  %v14152_v50 = vld [vmem:[#allocation2 + $0x19c] sm:$0xf] }
 0x32e   : > { %v9562_v59 = vsel %vm15013_vm5, %v9557_v33, %v9561_v60  ;;  %v4567_v42 = vor.u32 %v4565_v54, %v4564_v32  ;;  %v9575_v31 = vrot.slane %v9573_v49, 5  ;;  %v9583_v5 = vshll.u32 %v9154_v39, 16  ;;  %v9160_v33 = vld [vmem:[#allocation2 + $0x1b4] sm:$0x1] }
 0x32f   : > { %v11995_v16 = vcombine.low %v9552_v55, %v9562_v59  ;;  %v4559_v26 = vsel %vm15288_vm8, %v11646_v10, %v4558_v38  ;;  %v9570_v52 = vor.u32 %v9569_v56, %v9566_v45  ;;  %v9579_v18 = vrot.slane %v9577_v62, 4  ;;  %v9161_v56 = vld [vmem:[#allocation2 + $0x1c0] sm:$0xf]  ;;  %v9162_v62 = vld [vmem:[#allocation2 + $0x1c4] sm:$0xf] }
 0x330   : > { %v4568_v8 = vsel %vm15288_vm8, %v4560_v58, %v4567_v42  ;;  %v11737_v43 = vcombine.low %v14149_v6, %v14150_v40  ;;  %v9588_v53 = vshrl.u32 %v9155_v37, 16  ;;  %v9585_v35 = vrot.slane %v9583_v5, 5  ;;  %v14153_v5 = vld [vmem:[#allocation2 + $0x1ac] sm:$0xf]  ;;  %v9163_v40 = vld [vmem:[#allocation2 + $0x1c8] sm:$0x1] }
 0x331   : > { %13299 = vmatprep.mubr.bf16.mxu0 %v11995_v16  ;;  %v11695_v4 = vcombine.low %v4559_v26, %v4568_v8  ;;  %v9571_v9 = vrot.slane %v9570_v52, 4  ;;  %v9591_v63 = vshll.u32 %v9155_v37, 16  ;;  %v9580_v60 = vor.u32 %v9579_v18, %v9575_v31 }
 0x332   : > { %v9590_v28 = vrot.slane %v9588_v53, 4  ;;  %v9597_v44 = vshll.u32 %v9156_v13, 16  ;;  %v9601_v10 = vshrl.u32 %v9156_v13, 16  ;;  %v9607_v46 = vshll.u32 %v9157_v51, 16  ;;  %v14154_v13 = vld [vmem:[#allocation2 + $0x1b0] sm:$0xf] }
 0x333   : > { %12932 = vmatmul.mubr.bf16.gmra.mrb[60].mxu1 %v11695_v4  ;;  %v9576_v1 = vsel %vm15013_vm5, %v9571_v9, %v9575_v31  ;;  %v9593_v61 = vrot.slane %v9591_v63, 5  ;;  %v11738_v15 = vcombine.low %v14151_v11, %v14152_v50  ;;  %v9581_v27 = vrot.slane %v9580_v60, 4  ;;  %v9164_v63 = vld [vmem:[#allocation2 + $0x1d4] sm:$0xf] }
 0x334   : > { %12983 = vmatprep.mubr.bf16.mxu1 %v11737_v43  ;;  %v9599_v23 = vrot.slane %v9597_v44, 5  ;;  %v9603_v54 = vrot.slane %v9601_v10, 4  ;;  %v9612_v0 = vshrl.u32 %v9158_v2, 16  ;;  %v9609_v55 = vrot.slane %v9607_v46, 5  ;;  %v9165_v46 = vld [vmem:[#allocation2 + $0x1d8] sm:$0xf] }
 0x335   : > { %v9594_v25 = vor.u32 %v9593_v61, %v9590_v28  ;;  %v9615_v32 = vshll.u32 %v9158_v2, 16  ;;  %v9621_v39 = vshll.u32 %v9159_v34, 16  ;;  %v9586_v49 = vsel %vm15013_vm5, %v9581_v27, %v9585_v35  ;;  %v14155_v27 = vld [vmem:[#allocation2 + $0x1c0] sm:$0xf] }
 0x336   : > { %v9604_v38 = vor.u32 %v9603_v54, %v9599_v23  ;;  %v9614_v58 = vrot.slane %v9612_v0, 4  ;;  %v9625_v45 = vshrl.u32 %v9159_v34, 16  ;;  %v11996_v37 = vcombine.low %v9576_v1, %v9586_v49  ;;  %v9166_v0 = vld [vmem:[#allocation2 + $0x1dc] sm:$0x1] }
 0x337   : > { %v9595_v59 = vrot.slane %v9594_v25, 4  ;;  %v9617_v42 = vrot.slane %v9615_v32, 5  ;;  %v9623_v31 = vrot.slane %v9621_v39, 5  ;;  %v9631_v52 = vshll.u32 %v9160_v33, 16  ;;  %v9167_v39 = vld [vmem:[#allocation2 + $0x1e8] sm:$0xf] }
 0x338   : > { %v9605_v16 = vrot.slane %v9604_v38, 4  ;;  %v9627_v26 = vrot.slane %v9625_v45, 4  ;;  %v11739_v8 = vcombine.low %v14153_v5, %v14154_v13  ;;  %13300 = vmatmul.mubr.bf16.gmra.mrb[28].mxu0 %v11996_v37  ;;  %v9636_v43 = vshrl.u32 %v9161_v56, 16  ;;  %v9169_v13 = vld [vmem:[#allocation2 + $0x1f0] sm:$0x1] }
 0x339   : > { %v9600_v18 = vsel %vm15013_vm5, %v9595_v59, %v9599_v23  ;;  %v9618_v6 = vor.u32 %v9617_v42, %v9614_v58  ;;  %v9639_v51 = vshll.u32 %v9161_v56, 16  ;;  %v9633_v9 = vrot.slane %v9631_v52, 5  ;;  %v14156_v23 = vld [vmem:[#allocation2 + $0x1c4] sm:$0xf]  ;;  %v14158_v52 = vld [vmem:[#allocation2 + $0x1d8] sm:$0xf] }
 0x33a   : > { %v9610_v53 = vsel %vm15013_vm5, %v9605_v16, %v9609_v55  ;;  %v9628_v4 = vor.u32 %v9627_v26, %v9623_v31  ;;  %v9645_v35 = vshll.u32 %v9162_v62, 16  ;;  %v9638_v28 = vrot.slane %v9636_v43, 4  ;;  %v14157_v26 = vld [vmem:[#allocation2 + $0x1d4] sm:$0xf] }
 0x33b   : > { %v11997_v2 = vcombine.low %v9600_v18, %v9610_v53  ;;  %12984 = vmatmul.mubr.bf16.vlgmr.msra.gmra.mrb[32].mxu1 %v11738_v15  ;;  %v9619_v60 = vrot.slane %v9618_v6, 4  ;;  %v9641_v44 = vrot.slane %v9639_v51, 5  ;;  %v9649_v1 = vshrl.u32 %v9162_v62, 16 }
 0x33c   : > { %v9629_v10 = vrot.slane %v9628_v4, 4  ;;  %12987 = vmatprep.mubr.bf16.mxu1 %v11739_v8  ;;  %v9647_v34 = vrot.slane %v9645_v35, 5  ;;  %v9655_v61 = vshll.u32 %v9163_v40, 16  ;;  %v11740_v54 = vcombine.low %v14155_v27, %v14156_v23  ;;  %v14159_v23 = vld [vmem:[#allocation2 + $0x1e8] sm:$0xf] }
 0x33d   : > { %13303 = vmatprep.mubr.bf16.mxu0 %v11997_v2  ;;  %v9624_v11 = vsel %vm15013_vm5, %v9619_v60, %v9623_v31  ;;  %v9642_v50 = vor.u32 %v9641_v44, %v9638_v28  ;;  %v9660_v25 = vshrl.u32 %v9164_v63, 16  ;;  %v9651_v55 = vrot.slane %v9649_v1, 4  ;;  %v9168_v31 = vld [vmem:[#allocation2 + $0x1ec] sm:$0xf]  ;;  %v9170_v28 = vld [vmem:[#allocation2 + $0x1fc] sm:$0xf] }
 0x33e   : > { %v9634_v15 = vsel %vm15013_vm5, %v9629_v10, %v9633_v9  ;;  %v9657_v33 = vrot.slane %v9655_v61, 5  ;;  %v9663_v32 = vshll.u32 %v9164_v63, 16  ;;  %v9669_v45 = vshll.u32 %v9165_v46, 16  ;;  %v9171_v44 = vld [vmem:[#allocation2 + $0x200] sm:$0xf] }
 0x33f   : > { %v11998_v49 = vcombine.low %v9624_v11, %v9634_v15  ;;  %v9643_v38 = vrot.slane %v9642_v50, 4  ;;  %v9662_v58 = vrot.slane %v9660_v25, 4  ;;  %v9652_v56 = vor.u32 %v9651_v55, %v9647_v34 }
 0x340   : > { %v9665_v37 = vrot.slane %v9663_v32, 5  ;;  %v9673_v59 = vshrl.u32 %v9165_v46, 16  ;;  %v9679_v42 = vshll.u32 %v9166_v0, 16  ;;  %v9671_v16 = vrot.slane %v9669_v45, 5  ;;  %v9172_v46 = vld [vmem:[#allocation2 + $0x204] sm:$0x1] }
 0x341   : > { %13304 = vmatmul.mubr.bf16.gmra.mrb[32].mxu0 %v11998_v49  ;;  %v9648_v62 = vsel %vm15013_vm5, %v9643_v38, %v9647_v34  ;;  %v11741_v5 = vcombine.low %v14157_v26, %v14158_v52  ;;  %v9684_v8 = vshrl.u32 %v9167_v39, 16  ;;  %v9653_v18 = vrot.slane %v9652_v56, 4  ;;  %v9175_v52 = vld [vmem:[#allocation2 + $0x218] sm:$0x1] }
 0x342   : > { %v9666_v6 = vor.u32 %v9665_v37, %v9662_v58  ;;  %v9675_v40 = vrot.slane %v9673_v59, 4  ;;  %v9681_v43 = vrot.slane %v9679_v42, 5  ;;  %v9687_v53 = vshll.u32 %v9167_v39, 16  ;;  %v9173_v58 = vld [vmem:[#allocation2 + $0x210] sm:$0xf] }
 0x343   : > { %12988 = vmatmul.mubr.bf16.gmra.mrb[36].mxu1 %v11740_v54  ;;  %v9686_v51 = vrot.slane %v9684_v8, 4  ;;  %v9693_v4 = vshll.u32 %v9168_v31, 16  ;;  %v9697_v9 = vshrl.u32 %v9168_v31, 16  ;;  %v9658_v35 = vsel %vm15013_vm5, %v9653_v18, %v9657_v33  ;;  %v14160_v54 = vld [vmem:[#allocation2 + $0x1ec] sm:$0xf] }
 0x344   : > { %v9667_v63 = vrot.slane %v9666_v6, 4  ;;  %v9676_v2 = vor.u32 %v9675_v40, %v9671_v16  ;;  %12991 = vmatprep.mubr.bf16.mxu1 %v11741_v5  ;;  %v9703_v60 = vshll.u32 %v9169_v13, 16  ;;  %v11999_v10 = vcombine.low %v9648_v62, %v9658_v35  ;;  %v9174_v42 = vld [vmem:[#allocation2 + $0x214] sm:$0xf]  ;;  %v14161_v8 = vld [vmem:[#allocation2 + $0x1fc] sm:$0xf] }
 0x345   : > { %v9689_v34 = vrot.slane %v9687_v53, 5  ;;  %v9695_v1 = vrot.slane %v9693_v4, 5  ;;  %v9699_v61 = vrot.slane %v9697_v9, 4  ;;  %v11742_v0 = vcombine.low %v14159_v23, %v14160_v54  ;;  %v14162_v18 = vld [vmem:[#allocation2 + $0x200] sm:$0xf] }
 0x346   : > { %v9672_v11 = vsel %vm15013_vm5, %v9667_v63, %v9671_v16  ;;  %v9677_v50 = vrot.slane %v9676_v2, 4  ;;  %v9705_v27 = vrot.slane %v9703_v60, 5  ;;  %13307 = vmatprep.mubr.bf16.mxu0 %v11999_v10  ;;  %v9708_v55 = vshrl.u32 %v9170_v28, 16  ;;  %v9176_v9 = vld [vmem:[#allocation2 + $0x224] sm:$0xf] }
 0x347   : > { %v9690_v25 = vor.u32 %v9689_v34, %v9686_v51  ;;  %v9700_v15 = vor.u32 %v9699_v61, %v9695_v1  ;;  %v9711_v33 = vshll.u32 %v9170_v28, 16  ;;  %v9717_v39 = vshll.u32 %v9171_v44, 16  ;;  %v14163_v34 = vld [vmem:[#allocation2 + $0x210] sm:$0xf]  ;;  %v9178_v23 = vld [vmem:[#allocation2 + $0x22c] sm:$0x1] }
 0x348   : > { %v9682_v32 = vsel %vm15013_vm5, %v9677_v50, %v9681_v43  ;;  %v9721_v49 = vshrl.u32 %v9171_v44, 16  ;;  %v9727_v38 = vshll.u32 %v9172_v46, 16  ;;  %v9710_v59 = vrot.slane %v9708_v55, 4  ;;  %v9177_v46 = vld [vmem:[#allocation2 + $0x228] sm:$0xf] }
 0x349   : > { %v12000_v45 = vcombine.low %v9672_v11, %v9682_v32  ;;  %v9691_v56 = vrot.slane %v9690_v25, 4  ;;  %v9701_v37 = vrot.slane %v9700_v15, 4  ;;  %v9713_v31 = vrot.slane %v9711_v33, 5  ;;  %v9179_v33 = vld [vmem:[#allocation2 + $0x238] sm:$0xf] }
 0x34a   : > { %v9719_v62 = vrot.slane %v9717_v39, 5  ;;  %v9723_v16 = vrot.slane %v9721_v49, 4  ;;  %v9729_v26 = vrot.slane %v9727_v38, 5  ;;  %v11743_v6 = vcombine.low %v14161_v8, %v14162_v18  ;;  %v9181_v8 = vld [vmem:[#allocation2 + $0x240] sm:$0x1] }
 0x34b   : > { %13308 = vmatmul.mubr.bf16.gmra.mrb[36].mxu0 %v12000_v45  ;;  %v9696_v5 = vsel %vm15013_vm5, %v9691_v56, %v9695_v1  ;;  %v9706_v13 = vsel %vm15013_vm5, %v9701_v37, %v9705_v27  ;;  %12992 = vmatmul.mubr.bf16.gmra.mrb[40].mxu1 %v11742_v0  ;;  %v9732_v40 = vshrl.u32 %v9173_v58, 16  ;;  %v9714_v51 = vor.u32 %v9713_v31, %v9710_v59  ;;  %v14164_v1 = vld [vmem:[#allocation2 + $0x214] sm:$0xf]  ;;  %v9180_v59 = vld [vmem:[#allocation2 + $0x23c] sm:$0xf] }
 0x34c   : > { %v12001_v43 = vcombine.low %v9696_v5, %v9706_v13  ;;  %v9724_v53 = vor.u32 %v9723_v16, %v9719_v62  ;;  %v9735_v4 = vshll.u32 %v9173_v58, 16  ;;  %12995 = vmatprep.mubr.bf16.mxu1 %v11743_v6  ;;  %v9741_v63 = vshll.u32 %v9174_v42, 16 }
 0x34d   : > { %v9734_v35 = vrot.slane %v9732_v40, 4  ;;  %v9745_v2 = vshrl.u32 %v9174_v42, 16  ;;  %v9751_v60 = vshll.u32 %v9175_v52, 16  ;;  %v9715_v28 = vrot.slane %v9714_v51, 4  ;;  %v9182_v51 = vld [vmem:[#allocation2 + $0x24c] sm:$0xf] }
 0x34e   : > { %13311 = vmatprep.mubr.bf16.mxu0 %v12001_v43  ;;  %v9725_v44 = vrot.slane %v9724_v53, 4  ;;  %v9737_v10 = vrot.slane %v9735_v4, 5  ;;  %v11744_v61 = vcombine.low %v14163_v34, %v14164_v1  ;;  %v9743_v11 = vrot.slane %v9741_v63, 5 }
 0x34f   : > { %v9747_v50 = vrot.slane %v9745_v2, 4  ;;  %v9753_v27 = vrot.slane %v9751_v60, 5  ;;  %v9756_v54 = vshrl.u32 %v9176_v9, 16  ;;  %v9720_v0 = vsel %vm15013_vm5, %v9715_v28, %v9719_v62 }
 0x350   : > { %v9730_v25 = vsel %vm15013_vm5, %v9725_v44, %v9729_v26  ;;  %v9738_v15 = vor.u32 %v9737_v10, %v9734_v35  ;;  %v9759_v55 = vshll.u32 %v9176_v9, 16  ;;  %v9765_v38 = vshll.u32 %v9177_v46, 16 }
 0x351   : > { %v12002_v32 = vcombine.low %v9720_v0, %v9730_v25  ;;  %v9748_v39 = vor.u32 %v9747_v50, %v9743_v11  ;;  %v9758_v49 = vrot.slane %v9756_v54, 4  ;;  %v9769_v56 = vshrl.u32 %v9177_v46, 16  ;;  %v9184_v46 = vld [vmem:[#allocation2 + $0x254] sm:$0x1]  ;;  %v9185_v25 = vld [vmem:[#allocation2 + $0x260] sm:$0xf] }
 0x352   : > { %v9739_v58 = vrot.slane %v9738_v15, 4  ;;  %v9761_v45 = vrot.slane %v9759_v55, 5  ;;  %v9775_v37 = vshll.u32 %v9178_v23, 16  ;;  %v9767_v31 = vrot.slane %v9765_v38, 5 }
 0x353   : > { %13312 = vmatmul.mubr.bf16.gmra.mrb[40].mxu0 %v12002_v32  ;;  %v9749_v42 = vrot.slane %v9748_v39, 4  ;;  %12996 = vmatmul.mubr.bf16.gmra.mrb[44].mxu1 %v11744_v61  ;;  %v11745_v62 = vcombine.low %v16378_v3, %v16382_v14  ;;  %v9780_v16 = vshrl.u32 %v9179_v33, 16  ;;  %v9771_v5 = vrot.slane %v9769_v56, 4  ;;  %v9183_v14 = vld [vmem:[#allocation2 + $0x250] sm:$0xf] }
 0x354   : > { %v9744_v26 = vsel %vm15013_vm5, %v9739_v58, %v9743_v11  ;;  %v9762_v52 = vor.u32 %v9761_v45, %v9758_v49  ;;  %v9777_v13 = vrot.slane %v9775_v37, 5  ;;  %v9783_v40 = vshll.u32 %v9179_v33, 16  ;;  %v9186_v33 = vld [vmem:[#allocation2 + $0x264] sm:$0xf]  ;;  %v9187_v56 = vld [vmem:[#allocation2 + $0x268] sm:$0x1] }
 0x355   : > { %v9754_v18 = vsel %vm15013_vm5, %v9749_v42, %v9753_v27  ;;  %12999 = vmatprep.mubr.bf16.mxu1 %v11745_v62  ;;  %v9782_v6 = vrot.slane %v9780_v16, 4  ;;  %v9789_v43 = vshll.u32 %v9180_v59, 16  ;;  %v9772_v9 = vor.u32 %v9771_v5, %v9767_v31 }
 0x356   : > { %v12003_v53 = vcombine.low %v9744_v26, %v9754_v18  ;;  %v9763_v4 = vrot.slane %v9762_v52, 4  ;;  %v9793_v3 = vshrl.u32 %v9180_v59, 16  ;;  %v9785_v35 = vrot.slane %v9783_v40, 5  ;;  %v9188_v26 = vld [vmem:[#allocation2 + $0x274] sm:$0xf] }
 0x357   : > { %v9791_v63 = vrot.slane %v9789_v43, 5  ;;  %v9799_v2 = vshll.u32 %v9181_v8, 16  ;;  %v11746_v60 = vcombine.low %v16395_v29, %v16399_v47  ;;  %v9773_v44 = vrot.slane %v9772_v9, 4  ;;  %v9189_v40 = vld [vmem:[#allocation2 + $0x278] sm:$0xf] }
 0x358   : > { %13315 = vmatprep.mubr.bf16.mxu0 %v12003_v53  ;;  %v9768_v28 = vsel %vm15013_vm5, %v9763_v4, %v9767_v31  ;;  %v9795_v10 = vrot.slane %v9793_v3, 4  ;;  %v9804_v34 = vshrl.u32 %v9182_v51, 16  ;;  %v9786_v1 = vor.u32 %v9785_v35, %v9782_v6  ;;  %v9190_v4 = vld [vmem:[#allocation2 + $0x27c] sm:$0x1] }
 0x359   : > { %v9801_v61 = vrot.slane %v9799_v2, 5  ;;  %v9807_v11 = vshll.u32 %v9182_v51, 16  ;;  %v9813_v50 = vshll.u32 %v9183_v14, 16  ;;  %v9778_v27 = vsel %vm15013_vm5, %v9773_v44, %v9777_v13  ;;  %v9191_v2 = vld [vmem:[#allocation2 + $0x288] sm:$0xf] }
 0x35a   : > { %v9796_v23 = vor.u32 %v9795_v10, %v9791_v63  ;;  %v9806_v54 = vrot.slane %v9804_v34, 4  ;;  %v9817_v0 = vshrl.u32 %v9183_v14, 16  ;;  %v12004_v29 = vcombine.low %v9768_v28, %v9778_v27  ;;  %v9193_v27 = vld [vmem:[#allocation2 + $0x290] sm:$0x1] }
 0x35b   : > { %v9787_v47 = vrot.slane %v9786_v1, 4  ;;  %13000 = vmatmul.mubr.bf16.gmra.mrb[48].mxu1 %v11746_v60  ;;  %v9809_v15 = vrot.slane %v9807_v11, 5  ;;  %v9815_v55 = vrot.slane %v9813_v50, 5  ;;  %v9823_v49 = vshll.u32 %v9184_v46, 16  ;;  %v9192_v11 = vld [vmem:[#allocation2 + $0x28c] sm:$0xf] }
 0x35c   : > { %v9797_v32 = vrot.slane %v9796_v23, 4  ;;  %v9819_v39 = vrot.slane %v9817_v0, 4  ;;  %v11747_v38 = vcombine.low %v16413_v21, %v16415_v41  ;;  %13316 = vmatmul.mubr.bf16.gmra.mrb[44].mxu0 %v12004_v29  ;;  %v9828_v37 = vshrl.u32 %v9185_v25, 16 }
 0x35d   : > { %v9792_v58 = vsel %vm15013_vm5, %v9787_v47, %v9791_v63  ;;  %v9810_v45 = vor.u32 %v9809_v15, %v9806_v54  ;;  %v9831_v59 = vshll.u32 %v9185_v25, 16  ;;  %v9825_v62 = vrot.slane %v9823_v49, 5 }
 0x35e   : > { %v9802_v42 = vsel %vm15013_vm5, %v9797_v32, %v9801_v61  ;;  %v9820_v31 = vor.u32 %v9819_v39, %v9815_v55  ;;  %13003 = vmatprep.mubr.bf16.mxu1 %v11747_v38  ;;  %v9837_v16 = vshll.u32 %v9186_v33, 16  ;;  %v9830_v13 = vrot.slane %v9828_v37, 4 }
 0x35f   : > { %v12005_v52 = vcombine.low %v9792_v58, %v9802_v42  ;;  %v9811_v5 = vrot.slane %v9810_v45, 4  ;;  %v9833_v21 = vrot.slane %v9831_v59, 5  ;;  %v9841_v18 = vshrl.u32 %v9186_v33, 16  ;;  %v9194_v58 = vld [vmem:[#allocation2 + $0x29c] sm:$0xf] }
 0x360   : > { %v9821_v41 = vrot.slane %v9820_v31, 4  ;;  %v9839_v8 = vrot.slane %v9837_v16, 5  ;;  %v9847_v6 = vshll.u32 %v9187_v56, 16  ;;  %v11748_v53 = vcombine.low %v16429_v7, %v16433_v22  ;;  %v9195_v45 = vld [vmem:[#allocation2 + $0x2a0] sm:$0xf] }
 0x361   : > { %13319 = vmatprep.mubr.bf16.mxu0 %v12005_v52  ;;  %v9816_v43 = vsel %vm15013_vm5, %v9811_v5, %v9815_v55  ;;  %v9834_v51 = vor.u32 %v9833_v21, %v9830_v13  ;;  %v9852_v9 = vshrl.u32 %v9188_v26, 16  ;;  %v9843_v14 = vrot.slane %v9841_v18, 4  ;;  %v9196_v59 = vld [vmem:[#allocation2 + $0x2a4] sm:$0x1] }
 0x362   : > { %v9826_v3 = vsel %vm15013_vm5, %v9821_v41, %v9825_v62  ;;  %v9849_v35 = vrot.slane %v9847_v6, 5  ;;  %v9855_v63 = vshll.u32 %v9188_v26, 16  ;;  %v9861_v10 = vshll.u32 %v9189_v40, 16  ;;  %v9197_v6 = vld [vmem:[#allocation2 + $0x2b0] sm:$0xf] }
 0x363   : > { %v12006_v60 = vcombine.low %v9816_v43, %v9826_v3  ;;  %v9835_v28 = vrot.slane %v9834_v51, 4  ;;  %13004 = vmatmul.mubr.bf16.gmra.mrb[52].mxu1 %v11748_v53  ;;  %v9854_v44 = vrot.slane %v9852_v9, 4  ;;  %v9844_v34 = vor.u32 %v9843_v14, %v9839_v8  ;;  %v9199_v14 = vld [vmem:[#allocation2 + $0x2b8] sm:$0x1] }
 0x364   : > { %v9857_v1 = vrot.slane %v9855_v63, 5  ;;  %v9865_v61 = vshrl.u32 %v9189_v40, 16  ;;  %v9871_v46 = vshll.u32 %v9190_v4, 16  ;;  %v9863_v22 = vrot.slane %v9861_v10, 5  ;;  %v9198_v4 = vld [vmem:[#allocation2 + $0x2b4] sm:$0xf] }
 0x365   : > { %13320 = vmatmul.mubr.bf16.gmra.mrb[48].mxu0 %v12006_v60  ;;  %v9840_v7 = vsel %vm15013_vm5, %v9835_v28, %v9839_v8  ;;  %v11749_v50 = vcombine.low %v16445_v30, %v16449_v19  ;;  %v9876_v23 = vshrl.u32 %v9191_v2, 16  ;;  %v9845_v54 = vrot.slane %v9844_v34, 4 }
 0x366   : > { %v9858_v0 = vor.u32 %v9857_v1, %v9854_v44  ;;  %v9867_v25 = vrot.slane %v9865_v61, 4  ;;  %v9873_v29 = vrot.slane %v9871_v46, 5  ;;  %v9879_v15 = vshll.u32 %v9191_v2, 16  ;;  %v9200_v1 = vld [vmem:[#allocation2 + $0x2c4] sm:$0xf] }
 0x367   : > { %13007 = vmatprep.mubr.bf16.mxu1 %v11749_v50  ;;  %v9878_v47 = vrot.slane %v9876_v23, 4  ;;  %v9885_v55 = vshll.u32 %v9192_v11, 16  ;;  %v9889_v33 = vshrl.u32 %v9192_v11, 16  ;;  %v9850_v32 = vsel %vm15013_vm5, %v9845_v54, %v9849_v35  ;;  %v9201_v54 = vld [vmem:[#allocation2 + $0x2c8] sm:$0xf] }
 0x368   : > { %v9859_v39 = vrot.slane %v9858_v0, 4  ;;  %v9868_v49 = vor.u32 %v9867_v25, %v9863_v22  ;;  %v9895_v38 = vshll.u32 %v9193_v27, 16  ;;  %v12007_v30 = vcombine.low %v9840_v7, %v9850_v32  ;;  %v9202_v25 = vld [vmem:[#allocation2 + $0x2cc] sm:$0x1] }
 0x369   : > { %v9881_v19 = vrot.slane %v9879_v15, 5  ;;  %v9887_v56 = vrot.slane %v9885_v55, 5  ;;  %v9891_v37 = vrot.slane %v9889_v33, 4  ;;  %v11750_v16 = vcombine.low %v16459_v17, %v16465_v48 }
 0x36a   : > { %v9864_v42 = vsel %vm15013_vm5, %v9859_v39, %v9863_v22  ;;  %v9869_v31 = vrot.slane %v9868_v49, 4  ;;  %v9897_v62 = vrot.slane %v9895_v38, 5  ;;  %13323 = vmatprep.mubr.bf16.mxu0 %v12007_v30  ;;  %v9900_v5 = vshrl.u32 %v9194_v58, 16 }
 0x36b   : > { %v9882_v26 = vor.u32 %v9881_v19, %v9878_v47  ;;  %v9892_v52 = vor.u32 %v9891_v37, %v9887_v56  ;;  %v9903_v13 = vshll.u32 %v9194_v58, 16  ;;  %13008 = vmatmul.mubr.bf16.gmra.mrb[56].mxu1 %v11750_v16  ;;  %v9909_v41 = vshll.u32 %v9195_v45, 16 }
 0x36c   : > { %v9874_v21 = vsel %vm15013_vm5, %v9869_v31, %v9873_v29  ;;  %v9913_v8 = vshrl.u32 %v9195_v45, 16  ;;  %v9919_v18 = vshll.u32 %v9196_v59, 16  ;;  %v9902_v53 = vrot.slane %v9900_v5, 4 }
 0x36d   : > { %v12008_v40 = vcombine.low %v9864_v42, %v9874_v21  ;;  %v9883_v43 = vrot.slane %v9882_v26, 4  ;;  %v9893_v51 = vrot.slane %v9892_v52, 4  ;;  %v9905_v9 = vrot.slane %v9903_v13, 5 }
 0x36e   : > { %v9911_v17 = vrot.slane %v9909_v41, 5  ;;  %v9915_v48 = vrot.slane %v9913_v8, 4  ;;  %v9921_v3 = vrot.slane %v9919_v18, 5  ;;  %v11751_v2 = vcombine.low %v16477_v20, %v16481_v12 }
 0x36f   : > { %13324 = vmatmul.mubr.bf16.gmra.mrb[52].mxu0 %v12008_v40  ;;  %v9888_v35 = vsel %vm15013_vm5, %v9883_v43, %v9887_v56  ;;  %v9898_v63 = vsel %vm15013_vm5, %v9893_v51, %v9897_v62  ;;  %v9924_v60 = vshrl.u32 %v9197_v6, 16  ;;  %v9906_v44 = vor.u32 %v9905_v9, %v9902_v53 }
 0x370   : > { %v12009_v28 = vcombine.low %v9888_v35, %v9898_v63  ;;  %v9916_v10 = vor.u32 %v9915_v48, %v9911_v17  ;;  %v9927_v34 = vshll.u32 %v9197_v6, 16  ;;  %13011 = vmatprep.mubr.bf16.mxu1 %v11751_v2  ;;  %v9933_v46 = vshll.u32 %v9198_v4, 16 }
 0x371   : > { %v9926_v61 = vrot.slane %v9924_v60, 4  ;;  %v9937_v11 = vshrl.u32 %v9198_v4, 16  ;;  %v9943_v7 = vshll.u32 %v9199_v14, 16  ;;  %v9907_v22 = vrot.slane %v9906_v44, 4 }
 0x372   : > { %13327 = vmatprep.mubr.bf16.mxu0 %v12009_v28  ;;  %v9917_v50 = vrot.slane %v9916_v10, 4  ;;  %v9929_v27 = vrot.slane %v9927_v34, 5  ;;  %v11752_v23 = vcombine.low %v16493_v57, %v16497_v36  ;;  %v9935_v20 = vrot.slane %v9933_v46, 5  ;;  %v12873_v57 = vpop.f32.mrb[0].mxu1 }
 0x373   : > { %v9939_v12 = vrot.slane %v9937_v11, 4  ;;  %v9945_v0 = vrot.slane %v9943_v7, 5  ;;  %v9948_v29 = vshrl.u32 %v9200_v1, 16  ;;  %v9912_v47 = vsel %vm15013_vm5, %v9907_v22, %v9911_v17  ;;  %v4799_v19 = vpop.f32.mrb[1].mxu1 }
 0x374   : > { %v9922_v15 = vsel %vm15013_vm5, %v9917_v50, %v9921_v3  ;;  %v9930_v55 = vor.u32 %v9929_v27, %v9926_v61  ;;  %13012 = vmatmul.mubr.bf16.gmra.mrb[60].mxu1 %v11752_v23  ;;  %v9951_v33 = vshll.u32 %v9200_v1, 16  ;;  %v9957_v38 = vshll.u32 %v9201_v54, 16  ;;  %v12874_v59 = vpop.f32.mrb[2].mxu1  ;;  %v16637_v27 = vld [vmem:[%s10520_s7] ss:$0 sm:$0xff] }
 0x375   : > { %v12010_v32 = vcombine.low %v9912_v47, %v9922_v15  ;;  %v9940_v39 = vor.u32 %v9939_v12, %v9935_v20  ;;  %v9950_v49 = vrot.slane %v9948_v29, 4  ;;  %v9961_v45 = vshrl.u32 %v9201_v54, 16  ;;  %v4802_v16 = vpop.f32.mrb[3].mxu1 }
 0x376   : > { %v9931_v36 = vrot.slane %v9930_v55, 4  ;;  %v9953_v58 = vrot.slane %v9951_v33, 5  ;;  %v9967_v30 = vshll.u32 %v9202_v25, 16  ;;  %v9959_v37 = vrot.slane %v9957_v38, 5  ;;  %v12877_v18 = vpop.f32.mrb[4].mxu1 }
 0x377   : > { %13328 = vmatmul.mubr.bf16.gmra.mrb[56].mxu0 %v12010_v32  ;;  %v9941_v56 = vrot.slane %v9940_v39, 4  ;;  %v9963_v62 = vrot.slane %v9961_v45, 4  ;;  %v4815_v40 = vpop.f32.mrb[5].mxu1 }
 0x378   : > { %v9936_v42 = vsel %vm15013_vm5, %v9931_v36, %v9935_v20  ;;  %v9954_v31 = vor.u32 %v9953_v58, %v9950_v49  ;;  %v9969_v21 = vrot.slane %v9967_v30, 5  ;;  %v12878_v51 = vpop.f32.mrb[6].mxu1 }
 0x379   : > { %v9946_v26 = vsel %vm15013_vm5, %v9941_v56, %v9945_v0  ;;  %v9964_v13 = vor.u32 %v9963_v62, %v9959_v37  ;;  %v4818_v53 = vpop.f32.mrb[7].mxu1 }
 0x37a   : > { %v12011_v52 = vcombine.low %v9936_v42, %v9946_v26  ;;  %v9955_v5 = vrot.slane %v9954_v31, 4 }
 0x37b   : > { %v9965_v8 = vrot.slane %v9964_v13, 4 }
 0x37c   : > { %13331 = vmatprep.mubr.bf16.mxu0 %v12011_v52  ;;  %v9960_v41 = vsel %vm15013_vm5, %v9955_v5, %v9959_v37 }
 0x37d   : > { %v9970_v6 = vsel %vm15013_vm5, %v9965_v8, %v9969_v21 }
 0x37e   : > { %v12012_v43 = vcombine.low %v9960_v41, %v9970_v6  ;;  %v12881_v4 = vpop.f32.mrb[8].mxu1 }
 0x37f   : > { %v4831_v9 = vpop.f32.mrb[9].mxu1 }
 0x380   : > { %13332 = vmatmul.mubr.bf16.gmra.mrb[60].mxu0 %v12012_v43  ;;  %v12882_v17 = vpop.f32.mrb[10].mxu1 }
 0x381   : > { %v16597_v48 = vpop.f32.mrb[11].mxu1 }
 0x386   : > { %v16599_v3 = vpop.f32.mrb[12].mxu1 }
 0x387   : > { %v16601_v14 = vpop.f32.mrb[13].mxu1 }
 0x388   : > { %v16603_v35 = vpop.f32.mrb[14].mxu1 }
 0x389   : > { %v16605_v63 = vpop.f32.mrb[15].mxu1 }
 0x38e   : > { %v16607_v24 = vpop.f32.mrb[16].mxu1 }
 0x38f   : > { %v16609_v2 = vpop.f32.mrb[17].mxu1 }
 0x390   : > { %v16611_v60 = vpop.f32.mrb[18].mxu1 }
 0x391   : > { %v16613_v28 = vpop.f32.mrb[19].mxu1 }
 0x396   : > { %v16615_v44 = vpop.f32.mrb[20].mxu1 }
 0x397   : > { %v16617_v10 = vpop.f32.mrb[21].mxu1 }
 0x398   : > { %v16619_v34 = vpop.f32.mrb[22].mxu1 }
 0x399   : > { %v16621_v1 = vpop.f32.mrb[23].mxu1 }
 0x39e   : > { %v16623_v61 = vpop.f32.mrb[24].mxu1 }
 0x39f   : > { %v16625_v46 = vpop.f32.mrb[25].mxu1 }
 0x3a0   : > { %v16627_v11 = vpop.f32.mrb[26].mxu1 }
 0x3a1   : > { %v16629_v7 = vpop.f32.mrb[27].mxu1 }
 0x3a6   : > { %v16635_v22 = vpop.f32.mrb[28].mxu1 }
 0x3a7   : > { %v16639_v23 = vpop.f32.mrb[29].mxu1 }
 0x3a8   : > { %v13273_v50 = vpop.f32.mrb[0].mxu0  ;;  %v16641_v12 = vpop.f32.mrb[30].mxu1 }
 0x3a9   : > { %v13351_v54 = vadd.f32 %v13273_v50, %v12873_v57  ;;  %v10201_v20 = vpop.f32.mrb[1].mxu0  ;;  %v16643_v29 = vpop.f32.mrb[31].mxu1 }
 0x3aa   : > { %v13352_v0 = vadd.f32 %v10201_v20, %v4799_v19  ;;  %v13274_v25 = vpop.f32.mrb[2].mxu0 }
 0x3ab   : > { %v10530_v47 = vadd.f32 %v13351_v54, %v16637_v27  ;;  %v13353_v15 = vadd.f32 %v13274_v25, %v12874_v59  ;;  %v10204_v55 = vpop.f32.mrb[3].mxu0 }
 0x3ac   : > { %v10528_v33 = vadd.f32 %v13352_v0, %v16637_v27  ;;  %v13354_v32 = vadd.f32 %v10204_v55, %v4802_v16 }
 0x3ad   : > { %v16647_v39 = vmax.f32 %v10530_v47, 0.0  ;;  %v10531_v49 = vadd.f32 %v13353_v15, %v16637_v27 }
 0x3ae   : > { %v16650_v38 = vmax.f32 %v10528_v33, 0.0  ;;  %v10529_v57 = vadd.f32 %v13354_v32, %v16637_v27 }
 0x3af   : > { %18342 = vst [vmem:[#allocation22_spill] sm:$0xff] %v16647_v39  ;;  %v16653_v36 = vmax.f32 %v10531_v49, 0.0 }
 0x3b0   : > { %18343 = vst [vmem:[#allocation31_spill] sm:$0xff] %v16650_v38  ;;  %v16655_v58 = vmax.f32 %v10529_v57, 0.0  ;;  %v13277_v45 = vpop.f32.mrb[4].mxu0 }
 0x3b1   : > { %18344 = vst [vmem:[#allocation50_spill] sm:$0xff] %v16653_v36  ;;  %v13355_v30 = vadd.f32 %v13277_v45, %v12877_v18  ;;  %v10217_v19 = vpop.f32.mrb[5].mxu0 }
 0x3b2   : > { %18345 = vst [vmem:[#allocation55_spill] sm:$0xff] %v16655_v58  ;;  %v13356_v56 = vadd.f32 %v10217_v19, %v4815_v40  ;;  %v13278_v37 = vpop.f32.mrb[6].mxu0 }
 0x3b3   : > { %v10534_v59 = vadd.f32 %v13355_v30, %v16637_v27  ;;  %v13357_v42 = vadd.f32 %v13278_v37, %v12878_v51  ;;  %v10220_v31 = vpop.f32.mrb[7].mxu0 }
 0x3b4   : > { %v10532_v62 = vadd.f32 %v13356_v56, %v16637_v27  ;;  %v13358_v16 = vadd.f32 %v10220_v31, %v4818_v53 }
 0x3b5   : > { %v16659_v26 = vmax.f32 %v10534_v59, 0.0  ;;  %v10535_v52 = vadd.f32 %v13357_v42, %v16637_v27 }
 0x3b6   : > { %v16662_v5 = vmax.f32 %v10532_v62, 0.0  ;;  %v10533_v13 = vadd.f32 %v13358_v16, %v16637_v27 }
 0x3b7   : > { %18346 = vst [vmem:[#allocation47_spill] sm:$0xff] %v16659_v26  ;;  %v16665_v21 = vmax.f32 %v10535_v52, 0.0 }
 0x3b8   : > { %18347 = vst [vmem:[#allocation57_spill] sm:$0xff] %v16662_v5  ;;  %v16667_v41 = vmax.f32 %v10533_v13, 0.0 }
 0x3b9   : > { %18348 = vst [vmem:[#allocation49_spill] sm:$0xff] %v16665_v21 }
 0x3ba   : > { %18349 = vst [vmem:[#allocation64_spill] sm:$0xff] %v16667_v41 }
 0x3be   : > { %v13281_v8 = vpop.f32.mrb[8].mxu0 }
 0x3bf   : > { %v13359_v18 = vadd.f32 %v13281_v8, %v12881_v4  ;;  %v10233_v6 = vpop.f32.mrb[9].mxu0 }
 0x3c0   : > { %v13360_v40 = vadd.f32 %v10233_v6, %v4831_v9  ;;  %v13282_v43 = vpop.f32.mrb[10].mxu0 }
 0x3c1   : > { %v10538_v51 = vadd.f32 %v13359_v18, %v16637_v27  ;;  %v13361_v53 = vadd.f32 %v13282_v43, %v12882_v17  ;;  %v10236_v50 = vpop.f32.mrb[11].mxu0 }
 0x3c2   : > { %v10536_v54 = vadd.f32 %v13360_v40, %v16637_v27  ;;  %v13362_v20 = vadd.f32 %v10236_v50, %v16597_v48 }
 0x3c3   : > { %v16672_v0 = vmax.f32 %v10538_v51, 0.0  ;;  %v10539_v25 = vadd.f32 %v13361_v53, %v16637_v27 }
 0x3c4   : > { %v16675_v47 = vmax.f32 %v10536_v54, 0.0  ;;  %v10537_v15 = vadd.f32 %v13362_v20, %v16637_v27 }
 0x3c5   : > { %18350 = vst [vmem:[#allocation56_spill] sm:$0xff] %v16672_v0  ;;  %v16678_v4 = vmax.f32 %v10539_v25, 0.0 }
 0x3c6   : > { %18351 = vst [vmem:[#allocation65_spill] sm:$0xff] %v16675_v47  ;;  %v16680_v9 = vmax.f32 %v10537_v15, 0.0 }
 0x3c7   : > { %18352 = vst [vmem:[#allocation59_spill] sm:$0xff] %v16678_v4 }
 0x3c8   : > { %18353 = vst [vmem:[#allocation69_spill] sm:$0xff] %v16680_v9 }
 0x3cd   : > { %v13285_v55 = vpop.f32.mrb[12].mxu0 }
 0x3ce   : > { %v13363_v17 = vadd.f32 %v13285_v55, %v16599_v3  ;;  %v10249_v33 = vpop.f32.mrb[13].mxu0 }
 0x3cf   : > { %v13364_v32 = vadd.f32 %v10249_v33, %v16601_v14  ;;  %v13286_v49 = vpop.f32.mrb[14].mxu0 }
 0x3d0   : > { %v10542_v48 = vadd.f32 %v13363_v17, %v16637_v27  ;;  %v13365_v57 = vadd.f32 %v13286_v49, %v16603_v35  ;;  %v10252_v45 = vpop.f32.mrb[15].mxu0 }
 0x3d1   : > { %v10540_v30 = vadd.f32 %v13364_v32, %v16637_v27  ;;  %v13366_v19 = vadd.f32 %v10252_v45, %v16605_v63 }
 0x3d2   : > { %v16688_v56 = vmax.f32 %v10542_v48, 0.0  ;;  %v10543_v37 = vadd.f32 %v13365_v57, %v16637_v27 }
 0x3d3   : > { %v16691_v59 = vmax.f32 %v10540_v30, 0.0  ;;  %v10541_v3 = vadd.f32 %v13366_v19, %v16637_v27 }
 0x3d4   : > { %18354 = vst [vmem:[#allocation63_spill] sm:$0xff] %v16688_v56  ;;  %v16694_v42 = vmax.f32 %v10543_v37, 0.0 }
 0x3d5   : > { %18355 = vst [vmem:[#allocation71_spill] sm:$0xff] %v16691_v59  ;;  %v16696_v14 = vmax.f32 %v10541_v3, 0.0 }
 0x3d6   : > { %18356 = vst [vmem:[#allocation66_spill] sm:$0xff] %v16694_v42 }
 0x3d7   : > { %18357 = vst [vmem:[#allocation79_spill] sm:$0xff] %v16696_v14 }
 0x3dc   : > { %v13289_v31 = vpop.f32.mrb[16].mxu0 }
 0x3dd   : > { %v13367_v35 = vadd.f32 %v13289_v31, %v16607_v24  ;;  %v10265_v62 = vpop.f32.mrb[17].mxu0 }
 0x3de   : > { %v13368_v16 = vadd.f32 %v10265_v62, %v16609_v2  ;;  %v13290_v52 = vpop.f32.mrb[18].mxu0 }
 0x3df   : > { %v10546_v63 = vadd.f32 %v13367_v35, %v16637_v27  ;;  %v13369_v13 = vadd.f32 %v13290_v52, %v16611_v60  ;;  %v10268_v8 = vpop.f32.mrb[19].mxu0 }
 0x3e0   : > { %v10544_v18 = vadd.f32 %v13368_v16, %v16637_v27  ;;  %v13370_v6 = vadd.f32 %v10268_v8, %v16613_v28 }
 0x3e1   : > { %v16704_v40 = vmax.f32 %v10546_v63, 0.0  ;;  %v10547_v43 = vadd.f32 %v13369_v13, %v16637_v27 }
 0x3e2   : > { %v16707_v51 = vmax.f32 %v10544_v18, 0.0  ;;  %v10545_v24 = vadd.f32 %v13370_v6, %v16637_v27 }
 0x3e3   : > { %18358 = vst [vmem:[#allocation74_spill] sm:$0xff] %v16704_v40  ;;  %v16710_v53 = vmax.f32 %v10547_v43, 0.0 }
 0x3e4   : > { %18359 = vst [vmem:[#allocation81_spill] sm:$0xff] %v16707_v51  ;;  %v16712_v2 = vmax.f32 %v10545_v24, 0.0 }
 0x3e5   : > { %18360 = vst [vmem:[#allocation75_spill] sm:$0xff] %v16710_v53 }
 0x3e6   : > { %18361 = vst [vmem:[#allocation86_spill] sm:$0xff] %v16712_v2 }
 0x3ec   : > { %v13293_v50 = vpop.f32.mrb[20].mxu0 }
 0x3ed   : > { %v13371_v60 = vadd.f32 %v13293_v50, %v16615_v44  ;;  %v10281_v54 = vpop.f32.mrb[21].mxu0 }
 0x3ee   : > { %v13372_v20 = vadd.f32 %v10281_v54, %v16617_v10  ;;  %v13294_v25 = vpop.f32.mrb[22].mxu0 }
 0x3ef   : > { %v10550_v28 = vadd.f32 %v13371_v60, %v16637_v27  ;;  %v13373_v15 = vadd.f32 %v13294_v25, %v16619_v34  ;;  %v10284_v55 = vpop.f32.mrb[23].mxu0 }
 0x3f0   : > { %v10548_v17 = vadd.f32 %v13372_v20, %v16637_v27  ;;  %v13374_v33 = vadd.f32 %v10284_v55, %v16621_v1 }
 0x3f1   : > { %v16720_v32 = vmax.f32 %v10550_v28, 0.0  ;;  %v10551_v49 = vadd.f32 %v13373_v15, %v16637_v27 }
 0x3f2   : > { %v16723_v48 = vmax.f32 %v10548_v17, 0.0  ;;  %v10549_v44 = vadd.f32 %v13374_v33, %v16637_v27 }
 0x3f3   : > { %18362 = vst [vmem:[#allocation80_spill] sm:$0xff] %v16720_v32  ;;  %v16726_v57 = vmax.f32 %v10551_v49, 0.0 }
 0x3f4   : > { %18363 = vst [vmem:[#allocation88_spill] sm:$0xff] %v16723_v48  ;;  %v16728_v10 = vmax.f32 %v10549_v44, 0.0 }
 0x3f5   : > { %18364 = vst [vmem:[#allocation83_spill] sm:$0xff] %v16726_v57 }
 0x3f6   : > { %18365 = vst [vmem:[#allocation93_spill] sm:$0xff] %v16728_v10 }
 0x3fd   : > { %v13297_v45 = vpop.f32.mrb[24].mxu0 }
 0x3fe   : > { %v13375_v34 = vadd.f32 %v13297_v45, %v16623_v61  ;;  %v10297_v30 = vpop.f32.mrb[25].mxu0 }
 0x3ff   : > { %v13376_v19 = vadd.f32 %v10297_v30, %v16625_v46  ;;  %v13298_v37 = vpop.f32.mrb[26].mxu0 }
 0x400   : > { %v10554_v1 = vadd.f32 %v13375_v34, %v16637_v27  ;;  %v13377_v3 = vadd.f32 %v13298_v37, %v16627_v11  ;;  %v10300_v31 = vpop.f32.mrb[27].mxu0 }
 0x401   : > { %v10552_v35 = vadd.f32 %v13376_v19, %v16637_v27  ;;  %v13378_v62 = vadd.f32 %v10300_v31, %v16629_v7 }
 0x402   : > { %v16736_v16 = vmax.f32 %v10554_v1, 0.0  ;;  %v10555_v52 = vadd.f32 %v13377_v3, %v16637_v27 }
 0x403   : > { %v16739_v63 = vmax.f32 %v10552_v35, 0.0  ;;  %v10553_v61 = vadd.f32 %v13378_v62, %v16637_v27 }
 0x404   : > { %18366 = vst [vmem:[#allocation90_spill] sm:$0xff] %v16736_v16  ;;  %v16742_v13 = vmax.f32 %v10555_v52, 0.0 }
 0x405   : > { %18367 = vst [vmem:[#allocation94_spill] sm:$0xff] %v16739_v63  ;;  %v16744_v46 = vmax.f32 %v10553_v61, 0.0 }
 0x406   : > { %18368 = vst [vmem:[#allocation92_spill] sm:$0xff] %v16742_v13 }
 0x407   : > { %18369 = vst [vmem:[#allocation97_spill] sm:$0xff] %v16744_v46 }
 0x40b   : > { %v13301_v8 = vpop.f32.mrb[28].mxu0 }
 0x40c   : > { %v13379_v11 = vadd.f32 %v13301_v8, %v16635_v22  ;;  %v10313_v18 = vpop.f32.mrb[29].mxu0 }
 0x40d   : > { %v13380_v6 = vadd.f32 %v10313_v18, %v16639_v23  ;;  %v13302_v43 = vpop.f32.mrb[30].mxu0 }
 0x40e   : > { %v12985_v7 = vpop.f32.mrb[32].mxu1  ;;  %v10558_v24 = vadd.f32 %v13379_v11, %v16637_v27  ;;  %v13381_v50 = vadd.f32 %v13302_v43, %v16641_v12  ;;  %v10316_v60 = vpop.f32.mrb[31].mxu0 }
 0x40f   : > { %v5540_v54 = vpop.f32.mrb[33].mxu1  ;;  %v10556_v20 = vadd.f32 %v13380_v6, %v16637_v27  ;;  %v13382_v25 = vadd.f32 %v10316_v60, %v16643_v29 }
 0x410   : > { %v12986_v28 = vpop.f32.mrb[34].mxu1  ;;  %v16752_v15 = vmax.f32 %v10558_v24, 0.0  ;;  %v10559_v22 = vadd.f32 %v13381_v50, %v16637_v27 }
 0x411   : > { %v5543_v55 = vpop.f32.mrb[35].mxu1  ;;  %v16755_v17 = vmax.f32 %v10556_v20, 0.0  ;;  %v10557_v23 = vadd.f32 %v13382_v25, %v16637_v27 }
 0x412   : > { %18370 = vst [vmem:[#allocation95_spill] sm:$0xff] %v16752_v15  ;;  %v16758_v33 = vmax.f32 %v10559_v22, 0.0 }
 0x413   : > { %18371 = vst [vmem:[#allocation98_spill] sm:$0xff] %v16755_v17  ;;  %v16760_v49 = vmax.f32 %v10557_v23, 0.0 }
 0x414   : > { %18372 = vst [vmem:[#allocation96_spill] sm:$0xff] %v16758_v33  ;;  %v13305_v12 = vpop.f32.mrb[32].mxu0 }
 0x415   : > { %18373 = vst [vmem:[#allocation101_spill] sm:$0xff] %v16760_v49  ;;  %v13383_v44 = vadd.f32 %v13305_v12, %v12985_v7  ;;  %v10329_v45 = vpop.f32.mrb[33].mxu0 }
 0x416   : > { %v13384_v34 = vadd.f32 %v10329_v45, %v5540_v54  ;;  %v13306_v30 = vpop.f32.mrb[34].mxu0  ;;  %v12989_v29 = vpop.f32.mrb[36].mxu1 }
 0x417   : > { %v10562_v19 = vadd.f32 %v13383_v44, %v16637_v27  ;;  %v13385_v37 = vadd.f32 %v13306_v30, %v12986_v28  ;;  %v10332_v1 = vpop.f32.mrb[35].mxu0  ;;  %v5556_v3 = vpop.f32.mrb[37].mxu1 }
 0x418   : > { %v10560_v31 = vadd.f32 %v13384_v34, %v16637_v27  ;;  %v13386_v35 = vadd.f32 %v10332_v1, %v5543_v55  ;;  %v12990_v62 = vpop.f32.mrb[38].mxu1 }
 0x419   : > { %v16764_v52 = vmax.f32 %v10562_v19, 0.0  ;;  %v10563_v61 = vadd.f32 %v13385_v37, %v16637_v27  ;;  %v5559_v8 = vpop.f32.mrb[39].mxu1 }
 0x41a   : > { %v16767_v11 = vmax.f32 %v10560_v31, 0.0  ;;  %v10561_v18 = vadd.f32 %v13386_v35, %v16637_v27 }
 0x41b   : > { %18374 = vst [vmem:[#allocation99_spill] sm:$0xff] %v16764_v52  ;;  %v16770_v6 = vmax.f32 %v10563_v61, 0.0 }
 0x41c   : > { %18375 = vst [vmem:[#allocation102_spill] sm:$0xff] %v16767_v11  ;;  %v16772_v43 = vmax.f32 %v10561_v18, 0.0 }
 0x41d   : > { %18376 = vst [vmem:[#allocation100_spill] sm:$0xff] %v16770_v6 }
 0x41e   : > { %18377 = vst [vmem:[#allocation105_spill] sm:$0xff] %v16772_v43  ;;  %v13309_v7 = vpop.f32.mrb[36].mxu0  ;;  %v12993_v24 = vpop.f32.mrb[40].mxu1 }
 0x41f   : > { %v13387_v50 = vadd.f32 %v13309_v7, %v12989_v29  ;;  %v10345_v60 = vpop.f32.mrb[37].mxu0  ;;  %v5572_v54 = vpop.f32.mrb[41].mxu1 }
 0x420   : > { %v13388_v20 = vadd.f32 %v10345_v60, %v5556_v3  ;;  %v13310_v25 = vpop.f32.mrb[38].mxu0  ;;  %v12994_v28 = vpop.f32.mrb[42].mxu1 }
 0x421   : > { %v10566_v22 = vadd.f32 %v13387_v50, %v16637_v27  ;;  %v13389_v55 = vadd.f32 %v13310_v25, %v12990_v62  ;;  %v10348_v23 = vpop.f32.mrb[39].mxu0  ;;  %v5575_v12 = vpop.f32.mrb[43].mxu1 }
 0x422   : > { %v10564_v44 = vadd.f32 %v13388_v20, %v16637_v27  ;;  %v13390_v45 = vadd.f32 %v10348_v23, %v5559_v8 }
 0x423   : > { %v16776_v34 = vmax.f32 %v10566_v22, 0.0  ;;  %v10567_v30 = vadd.f32 %v13389_v55, %v16637_v27 }
 0x424   : > { %v16779_v19 = vmax.f32 %v10564_v44, 0.0  ;;  %v10565_v29 = vadd.f32 %v13390_v45, %v16637_v27 }
 0x425   : > { %18378 = vst [vmem:[#allocation103_spill] sm:$0xff] %v16776_v34  ;;  %v16782_v37 = vmax.f32 %v10567_v30, 0.0 }
 0x426   : > { %18379 = vst [vmem:[#allocation107_spill] sm:$0xff] %v16779_v19  ;;  %v16784_v1 = vmax.f32 %v10565_v29, 0.0  ;;  %v13313_v3 = vpop.f32.mrb[40].mxu0  ;;  %v12997_v31 = vpop.f32.mrb[44].mxu1 }
 0x427   : > { %18380 = vst [vmem:[#allocation104_spill] sm:$0xff] %v16782_v37  ;;  %v13391_v35 = vadd.f32 %v13313_v3, %v12993_v24  ;;  %v10361_v62 = vpop.f32.mrb[41].mxu0  ;;  %v5588_v61 = vpop.f32.mrb[45].mxu1 }
 0x428   : > { %18381 = vst [vmem:[#allocation109_spill] sm:$0xff] %v16784_v1  ;;  %v13392_v18 = vadd.f32 %v10361_v62, %v5572_v54  ;;  %v13314_v7 = vpop.f32.mrb[42].mxu0  ;;  %v12998_v8 = vpop.f32.mrb[46].mxu1 }
 0x429   : > { %v10570_v50 = vadd.f32 %v13391_v35, %v16637_v27  ;;  %v13393_v60 = vadd.f32 %v13314_v7, %v12994_v28  ;;  %v10364_v20 = vpop.f32.mrb[43].mxu0  ;;  %v5591_v25 = vpop.f32.mrb[47].mxu1 }
 0x42a   : > { %v10568_v22 = vadd.f32 %v13392_v18, %v16637_v27  ;;  %v13394_v55 = vadd.f32 %v10364_v20, %v5575_v12 }
 0x42b   : > { %v16788_v23 = vmax.f32 %v10570_v50, 0.0  ;;  %v10571_v44 = vadd.f32 %v13393_v60, %v16637_v27 }
 0x42c   : > { %v16791_v45 = vmax.f32 %v10568_v22, 0.0  ;;  %v10569_v24 = vadd.f32 %v13394_v55, %v16637_v27 }
 0x42d   : > { %18382 = vst [vmem:[#allocation106_spill] sm:$0xff] %v16788_v23  ;;  %v16794_v30 = vmax.f32 %v10571_v44, 0.0 }
 0x42e   : > { %18383 = vst [vmem:[#allocation111_spill] sm:$0xff] %v16791_v45  ;;  %v16796_v54 = vmax.f32 %v10569_v24, 0.0  ;;  %v13001_v29 = vpop.f32.mrb[48].mxu1 }
 0x42f   : > { %18384 = vst [vmem:[#allocation108_spill] sm:$0xff] %v16794_v30  ;;  %v5604_v3 = vpop.f32.mrb[49].mxu1  ;;  %v13317_v28 = vpop.f32.mrb[44].mxu0 }
 0x430   : > { %18385 = vst [vmem:[#allocation113_spill] sm:$0xff] %v16796_v54  ;;  %v13002_v35 = vpop.f32.mrb[50].mxu1  ;;  %v13395_v62 = vadd.f32 %v13317_v28, %v12997_v31  ;;  %v10377_v7 = vpop.f32.mrb[45].mxu0 }
 0x431   : > { %v5607_v18 = vpop.f32.mrb[51].mxu1  ;;  %v13396_v12 = vadd.f32 %v10377_v7, %v5588_v61  ;;  %v13318_v50 = vpop.f32.mrb[46].mxu0 }
 0x432   : > { %v10574_v20 = vadd.f32 %v13395_v62, %v16637_v27  ;;  %v13397_v60 = vadd.f32 %v13318_v50, %v12998_v8  ;;  %v10380_v22 = vpop.f32.mrb[47].mxu0 }
 0x433   : > { %v10572_v23 = vadd.f32 %v13396_v12, %v16637_v27  ;;  %v13398_v55 = vadd.f32 %v10380_v22, %v5591_v25 }
 0x434   : > { %v16800_v44 = vmax.f32 %v10574_v20, 0.0  ;;  %v10575_v24 = vadd.f32 %v13397_v60, %v16637_v27 }
 0x435   : > { %v16803_v30 = vmax.f32 %v10572_v23, 0.0  ;;  %v10573_v33 = vadd.f32 %v13398_v55, %v16637_v27 }
 0x436   : > { %18386 = vst [vmem:[#allocation110_spill] sm:$0xff] %v16800_v44  ;;  %v13005_v31 = vpop.f32.mrb[52].mxu1  ;;  %v16806_v28 = vmax.f32 %v10575_v24, 0.0 }
 0x437   : > { %18387 = vst [vmem:[#allocation114_spill] sm:$0xff] %v16803_v30  ;;  %v5620_v61 = vpop.f32.mrb[53].mxu1  ;;  %v16808_v7 = vmax.f32 %v10573_v33, 0.0 }
 0x438   : > { %18388 = vst [vmem:[#allocation112_spill] sm:$0xff] %v16806_v28  ;;  %v13321_v62 = vpop.f32.mrb[48].mxu0  ;;  %v13006_v8 = vpop.f32.mrb[54].mxu1 }
 0x439   : > { %18389 = vst [vmem:[#allocation117_spill] sm:$0xff] %v16808_v7  ;;  %v13399_v50 = vadd.f32 %v13321_v62, %v13001_v29  ;;  %v10393_v15 = vpop.f32.mrb[49].mxu0  ;;  %v5623_v12 = vpop.f32.mrb[55].mxu1 }
 0x43a   : > { %v13400_v25 = vadd.f32 %v10393_v15, %v5604_v3  ;;  %v13322_v20 = vpop.f32.mrb[50].mxu0 }
 0x43b   : > { %v10578_v22 = vadd.f32 %v13399_v50, %v16637_v27  ;;  %v13401_v60 = vadd.f32 %v13322_v20, %v13002_v35  ;;  %v10396_v23 = vpop.f32.mrb[51].mxu0 }
 0x43c   : > { %v10576_v44 = vadd.f32 %v13400_v25, %v16637_v27  ;;  %v13402_v55 = vadd.f32 %v10396_v23, %v5607_v18 }
 0x43d   : > { %v16812_v30 = vmax.f32 %v10578_v22, 0.0  ;;  %v10579_v24 = vadd.f32 %v13401_v60, %v16637_v27 }
 0x43e   : > { %v16815_v33 = vmax.f32 %v10576_v44, 0.0  ;;  %v10577_v28 = vadd.f32 %v13402_v55, %v16637_v27  ;;  %v13009_v62 = vpop.f32.mrb[56].mxu1 }
 0x43f   : > { %18390 = vst [vmem:[#allocation115_spill] sm:$0xff] %v16812_v30  ;;  %v16818_v29 = vmax.f32 %v10579_v24, 0.0  ;;  %v5636_v3 = vpop.f32.mrb[57].mxu1 }
 0x440   : > { %18391 = vst [vmem:[#allocation118_spill] sm:$0xff] %v16815_v33  ;;  %v16820_v15 = vmax.f32 %v10577_v28, 0.0  ;;  %v13010_v50 = vpop.f32.mrb[58].mxu1 }
 0x441   : > { %18392 = vst [vmem:[#allocation116_spill] sm:$0xff] %v16818_v29  ;;  %v5639_v20 = vpop.f32.mrb[59].mxu1 }
 0x442   : > { %18393 = vst [vmem:[#allocation121_spill] sm:$0xff] %v16820_v15  ;;  %v13325_v35 = vpop.f32.mrb[52].mxu0 }
 0x443   : > { %v13403_v7 = vadd.f32 %v13325_v35, %v13005_v31  ;;  %v10409_v25 = vpop.f32.mrb[53].mxu0 }
 0x444   : > { %v13404_v18 = vadd.f32 %v10409_v25, %v5620_v61  ;;  %v13326_v22 = vpop.f32.mrb[54].mxu0 }
 0x445   : > { %v10582_v23 = vadd.f32 %v13403_v7, %v16637_v27  ;;  %v13405_v60 = vadd.f32 %v13326_v22, %v13006_v8  ;;  %v10412_v44 = vpop.f32.mrb[55].mxu0 }
 0x446   : > { %v10580_v30 = vadd.f32 %v13404_v18, %v16637_v27  ;;  %v13406_v55 = vadd.f32 %v10412_v44, %v5623_v12 }
 0x447   : > { %v16824_v24 = vmax.f32 %v10582_v23, 0.0  ;;  %v10583_v28 = vadd.f32 %v13405_v60, %v16637_v27  ;;  %v13013_v29 = vpop.f32.mrb[60].mxu1 }
 0x448   : > { %v16827_v15 = vmax.f32 %v10580_v30, 0.0  ;;  %v10581_v33 = vadd.f32 %v13406_v55, %v16637_v27  ;;  %v5652_v31 = vpop.f32.mrb[61].mxu1 }
 0x449   : > { %18394 = vst [vmem:[#allocation119_spill] sm:$0xff] %v16824_v24  ;;  %v16830_v35 = vmax.f32 %v10583_v28, 0.0  ;;  %v13014_v61 = vpop.f32.mrb[62].mxu1 }
 0x44a   : > { %18395 = vst [vmem:[#allocation123_spill] sm:$0xff] %v16827_v15  ;;  %v16832_v25 = vmax.f32 %v10581_v33, 0.0  ;;  %v13329_v7 = vpop.f32.mrb[56].mxu0  ;;  %v5655_v8 = vpop.f32.mrb[63].mxu1 }
 0x44b   : > { %18396 = vst [vmem:[#allocation120_spill] sm:$0xff] %v16830_v35  ;;  %v13407_v22 = vadd.f32 %v13329_v7, %v13009_v62  ;;  %v10425_v18 = vpop.f32.mrb[57].mxu0 }
 0x44c   : > { %18397 = vst [vmem:[#allocation125_spill] sm:$0xff] %v16832_v25  ;;  %v13408_v12 = vadd.f32 %v10425_v18, %v5636_v3  ;;  %v13330_v23 = vpop.f32.mrb[58].mxu0 }
 0x44d   : > { %v10586_v44 = vadd.f32 %v13407_v22, %v16637_v27  ;;  %v13409_v60 = vadd.f32 %v13330_v23, %v13010_v50  ;;  %v10428_v24 = vpop.f32.mrb[59].mxu0 }
 0x44e   : > { %v10584_v30 = vadd.f32 %v13408_v12, %v16637_v27  ;;  %v13410_v15 = vadd.f32 %v10428_v24, %v5639_v20 }
 0x44f   : > { %v16836_v55 = vmax.f32 %v10586_v44, 0.0  ;;  %v10587_v28 = vadd.f32 %v13409_v60, %v16637_v27 }
 0x450   : > { %v16839_v35 = vmax.f32 %v10584_v30, 0.0  ;;  %v10585_v33 = vadd.f32 %v13410_v15, %v16637_v27 }
 0x451   : > { %v16842_v25 = vmax.f32 %v10587_v28, 0.0 }
 0x452   : > { %v16844_v62 = vmax.f32 %v10585_v33, 0.0 }
 0x453   : > { %v13333_v3 = vpop.f32.mrb[60].mxu0 }
 0x454   : > { %v13411_v7 = vadd.f32 %v13333_v3, %v13013_v29  ;;  %v10441_v22 = vpop.f32.mrb[61].mxu0 }
 0x455   : > { %v13412_v50 = vadd.f32 %v10441_v22, %v5652_v31  ;;  %v13334_v18 = vpop.f32.mrb[62].mxu0 }
 0x456   : > { %v10590_v12 = vadd.f32 %v13411_v7, %v16637_v27  ;;  %v13413_v20 = vadd.f32 %v13334_v18, %v13014_v61  ;;  %v10444_v24 = vpop.f32.mrb[63].mxu0  ;;  %10659 = sbr.rel (%p12022_p8) target bundleno = 1190 (0x4a6), region = 70 }
 0x457   : > { %v10588_v23 = vadd.f32 %v13412_v50, %v16637_v27  ;;  %v13414_v44 = vadd.f32 %v10444_v24, %v5655_v8 }
 0x458   : > { %v16848_v60 = vmax.f32 %v10590_v12, 0.0  ;;  %v10591_v15 = vadd.f32 %v13413_v20, %v16637_v27 }
 0x459   : > { %v16851_v30 = vmax.f32 %v10588_v23, 0.0  ;;  %v10589_v28 = vadd.f32 %v13414_v44, %v16637_v27 }
 0x45a   : > { %v16854_v33 = vmax.f32 %v10591_v15, 0.0 }
 0x45b   : > { %v16856_v29 = vmax.f32 %v10589_v28, 0.0 }
 0x45c   : > { %18398 = vst [vmem:[#allocation122_spill] sm:$0xff] %v16854_v33 }
 0x45d   : > { %v10660_v31 = vld [vmem:[%s14267_s23] sm:$0xff]  ;;  %s10788_s8 = scalar_select %p141_p5, 1, 0  ;;  %v10661_v27 = vld [vmem:[%s14267_s23 + $0x8] sm:$0xff]  ;;  %v10662_v22 = vld [vmem:[%s14267_s23 + $0x10] sm:$0xff] }
 0x45e   : > { %v10692_v61 = vld [vmem:[%s14267_s23 + $0x100] sm:$0xff]  ;;  %v10724_v8 = vadd.f32 %v10660_v31, %v16650_v38  ;;  %v10693_v3 = vld [vmem:[%s14267_s23 + $0x108] sm:$0xff]  ;;  %v10725_v7 = vadd.f32 %v10661_v27, %v16655_v58  ;;  %v10694_v50 = vld [vmem:[%s14267_s23 + $0x110] sm:$0xff]  ;;  %v10726_v20 = vadd.f32 %v10662_v22, %v16647_v39 }
 0x45f   : > { %v10756_v18 = vadd.f32 %v10692_v61, %v16767_v11  ;;  %v10789_v12 = vstv %s10788_s8  ;;  %v10663_v24 = vld [vmem:[%s14267_s23 + $0x18] sm:$0xff]  ;;  %v10664_v44 = vld [vmem:[%s14267_s23 + $0x20] sm:$0xff]  ;;  %v10757_v15 = vadd.f32 %v10693_v3, %v16772_v43  ;;  %v10758_v28 = vadd.f32 %v10694_v50, %v16764_v52  ;;  %v10665_v22 = vld [vmem:[%s14267_s23 + $0x28] sm:$0xff] }
 0x460   : > { %v10695_v23 = vld [vmem:[%s14267_s23 + $0x118] sm:$0xff]  ;;  %vm16876_vm9 = vcmp.eq.s32.totalorder %v10789_v12, 1  ;;  %v10727_v61 = vadd.f32 %v10663_v24, %v16653_v36  ;;  %v10728_v27 = vadd.f32 %v10664_v44, %v16662_v5  ;;  %v10729_v24 = vadd.f32 %v10665_v22, %v16667_v41 }
 0x461   : > { %v10759_v33 = vadd.f32 %v10695_v23, %v16770_v6  ;;  %v16887_v3 = vsel %vm16876_vm9, %v16650_v38, %v10724_v8  ;;  %v16892_v50 = vsel %vm16876_vm9, %v16655_v58, %v10725_v7  ;;  %v16897_v12 = vsel %vm16876_vm9, %v16647_v39, %v10726_v20  ;;  %v10666_v23 = vld [vmem:[%s14267_s23 + $0x30] sm:$0xff]  ;;  %v10667_v44 = vld [vmem:[%s14267_s23 + $0x38] sm:$0xff]  ;;  %v10696_v7 = vld [vmem:[%s14267_s23 + $0x120] sm:$0xff] }
 0x462   : > { %10855 = vst [vmem:[%s14267_s23] sm:$0xff] %v16887_v3  ;;  %10856 = vst [vmem:[%s14267_s23 + $0x8] sm:$0xff] %v16892_v50  ;;  %v16911_v8 = vsel %vm16876_vm9, %v16653_v36, %v10727_v61  ;;  %v16917_v20 = vsel %vm16876_vm9, %v16662_v5, %v10728_v27  ;;  %v10730_v22 = vadd.f32 %v10666_v23, %v16659_v26  ;;  %v10668_v58 = vld [vmem:[%s14267_s23 + $0x40] sm:$0xff]  ;;  %v10697_v61 = vld [vmem:[%s14267_s23 + $0x128] sm:$0xff] }
 0x463   : > { %10857 = vst [vmem:[%s14267_s23 + $0x10] sm:$0xff] %v16897_v12  ;;  %v10731_v39 = vadd.f32 %v10667_v44, %v16665_v21  ;;  %10858 = vst [vmem:[%s14267_s23 + $0x18] sm:$0xff] %v16911_v8  ;;  %v16930_v36 = vsel %vm16876_vm9, %v16667_v41, %v10729_v24  ;;  %v10732_v27 = vadd.f32 %v10668_v58, %v16675_v47  ;;  %v10669_v23 = vld [vmem:[%s14267_s23 + $0x48] sm:$0xff]  ;;  %v10670_v44 = vld [vmem:[%s14267_s23 + $0x50] sm:$0xff] }
 0x464   : > { %10859 = vst [vmem:[%s14267_s23 + $0x20] sm:$0xff] %v16917_v20  ;;  %v16938_v5 = vsel %vm16876_vm9, %v16767_v11, %v10756_v18  ;;  %v16943_v38 = vsel %vm16876_vm9, %v16772_v43, %v10757_v15  ;;  %10860 = vst [vmem:[%s14267_s23 + $0x28] sm:$0xff] %v16930_v36  ;;  %v16948_v24 = vld [vmem:[%s14267_s23 + $0x130] sm:$0xff]  ;;  %v16953_v58 = vsel %vm16876_vm9, %v16659_v26, %v10730_v22  ;;  %v16956_v41 = vld [vmem:[%s14267_s23 + $0x138] sm:$0xff] }
 0x465   : > { %18401 = vst [vmem:[#allocation153_spill] sm:$0xff] %v16938_v5  ;;  %18402 = vst [vmem:[#allocation154_spill] sm:$0xff] %v16943_v38  ;;  %v16961_v18 = vsel %vm16876_vm9, %v16665_v21, %v10731_v39  ;;  %v10733_v15 = vadd.f32 %v10669_v23, %v16680_v9  ;;  %v10734_v43 = vadd.f32 %v10670_v44, %v16672_v0  ;;  %v10671_v11 = vld [vmem:[%s14267_s23 + $0x58] sm:$0xff]  ;;  %v16975_v22 = vld [vmem:[%s14267_s23 + $0x140] sm:$0xff] }
 0x466   : > { %10887 = vst [vmem:[%s14267_s23 + $0x100] sm:$0xff] %v16938_v5  ;;  %10888 = vst [vmem:[%s14267_s23 + $0x108] sm:$0xff] %v16943_v38  ;;  %v16980_v39 = vsel %vm16876_vm9, %v16675_v47, %v10732_v27  ;;  %v10735_v23 = vadd.f32 %v10671_v11, %v16678_v4  ;;  %v10672_v44 = vld [vmem:[%s14267_s23 + $0x60] sm:$0xff]  ;;  %v10673_v21 = vld [vmem:[%s14267_s23 + $0x68] sm:$0xff]  ;;  %v16988_v26 = vsel %vm16876_vm9, %v16764_v52, %v10758_v28 }
 0x467   : > { %10861 = vst [vmem:[%s14267_s23 + $0x30] sm:$0xff] %v16953_v58  ;;  %10862 = vst [vmem:[%s14267_s23 + $0x38] sm:$0xff] %v16961_v18  ;;  %v16993_v38 = vsel %vm16876_vm9, %v16770_v6, %v10759_v33  ;;  %v16998_v27 = vld [vmem:[%s14267_s23 + $0x148] sm:$0xff]  ;;  %v17003_v11 = vsel %vm16876_vm9, %v16680_v9, %v10733_v15  ;;  %v17006_v47 = vld [vmem:[%s14267_s23 + $0x150] sm:$0xff]  ;;  %v17011_v28 = vsel %vm16876_vm9, %v16672_v0, %v10734_v43 }
 0x468   : > { %18403 = vst [vmem:[#allocation155_spill] sm:$0xff] %v16988_v26  ;;  %18404 = vst [vmem:[#allocation156_spill] sm:$0xff] %v16993_v38  ;;  %v10736_v33 = vadd.f32 %v10672_v44, %v16691_v59  ;;  %v10737_v6 = vadd.f32 %v10673_v21, %v16696_v14  ;;  %v10674_v52 = vld [vmem:[%s14267_s23 + $0x70] sm:$0xff]  ;;  %v17025_v15 = vld [vmem:[%s14267_s23 + $0x158] sm:$0xff]  ;;  %v17030_v43 = vsel %vm16876_vm9, %v16678_v4, %v10735_v23 }
 0x469   : > { %10863 = vst [vmem:[%s14267_s23 + $0x40] sm:$0xff] %v16980_v39  ;;  %10889 = vst [vmem:[%s14267_s23 + $0x110] sm:$0xff] %v16988_v26  ;;  %v10738_v21 = vadd.f32 %v10674_v52, %v16688_v56  ;;  %v10675_v44 = vld [vmem:[%s14267_s23 + $0x78] sm:$0xff]  ;;  %v10676_v0 = vld [vmem:[%s14267_s23 + $0x80] sm:$0xff]  ;;  %v10760_v9 = vadd.f32 %v10696_v7, %v16779_v19  ;;  %v12103_v31 = vpack.c.bf16 %v16980_v39, %v16980_v39 }
 0x46a   : > { %10890 = vst [vmem:[%s14267_s23 + $0x118] sm:$0xff] %v16993_v38  ;;  %10864 = vst [vmem:[%s14267_s23 + $0x48] sm:$0xff] %v17003_v11  ;;  %v10761_v38 = vadd.f32 %v10697_v61, %v16784_v1  ;;  %v17040_v26 = vld [vmem:[%s14267_s23 + $0x160] sm:$0xff]  ;;  %v17045_v23 = vsel %vm16876_vm9, %v16691_v59, %v10736_v33  ;;  %v17048_v52 = vld [vmem:[%s14267_s23 + $0x168] sm:$0xff]  ;;  %v17053_v7 = vsel %vm16876_vm9, %v16696_v14, %v10737_v6 }
 0x46b   : > { %10865 = vst [vmem:[%s14267_s23 + $0x50] sm:$0xff] %v17011_v28  ;;  %10866 = vst [vmem:[%s14267_s23 + $0x58] sm:$0xff] %v17030_v43  ;;  %v10739_v61 = vadd.f32 %v10675_v44, %v16694_v42  ;;  %v10740_v4 = vadd.f32 %v10676_v0, %v16707_v51  ;;  %v10677_v5 = vld [vmem:[%s14267_s23 + $0x88] sm:$0xff]  ;;  %v17063_v33 = vld [vmem:[%s14267_s23 + $0x170] sm:$0xff]  ;;  %v17068_v6 = vsel %vm16876_vm9, %v16688_v56, %v10738_v21 }
 0x46c   : > { %18405 = vst [vmem:[#allocation157_spill] sm:$0xff] %v17053_v7  ;;  %10867 = vst [vmem:[%s14267_s23 + $0x60] sm:$0xff] %v17045_v23  ;;  %v10741_v44 = vadd.f32 %v10677_v5, %v16712_v2  ;;  %v10678_v0 = vld [vmem:[%s14267_s23 + $0x90] sm:$0xff]  ;;  %v10679_v14 = vld [vmem:[%s14267_s23 + $0x98] sm:$0xff]  ;;  %v17076_v59 = vsel %vm16876_vm9, %v16779_v19, %v10760_v9 }
 0x46d   : > { %10868 = vst [vmem:[%s14267_s23 + $0x68] sm:$0xff] %v17053_v7  ;;  %18406 = vst [vmem:[#allocation158_spill] sm:$0xff] %v17076_v59  ;;  %v17081_v7 = vsel %vm16876_vm9, %v16784_v1, %v10761_v38  ;;  %v17086_v21 = vld [vmem:[%s14267_s23 + $0x178] sm:$0xff]  ;;  %v17091_v5 = vsel %vm16876_vm9, %v16694_v42, %v10739_v61  ;;  %v17094_v56 = vld [vmem:[%s14267_s23 + $0x180] sm:$0xff]  ;;  %v17099_v9 = vsel %vm16876_vm9, %v16707_v51, %v10740_v4 }
 0x46e   : > { %18407 = vst [vmem:[#allocation159_spill] sm:$0xff] %v17081_v7  ;;  %10869 = vst [vmem:[%s14267_s23 + $0x70] sm:$0xff] %v17068_v6  ;;  %v10742_v38 = vadd.f32 %v10678_v0, %v16704_v40  ;;  %v10743_v1 = vadd.f32 %v10679_v14, %v16710_v53  ;;  %v10680_v19 = vld [vmem:[%s14267_s23 + $0xa0] sm:$0xff]  ;;  %v17113_v61 = vld [vmem:[%s14267_s23 + $0x188] sm:$0xff]  ;;  %v17118_v4 = vsel %vm16876_vm9, %v16712_v2, %v10741_v44 }
 0x46f   : > { %10891 = vst [vmem:[%s14267_s23 + $0x120] sm:$0xff] %v17076_v59  ;;  %10892 = vst [vmem:[%s14267_s23 + $0x128] sm:$0xff] %v17081_v7  ;;  %v10744_v14 = vadd.f32 %v10680_v19, %v16723_v48  ;;  %v10681_v0 = vld [vmem:[%s14267_s23 + $0xa8] sm:$0xff]  ;;  %v10682_v51 = vld [vmem:[%s14267_s23 + $0xb0] sm:$0xff]  ;;  %v10762_v42 = vadd.f32 %v16948_v24, %v16776_v34  ;;  %v10763_v7 = vadd.f32 %v16956_v41, %v16782_v37 }
 0x470   : > { %10870 = vst [vmem:[%s14267_s23 + $0x78] sm:$0xff] %v17091_v5  ;;  %10871 = vst [vmem:[%s14267_s23 + $0x80] sm:$0xff] %v17099_v9  ;;  %v17130_v59 = vld [vmem:[%s14267_s23 + $0x190] sm:$0xff]  ;;  %v17135_v44 = vsel %vm16876_vm9, %v16704_v40, %v10742_v38  ;;  %v17138_v19 = vld [vmem:[%s14267_s23 + $0x198] sm:$0xff]  ;;  %v17143_v24 = vsel %vm16876_vm9, %v16710_v53, %v10743_v1  ;;  %v10745_v41 = vadd.f32 %v10681_v0, %v16728_v10 }
 0x471   : > { %18408 = vst [vmem:[#allocation160_spill] sm:$0xff] %v17118_v4  ;;  %10872 = vst [vmem:[%s14267_s23 + $0x88] sm:$0xff] %v17118_v4  ;;  %v10746_v2 = vadd.f32 %v10682_v51, %v16720_v32  ;;  %v10683_v4 = vld [vmem:[%s14267_s23 + $0xb8] sm:$0xff]  ;;  %v17153_v38 = vld [vmem:[%s14267_s23 + $0x1a0] sm:$0xff]  ;;  %v17158_v1 = vsel %vm16876_vm9, %v16723_v48, %v10744_v14  ;;  %v17166_v40 = vsel %vm16876_vm9, %v16776_v34, %v10762_v42 }
 0x472   : > { %18409 = vst [vmem:[#allocation161_spill] sm:$0xff] %v17143_v24  ;;  %10873 = vst [vmem:[%s14267_s23 + $0x90] sm:$0xff] %v17135_v44  ;;  %v10747_v0 = vadd.f32 %v10683_v4, %v16726_v57  ;;  %v10684_v51 = vld [vmem:[%s14267_s23 + $0xc0] sm:$0xff]  ;;  %v10685_v53 = vld [vmem:[%s14267_s23 + $0xc8] sm:$0xff]  ;;  %v17181_v4 = vsel %vm16876_vm9, %v16728_v10, %v10745_v41  ;;  %v10764_v10 = vadd.f32 %v16975_v22, %v16791_v45 }
 0x473   : > { %10874 = vst [vmem:[%s14267_s23 + $0x98] sm:$0xff] %v17143_v24  ;;  %18410 = vst [vmem:[#allocation162_spill] sm:$0xff] %v17166_v40  ;;  %v17171_v24 = vsel %vm16876_vm9, %v16782_v37, %v10763_v7  ;;  %v17176_v14 = vld [vmem:[%s14267_s23 + $0x1a8] sm:$0xff]  ;;  %v17184_v48 = vld [vmem:[%s14267_s23 + $0x1b0] sm:$0xff]  ;;  %v17189_v42 = vsel %vm16876_vm9, %v16720_v32, %v10746_v2  ;;  %v10748_v7 = vadd.f32 %v10684_v51, %v16739_v63 }
 0x474   : > { %18411 = vst [vmem:[#allocation163_spill] sm:$0xff] %v17171_v24  ;;  %10875 = vst [vmem:[%s14267_s23 + $0xa0] sm:$0xff] %v17158_v1  ;;  %v10749_v37 = vadd.f32 %v10685_v53, %v16744_v46  ;;  %v10686_v34 = vld [vmem:[%s14267_s23 + $0xd0] sm:$0xff]  ;;  %v17203_v41 = vld [vmem:[%s14267_s23 + $0x1b8] sm:$0xff]  ;;  %v17208_v2 = vsel %vm16876_vm9, %v16726_v57, %v10747_v0 }
 0x475   : > { %10893 = vst [vmem:[%s14267_s23 + $0x130] sm:$0xff] %v17166_v40  ;;  %10894 = vst [vmem:[%s14267_s23 + $0x138] sm:$0xff] %v17171_v24  ;;  %v10750_v53 = vadd.f32 %v10686_v34, %v16736_v16  ;;  %v10687_v51 = vld [vmem:[%s14267_s23 + $0xd8] sm:$0xff]  ;;  %v10688_v32 = vld [vmem:[%s14267_s23 + $0xe0] sm:$0xff]  ;;  %v10765_v24 = vadd.f32 %v16998_v27, %v16796_v54  ;;  %v17225_v0 = vsel %vm16876_vm9, %v16739_v63, %v10748_v7 }
 0x476   : > { %10876 = vst [vmem:[%s14267_s23 + $0xa8] sm:$0xff] %v17181_v4  ;;  %10877 = vst [vmem:[%s14267_s23 + $0xb0] sm:$0xff] %v17189_v42  ;;  %v17220_v40 = vld [vmem:[%s14267_s23 + $0x1c0] sm:$0xff]  ;;  %v17228_v34 = vld [vmem:[%s14267_s23 + $0x1c8] sm:$0xff]  ;;  %v17233_v22 = vsel %vm16876_vm9, %v16744_v46, %v10749_v37  ;;  %v10751_v27 = vadd.f32 %v10687_v51, %v16742_v13  ;;  %v10752_v57 = vadd.f32 %v10688_v32, %v16755_v17 }
 0x477   : > { %18412 = vst [vmem:[#allocation164_spill] sm:$0xff] %v17208_v2  ;;  %10878 = vst [vmem:[%s14267_s23 + $0xb8] sm:$0xff] %v17208_v2  ;;  %v10689_v2 = vld [vmem:[%s14267_s23 + $0xe8] sm:$0xff]  ;;  %v17243_v7 = vld [vmem:[%s14267_s23 + $0x1d0] sm:$0xff]  ;;  %v17248_v37 = vsel %vm16876_vm9, %v16736_v16, %v10750_v53  ;;  %v17256_v63 = vsel %vm16876_vm9, %v16791_v45, %v10764_v10 }
 0x478   : > { %18413 = vst [vmem:[#allocation165_spill] sm:$0xff] %v17233_v22  ;;  %10879 = vst [vmem:[%s14267_s23 + $0xc0] sm:$0xff] %v17225_v0  ;;  %v10753_v51 = vadd.f32 %v10689_v2, %v16760_v49  ;;  %v10690_v32 = vld [vmem:[%s14267_s23 + $0xf0] sm:$0xff]  ;;  %v10691_v46 = vld [vmem:[%s14267_s23 + $0xf8] sm:$0xff]  ;;  %v17271_v2 = vsel %vm16876_vm9, %v16742_v13, %v10751_v27  ;;  %v17277_v10 = vsel %vm16876_vm9, %v16755_v17, %v10752_v57 }
 0x479   : > { %10880 = vst [vmem:[%s14267_s23 + $0xc8] sm:$0xff] %v17233_v22  ;;  %18414 = vst [vmem:[#allocation166_spill] sm:$0xff] %v17248_v37  ;;  %v17261_v22 = vsel %vm16876_vm9, %v16796_v54, %v10765_v24  ;;  %v17266_v53 = vld [vmem:[%s14267_s23 + $0x1d8] sm:$0xff]  ;;  %v10720_v16 = vld [vmem:[%s14267_s23 + $0x1e0] sm:$0xff] }
 0x47a   : > { %18415 = vst [vmem:[#allocation167_spill] sm:$0xff] %v17256_v63  ;;  %18416 = vst [vmem:[#allocation168_spill] sm:$0xff] %v17261_v22  ;;  %v18419_v24 = vld [vmem:[#allocation95_spill] sm:$0xff]  ;;  %v18420_v45 = vld [vmem:[#allocation96_spill] sm:$0xff]  ;;  %v17293_v57 = vsel %vm16876_vm9, %v16760_v49, %v10753_v51 }
 0x47b   : > { %10881 = vst [vmem:[%s14267_s23 + $0xd0] sm:$0xff] %v17248_v37  ;;  %18417 = vst [vmem:[#allocation169_spill] sm:$0xff] %v17271_v2  ;;  %v10754_v54 = vadd.f32 %v10690_v32, %v18419_v24  ;;  %v10755_v37 = vadd.f32 %v10691_v46, %v18420_v45  ;;  %v10721_v27 = vld [vmem:[%s14267_s23 + $0x1e8] sm:$0xff]  ;;  %v18422_v17 = vld [vmem:[#allocation106_spill] sm:$0xff] }
 0x47c   : > { %18418 = vst [vmem:[#allocation170_spill] sm:$0xff] %v17277_v10  ;;  %10895 = vst [vmem:[%s14267_s23 + $0x140] sm:$0xff] %v17256_v63  ;;  %v10766_v32 = vadd.f32 %v17006_v47, %v18422_v17  ;;  %v18423_v46 = vld [vmem:[#allocation108_spill] sm:$0xff]  ;;  %v18424_v63 = vld [vmem:[#allocation114_spill] sm:$0xff] }
 0x47d   : > { %10896 = vst [vmem:[%s14267_s23 + $0x148] sm:$0xff] %v17261_v22  ;;  %10882 = vst [vmem:[%s14267_s23 + $0xd8] sm:$0xff] %v17271_v2  ;;  %v10767_v13 = vadd.f32 %v17025_v15, %v18423_v46  ;;  %v10768_v22 = vadd.f32 %v17040_v26, %v18424_v63  ;;  %v17307_v51 = vsel %vm16876_vm9, %v18419_v24, %v10754_v54  ;;  %v10723_v49 = vld [vmem:[%s14267_s23 + $0x1f8] sm:$0xff]  ;;  %v18425_v15 = vld [vmem:[#allocation117_spill] sm:$0xff] }
 0x47e   : > { %10883 = vst [vmem:[%s14267_s23 + $0xe0] sm:$0xff] %v17277_v10  ;;  %18421 = vst [vmem:[#allocation171_spill] sm:$0xff] %v17293_v57  ;;  %v10722_v10 = vld [vmem:[%s14267_s23 + $0x1f0] sm:$0xff]  ;;  %v17313_v47 = vsel %vm16876_vm9, %v18420_v45, %v10755_v37  ;;  %v10769_v2 = vadd.f32 %v17048_v52, %v18425_v15  ;;  %v17326_v54 = vsel %vm16876_vm9, %v18422_v17, %v10766_v32  ;;  %v18430_v32 = vld [vmem:[#allocation115_spill] sm:$0xff] }
 0x47f   : > { %10884 = vst [vmem:[%s14267_s23 + $0xe8] sm:$0xff] %v17293_v57  ;;  %v18426_v26 = vld [vmem:[#allocation110_spill] sm:$0xff]  ;;  %10885 = vst [vmem:[%s14267_s23 + $0xf0] sm:$0xff] %v17307_v51  ;;  %v17331_v45 = vsel %vm16876_vm9, %v18423_v46, %v10767_v13  ;;  %v17336_v52 = vsel %vm16876_vm9, %v18424_v63, %v10768_v22  ;;  %v18429_v22 = vld [vmem:[#allocation121_spill] sm:$0xff] }
 0x480   : > { %v10770_v57 = vadd.f32 %v17063_v33, %v18426_v26  ;;  %10886 = vst [vmem:[%s14267_s23 + $0xf8] sm:$0xff] %v17313_v47  ;;  %v18427_v33 = vld [vmem:[#allocation112_spill] sm:$0xff]  ;;  %10897 = vst [vmem:[%s14267_s23 + $0x150] sm:$0xff] %v17326_v54  ;;  %v17349_v13 = vsel %vm16876_vm9, %v18425_v15, %v10769_v2  ;;  %v18428_v17 = vld [vmem:[#allocation118_spill] sm:$0xff]  ;;  %v10773_v24 = vadd.f32 %v17113_v61, %v18429_v22 }
 0x481   : > { %v10771_v37 = vadd.f32 %v17086_v21, %v18427_v33  ;;  %10898 = vst [vmem:[%s14267_s23 + $0x158] sm:$0xff] %v17331_v45  ;;  %10899 = vst [vmem:[%s14267_s23 + $0x160] sm:$0xff] %v17336_v52  ;;  %v10772_v21 = vadd.f32 %v17094_v56, %v18428_v17  ;;  %v18431_v46 = vld [vmem:[#allocation116_spill] sm:$0xff]  ;;  %v18432_v15 = vld [vmem:[#allocation123_spill] sm:$0xff] }
 0x482   : > { %v17354_v63 = vsel %vm16876_vm9, %v18426_v26, %v10770_v57  ;;  %10900 = vst [vmem:[%s14267_s23 + $0x168] sm:$0xff] %v17349_v13  ;;  %v10774_v57 = vadd.f32 %v17130_v59, %v18430_v32  ;;  %v10775_v56 = vadd.f32 %v17138_v19, %v18431_v46  ;;  %v10776_v61 = vadd.f32 %v17153_v38, %v18432_v15  ;;  %v18433_v59 = vld [vmem:[#allocation125_spill] sm:$0xff]  ;;  %v18434_v19 = vld [vmem:[#allocation119_spill] sm:$0xff]  ;;  %v18438_v39 = vld [vmem:[#allocation160_spill] sm:$0xff] }
 0x483   : > { %10901 = vst [vmem:[%s14267_s23 + $0x170] sm:$0xff] %v17354_v63  ;;  %v17367_v2 = vsel %vm16876_vm9, %v18427_v33, %v10771_v37  ;;  %v17380_v26 = vsel %vm16876_vm9, %v18428_v17, %v10772_v21  ;;  %v17385_v33 = vsel %vm16876_vm9, %v18429_v22, %v10773_v24  ;;  %v10777_v37 = vadd.f32 %v17176_v14, %v18433_v59 }
 0x484   : > { %10902 = vst [vmem:[%s14267_s23 + $0x178] sm:$0xff] %v17367_v2  ;;  %v10778_v38 = vadd.f32 %v17184_v48, %v18434_v19  ;;  %10903 = vst [vmem:[%s14267_s23 + $0x180] sm:$0xff] %v17380_v26  ;;  %v17398_v17 = vsel %vm16876_vm9, %v18430_v32, %v10774_v57  ;;  %v17403_v21 = vsel %vm16876_vm9, %v18431_v46, %v10775_v56  ;;  %v18435_v48 = vld [vmem:[#allocation120_spill] sm:$0xff] }
 0x485   : > { %10904 = vst [vmem:[%s14267_s23 + $0x188] sm:$0xff] %v17385_v33  ;;  %v17408_v14 = vsel %vm16876_vm9, %v18432_v15, %v10776_v61  ;;  %v10779_v22 = vadd.f32 %v17203_v41, %v18435_v48  ;;  %10905 = vst [vmem:[%s14267_s23 + $0x190] sm:$0xff] %v17398_v17  ;;  %v17421_v24 = vsel %vm16876_vm9, %v18433_v59, %v10777_v37 }
 0x486   : > { %10906 = vst [vmem:[%s14267_s23 + $0x198] sm:$0xff] %v17403_v21  ;;  %10907 = vst [vmem:[%s14267_s23 + $0x1a0] sm:$0xff] %v17408_v14  ;;  %v17426_v32 = vsel %vm16876_vm9, %v18434_v19, %v10778_v38  ;;  %v10780_v41 = vadd.f32 %v17220_v40, %v16839_v35  ;;  %v10781_v57 = vadd.f32 %v17228_v34, %v16844_v62 }
 0x487   : > { %10908 = vst [vmem:[%s14267_s23 + $0x1a8] sm:$0xff] %v17421_v24  ;;  %10909 = vst [vmem:[%s14267_s23 + $0x1b0] sm:$0xff] %v17426_v32  ;;  %v17439_v46 = vsel %vm16876_vm9, %v18435_v48, %v10779_v22  ;;  %v10782_v56 = vadd.f32 %v17243_v7, %v16836_v55  ;;  %v10783_v40 = vadd.f32 %v17266_v53, %v16842_v25 }
 0x488   : > { %v10784_v34 = vadd.f32 %v10720_v16, %v16851_v30  ;;  %10910 = vst [vmem:[%s14267_s23 + $0x1b8] sm:$0xff] %v17439_v46  ;;  %v17451_v15 = vsel %vm16876_vm9, %v16839_v35, %v10780_v41  ;;  %v17456_v61 = vsel %vm16876_vm9, %v16844_v62, %v10781_v57  ;;  %v10785_v7 = vadd.f32 %v10721_v27, %v16856_v29 }
 0x489   : > { %v10786_v53 = vadd.f32 %v10722_v10, %v16848_v60  ;;  %10911 = vst [vmem:[%s14267_s23 + $0x1c0] sm:$0xff] %v17451_v15  ;;  %10912 = vst [vmem:[%s14267_s23 + $0x1c8] sm:$0xff] %v17456_v61  ;;  %v17467_v16 = vsel %vm16876_vm9, %v16836_v55, %v10782_v56  ;;  %v17472_v59 = vsel %vm16876_vm9, %v16842_v25, %v10783_v40  ;;  %v18436_v10 = vld [vmem:[#allocation122_spill] sm:$0xff] }
 0x48a   : > { %v17477_v27 = vsel %vm16876_vm9, %v16851_v30, %v10784_v34  ;;  %v10787_v37 = vadd.f32 %v10723_v49, %v18436_v10  ;;  %10913 = vst [vmem:[%s14267_s23 + $0x1d0] sm:$0xff] %v17467_v16  ;;  %10914 = vst [vmem:[%s14267_s23 + $0x1d8] sm:$0xff] %v17472_v59  ;;  %v17489_v19 = vsel %vm16876_vm9, %v16856_v29, %v10785_v7  ;;  %v18441_v34 = vld [vmem:[#allocation165_spill] sm:$0xff] }
 0x48b   : > { %10915 = vst [vmem:[%s14267_s23 + $0x1e0] sm:$0xff] %v17477_v27  ;;  %v17494_v38 = vsel %vm16876_vm9, %v16848_v60, %v10786_v53  ;;  %v12095_v48 = vpack.c.bf16 %v16887_v3, %v16887_v3  ;;  %v12096_v49 = vpack.c.bf16 %v16892_v50, %v16892_v50  ;;  %10916 = vst [vmem:[%s14267_s23 + $0x1e8] sm:$0xff] %v17489_v19  ;;  %v18443_v53 = vld [vmem:[#allocation169_spill] sm:$0xff] }
 0x48c   : > { %10917 = vst [vmem:[%s14267_s23 + $0x1f0] sm:$0xff] %v17494_v38  ;;  %v17507_v22 = vsel %vm16876_vm9, %v18436_v10, %v10787_v37  ;;  %v12162_v41 = vpack.c.bf16 %v16911_v8, %v16897_v12  ;;  %v12099_v57 = vpack.c.bf16 %v16917_v20, %v16917_v20  ;;  %v12100_v3 = vpack.c.bf16 %v16930_v36, %v16930_v36  ;;  %v18437_v8 = vld [vmem:[#allocation157_spill] sm:$0xff]  ;;  %v18445_v37 = vld [vmem:[#allocation171_spill] sm:$0xff] }
 0x48d   : > { %10918 = vst [vmem:[%s14267_s23 + $0x1f8] sm:$0xff] %v17507_v22  ;;  %11175 = vst [vmem:[#allocation2 + $0x1c] sm:$0xf] %v12095_v48  ;;  %v12167_v50 = vpack.c.bf16 %v16961_v18, %v16953_v58  ;;  %v12104_v56 = vpack.c.bf16 %v17003_v11, %v17003_v11  ;;  %v12172_v12 = vpack.c.bf16 %v17030_v43, %v17011_v28  ;;  %v18439_v28 = vld [vmem:[#allocation161_spill] sm:$0xff] }
 0x48e   : > { %11176 = vst [vmem:[#allocation2 + $0x20] sm:$0xf] %v12096_v49  ;;  %12239 = vst [vmem:[#allocation2 + $0x30] sm:$0xff] %v12162_v41   ;;  %v12107_v36 = vpack.c.bf16 %v17045_v23, %v17045_v23  ;;  %v12108_v20 = vpack.c.bf16 %v18437_v8, %v18437_v8  ;;  %v12177_v58 = vpack.c.bf16 %v17091_v5, %v17068_v6  ;;  %v18440_v6 = vld [vmem:[#allocation164_spill] sm:$0xff]  ;;  %v18447_v41 = vld [vmem:[#allocation154_spill] sm:$0xff] }
 0x48f   : > { %11179 = vst [vmem:[#allocation2 + $0x44] sm:$0xf] %v12099_v57  ;;  %11180 = vst [vmem:[#allocation2 + $0x48] sm:$0xf] %v12100_v3  ;;  %v12111_v18 = vpack.c.bf16 %v17099_v9, %v17099_v9  ;;  %v12112_v11 = vpack.c.bf16 %v18438_v39, %v18438_v39  ;;  %v12182_v43 = vpack.c.bf16 %v18439_v28, %v17135_v44  ;;  %v18442_v44 = vld [vmem:[#allocation166_spill] sm:$0xff]  ;;  %v18448_v3 = vld [vmem:[#allocation155_spill] sm:$0xff] }
 0x490   : > { %12240 = vst [vmem:[#allocation2 + $0x58] sm:$0xff] %v12167_v50   ;;  %11183 = vst [vmem:[#allocation2 + $0x6c] sm:$0xf] %v12103_v31  ;;  %v12115_v23 = vpack.c.bf16 %v17158_v1, %v17158_v1  ;;  %v12116_v40 = vpack.c.bf16 %v17181_v4, %v17181_v4  ;;  %v12187_v5 = vpack.c.bf16 %v18440_v6, %v17189_v42  ;;  %v18444_v1 = vld [vmem:[#allocation170_spill] sm:$0xff]  ;;  %v18449_v50 = vld [vmem:[#allocation156_spill] sm:$0xff] }
 0x491   : > { %11184 = vst [vmem:[#allocation2 + $0x70] sm:$0xf] %v12104_v56  ;;  %12241 = vst [vmem:[#allocation2 + $0x80] sm:$0xff] %v12172_v12   ;;  %v12119_v9 = vpack.c.bf16 %v17225_v0, %v17225_v0  ;;  %v12120_v7 = vpack.c.bf16 %v18441_v34, %v18441_v34  ;;  %v12192_v10 = vpack.c.bf16 %v18443_v53, %v18442_v44  ;;  %v18446_v0 = vld [vmem:[#allocation153_spill] sm:$0xff]  ;;  %v18450_v56 = vld [vmem:[#allocation158_spill] sm:$0xff] }
 0x492   : > { %11187 = vst [vmem:[#allocation2 + $0x94] sm:$0xf] %v12107_v36  ;;  %11188 = vst [vmem:[#allocation2 + $0x98] sm:$0xf] %v12108_v20  ;;  %v12123_v4 = vpack.c.bf16 %v18444_v1, %v18444_v1  ;;  %v12124_v48 = vpack.c.bf16 %v18445_v37, %v18445_v37  ;;  %v12197_v42 = vpack.c.bf16 %v17313_v47, %v17307_v51  ;;  %v18451_v36 = vld [vmem:[#allocation159_spill] sm:$0xff]  ;;  %v18452_v51 = vld [vmem:[#allocation162_spill] sm:$0xff] }
 0x493   : > { %12242 = vst [vmem:[#allocation2 + $0xa8] sm:$0xff] %v12177_v58   ;;  %11191 = vst [vmem:[#allocation2 + $0xbc] sm:$0xf] %v12111_v18  ;;  %v12127_v49 = vpack.c.bf16 %v18446_v0, %v18446_v0  ;;  %v12128_v57 = vpack.c.bf16 %v18447_v41, %v18447_v41  ;;  %v12202_v31 = vpack.c.bf16 %v18449_v50, %v18448_v3  ;;  %v18453_v47 = vld [vmem:[#allocation163_spill] sm:$0xff]  ;;  %v18455_v39 = vld [vmem:[#allocation168_spill] sm:$0xff] }
 0x494   : > { %11192 = vst [vmem:[#allocation2 + $0xc0] sm:$0xf] %v12112_v11  ;;  %12243 = vst [vmem:[#allocation2 + $0xd0] sm:$0xff] %v12182_v43   ;;  %v12131_v12 = vpack.c.bf16 %v18450_v56, %v18450_v56  ;;  %v12132_v8 = vpack.c.bf16 %v18451_v36, %v18451_v36  ;;  %v12207_v20 = vpack.c.bf16 %v18453_v47, %v18452_v51  ;;  %v18454_v58 = vld [vmem:[#allocation167_spill] sm:$0xff] }
 0x495   : > { %11195 = vst [vmem:[#allocation2 + $0xe4] sm:$0xf] %v12115_v23  ;;  %11196 = vst [vmem:[#allocation2 + $0xe8] sm:$0xf] %v12116_v40  ;;  %v12135_v18 = vpack.c.bf16 %v18454_v58, %v18454_v58  ;;  %v12136_v11 = vpack.c.bf16 %v18455_v39, %v18455_v39  ;;  %v12212_v28 = vpack.c.bf16 %v17331_v45, %v17326_v54 }
 0x496   : > { %12244 = vst [vmem:[#allocation2 + $0xf8] sm:$0xff] %v12187_v5   ;;  %11199 = vst [vmem:[#allocation2 + $0x10c] sm:$0xf] %v12119_v9  ;;  %v12139_v43 = vpack.c.bf16 %v17336_v52, %v17336_v52  ;;  %v12140_v23 = vpack.c.bf16 %v17349_v13, %v17349_v13  ;;  %v12217_v40 = vpack.c.bf16 %v17367_v2, %v17354_v63 }
 0x497   : > { %11200 = vst [vmem:[#allocation2 + $0x110] sm:$0xf] %v12120_v7  ;;  %12245 = vst [vmem:[#allocation2 + $0x120] sm:$0xff] %v12192_v10   ;;  %v12143_v6 = vpack.c.bf16 %v17380_v26, %v17380_v26  ;;  %v12144_v54 = vpack.c.bf16 %v17385_v33, %v17385_v33  ;;  %v12222_v45 = vpack.c.bf16 %v17403_v21, %v17398_v17 }
 0x498   : > { %11203 = vst [vmem:[#allocation2 + $0x134] sm:$0xf] %v12123_v4  ;;  %11204 = vst [vmem:[#allocation2 + $0x138] sm:$0xf] %v12124_v48  ;;  %v12147_v52 = vpack.c.bf16 %v17408_v14, %v17408_v14  ;;  %v12148_v13 = vpack.c.bf16 %v17421_v24, %v17421_v24  ;;  %v12227_v63 = vpack.c.bf16 %v17439_v46, %v17426_v32 }
 0x499   : > { %12246 = vst [vmem:[#allocation2 + $0x148] sm:$0xff] %v12197_v42   ;;  %11207 = vst [vmem:[#allocation2 + $0x184] sm:$0xf] %v12127_v49  ;;  %v12151_v2 = vpack.c.bf16 %v17451_v15, %v17451_v15  ;;  %v12152_v26 = vpack.c.bf16 %v17456_v61, %v17456_v61  ;;  %v12232_v33 = vpack.c.bf16 %v17472_v59, %v17467_v16 }
 0x49a   : > { %11208 = vst [vmem:[#allocation2 + $0x188] sm:$0xf] %v12128_v57  ;;  %12247 = vst [vmem:[#allocation2 + $0x198] sm:$0xff] %v12202_v31   ;;  %v12155_v17 = vpack.c.bf16 %v17477_v27, %v17477_v27  ;;  %v12156_v21 = vpack.c.bf16 %v17489_v19, %v17489_v19  ;;  %v12237_v14 = vpack.c.bf16 %v17507_v22, %v17494_v38 }
 0x49b   : > { %11211 = vst [vmem:[#allocation2 + $0x1ac] sm:$0xf] %v12131_v12  ;;  %11212 = vst [vmem:[#allocation2 + $0x1b0] sm:$0xf] %v12132_v8 }
 0x49c   : > { %12248 = vst [vmem:[#allocation2 + $0x1c0] sm:$0xff] %v12207_v20   ;;  %11215 = vst [vmem:[#allocation2 + $0x1d4] sm:$0xf] %v12135_v18 }
 0x49d   : > { %11216 = vst [vmem:[#allocation2 + $0x1d8] sm:$0xf] %v12136_v11  ;;  %12249 = vst [vmem:[#allocation2 + $0x1e8] sm:$0xff] %v12212_v28  }
 0x49e   : > { %11219 = vst [vmem:[#allocation2 + $0x1fc] sm:$0xf] %v12139_v43  ;;  %11220 = vst [vmem:[#allocation2 + $0x200] sm:$0xf] %v12140_v23 }
 0x49f   : > { %12250 = vst [vmem:[#allocation2 + $0x210] sm:$0xff] %v12217_v40   ;;  %11223 = vst [vmem:[#allocation2 + $0x224] sm:$0xf] %v12143_v6 }
 0x4a0   : > { %11224 = vst [vmem:[#allocation2 + $0x228] sm:$0xf] %v12144_v54  ;;  %12251 = vst [vmem:[#allocation2 + $0x238] sm:$0xff] %v12222_v45  }
 0x4a1   : > { %11227 = vst [vmem:[#allocation2 + $0x24c] sm:$0xf] %v12147_v52  ;;  %11228 = vst [vmem:[#allocation2 + $0x250] sm:$0xf] %v12148_v13 }
 0x4a2   : > { %12252 = vst [vmem:[#allocation2 + $0x260] sm:$0xff] %v12227_v63   ;;  %11231 = vst [vmem:[#allocation2 + $0x274] sm:$0xf] %v12151_v2 }
 0x4a3   : > { %11232 = vst [vmem:[#allocation2 + $0x278] sm:$0xf] %v12152_v26  ;;  %12253 = vst [vmem:[#allocation2 + $0x288] sm:$0xff] %v12232_v33  }
 0x4a4   : > { %11235 = vst [vmem:[#allocation2 + $0x29c] sm:$0xf] %v12155_v17  ;;  %11236 = vst [vmem:[#allocation2 + $0x2a0] sm:$0xf] %v12156_v21 }
 0x4a5   : > { %12254 = vst [vmem:[#allocation2 + $0x2b0] sm:$0xff] %v12237_v14  }
 0x4a6 PF: > { %p12087_p9 = scmp.ne.s32.totalorder %s14189_s12, 2 }
 0x4a7   : > { %v18456_v24 = vld [vmem:[#allocation31_spill] sm:$0xff] (!%p12087_p9)  ;;  %v18458_v46 = vld [vmem:[#allocation22_spill] sm:$0xff] (!%p12087_p9)  ;;  %v18460_v61 = vld [vmem:[#allocation57_spill] sm:$0xff] (!%p12087_p9)  ;;  %11299 = vst [vmem:[%s14267_s23 + $0x1c0] sm:$0xff] (!%p12087_p9), %v16839_v35 }
 0x4a8   : > { %11242 = sbr.rel (%p12087_p9) target bundleno = 1224 (0x4c8), region = 74  ;;  %11243 = vst [vmem:[%s14267_s23] sm:$0xff] (!%p12087_p9), %v18456_v24  ;;  %v18457_v32 = vld [vmem:[#allocation55_spill] sm:$0xff] (!%p12087_p9)  ;;  %11245 = vst [vmem:[%s14267_s23 + $0x10] sm:$0xff] (!%p12087_p9), %v18458_v46  ;;  %v18459_v15 = vld [vmem:[#allocation50_spill] sm:$0xff] (!%p12087_p9) }
 0x4a9   : > { %11244 = vst [vmem:[%s14267_s23 + $0x8] sm:$0xff] (!%p12087_p9), %v18457_v32  ;;  %11246 = vst [vmem:[%s14267_s23 + $0x18] sm:$0xff] (!%p12087_p9), %v18459_v15  ;;  %v18461_v16 = vld [vmem:[#allocation64_spill] sm:$0xff] (!%p12087_p9)  ;;  %v18462_v59 = vld [vmem:[#allocation47_spill] sm:$0xff] (!%p12087_p9) }
 0x4aa   : > { %11247 = vst [vmem:[%s14267_s23 + $0x20] sm:$0xff] (!%p12087_p9), %v18460_v61  ;;  %11248 = vst [vmem:[%s14267_s23 + $0x28] sm:$0xff] (!%p12087_p9), %v18461_v16  ;;  %v18463_v27 = vld [vmem:[#allocation49_spill] sm:$0xff] (!%p12087_p9)  ;;  %v18466_v22 = vld [vmem:[#allocation56_spill] sm:$0xff] (!%p12087_p9) }
 0x4ab   : > { %11249 = vst [vmem:[%s14267_s23 + $0x30] sm:$0xff] (!%p12087_p9), %v18462_v59  ;;  %11250 = vst [vmem:[%s14267_s23 + $0x38] sm:$0xff] (!%p12087_p9), %v18463_v27  ;;  %v18464_v19 = vld [vmem:[#allocation65_spill] sm:$0xff] (!%p12087_p9)  ;;  %v18467_v5 = vld [vmem:[#allocation59_spill] sm:$0xff] (!%p12087_p9) }
 0x4ac   : > { %11251 = vst [vmem:[%s14267_s23 + $0x40] sm:$0xff] (!%p12087_p9), %v18464_v19  ;;  %v18465_v38 = vld [vmem:[#allocation69_spill] sm:$0xff] (!%p12087_p9)  ;;  %11253 = vst [vmem:[%s14267_s23 + $0x50] sm:$0xff] (!%p12087_p9), %v18466_v22  ;;  %v18468_v9 = vld [vmem:[#allocation71_spill] sm:$0xff] (!%p12087_p9) }
 0x4ad   : > { %11252 = vst [vmem:[%s14267_s23 + $0x48] sm:$0xff] (!%p12087_p9), %v18465_v38  ;;  %11254 = vst [vmem:[%s14267_s23 + $0x58] sm:$0xff] (!%p12087_p9), %v18467_v5  ;;  %v18469_v34 = vld [vmem:[#allocation79_spill] sm:$0xff] (!%p12087_p9)  ;;  %v18471_v44 = vld [vmem:[#allocation66_spill] sm:$0xff] (!%p12087_p9) }
 0x4ae   : > { %11255 = vst [vmem:[%s14267_s23 + $0x60] sm:$0xff] (!%p12087_p9), %v18468_v9  ;;  %11256 = vst [vmem:[%s14267_s23 + $0x68] sm:$0xff] (!%p12087_p9), %v18469_v34  ;;  %v18470_v7 = vld [vmem:[#allocation63_spill] sm:$0xff] (!%p12087_p9)  ;;  %v18472_v53 = vld [vmem:[#allocation81_spill] sm:$0xff] (!%p12087_p9) }
 0x4af   : > { %11257 = vst [vmem:[%s14267_s23 + $0x70] sm:$0xff] %v18470_v7  ;;  %11258 = vst [vmem:[%s14267_s23 + $0x78] sm:$0xff] %v18471_v44  ;;  %v18473_v10 = vld [vmem:[#allocation86_spill] sm:$0xff]  ;;  %v18475_v4 = vld [vmem:[#allocation75_spill] sm:$0xff] }
 0x4b0   : > { %11259 = vst [vmem:[%s14267_s23 + $0x80] sm:$0xff] %v18472_v53  ;;  %11260 = vst [vmem:[%s14267_s23 + $0x88] sm:$0xff] %v18473_v10  ;;  %v18474_v1 = vld [vmem:[#allocation74_spill] sm:$0xff]  ;;  %v18476_v37 = vld [vmem:[#allocation88_spill] sm:$0xff] }
 0x4b1   : > { %11261 = vst [vmem:[%s14267_s23 + $0x90] sm:$0xff] %v18474_v1  ;;  %11262 = vst [vmem:[%s14267_s23 + $0x98] sm:$0xff] %v18475_v4  ;;  %v18477_v48 = vld [vmem:[#allocation93_spill] sm:$0xff]  ;;  %v18478_v42 = vld [vmem:[#allocation80_spill] sm:$0xff] }
 0x4b2   : > { %11263 = vst [vmem:[%s14267_s23 + $0xa0] sm:$0xff] %v18476_v37  ;;  %11264 = vst [vmem:[%s14267_s23 + $0xa8] sm:$0xff] %v18477_v48  ;;  %v18479_v0 = vld [vmem:[#allocation83_spill] sm:$0xff]  ;;  %v18480_v49 = vld [vmem:[#allocation94_spill] sm:$0xff] }
 0x4b3   : > { %11265 = vst [vmem:[%s14267_s23 + $0xb0] sm:$0xff] %v18478_v42  ;;  %11266 = vst [vmem:[%s14267_s23 + $0xb8] sm:$0xff] %v18479_v0  ;;  %v18481_v41 = vld [vmem:[#allocation97_spill] sm:$0xff]  ;;  %v18482_v57 = vld [vmem:[#allocation90_spill] sm:$0xff] }
 0x4b4   : > { %11267 = vst [vmem:[%s14267_s23 + $0xc0] sm:$0xff] %v18480_v49  ;;  %11268 = vst [vmem:[%s14267_s23 + $0xc8] sm:$0xff] %v18481_v41  ;;  %v18483_v3 = vld [vmem:[#allocation92_spill] sm:$0xff]  ;;  %v18484_v50 = vld [vmem:[#allocation98_spill] sm:$0xff] }
 0x4b5   : > { %11269 = vst [vmem:[%s14267_s23 + $0xd0] sm:$0xff] %v18482_v57  ;;  %11270 = vst [vmem:[%s14267_s23 + $0xd8] sm:$0xff] %v18483_v3  ;;  %v18485_v31 = vld [vmem:[#allocation101_spill] sm:$0xff]  ;;  %v18486_v56 = vld [vmem:[#allocation95_spill] sm:$0xff] }
 0x4b6   : > { %11271 = vst [vmem:[%s14267_s23 + $0xe0] sm:$0xff] %v18484_v50  ;;  %11272 = vst [vmem:[%s14267_s23 + $0xe8] sm:$0xff] %v18485_v31  ;;  %v18487_v12 = vld [vmem:[#allocation96_spill] sm:$0xff]  ;;  %v18488_v36 = vld [vmem:[#allocation102_spill] sm:$0xff] }
 0x4b7   : > { %11273 = vst [vmem:[%s14267_s23 + $0xf0] sm:$0xff] %v18486_v56  ;;  %11274 = vst [vmem:[%s14267_s23 + $0xf8] sm:$0xff] %v18487_v12  ;;  %v18489_v8 = vld [vmem:[#allocation105_spill] sm:$0xff]  ;;  %v18490_v51 = vld [vmem:[#allocation99_spill] sm:$0xff] }
 0x4b8   : > { %11275 = vst [vmem:[%s14267_s23 + $0x100] sm:$0xff] %v18488_v36  ;;  %11276 = vst [vmem:[%s14267_s23 + $0x108] sm:$0xff] %v18489_v8  ;;  %v18491_v47 = vld [vmem:[#allocation100_spill] sm:$0xff]  ;;  %v18492_v20 = vld [vmem:[#allocation107_spill] sm:$0xff] }
 0x4b9   : > { %11277 = vst [vmem:[%s14267_s23 + $0x110] sm:$0xff] %v18490_v51  ;;  %11278 = vst [vmem:[%s14267_s23 + $0x118] sm:$0xff] %v18491_v47  ;;  %v18493_v58 = vld [vmem:[#allocation109_spill] sm:$0xff]  ;;  %v18494_v18 = vld [vmem:[#allocation103_spill] sm:$0xff] }
 0x4ba   : > { %11279 = vst [vmem:[%s14267_s23 + $0x120] sm:$0xff] %v18492_v20  ;;  %11280 = vst [vmem:[%s14267_s23 + $0x128] sm:$0xff] %v18493_v58  ;;  %v18495_v39 = vld [vmem:[#allocation104_spill] sm:$0xff]  ;;  %v18496_v11 = vld [vmem:[#allocation111_spill] sm:$0xff] }
 0x4bb   : > { %11281 = vst [vmem:[%s14267_s23 + $0x130] sm:$0xff] %v18494_v18  ;;  %11282 = vst [vmem:[%s14267_s23 + $0x138] sm:$0xff] %v18495_v39  ;;  %v18497_v28 = vld [vmem:[#allocation113_spill] sm:$0xff]  ;;  %v18498_v43 = vld [vmem:[#allocation106_spill] sm:$0xff] }
 0x4bc   : > { %11283 = vst [vmem:[%s14267_s23 + $0x140] sm:$0xff] %v18496_v11  ;;  %11284 = vst [vmem:[%s14267_s23 + $0x148] sm:$0xff] %v18497_v28  ;;  %v18499_v23 = vld [vmem:[#allocation108_spill] sm:$0xff]  ;;  %v18500_v40 = vld [vmem:[#allocation114_spill] sm:$0xff] }
 0x4bd   : > { %11285 = vst [vmem:[%s14267_s23 + $0x150] sm:$0xff] %v18498_v43  ;;  %11286 = vst [vmem:[%s14267_s23 + $0x158] sm:$0xff] %v18499_v23  ;;  %v18501_v6 = vld [vmem:[#allocation117_spill] sm:$0xff]  ;;  %v18502_v54 = vld [vmem:[#allocation110_spill] sm:$0xff] }
 0x4be   : > { %11287 = vst [vmem:[%s14267_s23 + $0x160] sm:$0xff] %v18500_v40  ;;  %11288 = vst [vmem:[%s14267_s23 + $0x168] sm:$0xff] %v18501_v6  ;;  %v18503_v45 = vld [vmem:[#allocation112_spill] sm:$0xff]  ;;  %v18504_v52 = vld [vmem:[#allocation118_spill] sm:$0xff] }
 0x4bf   : > { %11289 = vst [vmem:[%s14267_s23 + $0x170] sm:$0xff] %v18502_v54  ;;  %11290 = vst [vmem:[%s14267_s23 + $0x178] sm:$0xff] %v18503_v45  ;;  %v18505_v13 = vld [vmem:[#allocation121_spill] sm:$0xff]  ;;  %v18506_v63 = vld [vmem:[#allocation115_spill] sm:$0xff] }
 0x4c0   : > { %11291 = vst [vmem:[%s14267_s23 + $0x180] sm:$0xff] %v18504_v52  ;;  %11292 = vst [vmem:[%s14267_s23 + $0x188] sm:$0xff] %v18505_v13  ;;  %v18507_v2 = vld [vmem:[#allocation116_spill] sm:$0xff]  ;;  %v18508_v26 = vld [vmem:[#allocation123_spill] sm:$0xff] }
 0x4c1   : > { %11293 = vst [vmem:[%s14267_s23 + $0x190] sm:$0xff] %v18506_v63  ;;  %11294 = vst [vmem:[%s14267_s23 + $0x198] sm:$0xff] %v18507_v2  ;;  %v18509_v33 = vld [vmem:[#allocation125_spill] sm:$0xff]  ;;  %v18510_v17 = vld [vmem:[#allocation119_spill] sm:$0xff] }
 0x4c2   : > { %11295 = vst [vmem:[%s14267_s23 + $0x1a0] sm:$0xff] %v18508_v26  ;;  %11296 = vst [vmem:[%s14267_s23 + $0x1a8] sm:$0xff] %v18509_v33  ;;  %v18511_v21 = vld [vmem:[#allocation120_spill] sm:$0xff]  ;;  %v18512_v14 = vld [vmem:[#allocation122_spill] sm:$0xff] }
 0x4c3   : > { %11297 = vst [vmem:[%s14267_s23 + $0x1b0] sm:$0xff] %v18510_v17  ;;  %11298 = vst [vmem:[%s14267_s23 + $0x1b8] sm:$0xff] %v18511_v21 }
 0x4c4   : > { %11300 = vst [vmem:[%s14267_s23 + $0x1c8] sm:$0xff] %v16844_v62  ;;  %11301 = vst [vmem:[%s14267_s23 + $0x1d0] sm:$0xff] %v16836_v55 }
 0x4c5   : > { %11302 = vst [vmem:[%s14267_s23 + $0x1d8] sm:$0xff] %v16842_v25  ;;  %11303 = vst [vmem:[%s14267_s23 + $0x1e0] sm:$0xff] %v16851_v30 }
 0x4c6   : > { %11304 = vst [vmem:[%s14267_s23 + $0x1e8] sm:$0xff] %v16856_v29  ;;  %11305 = vst [vmem:[%s14267_s23 + $0x1f0] sm:$0xff] %v16848_v60 }
 0x4c7   : > { %11306 = vst [vmem:[%s14267_s23 + $0x1f8] sm:$0xff] %v18512_v14 }
 0x4c8 PF: > { %s13_s16 = sadd.s32 1, %s14205_s16   ;;  %s18513_s12 = smov %s14197_s14 }
 0x4c9   : > { %p10_p10 = scmp.ge.s32.totalorder %s13_s16, 8   ;;  %s18514_s13 = smov %s14201_s15 }
 0x4ca   : > { %s18515_s14 = smov %s18518_s17  ;;  %s18516_s15 = smov %s18522_s18 }
 0x4cb   :  { %12 = sbr.rel (!%p10_p10) target bundleno = 3 (0x3), region = 125 }
 0x4d2   :  { %11331 = vsyncmov [#allocation3] }
 0x4d5   :  { %s11332_s9 = vpop.sfrf %11331 }
 0x4d6   :  { %p12090_p11 = scmp.ne.s32.totalorder %s11332_s9, 0 }
 0x4d8   :  { %11336 = shalt.err (%p12090_p11)  }

</bundles_post_ra>
